<compile_context>
chip_gen: v5e
topology: v5e:2x2
jax: 0.10.0
libtpu: 0.0.40
codegen_flags: <defaults>
</compile_context>

<pallas_src>
import functools
import math

import jax
import jax.numpy as jnp
import numpy as np
from jax.experimental import pallas as pl
from jax.experimental.pallas import tpu as pltpu


# ----------------------------- in-kernel helpers -----------------------------

def _layernorm(v, w, b, eps=1e-5):
    # v: (T, F), w/b: (1, F); population variance (PyTorch LayerNorm)
    mu = jnp.mean(v, axis=-1, keepdims=True)
    var = jnp.mean((v - mu) ** 2, axis=-1, keepdims=True)
    return (v - mu) * jax.lax.rsqrt(var + eps) * w + b


def _gelu_exact(x):
    # exact (erf-based) GELU, matching torch.nn.GELU() default
    return 0.5 * x * (1.0 + jax.lax.erf(x * (1.0 / math.sqrt(2.0))))


# --------------------------------- kernel ------------------------------------

def encoder_kernel(n_head, n_valid,
                   x_ref, la1w_ref, la1b_ref,
                   wqkv_ref, wo_ref, bo_ref,
                   la2w_ref, la2b_ref,
                   w1_ref, b1_ref, w2_ref, b2_ref,
                   out_ref):
    # One batch item per grid step; batch dim squeezed away by the BlockSpec.
    x = x_ref[...].astype(jnp.float32)              # (Np, F)
    Np, F = x.shape
    hd = F // n_head

    # ---- la1 + MultiHeadSelfAttention (sel1 and 1/sqrt(feats) folded in) ----
    h1 = _layernorm(x, la1w_ref[...], la1b_ref[...])

    # fused lane-dense QKV projection: one (Np,F)x(F,3F) matmul
    qkv = jnp.dot(h1, wqkv_ref[...], preferred_element_type=jnp.float32)   # (Np, 3F)

    # key mask for padded tokens (built once, hoisted out of the head loop)
    key_mask = None
    if n_valid < Np:
        col = jax.lax.broadcasted_iota(jnp.int32, (Np, Np), 1)
        key_mask = col < n_valid

    ctx_parts = []
    for h in range(n_head):                         # static loop; heads are few
        qh = qkv[:, h * hd:(h + 1) * hd]            # (Np, hd) static lane slices
        kh = qkv[:, F + h * hd:F + (h + 1) * hd]
        vh = qkv[:, 2 * F + h * hd:2 * F + (h + 1) * hd]
        # q @ k^T without an explicit transpose (contract last dims)
        dots = jax.lax.dot_general(qh, kh, (((1,), (1,)), ((), ())),
                                   preferred_element_type=jnp.float32)     # (Np, Np)
        if key_mask is not None:
            dots = jnp.where(key_mask, dots, -1e30)
        dots = dots - jnp.max(dots, axis=-1, keepdims=True)
        e = jnp.exp(dots)
        denom = jnp.sum(e, axis=-1, keepdims=True)
        r = pl.reciprocal(denom, approx=True)       # EUP vrcp
        r = r * (2.0 - denom * r)                   # one Newton step -> holds 1e-4
        score = e * r
        ctx_parts.append(jnp.dot(score, vh, preferred_element_type=jnp.float32))

    attn = jnp.concatenate(ctx_parts, axis=-1)      # (Np, F) head concat
    # single full-K output projection + bias + residual 1 (dropout p=0 -> id)
    o = jnp.dot(attn, wo_ref[...], preferred_element_type=jnp.float32) + bo_ref[...]
    out1 = o + x

    # ---- la2 + MLP (sel2 folded into w2 rows) ----
    h2 = _layernorm(out1, la2w_ref[...], la2b_ref[...])
    m1 = _gelu_exact(jnp.dot(h2, w1_ref[...], preferred_element_type=jnp.float32)
                     + b1_ref[...])
    m2 = _gelu_exact(jnp.dot(m1, w2_ref[...], preferred_element_type=jnp.float32)
                     + b2_ref[...])                 # vit11 mlp2 has a GELU after the Linear
    out_ref[...] = (m2 + out1).astype(out_ref.dtype)


# ------------------------- one-time parameter folding --------------------------

def prepare_params(p, n_head):
    """Constant-fold channel_selection + attention scale into weights; fuse QKV."""
    F = p["wq"].shape[0]
    H = p["w1"].shape[1]
    sel1 = p["sel1"].reshape(1, F)
    inv_sqrt_d = 1.0 / (F ** 0.5)   # reference scales by sqrt(feats), NOT sqrt(head_dim)

    wqkv = jnp.concatenate([p["wq"] * sel1 * inv_sqrt_d,   # (F, 3F), head-ordered cols
                            p["wk"] * sel1,
                            p["wv"] * sel1], axis=1)

    return {
        "la1_w": p["la1_w"], "la1_b": p["la1_b"],
        "wqkv": wqkv,
        "wo": p["wo"], "bo": p["bo"],
        "la2_w": p["la2_w"], "la2_b": p["la2_b"],
        "w1": p["w1"], "b1": p["b1"],
        "w2": p["sel2"].reshape(H, 1) * p["w2"],    # sel2 after GELU == scaling w2 rows
        "b2": p["b2"],
    }


# --------------------------------- wrapper -----------------------------------

def transformer_encoder(x, fp, n_head, *, n_pad_to=128,
                        vmem_limit_bytes=64 * 1024 * 1024):
    B, N, F = x.shape
    H = fp["w1"].shape[1]
    Np = ((N + n_pad_to - 1) // n_pad_to) * n_pad_to     # lane-dense token count
    x_p = jnp.pad(x, ((0, 0), (0, Np - N), (0, 0))) if Np != N else x

    def const_spec(shape):
        # full-array block, constant block index -> DMA'd once, stays resident
        return pl.BlockSpec(shape, lambda b: (0,) * len(shape))

    in_specs = [
        pl.BlockSpec((None, Np, F), lambda b: (b, 0, 0)),   # x: one batch item/step
        const_spec((1, F)), const_spec((1, F)),             # la1 weight / bias
        const_spec((F, 3 * F)),                             # fused, folded W_qkv
        const_spec((F, F)), const_spec((1, F)),             # wo, bo
        const_spec((1, F)), const_spec((1, F)),             # la2 weight / bias
        const_spec((F, H)), const_spec((1, H)),             # mlp1 W, b
        const_spec((H, F)), const_spec((1, F)),             # mlp2 W (sel2-folded), b
    ]

    # Advisory cost estimate so XLA schedules surrounding ops sensibly.
    flops = (2 * B * Np * F * (3 * F)          # fused QKV
             + 2 * (2 * B * Np * Np * F)       # scores + score@V (all heads)
             + 2 * B * Np * F * F              # output projection
             + 2 * (2 * B * Np * F * H))       # MLP
    transcendentals = (B * n_head * Np * Np    # softmax exp
                       + B * Np * (H + F)      # GELU erf
                       + B * Np * (n_head + 2))  # reciprocal + LN rsqrt
    weight_bytes = 4 * (3 * F * F + F * F + F * H + H * F + 6 * F + H)
    bytes_accessed = 4 * (2 * B * Np * F) + weight_bytes

    kernel = functools.partial(encoder_kernel, n_head, N)
    out = pl.pallas_call(
        kernel,
        out_shape=jax.ShapeDtypeStruct((B, Np, F), x.dtype),
        grid=(B,),
        in_specs=in_specs,
        out_specs=pl.BlockSpec((None, Np, F), lambda b: (b, 0, 0)),
        compiler_params=pltpu.CompilerParams(
            dimension_semantics=("parallel",),      # megacore shards batch on v7x
            vmem_limit_bytes=vmem_limit_bytes),
        cost_estimate=pl.CostEstimate(flops=flops,
                                      transcendentals=transcendentals,
                                      bytes_accessed=bytes_accessed),
    )(x_p, fp["la1_w"], fp["la1_b"],
      fp["wqkv"], fp["wo"], fp["bo"],
      fp["la2_w"], fp["la2_b"],
      fp["w1"], fp["b1"], fp["w2"], fp["b2"])
    return out[:, :N, :]


# ------------------------------ pure-JAX reference ----------------------------

def ref_forward(x, p, n_head):
    # Mirrors the PyTorch module with UNfolded params (sel multiplies, /sqrt(feats)).
    B, N, F = x.shape
    hd = F // n_head

    def ln(v, w, b, eps=1e-5):
        mu = jnp.mean(v, axis=-1, keepdims=True)
        var = jnp.mean((v - mu) ** 2, axis=-1, keepdims=True)
        return (v - mu) / jnp.sqrt(var + eps) * w + b

    h1 = ln(x, p["la1_w"], p["la1_b"])
    q = (h1 @ p["wq"]) * p["sel1"]
    k = (h1 @ p["wk"]) * p["sel1"]
    v = (h1 @ p["wv"]) * p["sel1"]
    q = q.reshape(B, N, n_head, hd).transpose(0, 2, 1, 3)
    k = k.reshape(B, N, n_head, hd).transpose(0, 2, 1, 3)
    v = v.reshape(B, N, n_head, hd).transpose(0, 2, 1, 3)
    dots = jnp.einsum("bhif,bhjf->bhij", q, k) / (F ** 0.5)
    score = jax.nn.softmax(dots, axis=-1)
    attn = jnp.einsum("bhij,bhjf->bihf", score, v).reshape(B, N, F)
    o = attn @ p["wo"] + p["bo"]
    out1 = o + x
    h2 = ln(out1, p["la2_w"], p["la2_b"])
    m1 = jax.nn.gelu(h2 @ p["w1"] + p["b1"], approximate=False) * p["sel2"]
    m2 = jax.nn.gelu(m1 @ p["w2"] + p["b2"], approximate=False)
    return m2 + out1


# ----------------------------------- main -------------------------------------

if __name__ == "__main__":
    B, N, F, H, n_head = 2, 8, 32, 64, 4   # feats=32, mlp_hidden=64, head=4
    key = jax.random.PRNGKey(0)
    ks = jax.random.split(key, 12)
    s = 0.02

    raw = {
        "la1_w": (1.0 + 0.1 * jax.random.normal(ks[0], (1, F))).astype(jnp.float32),
        "la1_b": (0.1 * jax.random.normal(ks[1], (1, F))).astype(jnp.float32),
        "wq": (jax.random.normal(ks[2], (F, F)) * s).astype(jnp.float32),
        "wk": (jax.random.normal(ks[3], (F, F)) * s).astype(jnp.float32),
        "wv": (jax.random.normal(ks[4], (F, F)) * s).astype(jnp.float32),
        # pruned-channel mask (channel_selection2.indexes) — exercises the folding
        "sel1": (jax.random.uniform(ks[5], (F,)) > 0.25).astype(jnp.float32),
        "wo": (jax.random.normal(ks[6], (F, F)) * s).astype(jnp.float32),
        "bo": (jax.random.normal(ks[7], (1, F)) * s).astype(jnp.float32),
        "la2_w": (1.0 + 0.1 * jax.random.normal(ks[8], (1, F))).astype(jnp.float32),
        "la2_b": (0.1 * jax.random.normal(ks[9], (1, F))).astype(jnp.float32),
        "w1": (jax.random.normal(ks[10], (F, H)) * s).astype(jnp.float32),
        "b1": (jax.random.normal(ks[11], (1, H)) * s).astype(jnp.float32),
        "sel2": (jax.random.uniform(jax.random.PRNGKey(123), (H,)) > 0.25).astype(jnp.float32),
        "w2": (jax.random.normal(jax.random.PRNGKey(7), (H, F)) * s).astype(jnp.float32),
        "b2": jnp.zeros((1, F), jnp.float32),
    }
    x = jax.random.normal(jax.random.PRNGKey(42), (B, N, F), jnp.float32)

    folded = prepare_params(raw, n_head)           # one-time constant fold
    out = transformer_encoder(x, folded, n_head)   # pads N=8 -> 128, masks keys
    out = jax.block_until_ready(out)

    ref = ref_forward(x, raw, n_head)
    np.testing.assert_allclose(np.asarray(out), np.asarray(ref), rtol=1e-4, atol=1e-4)
    print("KERNEL_OK")
</pallas_src>

<mosaic_0001>
module attributes {stable_mosaic.version = 11 : i64} {
  func.func @encoder_kernel(%arg0: i32, %arg1: memref<1x128x32xf32, #tpu.memory_space<vmem>>, %arg2: memref<1x32xf32, #tpu.memory_space<vmem>>, %arg3: memref<1x32xf32, #tpu.memory_space<vmem>>, %arg4: memref<32x96xf32, #tpu.memory_space<vmem>>, %arg5: memref<32x32xf32, #tpu.memory_space<vmem>>, %arg6: memref<1x32xf32, #tpu.memory_space<vmem>>, %arg7: memref<1x32xf32, #tpu.memory_space<vmem>>, %arg8: memref<1x32xf32, #tpu.memory_space<vmem>>, %arg9: memref<32x64xf32, #tpu.memory_space<vmem>>, %arg10: memref<1x64xf32, #tpu.memory_space<vmem>>, %arg11: memref<64x32xf32, #tpu.memory_space<vmem>>, %arg12: memref<1x32xf32, #tpu.memory_space<vmem>>, %arg13: memref<1x128x32xf32, #tpu.memory_space<vmem>>) attributes {dimension_semantics = [#tpu.dimension_semantics<parallel>], iteration_bounds = array<i64: 2>, scalar_prefetch = 0 : i64, scratch_operands = 0 : i64, tpu.core_type = #tpu.core_type<tc>, window_params = [{transform_indices = @transform_0, window_bounds = array<i64: 1, 128, 32>}, {pipeline_mode = #tpu.pipeline_mode<synchronous>, transform_indices = @transform_1, window_bounds = array<i64: 1, 32>}, {pipeline_mode = #tpu.pipeline_mode<synchronous>, transform_indices = @transform_2, window_bounds = array<i64: 1, 32>}, {pipeline_mode = #tpu.pipeline_mode<synchronous>, transform_indices = @transform_3, window_bounds = array<i64: 32, 96>}, {pipeline_mode = #tpu.pipeline_mode<synchronous>, transform_indices = @transform_4, window_bounds = array<i64: 32, 32>}, {pipeline_mode = #tpu.pipeline_mode<synchronous>, transform_indices = @transform_5, window_bounds = array<i64: 1, 32>}, {pipeline_mode = #tpu.pipeline_mode<synchronous>, transform_indices = @transform_6, window_bounds = array<i64: 1, 32>}, {pipeline_mode = #tpu.pipeline_mode<synchronous>, transform_indices = @transform_7, window_bounds = array<i64: 1, 32>}, {pipeline_mode = #tpu.pipeline_mode<synchronous>, transform_indices = @transform_8, window_bounds = array<i64: 32, 64>}, {pipeline_mode = #tpu.pipeline_mode<synchronous>, transform_indices = @transform_9, window_bounds = array<i64: 1, 64>}, {pipeline_mode = #tpu.pipeline_mode<synchronous>, transform_indices = @transform_10, window_bounds = array<i64: 64, 32>}, {pipeline_mode = #tpu.pipeline_mode<synchronous>, transform_indices = @transform_11, window_bounds = array<i64: 1, 32>}, {transform_indices = @transform_12, window_bounds = array<i64: 1, 128, 32>}]} {
    %c0 = arith.constant 0 : index
    %c0_0 = arith.constant 0 : index
    %c0_1 = arith.constant 0 : index
    %0 = vector.load %arg1[%c0, %c0_0, %c0_1] : memref<1x128x32xf32, #tpu.memory_space<vmem>>, vector<1x128x32xf32>
    %1 = vector.shape_cast %0 : vector<1x128x32xf32> to vector<128x32xf32>
    %c0_2 = arith.constant 0 : index
    %c0_3 = arith.constant 0 : index
    %2 = vector.load %arg2[%c0_2, %c0_3] : memref<1x32xf32, #tpu.memory_space<vmem>>, vector<1x32xf32>
    %c0_4 = arith.constant 0 : index
    %c0_5 = arith.constant 0 : index
    %3 = vector.load %arg3[%c0_4, %c0_5] : memref<1x32xf32, #tpu.memory_space<vmem>>, vector<1x32xf32>
    %cst = arith.constant dense<0.000000e+00> : vector<128xf32>
    %4 = vector.multi_reduction <add>, %1, %cst [1] : vector<128x32xf32> to vector<128xf32>
    %5 = vector.shape_cast %4 : vector<128xf32> to vector<128x1xf32>
    %cst_6 = arith.constant 3.200000e+01 : f32
    %6 = vector.broadcast %cst_6 : f32 to vector<128x1xf32>
    %7 = arith.divf %5, %6 : vector<128x1xf32>
    %8 = vector.broadcast %7 : vector<128x1xf32> to vector<128x32xf32>
    %9 = arith.subf %1, %8 : vector<128x32xf32>
    %10 = arith.mulf %9, %9 : vector<128x32xf32>
    %cst_7 = arith.constant dense<0.000000e+00> : vector<128xf32>
    %11 = vector.multi_reduction <add>, %10, %cst_7 [1] : vector<128x32xf32> to vector<128xf32>
    %12 = vector.shape_cast %11 : vector<128xf32> to vector<128x1xf32>
    %cst_8 = arith.constant 3.200000e+01 : f32
    %13 = vector.broadcast %cst_8 : f32 to vector<128x1xf32>
    %14 = arith.divf %12, %13 : vector<128x1xf32>
    %15 = vector.broadcast %7 : vector<128x1xf32> to vector<128x32xf32>
    %16 = arith.subf %1, %15 : vector<128x32xf32>
    %cst_9 = arith.constant 9.99999974E-6 : f32
    %17 = vector.broadcast %cst_9 : f32 to vector<128x1xf32>
    %18 = arith.addf %14, %17 : vector<128x1xf32>
    %19 = math.rsqrt %18 : vector<128x1xf32>
    %20 = vector.broadcast %19 : vector<128x1xf32> to vector<128x32xf32>
    %21 = arith.mulf %16, %20 : vector<128x32xf32>
    %22 = vector.broadcast %2 : vector<1x32xf32> to vector<128x32xf32>
    %23 = arith.mulf %21, %22 : vector<128x32xf32>
    %24 = vector.broadcast %3 : vector<1x32xf32> to vector<128x32xf32>
    %25 = arith.addf %23, %24 : vector<128x32xf32>
    %c0_10 = arith.constant 0 : index
    %c0_11 = arith.constant 0 : index
    %26 = vector.load %arg4[%c0_10, %c0_11] : memref<32x96xf32, #tpu.memory_space<vmem>>, vector<32x96xf32>
    %cst_12 = arith.constant dense<0.000000e+00> : vector<128x96xf32>
    %27 = tpu.matmul %25, %26, %cst_12 {dimension_numbers = #tpu.dot_dimension_numbers<[1], [0], [0], [1], [0, 0, 1, 1], [], []>} : vector<128x32xf32>, vector<32x96xf32>, vector<128x96xf32> -> vector<128x96xf32>
    %28 = tpu.iota {dimensions = array<i32: 1>} : vector<128x128xi32>
    %c8_i32 = arith.constant 8 : i32
    %29 = vector.broadcast %c8_i32 : i32 to vector<128x128xi32>
    %30 = arith.cmpi slt, %28, %29 : vector<128x128xi32>
    %31 = vector.extract_strided_slice %27 {offsets = [0, 0], sizes = [128, 8], strides = [1, 1]} : vector<128x96xf32> to vector<128x8xf32>
    %32 = vector.extract_strided_slice %27 {offsets = [0, 32], sizes = [128, 8], strides = [1, 1]} : vector<128x96xf32> to vector<128x8xf32>
    %33 = vector.extract_strided_slice %27 {offsets = [0, 64], sizes = [128, 8], strides = [1, 1]} : vector<128x96xf32> to vector<128x8xf32>
    %cst_13 = arith.constant dense<0.000000e+00> : vector<128x128xf32>
    %34 = tpu.matmul %31, %32, %cst_13 {dimension_numbers = #tpu.dot_dimension_numbers<[1], [1], [0], [0], [0, 0, 1, 0], [], []>} : vector<128x8xf32>, vector<128x8xf32>, vector<128x128xf32> -> vector<128x128xf32>
    %cst_14 = arith.constant -1.000000e+30 : f32
    %35 = vector.broadcast %cst_14 : f32 to vector<128x128xf32>
    %36 = arith.select %30, %34, %35 : vector<128x128xi1>, vector<128x128xf32>
    %cst_15 = arith.constant dense<0xFF800000> : vector<128xf32>
    %37 = vector.multi_reduction <maximumf>, %36, %cst_15 [1] : vector<128x128xf32> to vector<128xf32>
    %38 = vector.shape_cast %37 : vector<128xf32> to vector<128x1xf32>
    %39 = vector.broadcast %38 : vector<128x1xf32> to vector<128x128xf32>
    %40 = arith.subf %36, %39 : vector<128x128xf32>
    %41 = math.exp %40 : vector<128x128xf32>
    %cst_16 = arith.constant dense<0.000000e+00> : vector<128xf32>
    %42 = vector.multi_reduction <add>, %41, %cst_16 [1] : vector<128x128xf32> to vector<128xf32>
    %43 = vector.shape_cast %42 : vector<128xf32> to vector<128x1xf32>
    %44 = tpu.reciprocal %43 {approx = true} : vector<128x1xf32> -> vector<128x1xf32>
    %45 = arith.mulf %43, %44 : vector<128x1xf32>
    %cst_17 = arith.constant 2.000000e+00 : f32
    %46 = vector.broadcast %cst_17 : f32 to vector<128x1xf32>
    %47 = arith.subf %46, %45 : vector<128x1xf32>
    %48 = arith.mulf %44, %47 : vector<128x1xf32>
    %49 = vector.broadcast %48 : vector<128x1xf32> to vector<128x128xf32>
    %50 = arith.mulf %41, %49 : vector<128x128xf32>
    %cst_18 = arith.constant dense<0.000000e+00> : vector<128x8xf32>
    %51 = tpu.matmul %50, %33, %cst_18 {dimension_numbers = #tpu.dot_dimension_numbers<[1], [0], [0], [1], [0, 0, 1, 1], [], []>} : vector<128x128xf32>, vector<128x8xf32>, vector<128x8xf32> -> vector<128x8xf32>
    %52 = vector.extract_strided_slice %27 {offsets = [0, 8], sizes = [128, 8], strides = [1, 1]} : vector<128x96xf32> to vector<128x8xf32>
    %53 = vector.extract_strided_slice %27 {offsets = [0, 40], sizes = [128, 8], strides = [1, 1]} : vector<128x96xf32> to vector<128x8xf32>
    %54 = vector.extract_strided_slice %27 {offsets = [0, 72], sizes = [128, 8], strides = [1, 1]} : vector<128x96xf32> to vector<128x8xf32>
    %cst_19 = arith.constant dense<0.000000e+00> : vector<128x128xf32>
    %55 = tpu.matmul %52, %53, %cst_19 {dimension_numbers = #tpu.dot_dimension_numbers<[1], [1], [0], [0], [0, 0, 1, 0], [], []>} : vector<128x8xf32>, vector<128x8xf32>, vector<128x128xf32> -> vector<128x128xf32>
    %cst_20 = arith.constant -1.000000e+30 : f32
    %56 = vector.broadcast %cst_20 : f32 to vector<128x128xf32>
    %57 = arith.select %30, %55, %56 : vector<128x128xi1>, vector<128x128xf32>
    %cst_21 = arith.constant dense<0xFF800000> : vector<128xf32>
    %58 = vector.multi_reduction <maximumf>, %57, %cst_21 [1] : vector<128x128xf32> to vector<128xf32>
    %59 = vector.shape_cast %58 : vector<128xf32> to vector<128x1xf32>
    %60 = vector.broadcast %59 : vector<128x1xf32> to vector<128x128xf32>
    %61 = arith.subf %57, %60 : vector<128x128xf32>
    %62 = math.exp %61 : vector<128x128xf32>
    %cst_22 = arith.constant dense<0.000000e+00> : vector<128xf32>
    %63 = vector.multi_reduction <add>, %62, %cst_22 [1] : vector<128x128xf32> to vector<128xf32>
    %64 = vector.shape_cast %63 : vector<128xf32> to vector<128x1xf32>
    %65 = tpu.reciprocal %64 {approx = true} : vector<128x1xf32> -> vector<128x1xf32>
    %66 = arith.mulf %64, %65 : vector<128x1xf32>
    %cst_23 = arith.constant 2.000000e+00 : f32
    %67 = vector.broadcast %cst_23 : f32 to vector<128x1xf32>
    %68 = arith.subf %67, %66 : vector<128x1xf32>
    %69 = arith.mulf %65, %68 : vector<128x1xf32>
    %70 = vector.broadcast %69 : vector<128x1xf32> to vector<128x128xf32>
    %71 = arith.mulf %62, %70 : vector<128x128xf32>
    %cst_24 = arith.constant dense<0.000000e+00> : vector<128x8xf32>
    %72 = tpu.matmul %71, %54, %cst_24 {dimension_numbers = #tpu.dot_dimension_numbers<[1], [0], [0], [1], [0, 0, 1, 1], [], []>} : vector<128x128xf32>, vector<128x8xf32>, vector<128x8xf32> -> vector<128x8xf32>
    %73 = vector.extract_strided_slice %27 {offsets = [0, 16], sizes = [128, 8], strides = [1, 1]} : vector<128x96xf32> to vector<128x8xf32>
    %74 = vector.extract_strided_slice %27 {offsets = [0, 48], sizes = [128, 8], strides = [1, 1]} : vector<128x96xf32> to vector<128x8xf32>
    %75 = vector.extract_strided_slice %27 {offsets = [0, 80], sizes = [128, 8], strides = [1, 1]} : vector<128x96xf32> to vector<128x8xf32>
    %cst_25 = arith.constant dense<0.000000e+00> : vector<128x128xf32>
    %76 = tpu.matmul %73, %74, %cst_25 {dimension_numbers = #tpu.dot_dimension_numbers<[1], [1], [0], [0], [0, 0, 1, 0], [], []>} : vector<128x8xf32>, vector<128x8xf32>, vector<128x128xf32> -> vector<128x128xf32>
    %cst_26 = arith.constant -1.000000e+30 : f32
    %77 = vector.broadcast %cst_26 : f32 to vector<128x128xf32>
    %78 = arith.select %30, %76, %77 : vector<128x128xi1>, vector<128x128xf32>
    %cst_27 = arith.constant dense<0xFF800000> : vector<128xf32>
    %79 = vector.multi_reduction <maximumf>, %78, %cst_27 [1] : vector<128x128xf32> to vector<128xf32>
    %80 = vector.shape_cast %79 : vector<128xf32> to vector<128x1xf32>
    %81 = vector.broadcast %80 : vector<128x1xf32> to vector<128x128xf32>
    %82 = arith.subf %78, %81 : vector<128x128xf32>
    %83 = math.exp %82 : vector<128x128xf32>
    %cst_28 = arith.constant dense<0.000000e+00> : vector<128xf32>
    %84 = vector.multi_reduction <add>, %83, %cst_28 [1] : vector<128x128xf32> to vector<128xf32>
    %85 = vector.shape_cast %84 : vector<128xf32> to vector<128x1xf32>
    %86 = tpu.reciprocal %85 {approx = true} : vector<128x1xf32> -> vector<128x1xf32>
    %87 = arith.mulf %85, %86 : vector<128x1xf32>
    %cst_29 = arith.constant 2.000000e+00 : f32
    %88 = vector.broadcast %cst_29 : f32 to vector<128x1xf32>
    %89 = arith.subf %88, %87 : vector<128x1xf32>
    %90 = arith.mulf %86, %89 : vector<128x1xf32>
    %91 = vector.broadcast %90 : vector<128x1xf32> to vector<128x128xf32>
    %92 = arith.mulf %83, %91 : vector<128x128xf32>
    %cst_30 = arith.constant dense<0.000000e+00> : vector<128x8xf32>
    %93 = tpu.matmul %92, %75, %cst_30 {dimension_numbers = #tpu.dot_dimension_numbers<[1], [0], [0], [1], [0, 0, 1, 1], [], []>} : vector<128x128xf32>, vector<128x8xf32>, vector<128x8xf32> -> vector<128x8xf32>
    %94 = vector.extract_strided_slice %27 {offsets = [0, 24], sizes = [128, 8], strides = [1, 1]} : vector<128x96xf32> to vector<128x8xf32>
    %95 = vector.extract_strided_slice %27 {offsets = [0, 56], sizes = [128, 8], strides = [1, 1]} : vector<128x96xf32> to vector<128x8xf32>
    %96 = vector.extract_strided_slice %27 {offsets = [0, 88], sizes = [128, 8], strides = [1, 1]} : vector<128x96xf32> to vector<128x8xf32>
    %cst_31 = arith.constant dense<0.000000e+00> : vector<128x128xf32>
    %97 = tpu.matmul %94, %95, %cst_31 {dimension_numbers = #tpu.dot_dimension_numbers<[1], [1], [0], [0], [0, 0, 1, 0], [], []>} : vector<128x8xf32>, vector<128x8xf32>, vector<128x128xf32> -> vector<128x128xf32>
    %cst_32 = arith.constant -1.000000e+30 : f32
    %98 = vector.broadcast %cst_32 : f32 to vector<128x128xf32>
    %99 = arith.select %30, %97, %98 : vector<128x128xi1>, vector<128x128xf32>
    %cst_33 = arith.constant dense<0xFF800000> : vector<128xf32>
    %100 = vector.multi_reduction <maximumf>, %99, %cst_33 [1] : vector<128x128xf32> to vector<128xf32>
    %101 = vector.shape_cast %100 : vector<128xf32> to vector<128x1xf32>
    %102 = vector.broadcast %101 : vector<128x1xf32> to vector<128x128xf32>
    %103 = arith.subf %99, %102 : vector<128x128xf32>
    %104 = math.exp %103 : vector<128x128xf32>
    %cst_34 = arith.constant dense<0.000000e+00> : vector<128xf32>
    %105 = vector.multi_reduction <add>, %104, %cst_34 [1] : vector<128x128xf32> to vector<128xf32>
    %106 = vector.shape_cast %105 : vector<128xf32> to vector<128x1xf32>
    %107 = tpu.reciprocal %106 {approx = true} : vector<128x1xf32> -> vector<128x1xf32>
    %108 = arith.mulf %106, %107 : vector<128x1xf32>
    %cst_35 = arith.constant 2.000000e+00 : f32
    %109 = vector.broadcast %cst_35 : f32 to vector<128x1xf32>
    %110 = arith.subf %109, %108 : vector<128x1xf32>
    %111 = arith.mulf %107, %110 : vector<128x1xf32>
    %112 = vector.broadcast %111 : vector<128x1xf32> to vector<128x128xf32>
    %113 = arith.mulf %104, %112 : vector<128x128xf32>
    %cst_36 = arith.constant dense<0.000000e+00> : vector<128x8xf32>
    %114 = tpu.matmul %113, %96, %cst_36 {dimension_numbers = #tpu.dot_dimension_numbers<[1], [0], [0], [1], [0, 0, 1, 1], [], []>} : vector<128x128xf32>, vector<128x8xf32>, vector<128x8xf32> -> vector<128x8xf32>
    %115 = tpu.concatenate %51, %72, %93, %114 in 1 : vector<128x8xf32>, vector<128x8xf32>, vector<128x8xf32>, vector<128x8xf32> -> vector<128x32xf32>
    %c0_37 = arith.constant 0 : index
    %c0_38 = arith.constant 0 : index
    %116 = vector.load %arg5[%c0_37, %c0_38] : memref<32x32xf32, #tpu.memory_space<vmem>>, vector<32x32xf32>
    %cst_39 = arith.constant dense<0.000000e+00> : vector<128x32xf32>
    %117 = tpu.matmul %115, %116, %cst_39 {dimension_numbers = #tpu.dot_dimension_numbers<[1], [0], [0], [1], [0, 0, 1, 1], [], []>} : vector<128x32xf32>, vector<32x32xf32>, vector<128x32xf32> -> vector<128x32xf32>
    %c0_40 = arith.constant 0 : index
    %c0_41 = arith.constant 0 : index
    %118 = vector.load %arg6[%c0_40, %c0_41] : memref<1x32xf32, #tpu.memory_space<vmem>>, vector<1x32xf32>
    %119 = vector.broadcast %118 : vector<1x32xf32> to vector<128x32xf32>
    %120 = arith.addf %117, %119 : vector<128x32xf32>
    %121 = arith.addf %120, %1 : vector<128x32xf32>
    %c0_42 = arith.constant 0 : index
    %c0_43 = arith.constant 0 : index
    %122 = vector.load %arg7[%c0_42, %c0_43] : memref<1x32xf32, #tpu.memory_space<vmem>>, vector<1x32xf32>
    %c0_44 = arith.constant 0 : index
    %c0_45 = arith.constant 0 : index
    %123 = vector.load %arg8[%c0_44, %c0_45] : memref<1x32xf32, #tpu.memory_space<vmem>>, vector<1x32xf32>
    %cst_46 = arith.constant dense<0.000000e+00> : vector<128xf32>
    %124 = vector.multi_reduction <add>, %121, %cst_46 [1] : vector<128x32xf32> to vector<128xf32>
    %125 = vector.shape_cast %124 : vector<128xf32> to vector<128x1xf32>
    %cst_47 = arith.constant 3.200000e+01 : f32
    %126 = vector.broadcast %cst_47 : f32 to vector<128x1xf32>
    %127 = arith.divf %125, %126 : vector<128x1xf32>
    %128 = vector.broadcast %127 : vector<128x1xf32> to vector<128x32xf32>
    %129 = arith.subf %121, %128 : vector<128x32xf32>
    %130 = arith.mulf %129, %129 : vector<128x32xf32>
    %cst_48 = arith.constant dense<0.000000e+00> : vector<128xf32>
    %131 = vector.multi_reduction <add>, %130, %cst_48 [1] : vector<128x32xf32> to vector<128xf32>
    %132 = vector.shape_cast %131 : vector<128xf32> to vector<128x1xf32>
    %cst_49 = arith.constant 3.200000e+01 : f32
    %133 = vector.broadcast %cst_49 : f32 to vector<128x1xf32>
    %134 = arith.divf %132, %133 : vector<128x1xf32>
    %135 = vector.broadcast %127 : vector<128x1xf32> to vector<128x32xf32>
    %136 = arith.subf %121, %135 : vector<128x32xf32>
    %cst_50 = arith.constant 9.99999974E-6 : f32
    %137 = vector.broadcast %cst_50 : f32 to vector<128x1xf32>
    %138 = arith.addf %134, %137 : vector<128x1xf32>
    %139 = math.rsqrt %138 : vector<128x1xf32>
    %140 = vector.broadcast %139 : vector<128x1xf32> to vector<128x32xf32>
    %141 = arith.mulf %136, %140 : vector<128x32xf32>
    %142 = vector.broadcast %122 : vector<1x32xf32> to vector<128x32xf32>
    %143 = arith.mulf %141, %142 : vector<128x32xf32>
    %144 = vector.broadcast %123 : vector<1x32xf32> to vector<128x32xf32>
    %145 = arith.addf %143, %144 : vector<128x32xf32>
    %c0_51 = arith.constant 0 : index
    %c0_52 = arith.constant 0 : index
    %146 = vector.load %arg9[%c0_51, %c0_52] : memref<32x64xf32, #tpu.memory_space<vmem>>, vector<32x64xf32>
    %cst_53 = arith.constant dense<0.000000e+00> : vector<128x64xf32>
    %147 = tpu.matmul %145, %146, %cst_53 {dimension_numbers = #tpu.dot_dimension_numbers<[1], [0], [0], [1], [0, 0, 1, 1], [], []>} : vector<128x32xf32>, vector<32x64xf32>, vector<128x64xf32> -> vector<128x64xf32>
    %c0_54 = arith.constant 0 : index
    %c0_55 = arith.constant 0 : index
    %148 = vector.load %arg10[%c0_54, %c0_55] : memref<1x64xf32, #tpu.memory_space<vmem>>, vector<1x64xf32>
    %149 = vector.broadcast %148 : vector<1x64xf32> to vector<128x64xf32>
    %150 = arith.addf %147, %149 : vector<128x64xf32>
    %cst_56 = arith.constant 5.000000e-01 : f32
    %151 = vector.broadcast %cst_56 : f32 to vector<128x64xf32>
    %152 = arith.mulf %151, %150 : vector<128x64xf32>
    %cst_57 = arith.constant 0.707106769 : f32
    %153 = vector.broadcast %cst_57 : f32 to vector<128x64xf32>
    %154 = arith.mulf %150, %153 : vector<128x64xf32>
    %155 = math.erf %154 : vector<128x64xf32>
    %cst_58 = arith.constant 1.000000e+00 : f32
    %156 = vector.broadcast %cst_58 : f32 to vector<128x64xf32>
    %157 = arith.addf %156, %155 : vector<128x64xf32>
    %158 = arith.mulf %152, %157 : vector<128x64xf32>
    %c0_59 = arith.constant 0 : index
    %c0_60 = arith.constant 0 : index
    %159 = vector.load %arg11[%c0_59, %c0_60] : memref<64x32xf32, #tpu.memory_space<vmem>>, vector<64x32xf32>
    %cst_61 = arith.constant dense<0.000000e+00> : vector<128x32xf32>
    %160 = tpu.matmul %158, %159, %cst_61 {dimension_numbers = #tpu.dot_dimension_numbers<[1], [0], [0], [1], [0, 0, 1, 1], [], []>} : vector<128x64xf32>, vector<64x32xf32>, vector<128x32xf32> -> vector<128x32xf32>
    %c0_62 = arith.constant 0 : index
    %c0_63 = arith.constant 0 : index
    %161 = vector.load %arg12[%c0_62, %c0_63] : memref<1x32xf32, #tpu.memory_space<vmem>>, vector<1x32xf32>
    %162 = vector.broadcast %161 : vector<1x32xf32> to vector<128x32xf32>
    %163 = arith.addf %160, %162 : vector<128x32xf32>
    %cst_64 = arith.constant 5.000000e-01 : f32
    %164 = vector.broadcast %cst_64 : f32 to vector<128x32xf32>
    %165 = arith.mulf %164, %163 : vector<128x32xf32>
    %cst_65 = arith.constant 0.707106769 : f32
    %166 = vector.broadcast %cst_65 : f32 to vector<128x32xf32>
    %167 = arith.mulf %163, %166 : vector<128x32xf32>
    %168 = math.erf %167 : vector<128x32xf32>
    %cst_66 = arith.constant 1.000000e+00 : f32
    %169 = vector.broadcast %cst_66 : f32 to vector<128x32xf32>
    %170 = arith.addf %169, %168 : vector<128x32xf32>
    %171 = arith.mulf %165, %170 : vector<128x32xf32>
    %172 = arith.addf %171, %121 : vector<128x32xf32>
    %c0_67 = arith.constant 0 : index
    %c0_68 = arith.constant 0 : index
    %c0_69 = arith.constant 0 : index
    %173 = vector.load %arg13[%c0_67, %c0_68, %c0_69] : memref<1x128x32xf32, #tpu.memory_space<vmem>>, vector<1x128x32xf32>
    %174 = vector.shape_cast %173 : vector<1x128x32xf32> to vector<128x32xf32>
    %175 = vector.shape_cast %172 : vector<128x32xf32> to vector<1x128x32xf32>
    tpu.vector_store %arg13[%c0_67, %c0_68, %c0_69], %175 {strides = array<i32>} : memref<1x128x32xf32, #tpu.memory_space<vmem>>, vector<1x128x32xf32>,
    return
  }
  func.func @transform_0(%arg0: i32) -> (i32, i32, i32) {
    %c0_i32 = arith.constant 0 : i32
    %c0_i32_0 = arith.constant 0 : i32
    %c0_i32_1 = arith.constant 0 : i32
    return %arg0, %c0_i32, %c0_i32_0 : i32, i32, i32
  }
  func.func @transform_1(%arg0: i32) -> (i32, i32) {
    %c0_i32 = arith.constant 0 : i32
    %c0_i32_0 = arith.constant 0 : i32
    %c0_i32_1 = arith.constant 0 : i32
    return %c0_i32, %c0_i32_0 : i32, i32
  }
  func.func @transform_2(%arg0: i32) -> (i32, i32) {
    %c0_i32 = arith.constant 0 : i32
    %c0_i32_0 = arith.constant 0 : i32
    %c0_i32_1 = arith.constant 0 : i32
    return %c0_i32, %c0_i32_0 : i32, i32
  }
  func.func @transform_3(%arg0: i32) -> (i32, i32) {
    %c0_i32 = arith.constant 0 : i32
    %c0_i32_0 = arith.constant 0 : i32
    %c0_i32_1 = arith.constant 0 : i32
    return %c0_i32, %c0_i32_0 : i32, i32
  }
  func.func @transform_4(%arg0: i32) -> (i32, i32) {
    %c0_i32 = arith.constant 0 : i32
    %c0_i32_0 = arith.constant 0 : i32
    %c0_i32_1 = arith.constant 0 : i32
    return %c0_i32, %c0_i32_0 : i32, i32
  }
  func.func @transform_5(%arg0: i32) -> (i32, i32) {
    %c0_i32 = arith.constant 0 : i32
    %c0_i32_0 = arith.constant 0 : i32
    %c0_i32_1 = arith.constant 0 : i32
    return %c0_i32, %c0_i32_0 : i32, i32
  }
  func.func @transform_6(%arg0: i32) -> (i32, i32) {
    %c0_i32 = arith.constant 0 : i32
    %c0_i32_0 = arith.constant 0 : i32
    %c0_i32_1 = arith.constant 0 : i32
    return %c0_i32, %c0_i32_0 : i32, i32
  }
  func.func @transform_7(%arg0: i32) -> (i32, i32) {
    %c0_i32 = arith.constant 0 : i32
    %c0_i32_0 = arith.constant 0 : i32
    %c0_i32_1 = arith.constant 0 : i32
    return %c0_i32, %c0_i32_0 : i32, i32
  }
  func.func @transform_8(%arg0: i32) -> (i32, i32) {
    %c0_i32 = arith.constant 0 : i32
    %c0_i32_0 = arith.constant 0 : i32
    %c0_i32_1 = arith.constant 0 : i32
    return %c0_i32, %c0_i32_0 : i32, i32
  }
  func.func @transform_9(%arg0: i32) -> (i32, i32) {
    %c0_i32 = arith.constant 0 : i32
    %c0_i32_0 = arith.constant 0 : i32
    %c0_i32_1 = arith.constant 0 : i32
    return %c0_i32, %c0_i32_0 : i32, i32
  }
  func.func @transform_10(%arg0: i32) -> (i32, i32) {
    %c0_i32 = arith.constant 0 : i32
    %c0_i32_0 = arith.constant 0 : i32
    %c0_i32_1 = arith.constant 0 : i32
    return %c0_i32, %c0_i32_0 : i32, i32
  }
  func.func @transform_11(%arg0: i32) -> (i32, i32) {
    %c0_i32 = arith.constant 0 : i32
    %c0_i32_0 = arith.constant 0 : i32
    %c0_i32_1 = arith.constant 0 : i32
    return %c0_i32, %c0_i32_0 : i32, i32
  }
  func.func @transform_12(%arg0: i32) -> (i32, i32, i32) {
    %c0_i32 = arith.constant 0 : i32
    %c0_i32_0 = arith.constant 0 : i32
    %c0_i32_1 = arith.constant 0 : i32
    return %arg0, %c0_i32, %c0_i32_0 : i32, i32, i32
  }
}

</mosaic_0001>

<bundles_post_ra>
// kernel: tpu_custom_call.1
= control target key start
LH: loop header
LB: loop body
LE: loop exit
PB: predicated region body
PF: predicated region fallthrough
CT: control target
= control target key end

     0   :  { %s6437_s21 = smov 0   ;;  %s9960_s0 = inlined_call_operand.vmem [shape: f32[2,128,32], index: 0, kind: input, shape index: {}]   ;;  %s9961_s1 = inlined_call_operand.vmem [shape: f32[1,32], index: 1, kind: input, shape index: {}]   ;;  %s9962_s2 = inlined_call_operand.vmem [shape: f32[1,32], index: 2, kind: input, shape index: {}]   ;;  %s9963_s3 = inlined_call_operand.vmem [shape: f32[32,96], index: 3, kind: input, shape index: {}]   ;;  %s9964_s4 = inlined_call_operand.vmem [shape: f32[32,32], index: 4, kind: input, shape index: {}]   ;;  %s9965_s5 = inlined_call_operand.vmem [shape: f32[1,32], index: 5, kind: input, shape index: {}]   ;;  %s9966_s6 = inlined_call_operand.vmem [shape: f32[1,32], index: 6, kind: input, shape index: {}]   ;;  %s9967_s7 = inlined_call_operand.vmem [shape: f32[1,32], index: 7, kind: input, shape index: {}]   ;;  %s9968_s8 = inlined_call_operand.vmem [shape: f32[32,64], index: 8, kind: input, shape index: {}]   ;;  %s9969_s9 = inlined_call_operand.vmem [shape: f32[1,64], index: 9, kind: input, shape index: {}]   ;;  %s9970_s10 = inlined_call_operand.vmem [shape: f32[64,32], index: 10, kind: input, shape index: {}]   ;;  %s9971_s11 = inlined_call_operand.vmem [shape: f32[1,32], index: 11, kind: input, shape index: {}]   ;;  %s9972_s12 = inlined_call_operand.vmem [shape: f32[2,128,32], index: 12, kind: output, shape index: {}]  }
   0x1 LB: > { %s5504_s22 = sadd.s32 4294967295, %s6355_s21   ;;  %p5508_p0 = scmp.ge.s32.totalorder %s6355_s21, 1  ;;  %s6355_s21 = sphi %s6437_s21, %s22_s21  }
   0x2   : > { %p362_p1 = scmp.lt.s32.totalorder %s6355_s21, 3 }
   0x4   : > { %p363_p2 = pnand %p5508_p0, %p362_p1 }
   0x6   : > { %366 = sbr.rel (%p363_p2) target bundleno = 3229 (0xc9d), region = 68 }
   0xb   : > { %p404_p3 = scmp.lt.s32.totalorder %s5504_s22, 1  ;;  %vm432_vm0 = vcmask 261120   ;;  %v6357_v14 = vmov 32.0   ;;  %s6358_s24 = smov 96  }
   0xc   : > { %5943 = vrcp.f32 %v6357_v14  ;;  %s6359_s25 = smov 88   ;;  %s6360_s27 = smov 120  }
   0xd   : > { %s10084_s22 = smov (!%p404_p3, %s5504_s22), 1  ;;  %s6361_s28 = smov 64  }
   0xe   : > { %s5739_s23 = sshll.u32 %s10084_s22, 7  ;;  %s6362_s29 = smov 80  }
   0xf   : > { %s6453_s26 = scalar_lea.vmem %s9960_s0, %s5739_s23  ;;  %s6363_s30 = smov 72  }
  0x10   : > { %v416_v0 = vld [vmem:[%s6453_s26 + $0x10] sm:$0xff]  ;;  %v414_v1 = vld [vmem:[%s6453_s26] sm:$0xff]  ;;  %v415_v6 = vld [vmem:[%s6453_s26 + $0x8] sm:$0xff]  ;;  %s6364_s13 = smov 104   ;;  %s6365_s14 = smov 112  }
  0x11   : > { %v6458_v2 = vld [vmem:[%s6453_s26 + $0x20] sm:$0xff]  ;;  %v439_v3 = vsel %vm432_vm0, %v416_v0, 0.0  ;;  %v433_v4 = vsel %vm432_vm0, %v414_v1, 0.0  ;;  %v417_v7 = vld [vmem:[%s6453_s26 + $0x18] sm:$0xff]  ;;  %v419_v8 = vld [vmem:[%s6453_s26 + $0x28] sm:$0xff]  ;;  %v436_v9 = vsel %vm432_vm0, %v415_v6, 0.0 }
  0x12   : > { %v445_v5 = vsel %vm432_vm0, %v6458_v2, 0.0  ;;  %440 = vadd.xlane.f32.xlu1 %v439_v3  ;;  %434 = vadd.xlane.f32.xlu0 %v433_v4  ;;  %v442_v10 = vsel %vm432_vm0, %v417_v7, 0.0  ;;  %v448_v11 = vsel %vm432_vm0, %v419_v8, 0.0  ;;  %v420_v12 = vld [vmem:[%s6453_s26 + $0x30] sm:$0xff]  ;;  %v5944_v15 = vpop.eup %5943  ;;  %v6488_v36 = vld [vmem:[%s6453_s26 + $0x48] sm:$0xff]  ;;  %v6493_v39 = vld [vmem:[%s6453_s26 + $0x38] sm:$0xff] }
  0x13   : > { %446 = vadd.xlane.f32.xlu2 %v445_v5  ;;  %v451_v13 = vsel %vm432_vm0, %v420_v12, 0.0  ;;  %v482_v16 = vmul.f32 32.0, %v5944_v15  ;;  %vm486_vm1 = vweird.f32 %v5944_v15  ;;  %v460_v41 = vsel %vm432_vm0, %v6488_v36, 0.0  ;;  %v6514_v50 = vld [vmem:[%s6453_s26 + $0x40] sm:$0xff]  ;;  %v6525_v57 = vld [vmem:[%s6453_s26 + $0x50] sm:$0xff]  ;;  %v6548_v4 = vld [vmem:[%s6453_s26 + $0x68] sm:$0xff] }
  0x14   : > { %v454_v44 = vsel %vm432_vm0, %v6493_v39, 0.0  ;;  %v457_v54 = vsel %vm432_vm0, %v6514_v50, 0.0  ;;  %v6530_v59 = vld [vmem:[%s6453_s26 + $0x60] sm:$0xff]  ;;  %v463_v61 = vsel %vm432_vm0, %v6525_v57, 0.0  ;;  %v472_v5 = vsel %vm432_vm0, %v6548_v4, 0.0  ;;  %s6366_s15 = smov 56  }
  0x15   : > { %v483_v17 = vsub.f32 1.0, %v482_v16  ;;  %v469_v62 = vsel %vm432_vm0, %v6530_v59, 0.0  ;;  %s6367_s16 = smov 48   ;;  %s6368_s17 = smov 40  }
  0x16   : > { %s6369_s18 = smov 16   ;;  %s6370_s19 = smov 24  }
  0x17   : > { %v484_v18 = vmul.f32 %v5944_v15, %v483_v17  ;;  %s6371_s20 = smov 8  }
  0x19   : > { %v485_v19 = vadd.f32 %v5944_v15, %v484_v18 }
  0x1a   : > { %437 = vadd.xlane.f32.xlu0 %v436_v9  ;;  %443 = vadd.xlane.f32.xlu1 %v442_v10  ;;  %v830_v9 = vld [vmem:[%s9963_s3] sm:$0xff] }
  0x1b   : > { %449 = vadd.xlane.f32.xlu2 %v448_v11  ;;  %v6472_v20 = vsel %vm486_vm1, %v5944_v15, %v485_v19 }
  0x1c   : > { %9993 = vst [vmem:[#allocation2_spill] sm:$0xff] %v6472_v20 }
  0x22   : > { %452 = vadd.xlane.f32.xlu1 %v451_v13 }
  0x85   : > { %v441_v21 = vpop.xlane.xlu1 %440  ;;  %v435_v22 = vpop.xlane.xlu0 %434 }
  0x86   : > { %v490_v23 = vmul.f32 %v6472_v20, %v441_v21  ;;  %v488_v24 = vmul.f32 %v6472_v20, %v435_v22  ;;  %v447_v25 = vpop.xlane.xlu2 %446 }
  0x87   : > { %v492_v49 = vmul.f32 %v6472_v20, %v447_v25 }
  0x88   : > { %v6476_v26 = vsub.f32 %v416_v0, %v490_v23  ;;  %v6478_v27 = vsub.f32 %v414_v1, %v488_v24  ;;  %v6542_v1 = vld [vmem:[%s6453_s26 + $0x58] sm:$0xff] }
  0x89   : > { %v6519_v53 = vsub.f32 %v6458_v2, %v492_v49  ;;  %v466_v3 = vsel %vm432_vm0, %v6542_v1, 0.0 }
  0x8a   : > { %v522_v28 = vmul.f32 %v6476_v26, %v6476_v26  ;;  %v520_v29 = vmul.f32 %v6478_v27, %v6478_v27 }
  0x8b   : > { %v524_v58 = vmul.f32 %v6519_v53, %v6519_v53 }
  0x8c   : > { %v542_v30 = vsel %vm432_vm0, %v522_v28, 0.0  ;;  %v536_v31 = vsel %vm432_vm0, %v520_v29, 0.0 }
  0x8d   : > { %543 = vadd.xlane.f32.xlu1 %v542_v30  ;;  %537 = vadd.xlane.f32.xlu0 %v536_v31  ;;  %v438_v32 = vpop.xlane.xlu0 %437  ;;  %v444_v33 = vpop.xlane.xlu1 %443  ;;  %v548_v63 = vsel %vm432_vm0, %v524_v58, 0.0 }
  0x8e   : > { %v489_v34 = vmul.f32 %v6472_v20, %v438_v32  ;;  %v450_v35 = vpop.xlane.xlu2 %449  ;;  %v491_v37 = vmul.f32 %v6472_v20, %v444_v33 }
  0x8f   : > { %v493_v38 = vmul.f32 %v6472_v20, %v450_v35 }
  0x90   : > { %v6495_v40 = vsub.f32 %v415_v6, %v489_v34  ;;  %v6501_v43 = vsub.f32 %v417_v7, %v491_v37  ;;  %v833_v6 = vld [vmem:[%s9963_s3 + $0x18] sm:$0xff]  ;;  %v832_v7 = vld [vmem:[%s9963_s3 + $0x10] sm:$0xff] }
  0x91   : > { %v6499_v42 = vsub.f32 %v419_v8, %v493_v38  ;;  %894 = vmatpush.msra.mxu0 %v833_v6  ;;  %v831_v8 = vld [vmem:[%s9963_s3 + $0x8] sm:$0xff] }
  0x92   : > { %v521_v45 = vmul.f32 %v6495_v40, %v6495_v40  ;;  %v523_v48 = vmul.f32 %v6501_v43, %v6501_v43 }
  0x93   : > { %v525_v47 = vmul.f32 %v6499_v42, %v6499_v42  ;;  %895 = vmatpush.msra.mxu0 %v832_v7  ;;  %v6621_v7 = vld [vmem:[%s9962_s2] ss:$0 sm:$0xff] }
  0x94   : > { %v539_v46 = vsel %vm432_vm0, %v521_v45, 0.0  ;;  %v545_v52 = vsel %vm432_vm0, %v523_v48, 0.0 }
  0x95   : > { %461 = vadd.xlane.f32.xlu1 %v460_v41  ;;  %455 = vadd.xlane.f32.xlu0 %v454_v44  ;;  %v551_v51 = vsel %vm432_vm0, %v525_v47, 0.0  ;;  %v453_v55 = vpop.xlane.xlu1 %452 }
  0x96   : > { %540 = vadd.xlane.f32.xlu2 %v539_v46  ;;  %v494_v56 = vmul.f32 %v6472_v20, %v453_v55  ;;  %896 = vmatpush.msra.mxu0 %v831_v8  ;;  %v6594_v46 = vld [vmem:[%s6453_s26 + $0x70] sm:$0xff] }
  0x97   : > { %v475_v55 = vsel %vm432_vm0, %v6594_v46, 0.0 }
  0x98   : > { %v6532_v60 = vsub.f32 %v420_v12, %v494_v56  ;;  %897 = vmatpush.msra.mxu0 %v830_v9 }
  0x9a   : > { %v526_v0 = vmul.f32 %v6532_v60, %v6532_v60 }
  0x9c   : > { %v554_v2 = vsel %vm432_vm0, %v526_v0, 0.0 }
  0x9d   : > { %552 = vadd.xlane.f32.xlu1 %v551_v51  ;;  %546 = vadd.xlane.f32.xlu0 %v545_v52 }
  0x9e   : > { %458 = vadd.xlane.f32.xlu2 %v457_v54 }
  0xa5   : > { %464 = vadd.xlane.f32.xlu0 %v463_v61  ;;  %470 = vadd.xlane.f32.xlu1 %v469_v62 }
  0xa6   : > { %549 = vadd.xlane.f32.xlu2 %v548_v63  ;;  %v6612_v63 = vld [vmem:[%s9961_s1] ss:$0 sm:$0xff] }
  0xad   : > { %555 = vadd.xlane.f32.xlu0 %v554_v2 }
  0xae   : > { %467 = vadd.xlane.f32.xlu2 %v466_v3 }
  0xb5   : > { %473 = vadd.xlane.f32.xlu0 %v472_v5 }
 0x100   : > { %v544_v10 = vpop.xlane.xlu1 %543  ;;  %v538_v11 = vpop.xlane.xlu0 %537 }
 0x101   : > { %v586_v12 = vmul.f32 %v544_v10, %v6472_v20  ;;  %v584_v13 = vmul.f32 %v538_v11, %v6472_v20 }
 0x103   : > { %v6566_v14 = vadd.f32 1e-05, %v586_v12  ;;  %v600_v15 = vadd.f32 1e-05, %v584_v13 }
 0x105   : > { %5945 = vrsqrt.f32 %v6566_v14  ;;  %vm622_vm3 = vweird.f32 %v600_v15  ;;  %vm642_vm5 = vweird.f32 %v6566_v14 }
 0x106   : > { %5947 = vrsqrt.f32 %v600_v15 }
 0x108   : > { %v462_v16 = vpop.xlane.xlu1 %461  ;;  %v456_v17 = vpop.xlane.xlu0 %455 }
 0x109   : > { %v497_v18 = vmul.f32 %v6472_v20, %v462_v16  ;;  %v541_v19 = vpop.xlane.xlu2 %540  ;;  %v495_v21 = vmul.f32 %v6472_v20, %v456_v17 }
 0x10a   : > { %v585_v22 = vmul.f32 %v541_v19, %v6472_v20 }
 0x10b   : > { %v6572_v23 = vpop.eup %5945  ;;  %v6575_v24 = vsub.f32 %v6488_v36, %v497_v18  ;;  %v6578_v25 = vsub.f32 %v6493_v39, %v495_v21  ;;  %v6633_v18 = vld [vmem:[%s6453_s26 + $0x78] sm:$0xff] }
 0x10c   : > { %v5948_v28 = vpop.eup %5947  ;;  %v6580_v29 = vadd.f32 1e-05, %v585_v22  ;;  %v637_v30 = vmul.f32 %v6572_v23, %v6566_v14  ;;  %vm643_vm6 = vweird.f32 %v6572_v23  ;;  %v478_v14 = vsel %vm432_vm0, %v6633_v18, 0.0 }
 0x10d   : > { %v617_v31 = vmul.f32 %v5948_v28, %v600_v15  ;;  %v529_v32 = vmul.f32 %v6575_v24, %v6575_v24  ;;  %v527_v33 = vmul.f32 %v6578_v25, %v6578_v25  ;;  %vm623_vm2 = vweird.f32 %v5948_v28  ;;  %vm6645_vm9 = vmor %vm642_vm5, %vm643_vm6 }
 0x10e   : > { %5949 = vrsqrt.f32 %v6580_v29  ;;  %v638_v39 = vmul.f32 %v6572_v23, %v637_v30  ;;  %vm624_vm4 = vmor %vm622_vm3, %vm623_vm2  ;;  %vm632_vm8 = vweird.f32 %v6580_v29 }
 0x10f   : > { %v618_v34 = vmul.f32 %v5948_v28, %v617_v31  ;;  %v563_v35 = vsel %vm432_vm0, %v529_v32, 0.0  ;;  %v557_v36 = vsel %vm432_vm0, %v527_v33, 0.0 }
 0x110   : > { %v553_v37 = vpop.xlane.xlu1 %552  ;;  %564 = vadd.xlane.f32.xlu0 %v563_v35  ;;  %558 = vadd.xlane.f32.xlu2 %v557_v36  ;;  %v547_v38 = vpop.xlane.xlu0 %546  ;;  %v639_v56 = vmul.f32 0.5, %v638_v39 }
 0x111   : > { %v619_v41 = vmul.f32 0.5, %v618_v34  ;;  %v459_v44 = vpop.xlane.xlu2 %458  ;;  %v587_v45 = vmul.f32 %v547_v38, %v6472_v20  ;;  %v589_v52 = vmul.f32 %v553_v37, %v6472_v20 }
 0x112   : > { %v496_v47 = vmul.f32 %v6472_v20, %v459_v44  ;;  %v640_v9 = vsub.f32 1.5, %v639_v56 }
 0x113   : > { %v620_v48 = vsub.f32 1.5, %v619_v41  ;;  %v6597_v49 = vadd.f32 1e-05, %v587_v45  ;;  %v6614_v2 = vadd.f32 1e-05, %v589_v52 }
 0x114   : > { %v5950_v51 = vpop.eup %5949  ;;  %v6601_v54 = vsub.f32 %v6514_v50, %v496_v47 }
 0x115   : > { %v621_v58 = vmul.f32 %v5948_v28, %v620_v48  ;;  %v627_v61 = vmul.f32 %v5950_v51, %v6580_v29  ;;  %5951 = vrsqrt.f32 %v6597_v49  ;;  %vm633_vm7 = vweird.f32 %v5950_v51 }
 0x116   : > { %v528_v62 = vmul.f32 %v6601_v54, %v6601_v54  ;;  %5953 = vrsqrt.f32 %v6614_v2  ;;  %vm634_vm10 = vmor %vm632_vm8, %vm633_vm7  ;;  %vm652_vm11 = vweird.f32 %v6597_v49  ;;  %vm672_vm2 = vweird.f32 %v6614_v2 }
 0x117   : > { %v628_v50 = vmul.f32 %v5950_v51, %v627_v61  ;;  %v625_v0 = vsel %vm624_vm4, %v5948_v28, %v621_v58  ;;  %v641_v28 = vmul.f32 %v6572_v23, %v640_v9 }
 0x118   : > { %v560_v3 = vsel %vm432_vm0, %v528_v62, 0.0  ;;  %476 = vadd.xlane.f32.xlu2 %v475_v55  ;;  %v465_v5 = vpop.xlane.xlu0 %464  ;;  %v776_v6 = vmul.f32 %v625_v0, %v6478_v27  ;;  %v471_v8 = vpop.xlane.xlu1 %470 }
 0x119   : > { %v629_v10 = vmul.f32 0.5, %v628_v50  ;;  %561 = vadd.xlane.f32.xlu1 %v560_v3  ;;  %v550_v11 = vpop.xlane.xlu2 %549  ;;  %v498_v12 = vmul.f32 %v6472_v20, %v465_v5  ;;  %v500_v15 = vmul.f32 %v6472_v20, %v471_v8 }
 0x11a   : > { %v588_v13 = vmul.f32 %v550_v11, %v6472_v20  ;;  %v795_v27 = vmul.f32 %v6612_v63, %v776_v6 }
 0x11b   : > { %v630_v16 = vsub.f32 1.5, %v629_v10  ;;  %v6630_v17 = vsub.f32 %v6525_v57, %v498_v12  ;;  %v6635_v19 = vpop.eup %5951  ;;  %v6656_v32 = vsub.f32 %v6530_v59, %v500_v15  ;;  %v645_v59 = vsel %vm6645_vm9, %v6572_v23, %v641_v28 }
 0x11c   : > { %v6639_v21 = vadd.f32 1e-05, %v588_v13  ;;  %v814_v22 = vadd.f32 %v6621_v7, %v795_v27  ;;  %v647_v31 = vmul.f32 %v6635_v19, %v6597_v49  ;;  %v6667_v44 = vpop.eup %5953  ;;  %vm653_vm12 = vweird.f32 %v6635_v19 }
 0x11d   : > { %v631_v57 = vmul.f32 %v5950_v51, %v630_v16  ;;  %v530_v29 = vmul.f32 %v6630_v17, %v6630_v17  ;;  %v532_v48 = vmul.f32 %v6656_v32, %v6656_v32  ;;  %v778_v56 = vmul.f32 %v645_v59, %v6476_v26  ;;  %vm6684_vm13 = vmor %vm652_vm11, %vm653_vm12 }
 0x11e   : > { %5955 = vrsqrt.f32 %v6639_v21  ;;  %5513 = vmatmul.msk.f32.vlgmr.msra.gmra.mxu0 %vm432_vm0, %v814_v22  ;;  %v648_v33 = vmul.f32 %v6635_v19, %v647_v31  ;;  %v667_v58 = vmul.f32 %v6667_v44, %v6614_v2  ;;  %vm662_vm14 = vweird.f32 %v6639_v21 }
 0x11f   : > { %v566_v34 = vsel %vm432_vm0, %v530_v29, 0.0  ;;  %v635_v35 = vsel %vm634_vm10, %v5950_v51, %v631_v57  ;;  %v797_v5 = vmul.f32 %v6612_v63, %v778_v56  ;;  %vm673_vm3 = vweird.f32 %v6667_v44 }
 0x120   : > { %567 = vadd.xlane.f32.xlu2 %v566_v34  ;;  %v556_v36 = vpop.xlane.xlu0 %555  ;;  %v777_v37 = vmul.f32 %v635_v35, %v6495_v40  ;;  %v649_v38 = vmul.f32 0.5, %v648_v33  ;;  %v668_v6 = vmul.f32 %v6667_v44, %v667_v58  ;;  %vm674_vm4 = vmor %vm672_vm2, %vm673_vm3 }
 0x121   : > { %479 = vadd.xlane.f32.xlu1 %v478_v14  ;;  %v468_v39 = vpop.xlane.xlu2 %467  ;;  %v590_v41 = vmul.f32 %v556_v36, %v6472_v20  ;;  %v816_v27 = vadd.f32 %v6621_v7, %v797_v5 }
 0x122   : > { %v499_v45 = vmul.f32 %v6472_v20, %v468_v39  ;;  %v796_v47 = vmul.f32 %v6612_v63, %v777_v37  ;;  %v650_v51 = vsub.f32 1.5, %v649_v38  ;;  %v669_v16 = vmul.f32 0.5, %v668_v6 }
 0x123   : > { %v606_v40 = vadd.f32 1e-05, %v590_v41 }
 0x124   : > { %v5956_v52 = vpop.eup %5955  ;;  %v6676_v55 = vsub.f32 %v6542_v1, %v499_v45  ;;  %v815_v23 = vadd.f32 %v6621_v7, %v796_v47  ;;  %v651_v61 = vmul.f32 %v6635_v19, %v650_v51  ;;  %v572_v1 = vsel %vm432_vm0, %v532_v48, 0.0 }
 0x125   : > { %v657_v62 = vmul.f32 %v5956_v52, %v6639_v21  ;;  %5957 = vrsqrt.f32 %v606_v40  ;;  %vm663_vm15 = vweird.f32 %v5956_v52  ;;  %vm682_vm5 = vweird.f32 %v606_v40 }
 0x126   : > { %5514 = vmatmul.msk.f32.gmra.mxu0 %vm432_vm0, %v815_v23  ;;  %v531_v50 = vmul.f32 %v6676_v55, %v6676_v55  ;;  %v655_v10 = vsel %vm6684_vm13, %v6635_v19, %v651_v61  ;;  %vm664_vm1 = vmor %vm662_vm14, %vm663_vm15 }
 0x127   : > { %v658_v26 = vmul.f32 %v5956_v52, %v657_v62  ;;  %v779_v15 = vmul.f32 %v655_v10, %v6501_v43 }
 0x128   : > { %v569_v0 = vsel %vm432_vm0, %v531_v50, 0.0  ;;  %v474_v3 = vpop.xlane.xlu0 %473 }
 0x129   : > { %v659_v8 = vmul.f32 0.5, %v658_v26  ;;  %573 = vadd.xlane.f32.xlu1 %v572_v1  ;;  %570 = vadd.xlane.f32.xlu0 %v569_v0  ;;  %v501_v9 = vmul.f32 %v6472_v20, %v474_v3  ;;  %v798_v21 = vmul.f32 %v6612_v63, %v779_v15 }
 0x12b   : > { %v5958_v11 = vpop.eup %5957  ;;  %v660_v12 = vsub.f32 1.5, %v659_v8  ;;  %v6701_v13 = vsub.f32 %v6548_v4, %v501_v9  ;;  %v670_v4 = vsub.f32 1.5, %v669_v16  ;;  %v817_v43 = vadd.f32 %v6621_v7, %v798_v21 }
 0x12c   : > { %v677_v28 = vmul.f32 %v5958_v11, %v606_v40  ;;  %vm683_vm6 = vweird.f32 %v5958_v11 }
 0x12d   : > { %v661_v22 = vmul.f32 %v5956_v52, %v660_v12  ;;  %v533_v30 = vmul.f32 %v6701_v13, %v6701_v13  ;;  %v671_v14 = vmul.f32 %v6667_v44, %v670_v4  ;;  %vm684_vm7 = vmor %vm682_vm5, %vm683_vm6 }
 0x12e   : > { %5515 = vmatmul.msk.f32.gmra.mxu0 %vm432_vm0, %v816_v27  ;;  %v678_v57 = vmul.f32 %v5958_v11, %v677_v28 }
 0x12f   : > { %v575_v19 = vsel %vm432_vm0, %v533_v30, 0.0  ;;  %v665_v31 = vsel %vm664_vm1, %v5956_v52, %v661_v22  ;;  %v675_v36 = vsel %vm674_vm4, %v6667_v44, %v671_v14 }
 0x130   : > { %576 = vadd.xlane.f32.xlu2 %v575_v19  ;;  %v780_v29 = vmul.f32 %v665_v31, %v6519_v53  ;;  %v679_v33 = vmul.f32 0.5, %v678_v57  ;;  %v781_v37 = vmul.f32 %v675_v36, %v6499_v42 }
 0x132   : > { %v799_v34 = vmul.f32 %v6612_v63, %v780_v29  ;;  %v680_v35 = vsub.f32 1.5, %v679_v33  ;;  %v800_v53 = vmul.f32 %v6612_v63, %v781_v37 }
 0x134   : > { %v818_v2 = vadd.f32 %v6621_v7, %v799_v34  ;;  %v681_v38 = vmul.f32 %v5958_v11, %v680_v35  ;;  %v819_v41 = vadd.f32 %v6621_v7, %v800_v53 }
 0x136   : > { %5516 = vmatmul.msk.f32.gmra.mxu0 %vm432_vm0, %v817_v43  ;;  %v685_v39 = vsel %vm684_vm7, %v5958_v11, %v681_v38 }
 0x137   : > { %v782_v59 = vmul.f32 %v685_v39, %v6532_v60 }
 0x139   : > { %v801_v44 = vmul.f32 %v6612_v63, %v782_v59 }
 0x13b   : > { %v820_v45 = vadd.f32 %v6621_v7, %v801_v44 }
 0x13e   : > { %5517 = vmatmul.msk.f32.gmra.mxu0 %vm432_vm0, %v818_v2 }
 0x146   : > { %5518 = vmatmul.msk.f32.gmra.mxu0 %vm432_vm0, %v819_v41 }
 0x14e   : > { %5519 = vmatmul.msk.f32.gmra.mxu0 %vm432_vm0, %v820_v45 }
 0x183   : > { %v559_v42 = vpop.xlane.xlu2 %558  ;;  %v565_v47 = vpop.xlane.xlu0 %564 }
 0x184   : > { %v591_v48 = vmul.f32 %v559_v42, %v6472_v20  ;;  %v593_v51 = vmul.f32 %v565_v47, %v6472_v20 }
 0x186   : > { %v607_v40 = vadd.f32 1e-05, %v591_v48  ;;  %v609_v52 = vadd.f32 1e-05, %v593_v51 }
 0x188   : > { %5959 = vrsqrt.f32 %v607_v40  ;;  %vm692_vm9 = vweird.f32 %v607_v40  ;;  %vm712_vm11 = vweird.f32 %v609_v52 }
 0x189   : > { %5961 = vrsqrt.f32 %v609_v52 }
 0x18b   : > { %v477_v23 = vpop.xlane.xlu2 %476 }
 0x18c   : > { %v562_v60 = vpop.xlane.xlu1 %561  ;;  %v502_v56 = vmul.f32 %v6472_v20, %v477_v23 }
 0x18d   : > { %v592_v58 = vmul.f32 %v562_v60, %v6472_v20 }
 0x18e   : > { %v5960_v61 = vpop.eup %5959  ;;  %v6733_v62 = vsub.f32 %v6594_v46, %v502_v56 }
 0x18f   : > { %v6735_v49 = vpop.eup %5961  ;;  %v687_v1 = vmul.f32 %v5960_v61, %v607_v40  ;;  %v608_v50 = vadd.f32 1e-05, %v592_v58  ;;  %vm693_vm8 = vweird.f32 %v5960_v61 }
 0x190   : > { %v707_v26 = vmul.f32 %v6735_v49, %v609_v52  ;;  %v534_v0 = vmul.f32 %v6733_v62, %v6733_v62  ;;  %vm694_vm10 = vmor %vm692_vm9, %vm693_vm8  ;;  %vm713_vm12 = vweird.f32 %v6735_v49 }
 0x191   : > { %v688_v3 = vmul.f32 %v5960_v61, %v687_v1  ;;  %5963 = vrsqrt.f32 %v608_v50  ;;  %vm6765_vm14 = vmor %vm712_vm11, %vm713_vm12  ;;  %vm702_vm15 = vweird.f32 %v608_v50 }
 0x192   : > { %v578_v5 = vsel %vm432_vm0, %v534_v0, 0.0  ;;  %v708_v9 = vmul.f32 %v6735_v49, %v707_v26 }
 0x193   : > { %v689_v6 = vmul.f32 0.5, %v688_v3  ;;  %579 = vadd.xlane.f32.xlu0 %v578_v5  ;;  %v568_v8 = vpop.xlane.xlu2 %567 }
 0x194   : > { %v480_v46 = vpop.xlane.xlu1 %479  ;;  %v594_v10 = vmul.f32 %v568_v8, %v6472_v20  ;;  %v709_v28 = vmul.f32 0.5, %v708_v9 }
 0x195   : > { %v690_v11 = vsub.f32 1.5, %v689_v6  ;;  %v503_v12 = vmul.f32 %v6472_v20, %v480_v46 }
 0x196   : > { %v6744_v27 = vadd.f32 1e-05, %v594_v10  ;;  %v710_v29 = vsub.f32 1.5, %v709_v28 }
 0x197   : > { %v5964_v15 = vpop.eup %5963  ;;  %v691_v16 = vmul.f32 %v5960_v61, %v690_v11  ;;  %v6747_v22 = vsub.f32 %v6633_v18, %v503_v12 }
 0x198   : > { %v697_v30 = vmul.f32 %v5964_v15, %v608_v50  ;;  %5965 = vrsqrt.f32 %v6744_v27  ;;  %vm703_vm13 = vweird.f32 %v5964_v15  ;;  %v711_v41 = vmul.f32 %v6735_v49, %v710_v29 }
 0x199   : > { %v535_v19 = vmul.f32 %v6747_v22, %v6747_v22  ;;  %v695_v21 = vsel %vm694_vm10, %v5960_v61, %v691_v16  ;;  %vm704_vm1 = vmor %vm702_vm15, %vm703_vm13  ;;  %vm722_vm2 = vweird.f32 %v6744_v27 }
 0x19a   : > { %v698_v4 = vmul.f32 %v5964_v15, %v697_v30  ;;  %v783_v57 = vmul.f32 %v695_v21, %v6578_v25  ;;  %v715_v23 = vsel %vm6765_vm14, %v6735_v49, %v711_v41 }
 0x19b   : > { %v6753_v31 = vpop.f32.mrf.mxu0  ;;  %v581_v43 = vsel %vm432_vm0, %v535_v19, 0.0  ;;  %v785_v1 = vmul.f32 %v715_v23, %v6575_v24 }
 0x19c   : > { %v699_v14 = vmul.f32 0.5, %v698_v4  ;;  %582 = vadd.xlane.f32.xlu1 %v581_v43  ;;  %v574_v18 = vpop.xlane.xlu1 %573  ;;  %v571_v33 = vpop.xlane.xlu0 %570  ;;  %v802_v34 = vmul.f32 %v6612_v63, %v783_v57 }
 0x19d   : > { %v596_v35 = vmul.f32 %v574_v18, %v6472_v20  ;;  %v595_v36 = vmul.f32 %v571_v33, %v6472_v20  ;;  %v804_v8 = vmul.f32 %v6612_v63, %v785_v1 }
 0x19e   : > { %v5966_v2 = vpop.eup %5965  ;;  %v700_v25 = vsub.f32 1.5, %v699_v14  ;;  %v821_v37 = vadd.f32 %v6621_v7, %v802_v34 }
 0x19f   : > { %v717_v38 = vmul.f32 %v5966_v2, %v6744_v27  ;;  %v6762_v53 = vadd.f32 1e-05, %v596_v35  ;;  %v611_v39 = vadd.f32 1e-05, %v595_v36  ;;  %vm723_vm3 = vweird.f32 %v5966_v2 }
 0x1a0   : > { %v701_v44 = vmul.f32 %v5964_v15, %v700_v25  ;;  %5520 = vmatmul.msk.f32.gmra.mxu0 %vm432_vm0, %v821_v37  ;;  %vm6790_vm4 = vmor %vm722_vm2, %vm723_vm3  ;;  %v823_v12 = vadd.f32 %v6621_v7, %v804_v8 }
 0x1a1   : > { %v718_v45 = vmul.f32 %v5966_v2, %v717_v38  ;;  %5967 = vrsqrt.f32 %v6762_v53  ;;  %vm732_vm5 = vweird.f32 %v611_v39  ;;  %vm742_vm8 = vweird.f32 %v6762_v53 }
 0x1a2   : > { %5969 = vrsqrt.f32 %v611_v39  ;;  %v705_v42 = vsel %vm704_vm1, %v5964_v15, %v701_v44 }
 0x1a3   : > { %v719_v47 = vmul.f32 0.5, %v718_v45  ;;  %v6771_v48 = vpop.f32.mrf.mxu0  ;;  %v577_v51 = vpop.xlane.xlu2 %576  ;;  %v784_v40 = vmul.f32 %v705_v42, %v6601_v54 }
 0x1a4   : > { %968 = vrot.lane.b32.xlu2 %v6771_v48, %s6358_s24  ;;  %v597_v52 = vmul.f32 %v577_v51, %v6472_v20  ;;  %v6827_v33 = vpack.i.bf16 %v6753_v31, %v6771_v48 }
 0x1a5   : > { %v720_v60 = vsub.f32 1.5, %v719_v47  ;;  %v803_v56 = vmul.f32 %v6612_v63, %v784_v40 }
 0x1a6   : > { %v6782_v58 = vadd.f32 1e-05, %v597_v52  ;;  %10003 = vst [vmem:[#allocation4_spill] sm:$0xff] %v6827_v33 }
 0x1a7   : > { %v5968_v61 = vpop.eup %5967  ;;  %1481 = vrot.lane.b32.xlu0 %v6753_v31, %s6359_s25  ;;  %v822_v54 = vadd.f32 %v6621_v7, %v803_v56  ;;  %v721_v26 = vmul.f32 %v5966_v2, %v720_v60 }
 0x1a8   : > { %v5970_v50 = vpop.eup %5969  ;;  %v737_v49 = vmul.f32 %v5968_v61, %v6762_v53  ;;  %5971 = vrsqrt.f32 %v6782_v58  ;;  %vm743_vm9 = vweird.f32 %v5968_v61  ;;  %vm752_vm11 = vweird.f32 %v6782_v58 }
 0x1a9   : > { %v727_v3 = vmul.f32 %v5970_v50, %v611_v39  ;;  %5521 = vmatmul.msk.f32.gmra.mxu0 %vm432_vm0, %v822_v54  ;;  %v725_v24 = vsel %vm6790_vm4, %v5966_v2, %v721_v26  ;;  %vm733_vm6 = vweird.f32 %v5970_v50  ;;  %vm744_vm10 = vmor %vm742_vm8, %vm743_vm9  ;;  %vm3216_vm8 = vcmask 195584  }
 0x1aa   : > { %v738_v9 = vmul.f32 %v5968_v61, %v737_v49  ;;  %v786_v27 = vmul.f32 %v725_v24, %v6630_v17  ;;  %vm734_vm7 = vmor %vm732_vm5, %vm733_vm6  ;;  %vm998_vm5 = vcmask 64512  }
 0x1ab   : > { %v728_v5 = vmul.f32 %v5970_v50, %v727_v3  ;;  %v6795_v6 = vpop.f32.mrf.mxu0 }
 0x1ac   : > { %1451 = vrot.lane.b32.xlu2 %v6771_v48, %s6360_s27  ;;  %v739_v15 = vmul.f32 0.5, %v738_v9  ;;  %v805_v19 = vmul.f32 %v6612_v63, %v786_v27 }
 0x1ad   : > { %v729_v46 = vmul.f32 0.5, %v728_v5 }
 0x1ae   : > { %v5972_v10 = vpop.eup %5971  ;;  %v740_v21 = vsub.f32 1.5, %v739_v15  ;;  %v824_v17 = vadd.f32 %v6621_v7, %v805_v19 }
 0x1af   : > { %v730_v11 = vsub.f32 1.5, %v729_v46  ;;  %1449 = vrot.lane.b32.xlu0 %v6753_v31, %s6360_s27  ;;  %v747_v16 = vmul.f32 %v5972_v10, %v6782_v58  ;;  %vm753_vm12 = vweird.f32 %v5972_v10 }
 0x1b0   : > { %v741_v29 = vmul.f32 %v5968_v61, %v740_v21  ;;  %vm754_vm13 = vmor %vm752_vm11, %vm753_vm12 }
 0x1b1   : > { %v731_v28 = vmul.f32 %v5970_v50, %v730_v11  ;;  %5522 = vmatmul.msk.f32.gmra.mxu0 %vm432_vm0, %v823_v12  ;;  %v748_v4 = vmul.f32 %v5972_v10, %v747_v16 }
 0x1b3   : > { %v6808_v30 = vpop.f32.mrf.mxu0  ;;  %v735_v57 = vsel %vm734_vm7, %v5970_v50, %v731_v28  ;;  %v749_v14 = vmul.f32 0.5, %v748_v4  ;;  %vm3199_vm7 = vcmask 130048  }
 0x1b4   : > { %1487 = vrot.lane.b32.xlu2 %v6808_v30, %s6359_s25  ;;  %v787_v43 = vmul.f32 %v735_v57, %v6676_v55  ;;  %v6823_v18 = vpack.i.bf16 %v6795_v6, %v6808_v30  ;;  %v745_v55 = vsel %vm744_vm10, %v5968_v61, %v741_v29 }
 0x1b5   : > { %966 = vrot.lane.b32.xlu1 %v6753_v31, %s6358_s24  ;;  %v750_v35 = vsub.f32 1.5, %v749_v14  ;;  %v788_v2 = vmul.f32 %v745_v55, %v6656_v32 }
 0x1b6   : > { %10002 = vst [vmem:[#allocation3_spill] sm:$0xff] %v6823_v18  ;;  %v806_v34 = vmul.f32 %v6612_v63, %v787_v43 }
 0x1b7   : > { %1483 = vrot.lane.b32.xlu0 %v6771_v48, %s6359_s25  ;;  %v751_v25 = vmul.f32 %v5972_v10, %v750_v35  ;;  %v807_v38 = vmul.f32 %v6612_v63, %v788_v2 }
 0x1b8   : > { %v825_v36 = vadd.f32 %v6621_v7, %v806_v34 }
 0x1b9   : > { %5523 = vmatmul.msk.f32.gmra.mxu0 %vm432_vm0, %v824_v17  ;;  %v755_v53 = vsel %vm754_vm13, %v5972_v10, %v751_v25  ;;  %v826_v32 = vadd.f32 %v6621_v7, %v807_v38 }
 0x1ba   : > { %v789_v39 = vmul.f32 %v755_v53, %v6701_v13 }
 0x1bb   : > { %v6840_v37 = vpop.f32.mrf.mxu0 }
 0x1bc   : > { %5782 = vrot.lane.b32.xlu2 %v6823_v18, %s6361_s28  ;;  %v808_v41 = vmul.f32 %v6612_v63, %v789_v39 }
 0x1bd   : > { %5777 = vrot.lane.b32.xlu1 %v6827_v33, %s6361_s28 }
 0x1be   : > { %v827_v44 = vadd.f32 %v6621_v7, %v808_v41 }
 0x1bf   : > { %970 = vrot.lane.b32.xlu0 %v6795_v6, %s6358_s24 }
 0x1c1   : > { %5524 = vmatmul.msk.f32.gmra.mxu0 %vm432_vm0, %v825_v36 }
 0x1c3   : > { %v6857_v59 = vpop.f32.mrf.mxu0 }
 0x1c4   : > { %974 = vrot.lane.b32.xlu2 %v6840_v37, %s6358_s24  ;;  %v6871_v13 = vpack.i.bf16 %v6840_v37, %v6857_v59 }
 0x1c5   : > { %1485 = vrot.lane.b32.xlu1 %v6795_v6, %s6359_s25 }
 0x1c6   : > { %10004 = vst [vmem:[#allocation5_spill] sm:$0xff] %v6871_v13 }
 0x1c7   : > { %1455 = vrot.lane.b32.xlu0 %v6808_v30, %s6360_s27 }
 0x1c9   : > { %5525 = vmatmul.msk.f32.gmra.mxu0 %vm432_vm0, %v826_v32 }
 0x1cb   : > { %v6877_v45 = vpop.f32.mrf.mxu0 }
 0x1cc   : > { %1489 = vrot.lane.b32.xlu2 %v6840_v37, %s6359_s25 }
 0x1cd   : > { %1453 = vrot.lane.b32.xlu1 %v6795_v6, %s6360_s27 }
 0x1cf   : > { %976 = vrot.lane.b32.xlu0 %v6857_v59, %s6358_s24 }
 0x1d1   : > { %5526 = vmatmul.msk.f32.gmra.mxu0 %vm432_vm0, %v827_v44 }
 0x1d4   : > { %1457 = vrot.lane.b32.xlu2 %v6840_v37, %s6360_s27 }
 0x1d5   : > { %972 = vrot.lane.b32.xlu1 %v6808_v30, %s6358_s24 }
 0x1d7   : > { %1491 = vrot.lane.b32.xlu0 %v6857_v59, %s6359_s25 }
 0x1dc   : > { %5787 = vrot.lane.b32.xlu2 %v6871_v13, %s6361_s28 }
 0x1dd   : > { %1459 = vrot.lane.b32.xlu1 %v6857_v59, %s6360_s27 }
 0x1df   : > { %1493 = vrot.lane.b32.xlu0 %v6877_v45, %s6359_s25 }
 0x1e5   : > { %978 = vrot.lane.b32.xlu1 %v6877_v45, %s6358_s24 }
 0x1e7   : > { %1461 = vrot.lane.b32.xlu0 %v6877_v45, %s6360_s27 }
 0x1fe   : > { %v6965_v17 = vpop.permute.xlu2 %968 }
 0x206   : > { %v580_v42 = vpop.xlane.xlu0 %579  ;;  %v6969_v43 = vpop.permute.xlu2 %1451 }
 0x207   : > { %v598_v47 = vmul.f32 %v580_v42, %v6472_v20 }
 0x209   : > { %v614_v51 = vadd.f32 1e-05, %v598_v47 }
 0x20b   : > { %5973 = vrsqrt.f32 %v614_v51  ;;  %vm762_vm15 = vweird.f32 %v614_v51 }
 0x20e   : > { %v6973_v29 = vpop.permute.xlu2 %1487 }
 0x20f   : > { %v583_v40 = vpop.xlane.xlu1 %582 }
 0x210   : > { %v599_v52 = vmul.f32 %v583_v40, %v6472_v20 }
 0x211   : > { %v5974_v23 = vpop.eup %5973 }
 0x212   : > { %v757_v60 = vmul.f32 %v5974_v23, %v614_v51  ;;  %v615_v56 = vadd.f32 1e-05, %v599_v52  ;;  %vm763_vm14 = vweird.f32 %v5974_v23 }
 0x213   : > { %vm764_vm1 = vmor %vm762_vm15, %vm763_vm14 }
 0x214   : > { %v758_v58 = vmul.f32 %v5974_v23, %v757_v60  ;;  %5975 = vrsqrt.f32 %v615_v56  ;;  %vm772_vm3 = vweird.f32 %v615_v56 }
 0x216   : > { %v759_v61 = vmul.f32 0.5, %v758_v58  ;;  %v6981_v35 = vpop.permute.xlu2 %5782 }
 0x218   : > { %v760_v54 = vsub.f32 1.5, %v759_v61 }
 0x219   : > { %v6977_v14 = vpop.permute.xlu0 %1481 }
 0x21a   : > { %v5976_v1 = vpop.eup %5975  ;;  %v761_v50 = vmul.f32 %v5974_v23, %v760_v54 }
 0x21b   : > { %v767_v26 = vmul.f32 %v5976_v1, %v615_v56  ;;  %vm773_vm2 = vweird.f32 %v5976_v1 }
 0x21c   : > { %v765_v49 = vsel %vm764_vm1, %v5974_v23, %v761_v50  ;;  %vm774_vm4 = vmor %vm772_vm3, %vm773_vm2 }
 0x21d   : > { %v768_v0 = vmul.f32 %v5976_v1, %v767_v26  ;;  %v6887_v3 = vpop.f32.mrf.mxu0  ;;  %v790_v5 = vmul.f32 %v765_v49, %v6733_v62 }
 0x21e   : > { %1495 = vrot.lane.b32.xlu0 %v6887_v3, %s6359_s25  ;;  %980 = vrot.lane.b32.xlu2 %v6887_v3, %s6358_s24  ;;  %v6899_v62 = vpack.i.bf16 %v6877_v45, %v6887_v3  ;;  %v6991_v2 = vpop.permute.xlu2 %974 }
 0x21f   : > { %v769_v8 = vmul.f32 0.5, %v768_v0  ;;  %v809_v9 = vmul.f32 %v6612_v63, %v790_v5 }
 0x220   : > { %10005 = vst [vmem:[#allocation6_spill] sm:$0xff] %v6899_v62 }
 0x221   : > { %v770_v24 = vsub.f32 1.5, %v769_v8  ;;  %v828_v46 = vadd.f32 %v6621_v7, %v809_v9  ;;  %v6985_v55 = vpop.permute.xlu0 %1449 }
 0x223   : > { %v771_v10 = vmul.f32 %v5976_v1, %v770_v24  ;;  %5527 = vmatmul.msk.f32.gmra.mxu0 %vm432_vm0, %v828_v46 }
 0x225   : > { %v775_v11 = vsel %vm774_vm4, %v5976_v1, %v771_v10 }
 0x226   : > { %v6901_v12 = vpop.f32.mrf.mxu0  ;;  %5792 = vrot.lane.b32.xlu2 %v6899_v62, %s6361_s28  ;;  %v791_v27 = vmul.f32 %v775_v11, %v6747_v22  ;;  %v6999_v53 = vpop.permute.xlu2 %1489 }
 0x227   : > { %982 = vrot.lane.b32.xlu0 %v6901_v12, %s6358_s24  ;;  %v6979_v34 = vpop.permute.xlu1 %966 }
 0x228   : > { %v810_v15 = vmul.f32 %v6612_v63, %v791_v27 }
 0x229   : > { %v6995_v25 = vpop.permute.xlu0 %1483 }
 0x22a   : > { %v829_v16 = vadd.f32 %v6621_v7, %v810_v15 }
 0x22c   : > { %5528 = vmatmul.msk.f32.gmra.mxu0 %vm432_vm0, %v829_v16 }
 0x22e   : > { %v6911_v28 = vpop.f32.mrf.mxu0  ;;  %1497 = vrot.lane.b32.xlu2 %v6901_v12, %s6359_s25  ;;  %v7013_v44 = vpop.permute.xlu2 %1457 }
 0x22f   : > { %984 = vrot.lane.b32.xlu1 %v6911_v28, %s6358_s24  ;;  %v6919_v22 = vpack.i.bf16 %v6901_v12, %v6911_v28  ;;  %v6989_v36 = vpop.permute.xlu1 %5777  ;;  %10010 = vst [vmem:[#allocation11_spill] sm:$0xff] %v7013_v44 }
 0x231   : > { %10006 = vst [vmem:[#allocation7_spill] sm:$0xff] %v6919_v22  ;;  %5797 = vrot.lane.b32.xlu0 %v6919_v22, %s6361_s28  ;;  %v7009_v39 = vpop.permute.xlu0 %970 }
 0x236   : > { %v6923_v63 = vpop.f32.mrf.mxu0  ;;  %v7027_v40 = vpop.permute.xlu2 %5787 }
 0x237   : > { %1499 = vrot.lane.b32.xlu1 %v6911_v28, %s6359_s25  ;;  %986 = vrot.lane.b32.xlu2 %v6923_v63, %s6358_s24  ;;  %v6997_v38 = vpop.permute.xlu1 %1485 }
 0x239   : > { %v7023_v47 = vpop.permute.xlu0 %1455 }
 0x23a   : > { %10011 = vst [vmem:[#allocation12_spill] sm:$0xff] %v7023_v47 }
 0x23e   : > { %v6929_v7 = vpop.f32.mrf.mxu0 }
 0x23f   : > { %1501 = vrot.lane.b32.xlu2 %v6923_v63, %s6359_s25  ;;  %1503 = vrot.lane.b32.xlu1 %v6929_v7, %s6359_s25  ;;  %v6941_v21 = vpack.i.bf16 %v6923_v63, %v6929_v7  ;;  %v7011_v41 = vpop.permute.xlu1 %1453 }
 0x240   : > { %988 = vrot.lane.b32.xlu0 %v6929_v7, %s6358_s24 }
 0x241   : > { %10007 = vst [vmem:[#allocation8_spill] sm:$0xff] %v6941_v21  ;;  %v7035_v52 = vpop.permute.xlu0 %976 }
 0x246   : > { %v6937_v19 = vpop.f32.mrf.mxu0 }
 0x247   : > { %990 = vrot.lane.b32.xlu2 %v6937_v19, %s6358_s24  ;;  %v7025_v51 = vpop.permute.xlu1 %972 }
 0x248   : > { %5802 = vrot.lane.b32.xlu0 %v6941_v21, %s6361_s28 }
 0x249   : > { %v7049_v56 = vpop.permute.xlu0 %1491 }
 0x24e   : > { %v6947_v4 = vpop.f32.mrf.mxu0 }
 0x24f   : > { %10008 = vst [vmem:[#allocation9_spill] sm:$0xff] %v6947_v4  ;;  %1507 = vrot.lane.b32.xlu2 %v6947_v4, %s6359_s25  ;;  %992 = vrot.lane.b32.xlu1 %v6947_v4, %s6358_s24  ;;  %v6957_v57 = vpack.i.bf16 %v6937_v19, %v6947_v4  ;;  %v7041_v60 = vpop.permute.xlu1 %1459 }
 0x250   : > { %1505 = vrot.lane.b32.xlu0 %v6937_v19, %s6359_s25  ;;  %10012 = vst [vmem:[#allocation13_spill] sm:$0xff] %v7041_v60 }
 0x251   : > { %10009 = vst [vmem:[#allocation10_spill] sm:$0xff] %v6957_v57  ;;  %v7065_v1 = vpop.permute.xlu0 %1493 }
 0x257   : > { %5807 = vrot.lane.b32.xlu1 %v6957_v57, %s6361_s28  ;;  %v7055_v61 = vpop.permute.xlu1 %978 }
 0x259   : > { %v7079_v49 = vpop.permute.xlu0 %1461 }
 0x25a   : > { %10013 = vst [vmem:[#allocation14_spill] sm:$0xff] %v7079_v49 }
 0x25f   : > { %1467 = vrot.lane.b32.xlu1 %v6911_v28, %s6360_s27 }
 0x267   : > { %2021 = vrot.lane.b32.xlu1 %v6947_v4, %s6362_s29 }
 0x26f   : > { %2019 = vrot.lane.b32.xlu1 %v6937_v19, %s6362_s29 }
 0x277   : > { %2013 = vrot.lane.b32.xlu1 %v6911_v28, %s6362_s29 }
 0x278   : > { %v7037_v23 = vpop.permute.xlu2 %980 }
 0x27f   : > { %2519 = vrot.lane.b32.xlu1 %v6857_v59, %s6363_s30 }
 0x280   : > { %v7051_v58 = vpop.permute.xlu2 %5792 }
 0x287   : > { %2001 = vrot.lane.b32.xlu1 %v6808_v30, %s6362_s29 }
 0x288   : > { %v7067_v50 = vpop.permute.xlu2 %1497 }
 0x28f   : > { %2513 = vrot.lane.b32.xlu1 %v6795_v6, %s6363_s30 }
 0x290   : > { %v7087_v5 = vpop.permute.xlu0 %1495 }
 0x291   : > { %v987_v0 = vpop.permute.xlu2 %986 }
 0x297   : > { %1997 = vrot.lane.b32.xlu1 %v6771_v48, %s6362_s29 }
 0x299   : > { %v7091_v9 = vpop.permute.xlu2 %1501  ;;  %v983_v46 = vpop.permute.xlu0 %982 }
 0x29f   : > { %1995 = vrot.lane.b32.xlu1 %v6753_v31, %s6362_s29 }
 0x2a0   : > { %v7003_v32 = vpop.f32.mrf.mxu0 }
 0x2a1   : > { %1509 = vrot.lane.b32.xlu2 %v7003_v32, %s6359_s25  ;;  %994 = vrot.lane.b32.xlu0 %v7003_v32, %s6358_s24  ;;  %v7063_v54 = vpop.permute.xlu1 %984  ;;  %v991_v10 = vpop.permute.xlu2 %990 }
 0x2a3   : > { %v7105_v11 = vpop.permute.xlu0 %5797 }
 0x2a7   : > { %2477 = vrot.lane.b32.xlu1 %v6753_v31, %s6364_s13 }
 0x2a9   : > { %2537 = vrot.lane.b32.xlu0 %v7003_v32, %s6363_s30  ;;  %v7019_v42 = vpop.f32.mrf.mxu0  ;;  %v7077_v26 = vpop.permute.xlu1 %1499 }
 0x2aa   : > { %996 = vrot.lane.b32.xlu2 %v7019_v42, %s6358_s24  ;;  %v7111_v15 = vpop.permute.xlu2 %1507 }
 0x2af   : > { %1967 = vrot.lane.b32.xlu1 %v6795_v6, %s6365_s14 }
 0x2b1   : > { %2535 = vrot.lane.b32.xlu0 %v6947_v4, %s6363_s30  ;;  %v7089_v8 = vpop.permute.xlu1 %1503 }
 0x2b2   : > { %1463 = vrot.lane.b32.xlu2 %v6887_v3, %s6360_s27  ;;  %v989_v16 = vpop.permute.xlu0 %988 }
 0x2b7   : > { %2483 = vrot.lane.b32.xlu1 %v6808_v30, %s6364_s13 }
 0x2b9   : > { %2533 = vrot.lane.b32.xlu0 %v6937_v19, %s6363_s30 }
 0x2ba   : > { %1465 = vrot.lane.b32.xlu2 %v6901_v12, %s6360_s27  ;;  %v7123_v33 = vpop.permute.xlu0 %5802 }
 0x2bf   : > { %1973 = vrot.lane.b32.xlu1 %v6857_v59, %s6365_s14 }
 0x2c1   : > { %1469 = vrot.lane.b32.xlu0 %v6923_v63, %s6360_s27  ;;  %v993_v24 = vpop.permute.xlu1 %992 }
 0x2c2   : > { %2023 = vrot.lane.b32.xlu2 %v7003_v32, %s6362_s29  ;;  %v7138_v62 = vpop.permute.xlu0 %1505 }
 0x2c7   : > { %1975 = vrot.lane.b32.xlu1 %v6877_v45, %s6365_s14 }
 0x2c9   : > { %2531 = vrot.lane.b32.xlu0 %v6929_v7, %s6363_s30  ;;  %v7107_v27 = vpop.permute.xlu1 %5807 }
 0x2ca   : > { %2017 = vrot.lane.b32.xlu2 %v6929_v7, %s6362_s29 }
 0x2cf   : > { %2025 = vrot.lane.b32.xlu1 %v7019_v42, %s6362_s29 }
 0x2d1   : > { %2015 = vrot.lane.b32.xlu0 %v6923_v63, %s6362_s29  ;;  %v7117_v20 = vpop.permute.xlu1 %1467 }
 0x2d2   : > { %2009 = vrot.lane.b32.xlu2 %v6887_v3, %s6362_s29  ;;  %10014 = vst [vmem:[#allocation15_spill] sm:$0xff] %v7117_v20  ;;  %v7136_v20 = vpack.i.bf16 %v7003_v32, %v7019_v42 }
 0x2d4   : > { %10015 = vst [vmem:[#allocation16_spill] sm:$0xff] %v7136_v20 }
 0x2d7   : > { %2493 = vrot.lane.b32.xlu1 %v6901_v12, %s6364_s13 }
 0x2d9   : > { %2529 = vrot.lane.b32.xlu0 %v6923_v63, %s6363_s30  ;;  %v7129_v18 = vpop.permute.xlu1 %2021 }
 0x2da   : > { %1999 = vrot.lane.b32.xlu2 %v6795_v6, %s6362_s29 }
 0x2df   : > { %2495 = vrot.lane.b32.xlu1 %v6911_v28, %s6364_s13 }
 0x2e1   : > { %1471 = vrot.lane.b32.xlu0 %v6929_v7, %s6360_s27  ;;  %v7144_v44 = vpop.permute.xlu1 %2019 }
 0x2e2   : > { %1963 = vrot.lane.b32.xlu2 %v6753_v31, %s6365_s14 }
 0x2e7   : > { %5822 = vrot.lane.b32.xlu1 %v6957_v57, %s6366_s15 }
 0x2e9   : > { %2527 = vrot.lane.b32.xlu0 %v6911_v28, %s6363_s30  ;;  %v7153_v47 = vpop.permute.xlu1 %2013 }
 0x2ea   : > { %2479 = vrot.lane.b32.xlu2 %v6771_v48, %s6364_s13 }
 0x2f1   : > { %2011 = vrot.lane.b32.xlu0 %v6901_v12, %s6362_s29 }
 0x2f2   : > { %1969 = vrot.lane.b32.xlu2 %v6808_v30, %s6365_s14 }
 0x2f9   : > { %2525 = vrot.lane.b32.xlu0 %v6901_v12, %s6363_s30 }
 0x2fa   : > { %2485 = vrot.lane.b32.xlu2 %v6840_v37, %s6364_s13 }
 0x2fb   : > { %v7121_v57 = vpop.permute.xlu2 %1509 }
 0x301   : > { %1473 = vrot.lane.b32.xlu0 %v6937_v19, %s6360_s27 }
 0x302   : > { %1511 = vrot.lane.b32.xlu2 %v7019_v42, %s6359_s25 }
 0x304   : > { %v997_v49 = vpop.permute.xlu2 %996 }
 0x305   : > { %5529 = vmatpush.xpose.msk.msra.mxu1 %vm998_vm5, %v997_v49 }
 0x309   : > { %2523 = vrot.lane.b32.xlu0 %v6887_v3, %s6363_s30 }
 0x30a   : > { %5812 = vrot.lane.b32.xlu2 %v7136_v20, %s6361_s28 }
 0x30c   : > { %v7142_v60 = vpop.permute.xlu2 %1463 }
 0x30d   : > { %10016 = vst [vmem:[#allocation17_spill] sm:$0xff] %v7142_v60 }
 0x311   : > { %2007 = vrot.lane.b32.xlu0 %v6877_v45, %s6362_s29 }
 0x312   : > { %2539 = vrot.lane.b32.xlu2 %v7019_v42, %s6363_s30 }
 0x313   : > { %v995_v49 = vpop.permute.xlu0 %994 }
 0x314   : > { %5530 = vmatpush.xpose.msk.msra.mxu1 %vm998_vm5, %v995_v49  ;;  %v7151_v22 = vpop.permute.xlu2 %1465  ;;  %v7168_v49 = vpop.permute.xlu1 %2519 }
 0x315   : > { %10017 = vst [vmem:[#allocation18_spill] sm:$0xff] %v7151_v22 }
 0x316   : > { %10018 = vst [vmem:[#allocation19_spill] sm:$0xff] %v7168_v49 }
 0x318   : > { %5531 = vmatpush.xpose.msk.msra.mxu1 %vm998_vm5, %v993_v24 }
 0x319   : > { %2521 = vrot.lane.b32.xlu0 %v6877_v45, %s6363_s30 }
 0x31a   : > { %1979 = vrot.lane.b32.xlu2 %v6901_v12, %s6365_s14 }
 0x31b   : > { %v7160_v60 = vpop.permute.xlu0 %2537 }
 0x31c   : > { %5532 = vmatpush.xpose.msk.msra.mxu1 %vm998_vm5, %v991_v10  ;;  %v7163_v20 = vpop.permute.xlu2 %2023 }
 0x320   : > { %5533 = vmatpush.xpose.msk.msra.mxu1 %vm998_vm5, %v989_v16  ;;  %v7185_v16 = vpop.permute.xlu1 %2001 }
 0x321   : > { %1475 = vrot.lane.b32.xlu0 %v6947_v4, %s6360_s27 }
 0x322   : > { %2497 = vrot.lane.b32.xlu2 %v6923_v63, %s6364_s13 }
 0x323   : > { %v7172_v24 = vpop.permute.xlu0 %2535 }
 0x324   : > { %5534 = vmatpush.xpose.msk.msra.mxu1 %vm998_vm5, %v987_v0  ;;  %v7175_v22 = vpop.permute.xlu2 %2017 }
 0x328   : > { %5535 = vmatpush.xpose.msk.msra.mxu1 %vm998_vm5, %v7063_v54  ;;  %v7202_v4 = vpop.permute.xlu1 %2513 }
 0x329   : > { %2005 = vrot.lane.b32.xlu0 %v6857_v59, %s6362_s29 }
 0x32a   : > { %1985 = vrot.lane.b32.xlu2 %v6929_v7, %s6365_s14 }
 0x32b   : > { %v7183_v10 = vpop.permute.xlu0 %2533 }
 0x32c   : > { %5536 = vmatpush.xpose.msk.msra.mxu1 %vm998_vm5, %v983_v46  ;;  %v7188_v49 = vpop.permute.xlu2 %2009 }
 0x330   : > { %5537 = vmatpush.xpose.msk.msra.mxu1 %vm998_vm5, %v7037_v23 }
 0x331   : > { %2003 = vrot.lane.b32.xlu0 %v6840_v37, %s6362_s29 }
 0x332   : > { %5827 = vrot.lane.b32.xlu2 %v6941_v21, %s6366_s15 }
 0x333   : > { %v7196_v54 = vpop.permute.xlu0 %1469 }
 0x334   : > { %5538 = vmatpush.xpose.msk.msra.mxu1 %vm998_vm5, %v7055_v61  ;;  %v7200_v0 = vpop.permute.xlu2 %1999  ;;  %v7216_v61 = vpop.permute.xlu1 %1997 }
 0x338   : > { %5539 = vmatpush.xpose.msk.msra.mxu1 %vm998_vm5, %v7035_v52 }
 0x339   : > { %2517 = vrot.lane.b32.xlu0 %v6840_v37, %s6363_s30 }
 0x33a   : > { %2499 = vrot.lane.b32.xlu2 %v6929_v7, %s6364_s13 }
 0x33b   : > { %v7210_v23 = vpop.permute.xlu0 %2531 }
 0x33c   : > { %5540 = vmatpush.xpose.msk.msra.mxu1 %vm998_vm5, %v6991_v2  ;;  %v7214_v46 = vpop.permute.xlu2 %1963  ;;  %v7234_v2 = vpop.permute.xlu1 %1995 }
 0x33d   : > { %10019 = vst [vmem:[#allocation20_spill] sm:$0xff] %v7214_v46 }
 0x340   : > { %5541 = vmatpush.xpose.msk.msra.mxu1 %vm998_vm5, %v7025_v51 }
 0x341   : > { %1477 = vrot.lane.b32.xlu0 %v7003_v32, %s6360_s27 }
 0x342   : > { %5842 = vrot.lane.b32.xlu2 %v6871_v13, %s6366_s15 }
 0x343   : > { %v7224_v52 = vpop.permute.xlu0 %2015 }
 0x344   : > { %5542 = vmatpush.xpose.msk.msra.mxu1 %vm998_vm5, %v7009_v39  ;;  %v7228_v21 = vpop.permute.xlu2 %2479 }
 0x345   : > { %10020 = vst [vmem:[#allocation21_spill] sm:$0xff] %v7228_v21 }
 0x348   : > { %5543 = vmatpush.xpose.msk.msra.mxu1 %vm998_vm5, %v6965_v17  ;;  %v7248_v17 = vpop.permute.xlu1 %2477 }
 0x349   : > { %2515 = vrot.lane.b32.xlu0 %v6808_v30, %s6363_s30  ;;  %10022 = vst [vmem:[#allocation23_spill] sm:$0xff] %v7248_v17 }
 0x34b   : > { %v7236_v51 = vpop.permute.xlu0 %2529 }
 0x34c   : > { %5544 = vmatpush.xpose.msk.msra.mxu1 %vm998_vm5, %v6979_v34  ;;  %v7240_v13 = vpop.permute.xlu2 %1969 }
 0x34d   : > { %10021 = vst [vmem:[#allocation22_spill] sm:$0xff] %v7240_v13 }
 0x34f   : > { %5545 = vmatmul.msk.f32.vlgmr.msra.gmra.mxu1 %vm998_vm5, %v6753_v31 }
 0x350   : > { %v7258_v21 = vpop.permute.xlu1 %1967 }
 0x351   : > { %2511 = vrot.lane.b32.xlu0 %v6771_v48, %s6363_s30  ;;  %10024 = vst [vmem:[#allocation25_spill] sm:$0xff] %v7258_v21 }
 0x353   : > { %v7246_v39 = vpop.permute.xlu0 %1471 }
 0x354   : > { %v7250_v46 = vpop.permute.xlu2 %2485 }
 0x355   : > { %10023 = vst [vmem:[#allocation24_spill] sm:$0xff] %v7250_v46 }
 0x357   : > { %5546 = vmatmul.msk.f32.gmra.mxu1 %vm998_vm5, %v6771_v48 }
 0x359   : > { %2509 = vrot.lane.b32.xlu0 %v6753_v31, %s6363_s30  ;;  %s9452_s30 = scalar_lea.vmem %s9972_s12, %s5739_s23 }
 0x35b   : > { %v7256_v34 = vpop.permute.xlu0 %2527 }
 0x35c   : > { %v1512_v13 = vpop.permute.xlu2 %1511 }
 0x35d   : > { %5561 = vmatpush.xpose.msk.msra.mxu3 %vm998_vm5, %v1512_v13  ;;  %v7273_v13 = vpop.permute.xlu1 %2483 }
 0x35f   : > { %5547 = vmatmul.msk.f32.gmra.mxu1 %vm998_vm5, %v6795_v6 }
 0x361   : > { %1965 = vrot.lane.b32.xlu0 %v6771_v48, %s6365_s14  ;;  %5562 = vmatpush.xpose.msk.msra.mxu3 %vm998_vm5, %v7121_v57  ;;  %v5809_v48 = vunpack.i.l.bf16 %v7107_v27 }
 0x363   : > { %v7267_v46 = vpop.permute.xlu0 %2011 }
 0x364   : > { %v5813_v17 = vpop.permute.xlu2 %5812 }
 0x365   : > { %5563 = vmatpush.xpose.msk.msra.mxu3 %vm998_vm5, %v7111_v15  ;;  %v5814_v31 = vunpack.i.l.bf16 %v5813_v17  ;;  %v5815_v21 = vunpack.i.h.bf16 %v5813_v17  ;;  %v5810_v15 = vunpack.i.h.bf16 %v7107_v27  ;;  %v5800_v27 = vunpack.i.h.bf16 %v7105_v11 }
 0x366   : > { %v5790_v17 = vunpack.i.h.bf16 %v7027_v40 }
 0x367   : > { %5548 = vmatmul.msk.f32.gmra.mxu1 %vm998_vm5, %v6808_v30  ;;  %1384 = vmatpush.msra.mxu2 %v5814_v31  ;;  %v5804_v30 = vunpack.i.l.bf16 %v7123_v33 }
 0x369   : > { %2481 = vrot.lane.b32.xlu0 %v6795_v6, %s6364_s13  ;;  %1385 = vmatpush.msra.mxu2 %v5815_v21  ;;  %v5805_v6 = vunpack.i.h.bf16 %v7123_v33  ;;  %v5799_v21 = vunpack.i.l.bf16 %v7105_v11  ;;  %v5794_v33 = vunpack.i.l.bf16 %v7051_v58 }
 0x36a   : > { %5564 = vmatpush.xpose.msk.msra.mxu3 %vm998_vm5, %v7138_v62  ;;  %v7291_v62 = vpop.permute.xlu1 %1973 }
 0x36b   : > { %v7280_v57 = vpop.permute.xlu0 %2525  ;;  %1386 = vmatpush.msra.mxu2 %v5809_v48 }
 0x36d   : > { %1387 = vmatpush.msra.mxu2 %v5810_v15 }
 0x36e   : > { %5565 = vmatpush.xpose.msk.msra.mxu3 %vm998_vm5, %v7089_v8 }
 0x36f   : > { %5549 = vmatmul.msk.f32.gmra.mxu1 %vm998_vm5, %v6840_v37  ;;  %1388 = vmatpush.msra.mxu2 %v5804_v30 }
 0x371   : > { %1971 = vrot.lane.b32.xlu0 %v6840_v37, %s6365_s14  ;;  %1389 = vmatpush.msra.mxu2 %v5805_v6  ;;  %v5795_v37 = vunpack.i.h.bf16 %v7051_v58  ;;  %v5784_v58 = vunpack.i.l.bf16 %v6981_v35 }
 0x372   : > { %5566 = vmatpush.xpose.msk.msra.mxu3 %vm998_vm5, %v7091_v9  ;;  %v5789_v9 = vunpack.i.l.bf16 %v7027_v40  ;;  %v5779_v40 = vunpack.i.l.bf16 %v6989_v36 }
 0x373   : > { %v7296_v8 = vpop.permute.xlu0 %1473  ;;  %1390 = vmatpush.msra.mxu2 %v5799_v21 }
 0x375   : > { %1391 = vmatpush.msra.mxu2 %v5800_v27 }
 0x376   : > { %5567 = vmatpush.xpose.msk.msra.mxu3 %vm998_vm5, %v7077_v26  ;;  %v7312_v26 = vpop.permute.xlu1 %1975 }
 0x377   : > { %5550 = vmatmul.msk.f32.gmra.mxu1 %vm998_vm5, %v6857_v59  ;;  %1392 = vmatpush.msra.mxu2 %v5794_v33 }
 0x379   : > { %2487 = vrot.lane.b32.xlu0 %v6857_v59, %s6364_s13  ;;  %1393 = vmatpush.msra.mxu2 %v5795_v37  ;;  %v5785_v59 = vunpack.i.h.bf16 %v6981_v35  ;;  %v10037_v37 = vld [vmem:[#allocation23_spill] sm:$0xff] }
 0x37a   : > { %5568 = vmatpush.xpose.msk.msra.mxu3 %vm998_vm5, %v7067_v50 }
 0x37b   : > { %v7310_v11 = vpop.permute.xlu0 %2523  ;;  %1394 = vmatpush.msra.mxu2 %v5789_v9 }
 0x37d   : > { %1395 = vmatpush.msra.mxu2 %v5790_v17 }
 0x37e   : > { %5569 = vmatpush.xpose.msk.msra.mxu3 %vm998_vm5, %v7087_v5  ;;  %v5780_v5 = vunpack.i.h.bf16 %v6989_v36  ;;  %v2026_v31 = vpop.permute.xlu1 %2025 }
 0x37f   : > { %5551 = vmatmul.msk.f32.gmra.mxu1 %vm998_vm5, %v6877_v45  ;;  %1396 = vmatpush.msra.mxu2 %v5784_v58 }
 0x381   : > { %1479 = vrot.lane.b32.xlu0 %v7019_v42, %s6360_s27  ;;  %1397 = vmatpush.msra.mxu2 %v5785_v59 }
 0x382   : > { %5570 = vmatpush.xpose.msk.msra.mxu3 %vm998_vm5, %v7065_v1 }
 0x383   : > { %v2008_v50 = vpop.permute.xlu0 %2007  ;;  %1398 = vmatpush.msra.mxu2 %v5779_v40  ;;  %v10038_v40 = vld [vmem:[#allocation21_spill] sm:$0xff] }
 0x385   : > { %1399 = vmatpush.msra.mxu2 %v5780_v5 }
 0x386   : > { %5571 = vmatpush.xpose.msk.msra.mxu3 %vm998_vm5, %v7049_v56  ;;  %v7495_v15 = vpop.permute.xlu1 %2493 }
 0x387   : > { %5593 = vmatpush.xpose.msk.msrb.mxu2 %vm998_vm5, %v2026_v31  ;;  %5552 = vmatmul.msk.f32.gmra.mxu1 %vm998_vm5, %v6887_v3 }
 0x389   : > { %2489 = vrot.lane.b32.xlu0 %v6877_v45, %s6364_s13 }
 0x38a   : > { %5572 = vmatpush.xpose.msk.msra.mxu3 %vm998_vm5, %v6999_v53 }
 0x38b   : > { %5594 = vmatpush.xpose.msk.msrb.mxu2 %vm998_vm5, %v7163_v20  ;;  %v2522_v35 = vpop.permute.xlu0 %2521 }
 0x38e   : > { %5573 = vmatpush.xpose.msk.msra.mxu3 %vm998_vm5, %v6973_v29  ;;  %v7506_v27 = vpop.permute.xlu1 %2495 }
 0x38f   : > { %5595 = vmatpush.xpose.msk.msrb.mxu2 %vm998_vm5, %v7129_v18  ;;  %5553 = vmatmul.msk.f32.gmra.mxu1 %vm998_vm5, %v6901_v12  ;;  %v2540_v18 = vpop.permute.xlu2 %2539 }
 0x391   : > { %1977 = vrot.lane.b32.xlu0 %v6887_v3, %s6365_s14 }
 0x392   : > { %5574 = vmatpush.xpose.msk.msra.mxu3 %vm998_vm5, %v6997_v38  ;;  %v10032_v38 = vld [vmem:[#allocation6_spill] sm:$0xff] }
 0x393   : > { %5596 = vmatpush.xpose.msk.msrb.mxu2 %vm998_vm5, %v7144_v44  ;;  %v7350_v20 = vpop.permute.xlu0 %1475  ;;  %v947_v44 = vlaneseq }
 0x396   : > { %5575 = vmatpush.xpose.msk.msra.mxu3 %vm998_vm5, %v6995_v25  ;;  %v10031_v25 = vld [vmem:[#allocation13_spill] sm:$0xff] }
 0x397   : > { %5597 = vmatpush.xpose.msk.msrb.mxu2 %vm998_vm5, %v7175_v22  ;;  %5554 = vmatmul.msk.f32.gmra.mxu1 %vm998_vm5, %v6911_v28 }
 0x399   : > { %2491 = vrot.lane.b32.xlu0 %v6887_v3, %s6364_s13 }
 0x39a   : > { %5576 = vmatpush.xpose.msk.msra.mxu3 %vm998_vm5, %v6977_v14  ;;  %v10029_v14 = vld [vmem:[#allocation11_spill] sm:$0xff] }
 0x39b   : > { %5598 = vmatpush.xpose.msk.msrb.mxu2 %vm998_vm5, %v7224_v52  ;;  %v2006_v45 = vpop.permute.xlu0 %2005 }
 0x39d   : > { %5577 = vmatmul.msk.f32.vlgmr.msra.gmra.mxu3 %vm998_vm5, %v6985_v55  ;;  %v10030_v55 = vld [vmem:[#allocation19_spill] sm:$0xff] }
 0x39e   : > { %5625 = vmatpush.xpose.msk.msrb.mxu3 %vm998_vm5, %v2540_v18 }
 0x39f   : > { %5599 = vmatpush.xpose.msk.msrb.mxu2 %vm998_vm5, %v7153_v47  ;;  %5555 = vmatmul.msk.f32.gmra.mxu1 %vm998_vm5, %v6923_v63  ;;  %v10033_v47 = vld [vmem:[#allocation14_spill] sm:$0xff] }
 0x3a1   : > { %1981 = vrot.lane.b32.xlu0 %v6911_v28, %s6365_s14  ;;  %v10025_v28 = vld [vmem:[#allocation16_spill] sm:$0xff] }
 0x3a2   : > { %5626 = vmatpush.xpose.msk.msrb.mxu3 %vm998_vm5, %v7160_v60  ;;  %v7443_v60 = vand.u32 127, %v947_v44 }
 0x3a3   : > { %5600 = vmatpush.xpose.msk.msrb.mxu2 %vm998_vm5, %v7267_v46  ;;  %v2004_v3 = vpop.permute.xlu0 %2003 }
 0x3a4   : > { %vm949_vm6 = vcmp.lt.s32.totalorder %v7443_v60, 8 }
 0x3a5   : > { %5578 = vmatmul.msk.f32.gmra.mxu3 %vm998_vm5, %v6969_v43  ;;  %v10028_v43 = vld [vmem:[#allocation7_spill] sm:$0xff] }
 0x3a6   : > { %5627 = vmatpush.xpose.msk.msrb.mxu3 %vm998_vm5, %v7172_v24 }
 0x3a7   : > { %5601 = vmatpush.xpose.msk.msrb.mxu2 %vm998_vm5, %v7188_v49  ;;  %5556 = vmatmul.msk.f32.gmra.mxu1 %vm998_vm5, %v6929_v7  ;;  %v10027_v7 = vld [vmem:[#allocation9_spill] sm:$0xff] }
 0x3a8   : > { %v10034_v49 = vld [vmem:[#allocation17_spill] sm:$0xff] }
 0x3a9   : > { %1983 = vrot.lane.b32.xlu0 %v6923_v63, %s6365_s14  ;;  %v10026_v63 = vld [vmem:[#allocation12_spill] sm:$0xff] }
 0x3aa   : > { %5628 = vmatpush.xpose.msk.msrb.mxu3 %vm998_vm5, %v7183_v10 }
 0x3ab   : > { %5602 = vmatpush.xpose.msk.msrb.mxu2 %vm998_vm5, %v2008_v50  ;;  %v2518_v12 = vpop.permute.xlu0 %2517  ;;  %v5823_v50 = vpop.permute.xlu1 %5822 }
 0x3ad   : > { %5579 = vmatmul.msk.f32.gmra.mxu3 %vm998_vm5, %v7011_v41 }
 0x3ae   : > { %5629 = vmatpush.xpose.msk.msrb.mxu3 %vm998_vm5, %v7210_v23 }
 0x3af   : > { %5603 = vmatpush.xpose.msk.msrb.mxu2 %vm998_vm5, %v2006_v45  ;;  %5557 = vmatmul.msk.f32.gmra.mxu1 %vm998_vm5, %v6937_v19  ;;  %v5824_v45 = vunpack.i.l.bf16 %v5823_v50 }
 0x3b1   : > { %5817 = vrot.lane.b32.xlu0 %v10025_v28, %s6366_s15 }
 0x3b2   : > { %5630 = vmatpush.xpose.msk.msrb.mxu3 %vm998_vm5, %v7236_v51 }
 0x3b3   : > { %5604 = vmatpush.xpose.msk.msrb.mxu2 %vm998_vm5, %v2004_v3  ;;  %v1478_v22 = vpop.permute.xlu0 %1477 }
 0x3b5   : > { %5580 = vmatmul.msk.f32.gmra.mxu3 %vm998_vm5, %v10026_v63 }
 0x3b6   : > { %5631 = vmatpush.xpose.msk.msrb.mxu3 %vm998_vm5, %v7256_v34 }
 0x3b7   : > { %5605 = vmatpush.xpose.msk.msrb.mxu2 %vm998_vm5, %v7185_v16  ;;  %5558 = vmatmul.msk.f32.gmra.mxu1 %vm998_vm5, %v10027_v7 }
 0x3b9   : > { %5832 = vrot.lane.b32.xlu0 %v10028_v43, %s6366_s15 }
 0x3ba   : > { %5632 = vmatpush.xpose.msk.msrb.mxu3 %vm998_vm5, %v7280_v57  ;;  %v7492_v57 = vpop.permute.xlu2 %1979 }
 0x3bb   : > { %5606 = vmatpush.xpose.msk.msrb.mxu2 %vm998_vm5, %v7200_v0  ;;  %v2516_v29 = vpop.permute.xlu0 %2515  ;;  %v10036_v0 = vld [vmem:[#allocation15_spill] sm:$0xff] }
 0x3bd   : > { %5581 = vmatmul.msk.f32.gmra.mxu3 %vm998_vm5, %v10029_v14 }
 0x3be   : > { %5633 = vmatpush.xpose.msk.msrb.mxu3 %vm998_vm5, %v7310_v11 }
 0x3bf   : > { %5607 = vmatpush.xpose.msk.msrb.mxu2 %vm998_vm5, %v7216_v61  ;;  %5559 = vmatmul.msk.f32.gmra.mxu1 %vm998_vm5, %v7003_v32 }
 0x3c1   : > { %1987 = vrot.lane.b32.xlu0 %v6937_v19, %s6365_s14 }
 0x3c2   : > { %5634 = vmatpush.xpose.msk.msrb.mxu3 %vm998_vm5, %v2522_v35  ;;  %v7502_v21 = vpop.permute.xlu2 %2497 }
 0x3c3   : > { %5608 = vmatpush.xpose.msk.msrb.mxu2 %vm998_vm5, %v7234_v2  ;;  %v2512_v36 = vpop.permute.xlu0 %2511 }
 0x3c5   : > { %5582 = vmatmul.msk.f32.gmra.mxu3 %vm998_vm5, %v10031_v25 }
 0x3c6   : > { %5635 = vmatpush.xpose.msk.msrb.mxu3 %vm998_vm5, %v10030_v55 }
 0x3c7   : > { %5560 = vmatmul.msk.f32.gmra.mxu1 %vm998_vm5, %v7019_v42 }
 0x3c9   : > { %5837 = vrot.lane.b32.xlu0 %v10032_v38, %s6366_s15 }
 0x3ca   : > { %5636 = vmatpush.xpose.msk.msrb.mxu3 %vm998_vm5, %v2518_v12  ;;  %v7512_v9 = vpop.permute.xlu2 %1985 }
 0x3cb   : > { %v2510_v53 = vpop.permute.xlu0 %2509 }
 0x3cc   : > { %v1080_v41 = vpop.f32.mrf.mxu1 }
 0x3cd   : > { %5583 = vmatmul.msk.f32.gmra.mxu3 %vm998_vm5, %v10033_v47  ;;  %v7475_v2 = vsel %vm949_vm6, %v1080_v41, -1e+30 }
 0x3ce   : > { %5637 = vmatpush.xpose.msk.msrb.mxu3 %vm998_vm5, %v2516_v29 }
 0x3d1   : > { %2501 = vrot.lane.b32.xlu0 %v6937_v19, %s6364_s13  ;;  %v10035_v19 = vld [vmem:[#allocation18_spill] sm:$0xff] }
 0x3d2   : > { %5638 = vmatpush.xpose.msk.msrb.mxu3 %vm998_vm5, %v7202_v4  ;;  %v5828_v3 = vpop.permute.xlu2 %5827 }
 0x3d3   : > { %v7448_v56 = vpop.permute.xlu0 %1965  ;;  %v5829_v63 = vunpack.i.l.bf16 %v5828_v3  ;;  %v5830_v29 = vunpack.i.h.bf16 %v5828_v3 }
 0x3d4   : > { %v1083_v1 = vpop.f32.mrf.mxu1 }
 0x3d5   : > { %5584 = vmatmul.msk.f32.gmra.mxu3 %vm998_vm5, %v10034_v49  ;;  %v7455_v24 = vsel %vm949_vm6, %v1083_v1, -1e+30 }
 0x3d6   : > { %5639 = vmatpush.xpose.msk.msrb.mxu3 %vm998_vm5, %v2512_v36  ;;  %1146 = vmax.xlane.f32.xlu1 %v7455_v24 }
 0x3da   : > { %5640 = vmatpush.xpose.msk.msrb.mxu3 %vm998_vm5, %v2510_v53  ;;  %v7548_v47 = vpop.permute.xlu2 %2499 }
 0x3db   : > { %v2482_v4 = vpop.permute.xlu0 %2481 }
 0x3dc   : > { %v1086_v10 = vpop.f32.mrf.mxu1 }
 0x3dd   : > { %5585 = vmatmul.msk.f32.gmra.mxu3 %vm998_vm5, %v10035_v19  ;;  %v7529_v18 = vsel %vm949_vm6, %v1086_v10, -1e+30 }
 0x3e3   : > { %v7461_v16 = vpop.permute.xlu0 %1971 }
 0x3e4   : > { %v7465_v23 = vpop.f32.mrf.mxu1 }
 0x3e5   : > { %5586 = vmatmul.msk.f32.gmra.mxu3 %vm998_vm5, %v10036_v0 }
 0x3eb   : > { %v7467_v46 = vpop.permute.xlu0 %2487 }
 0x3ec   : > { %v1092_v52 = vpop.f32.mrf.mxu1 }
 0x3ed   : > { %5587 = vmatmul.msk.f32.gmra.mxu3 %vm998_vm5, %v7196_v54  ;;  %v7542_v25 = vsel %vm949_vm6, %v1092_v52, -1e+30 }
 0x3f3   : > { %v1480_v61 = vpop.permute.xlu0 %1479 }
 0x3f4   : > { %v7482_v34 = vpop.f32.mrf.mxu1 }
 0x3f5   : > { %5588 = vmatmul.msk.f32.gmra.mxu3 %vm998_vm5, %v7246_v39 }
 0x3fb   : > { %1144 = vmax.xlane.f32.xlu0 %v7475_v2  ;;  %v7478_v51 = vpop.permute.xlu0 %2489 }
 0x3fc   : > { %v7488_v54 = vpop.f32.mrf.mxu1 }
 0x3fd   : > { %5589 = vmatmul.msk.f32.gmra.mxu3 %vm998_vm5, %v7296_v8 }
 0x403   : > { %v7484_v48 = vpop.permute.xlu0 %1977 }
 0x404   : > { %v7497_v30 = vpop.f32.mrf.mxu1 }
 0x405   : > { %5590 = vmatmul.msk.f32.gmra.mxu3 %vm998_vm5, %v7350_v20 }
 0x40b   : > { %v7490_v39 = vpop.permute.xlu0 %2491 }
 0x40c   : > { %v7508_v33 = vpop.f32.mrf.mxu1 }
 0x40d   : > { %5591 = vmatmul.msk.f32.gmra.mxu3 %vm998_vm5, %v1478_v22  ;;  %v5825_v22 = vunpack.i.h.bf16 %v5823_v50 }
 0x413   : > { %v7499_v6 = vpop.permute.xlu0 %1981 }
 0x414   : > { %v7521_v31 = vpop.f32.mrf.mxu1 }
 0x415   : > { %5592 = vmatmul.msk.f32.gmra.mxu3 %vm998_vm5, %v1480_v61  ;;  %v10039_v61 = vld [vmem:[#allocation24_spill] sm:$0xff]  ;;  %v7604_v3 = vsel %vm949_vm6, %v7521_v31, -1e+30 }
 0x41b   : > { %v7504_v8 = vpop.permute.xlu0 %1983 }
 0x41c   : > { %v7534_v55 = vpop.f32.mrf.mxu1 }
 0x41d   : > { %5641 = vmatmul.msk.f32.vlgmr.msrb.gmra.mxu3 %vm998_vm5, %v10037_v37 }
 0x420   : > { %v1594_v11 = vpop.f32.mrf.mxu3 }
 0x421   : > { %v7516_v17 = vsel %vm949_vm6, %v1594_v11, -1e+30 }
 0x422   : > { %1658 = vmax.xlane.f32.xlu2 %v7516_v17 }
 0x423   : > { %v5818_v58 = vpop.permute.xlu0 %5817 }
 0x424   : > { %v5819_v59 = vunpack.i.l.bf16 %v5818_v58  ;;  %v5820_v5 = vunpack.i.h.bf16 %v5818_v58  ;;  %v1113_v19 = vpop.f32.mrf.mxu1 }
 0x425   : > { %5642 = vmatmul.msk.f32.gmra.mxu3 %vm998_vm5, %v10038_v40  ;;  %v7622_v31 = vsel %vm949_vm6, %v1113_v19, -1e+30 }
 0x426   : > { %1898 = vmatpush.msrb.mxu0 %v5819_v59 }
 0x428   : > { %v1597_v35 = vpop.f32.mrf.mxu3  ;;  %1899 = vmatpush.msrb.mxu0 %v5820_v5 }
 0x429   : > { %v7525_v20 = vsel %vm949_vm6, %v1597_v35, -1e+30  ;;  %v7592_v35 = vsel %vm949_vm6, %v7508_v33, -1e+30 }
 0x42a   : > { %1660 = vmax.xlane.f32.xlu1 %v7525_v20  ;;  %1148 = vmax.xlane.f32.xlu2 %v7529_v18 }
 0x42b   : > { %1900 = vmatpush.msrb.mxu0 %v5824_v45  ;;  %v5833_v12 = vpop.permute.xlu0 %5832 }
 0x42c   : > { %v5834_v53 = vunpack.i.l.bf16 %v5833_v12  ;;  %v5835_v44 = vunpack.i.h.bf16 %v5833_v12  ;;  %v1116_v40 = vpop.f32.mrf.mxu1 }
 0x42d   : > { %5643 = vmatmul.msk.f32.gmra.mxu3 %vm998_vm5, %v2482_v4  ;;  %1901 = vmatpush.msrb.mxu0 %v5825_v22  ;;  %v7559_v4 = vsel %vm949_vm6, %v7465_v23, -1e+30  ;;  %v7572_v23 = vsel %vm949_vm6, %v7482_v34, -1e+30  ;;  %v7585_v34 = vsel %vm949_vm6, %v7488_v54, -1e+30 }
 0x42f   : > { %1902 = vmatpush.msrb.mxu0 %v5829_v63 }
 0x430   : > { %v1600_v14 = vpop.f32.mrf.mxu3 }
 0x431   : > { %v7538_v36 = vsel %vm949_vm6, %v1600_v14, -1e+30  ;;  %1903 = vmatpush.msrb.mxu0 %v5830_v29 }
 0x432   : > { %1662 = vmax.xlane.f32.xlu0 %v7538_v36  ;;  %1152 = vmax.xlane.f32.xlu1 %v7542_v25 }
 0x433   : > { %1904 = vmatpush.msrb.mxu0 %v5834_v53  ;;  %v7546_v41 = vpop.permute.xlu0 %1987 }
 0x435   : > { %5644 = vmatmul.msk.f32.gmra.mxu3 %vm998_vm5, %v7273_v13  ;;  %1905 = vmatpush.msrb.mxu0 %v5835_v44  ;;  %v5843_v13 = vpop.permute.xlu2 %5842 }
 0x436   : > { %v5844_v58 = vunpack.i.l.bf16 %v5843_v13  ;;  %v5845_v59 = vunpack.i.h.bf16 %v5843_v13 }
 0x438   : > { %v1603_v1 = vpop.f32.mrf.mxu3 }
 0x439   : > { %v7554_v49 = vsel %vm949_vm6, %v1603_v1, -1e+30  ;;  %v7651_v1 = vsel %vm949_vm6, %v1116_v40, -1e+30 }
 0x43a   : > { %1664 = vmax.xlane.f32.xlu2 %v7554_v49  ;;  %1150 = vmax.xlane.f32.xlu0 %v7559_v4 }
 0x43b   : > { %v5838_v10 = vpop.permute.xlu0 %5837 }
 0x43c   : > { %v5839_v0 = vunpack.i.l.bf16 %v5838_v10  ;;  %v5840_v52 = vunpack.i.h.bf16 %v5838_v10 }
 0x43d   : > { %5645 = vmatmul.msk.f32.gmra.mxu3 %vm998_vm5, %v10039_v61 }
 0x43e   : > { %1906 = vmatpush.msrb.mxu0 %v5839_v0 }
 0x440   : > { %v1606_v37 = vpop.f32.mrf.mxu3  ;;  %1907 = vmatpush.msrb.mxu0 %v5840_v52 }
 0x441   : > { %v7567_v11 = vsel %vm949_vm6, %v1606_v37, -1e+30 }
 0x442   : > { %1666 = vmax.xlane.f32.xlu1 %v7567_v11  ;;  %1154 = vmax.xlane.f32.xlu2 %v7572_v23 }
 0x443   : > { %1908 = vmatpush.msrb.mxu0 %v5844_v58  ;;  %v2502_v63 = vpop.permute.xlu0 %2501 }
 0x445   : > { %5646 = vmatmul.msk.f32.gmra.mxu3 %vm998_vm5, %v7467_v46  ;;  %1909 = vmatpush.msrb.mxu0 %v5845_v59  ;;  %v1119_v46 = vpop.f32.mrf.mxu1 }
 0x446   : > { %v7610_v33 = vsel %vm949_vm6, %v1119_v46, -1e+30 }
 0x448   : > { %v1609_v50 = vpop.f32.mrf.mxu3 }
 0x449   : > { %v7580_v5 = vsel %vm949_vm6, %v1609_v50, -1e+30  ;;  %v1147_v53 = vpop.xlane.xlu1 %1146 }
 0x44a   : > { %1668 = vmax.xlane.f32.xlu0 %v7580_v5  ;;  %1156 = vmax.xlane.f32.xlu1 %v7585_v34 }
 0x44b   : > { %1160 = vmax.xlane.f32.xlu2 %v7592_v35 }
 0x44d   : > { %5647 = vmatmul.msk.f32.gmra.mxu3 %vm998_vm5, %v7478_v51  ;;  %v7618_v51 = vsel %vm949_vm6, %v7497_v30, -1e+30  ;;  %v1122_v12 = vpop.f32.mrf.mxu1 }
 0x44e   : > { %v7634_v30 = vsel %vm949_vm6, %v1122_v12, -1e+30 }
 0x450   : > { %v1612_v45 = vpop.f32.mrf.mxu3 }
 0x451   : > { %v7599_v54 = vsel %vm949_vm6, %v1612_v45, -1e+30 }
 0x452   : > { %1670 = vmax.xlane.f32.xlu1 %v7599_v54  ;;  %1162 = vmax.xlane.f32.xlu0 %v7604_v3 }
 0x453   : > { %1170 = vmax.xlane.f32.xlu2 %v7610_v33 }
 0x455   : > { %5648 = vmatmul.msk.f32.gmra.mxu3 %vm998_vm5, %v7490_v39 }
 0x458   : > { %v1615_v22 = vpop.f32.mrf.mxu3 }
 0x459   : > { %v7630_v39 = vsel %vm949_vm6, %v1615_v22, -1e+30 }
 0x45a   : > { %1158 = vmax.xlane.f32.xlu1 %v7618_v51  ;;  %1166 = vmax.xlane.f32.xlu0 %v7622_v31 }
 0x45d   : > { %5649 = vmatmul.msk.f32.gmra.mxu3 %vm998_vm5, %v7495_v15  ;;  %v7643_v15 = vsel %vm949_vm6, %v7534_v55, -1e+30  ;;  %v1125_v55 = vpop.f32.mrf.mxu1 }
 0x462   : > { %1672 = vmax.xlane.f32.xlu1 %v7630_v39  ;;  %1172 = vmax.xlane.f32.xlu0 %v7634_v30 }
 0x465   : > { %5650 = vmatmul.msk.f32.gmra.mxu3 %vm998_vm5, %v7506_v27  ;;  %v1177_v27 = vsub.f32 %v7455_v24, %v1147_v53 }
 0x467   : > { %v1194_v19 = vmul.f32 1.442695, %v1177_v27 }
 0x46a   : > { %1164 = vmax.xlane.f32.xlu1 %v7643_v15 }
 0x46d   : > { %5651 = vmatmul.msk.f32.gmra.mxu3 %vm998_vm5, %v7502_v21 }
 0x46e   : > { %v1145_v29 = vpop.xlane.xlu0 %1144 }
 0x46f   : > { %v1176_v14 = vsub.f32 %v7475_v2, %v1145_v29  ;;  %v7661_v2 = vsel %vm949_vm6, %v1125_v55, -1e+30 }
 0x471   : > { %v1192_v44 = vmul.f32 1.442695, %v1176_v14 }
 0x472   : > { %1168 = vmax.xlane.f32.xlu1 %v7651_v1 }
 0x473   : > { %5977 = vpow2.f32 %v1192_v44 }
 0x474   : > { %5979 = vpow2.f32 %v1194_v19 }
 0x475   : > { %5652 = vmatmul.msk.f32.gmra.mxu3 %vm998_vm5, %v7548_v47 }
 0x479   : > { %v7657_v21 = vpop.eup %5977 }
 0x47a   : > { %1174 = vmax.xlane.f32.xlu1 %v7661_v2  ;;  %1224 = vadd.xlane.f32.xlu0 %v7657_v21  ;;  %v7666_v24 = vpop.eup %5979 }
 0x47d   : > { %5653 = vmatmul.msk.f32.gmra.mxu3 %vm998_vm5, %v2502_v63 }
 0x482   : > { %1226 = vadd.xlane.f32.xlu0 %v7666_v24 }
 0x495   : > { %v1659_v47 = vpop.xlane.xlu2 %1658 }
 0x496   : > { %v1690_v10 = vsub.f32 %v7516_v17, %v1659_v47 }
 0x498   : > { %v1706_v0 = vmul.f32 1.442695, %v1690_v10 }
 0x49a   : > { %5981 = vpow2.f32 %v1706_v0 }
 0x49d   : > { %v1149_v61 = vpop.xlane.xlu2 %1148  ;;  %v1661_v58 = vpop.xlane.xlu1 %1660 }
 0x49e   : > { %v1178_v13 = vsub.f32 %v7529_v18, %v1149_v61 }
 0x4a0   : > { %v7671_v52 = vpop.eup %5981  ;;  %v1196_v37 = vmul.f32 1.442695, %v1178_v13 }
 0x4a1   : > { %1738 = vadd.xlane.f32.xlu2 %v7671_v52 }
 0x4a2   : > { %5983 = vpow2.f32 %v1196_v37 }
 0x4a5   : > { %v7674_v59 = vpop.xlane.xlu0 %1662  ;;  %v1153_v50 = vpop.xlane.xlu1 %1152 }
 0x4a6   : > { %v1180_v12 = vsub.f32 %v7542_v25, %v1153_v50 }
 0x4a8   : > { %v7676_v40 = vpop.eup %5983  ;;  %v1200_v29 = vmul.f32 1.442695, %v1180_v12 }
 0x4a9   : > { %1228 = vadd.xlane.f32.xlu1 %v7676_v40 }
 0x4ad   : > { %v7679_v17 = vpop.xlane.xlu2 %1664  ;;  %v1151_v46 = vpop.xlane.xlu0 %1150 }
 0x4ae   : > { %v1179_v45 = vsub.f32 %v7559_v4, %v1151_v46 }
 0x4b0   : > { %v1198_v18 = vmul.f32 1.442695, %v1179_v45 }
 0x4b2   : > { %5985 = vpow2.f32 %v1198_v18 }
 0x4b3   : > { %5987 = vpow2.f32 %v1200_v29 }
 0x4b5   : > { %v7683_v22 = vpop.xlane.xlu1 %1666  ;;  %v1155_v63 = vpop.xlane.xlu2 %1154 }
 0x4b6   : > { %v1181_v14 = vsub.f32 %v7572_v23, %v1155_v63 }
 0x4b8   : > { %v1202_v53 = vmul.f32 1.442695, %v1181_v14  ;;  %v7686_v44 = vpop.eup %5985 }
 0x4b9   : > { %1230 = vadd.xlane.f32.xlu2 %v7686_v44  ;;  %v7692_v25 = vpop.eup %5987 }
 0x4ba   : > { %5989 = vpow2.f32 %v1202_v53 }
 0x4bd   : > { %v1157_v27 = vpop.xlane.xlu1 %1156  ;;  %v7689_v55 = vpop.xlane.xlu0 %1668 }
 0x4be   : > { %v1182_v4 = vsub.f32 %v7585_v34, %v1157_v27  ;;  %v1161_v47 = vpop.xlane.xlu2 %1160  ;;  %v1691_v27 = vsub.f32 %v7525_v20, %v1661_v58 }
 0x4bf   : > { %v1184_v23 = vsub.f32 %v7592_v35, %v1161_v47 }
 0x4c0   : > { %v1204_v19 = vmul.f32 1.442695, %v1182_v4  ;;  %v7694_v10 = vpop.eup %5989 }
 0x4c1   : > { %1234 = vadd.xlane.f32.xlu0 %v7694_v10  ;;  %1232 = vadd.xlane.f32.xlu2 %v7692_v25  ;;  %v1208_v37 = vmul.f32 1.442695, %v1184_v23  ;;  %v1692_v23 = vsub.f32 %v7538_v36, %v7674_v59 }
 0x4c2   : > { %5991 = vpow2.f32 %v1204_v19  ;;  %v1708_v19 = vmul.f32 1.442695, %v1691_v27  ;;  %v10041_v27 = vld [vmem:[#allocation4_spill] sm:$0xff] }
 0x4c3   : > { %5993 = vpow2.f32 %v1208_v37 }
 0x4c5   : > { %v7699_v0 = vpop.xlane.xlu1 %1670  ;;  %v1163_v61 = vpop.xlane.xlu0 %1162 }
 0x4c6   : > { %v1185_v13 = vsub.f32 %v7604_v3, %v1163_v61  ;;  %v10040_v61 = vld [vmem:[#allocation3_spill] sm:$0xff] }
 0x4c8   : > { %v7702_v34 = vpop.eup %5991  ;;  %v1210_v50 = vmul.f32 1.442695, %v1185_v13 }
 0x4c9   : > { %1236 = vadd.xlane.f32.xlu0 %v7702_v34  ;;  %v7706_v12 = vpop.eup %5993 }
 0x4ca   : > { %5995 = vpow2.f32 %v1210_v50 }
 0x4cd   : > { %v1159_v46 = vpop.xlane.xlu1 %1158  ;;  %v1167_v29 = vpop.xlane.xlu0 %1166 }
 0x4ce   : > { %v1183_v45 = vsub.f32 %v7618_v51, %v1159_v46 }
 0x4d0   : > { %v1206_v18 = vmul.f32 1.442695, %v1183_v45  ;;  %v7708_v35 = vpop.eup %5995 }
 0x4d1   : > { %1240 = vadd.xlane.f32.xlu0 %v7706_v12  ;;  %1242 = vadd.xlane.f32.xlu2 %v7708_v35 }
 0x4d2   : > { %5997 = vpow2.f32 %v1206_v18 }
 0x4d5   : > { %v7712_v3 = vpop.xlane.xlu1 %1672  ;;  %v7719_v4 = vpop.xlane.xlu0 %1172 }
 0x4d8   : > { %v7714_v63 = vpop.eup %5997 }
 0x4d9   : > { %1238 = vadd.xlane.f32.xlu1 %v7714_v63 }
 0x4dd   : > { %v1165_v14 = vpop.xlane.xlu1 %1164 }
 0x4de   : > { %v1186_v51 = vsub.f32 %v7643_v15, %v1165_v14  ;;  %v1710_v15 = vmul.f32 1.442695, %v1692_v23 }
 0x4e0   : > { %v1212_v53 = vmul.f32 1.442695, %v1186_v51 }
 0x4e2   : > { %5999 = vpow2.f32 %v1212_v53 }
 0x4e3   : > { %6001 = vpow2.f32 %v1708_v19 }
 0x4e5   : > { %v1169_v23 = vpop.xlane.xlu1 %1168 }
 0x4e8   : > { %v7721_v47 = vpop.eup %5999 }
 0x4e9   : > { %1244 = vadd.xlane.f32.xlu0 %v7721_v47  ;;  %5847 = vrot.lane.b32.xlu2 %v10040_v61, %s6366_s15  ;;  %v7728_v37 = vpop.eup %6001 }
 0x4ed   : > { %v1225_v13 = vpop.xlane.xlu0 %1224 }
 0x4ee   : > { %6003 = vrcp.f32 %v1225_v13 }
 0x4ef   : > { %6005 = vpow2.f32 %v1710_v15 }
 0x4f1   : > { %1740 = vadd.xlane.f32.xlu0 %v7728_v37 }
 0x4f2   : > { %1989 = vrot.lane.b32.xlu1 %v10027_v7, %s6365_s14 }
 0x4f4   : > { %v6004_v20 = vpop.eup %6003 }
 0x4f5   : > { %v1272_v58 = vmul.f32 %v6004_v20, %v1225_v13  ;;  %v1227_v50 = vpop.xlane.xlu0 %1226  ;;  %v7733_v36 = vpop.eup %6005  ;;  %v1187_v13 = vsub.f32 %v7622_v31, %v1167_v29  ;;  %v1188_v31 = vsub.f32 %v7651_v1, %v1169_v23 }
 0x4f6   : > { %6007 = vrcp.f32 %v1227_v50 }
 0x4f7   : > { %v1288_v46 = vsub.f32 2.0, %v1272_v58  ;;  %v1214_v15 = vmul.f32 1.442695, %v1187_v13 }
 0x4f9   : > { %1742 = vadd.xlane.f32.xlu0 %v7733_v36  ;;  %v1304_v59 = vmul.f32 %v6004_v20, %v1288_v46  ;;  %6009 = vpow2.f32 %v1214_v15 }
 0x4fa   : > { %2503 = vrot.lane.b32.xlu1 %v10027_v7, %s6364_s13  ;;  %v1618_v7 = vpop.f32.mrf.mxu3 }
 0x4fb   : > { %v1320_v45 = vmul.f32 %v7657_v21, %v1304_v59  ;;  %v1171_v21 = vpop.xlane.xlu2 %1170  ;;  %v7747_v20 = vsel %vm949_vm6, %v1618_v7, -1e+30 }
 0x4fc   : > { %v6008_v18 = vpop.eup %6007  ;;  %v1189_v58 = vsub.f32 %v7610_v33, %v1171_v21  ;;  %v1190_v33 = vsub.f32 %v7634_v30, %v7719_v4 }
 0x4fd   : > { %v1273_v14 = vmul.f32 %v6008_v18, %v1227_v50  ;;  %1400 = vmatmul.f32.vlgmr.msra.gmra.mxu2 %v1320_v45  ;;  %v1216_v45 = vmul.f32 1.442695, %v1188_v31 }
 0x4fe   : > { %v1218_v50 = vmul.f32 1.442695, %v1189_v58  ;;  %v1220_v23 = vmul.f32 1.442695, %v1190_v33 }
 0x4ff   : > { %v1289_v51 = vsub.f32 2.0, %v1273_v14  ;;  %v7751_v46 = vpop.eup %6009 }
 0x500   : > { %6011 = vpow2.f32 %v1218_v50 }
 0x501   : > { %v1305_v53 = vmul.f32 %v6008_v18, %v1289_v51 }
 0x502   : > { %5852 = vrot.lane.b32.xlu1 %v10041_v27, %s6366_s15  ;;  %v7772_v30 = vpop.f32.mrf.mxu3 }
 0x503   : > { %v1321_v19 = vmul.f32 %v7666_v24, %v1305_v53  ;;  %v1175_v24 = vpop.xlane.xlu1 %1174 }
 0x504   : > { %v1191_v29 = vsub.f32 %v7661_v2, %v1175_v24  ;;  %v1693_v2 = vsub.f32 %v7554_v49, %v7679_v17  ;;  %v1694_v49 = vsub.f32 %v7567_v11, %v7683_v22 }
 0x505   : > { %1403 = vmatmul.f32.gmra.mxu2 %v1321_v19 }
 0x506   : > { %v1222_v18 = vmul.f32 1.442695, %v1191_v29  ;;  %v7756_v14 = vpop.eup %6011  ;;  %v1712_v58 = vmul.f32 1.442695, %v1693_v2  ;;  %v1714_v50 = vmul.f32 1.442695, %v1694_v49 }
 0x50d   : > { %2505 = vrot.lane.b32.xlu0 %v7003_v32, %s6364_s13 }
 0x512   : > { %1674 = vmax.xlane.f32.xlu2 %v7747_v20 }
 0x514   : > { %v7761_v1 = vpop.xlane.xlu2 %1738 }
 0x51a   : > { %1246 = vadd.xlane.f32.xlu2 %v7751_v46 }
 0x51c   : > { %v1229_v59 = vpop.xlane.xlu1 %1228 }
 0x51d   : > { %6013 = vrcp.f32 %v1229_v59 }
 0x51e   : > { %6015 = vpow2.f32 %v1216_v45  ;;  %v7781_v45 = vpop.f32.mrf.mxu3 }
 0x51f   : > { %6017 = vpow2.f32 %v1222_v18 }
 0x520   : > { %6019 = vpow2.f32 %v1220_v23 }
 0x522   : > { %1250 = vadd.xlane.f32.xlu2 %v7756_v14 }
 0x523   : > { %v6014_v51 = vpop.eup %6013 }
 0x524   : > { %v1274_v53 = vmul.f32 %v6014_v51, %v1229_v59  ;;  %v7765_v7 = vpop.eup %6015 }
 0x525   : > { %v7767_v15 = vpop.eup %6017 }
 0x526   : > { %v1290_v19 = vsub.f32 2.0, %v1274_v53  ;;  %v7776_v17 = vpop.eup %6019 }
 0x528   : > { %v1306_v13 = vmul.f32 %v6014_v51, %v1290_v19 }
 0x52a   : > { %v1322_v21 = vmul.f32 %v7676_v40, %v1306_v13  ;;  %1254 = vadd.xlane.f32.xlu2 %v7767_v15 }
 0x52c   : > { %1248 = vadd.xlane.f32.xlu1 %v7765_v7  ;;  %v1231_v4 = vpop.xlane.xlu2 %1230  ;;  %1406 = vmatmul.f32.gmra.mxu2 %v1322_v21  ;;  %v1627_v21 = vpop.f32.mrf.mxu3 }
 0x52d   : > { %6021 = vrcp.f32 %v1231_v4 }
 0x52e   : > { %6023 = vpow2.f32 %v1712_v58 }
 0x533   : > { %v6022_v24 = vpop.eup %6021 }
 0x534   : > { %1252 = vadd.xlane.f32.xlu1 %v7776_v17  ;;  %v1275_v40 = vmul.f32 %v6022_v24, %v1231_v4  ;;  %v1233_v31 = vpop.xlane.xlu2 %1232  ;;  %v1235_v29 = vpop.xlane.xlu0 %1234 }
 0x535   : > { %v7779_v59 = vpop.eup %6023  ;;  %6025 = vrcp.f32 %v1233_v31 }
 0x536   : > { %v1291_v18 = vsub.f32 2.0, %v1275_v40  ;;  %6027 = vrcp.f32 %v1235_v29 }
 0x537   : > { %1744 = vadd.xlane.f32.xlu0 %v7779_v59  ;;  %6029 = vpow2.f32 %v1714_v50  ;;  %v7793_v50 = vsel %vm949_vm6, %v1627_v21, -1e+30 }
 0x538   : > { %v1307_v11 = vmul.f32 %v6022_v24, %v1291_v18  ;;  %v1630_v18 = vpop.f32.mrf.mxu3 }
 0x53a   : > { %v1323_v22 = vmul.f32 %v7686_v44, %v1307_v11 }
 0x53b   : > { %v6026_v51 = vpop.eup %6025 }
 0x53c   : > { %v6028_v33 = vpop.eup %6027  ;;  %v1276_v53 = vmul.f32 %v6026_v51, %v1233_v31  ;;  %v1237_v19 = vpop.xlane.xlu0 %1236  ;;  %1409 = vmatmul.f32.gmra.mxu2 %v1323_v22 }
 0x53d   : > { %v7785_v2 = vpop.eup %6029  ;;  %6031 = vrcp.f32 %v1237_v19  ;;  %v1277_v13 = vmul.f32 %v6028_v33, %v1235_v29  ;;  %v1696_v29 = vsub.f32 %v7599_v54, %v7699_v0 }
 0x53e   : > { %v1292_v23 = vsub.f32 2.0, %v1276_v53 }
 0x53f   : > { %1746 = vadd.xlane.f32.xlu0 %v7785_v2  ;;  %v1293_v4 = vsub.f32 2.0, %v1277_v13 }
 0x540   : > { %v1308_v58 = vmul.f32 %v6026_v51, %v1292_v23  ;;  %v1718_v51 = vmul.f32 1.442695, %v1696_v29 }
 0x541   : > { %v1309_v31 = vmul.f32 %v6028_v33, %v1293_v4  ;;  %v7803_v33 = vsel %vm949_vm6, %v1630_v18, -1e+30 }
 0x542   : > { %v1324_v49 = vmul.f32 %v7692_v25, %v1308_v58  ;;  %1993 = vrot.lane.b32.xlu2 %v7019_v42, %s6365_s14 }
 0x543   : > { %v6032_v24 = vpop.eup %6031  ;;  %v1325_v22 = vmul.f32 %v7694_v10, %v1309_v31  ;;  %v1697_v10 = vsub.f32 %v7630_v39, %v7712_v3 }
 0x544   : > { %1412 = vmatmul.f32.gmra.mxu2 %v1324_v49  ;;  %v1243_v44 = vpop.xlane.xlu2 %1242  ;;  %v1278_v40 = vmul.f32 %v6032_v24, %v1237_v19  ;;  %v1241_v25 = vpop.xlane.xlu0 %1240 }
 0x545   : > { %v1720_v58 = vmul.f32 1.442695, %v1697_v10 }
 0x546   : > { %v1294_v11 = vsub.f32 2.0, %v1278_v40 }
 0x547   : > { %1680 = vmax.xlane.f32.xlu0 %v7793_v50 }
 0x548   : > { %v1310_v0 = vmul.f32 %v6032_v24, %v1294_v11 }
 0x54c   : > { %v1239_v53 = vpop.xlane.xlu1 %1238  ;;  %1415 = vmatmul.f32.gmra.mxu2 %v1325_v22  ;;  %v5848_v19 = vpop.permute.xlu2 %5847 }
 0x54d   : > { %6033 = vrcp.f32 %v1239_v53  ;;  %1991 = vrot.lane.b32.xlu1 %v7003_v32, %s6365_s14  ;;  %v5849_v54 = vunpack.i.l.bf16 %v5848_v19  ;;  %v5850_v23 = vunpack.i.h.bf16 %v5848_v19  ;;  %v1326_v32 = vmul.f32 %v7702_v34, %v1310_v0 }
 0x54e   : > { %6035 = vrcp.f32 %v1241_v25 }
 0x54f   : > { %1682 = vmax.xlane.f32.xlu0 %v7803_v33  ;;  %6037 = vpow2.f32 %v1718_v51  ;;  %1910 = vmatpush.msrb.mxu0 %v5849_v54 }
 0x550   : > { %6039 = vrcp.f32 %v1243_v44 }
 0x551   : > { %1911 = vmatpush.msrb.mxu0 %v5850_v23  ;;  %6041 = vpow2.f32 %v1720_v58 }
 0x553   : > { %v6034_v13 = vpop.eup %6033 }
 0x554   : > { %v6036_v21 = vpop.eup %6035  ;;  %v1279_v4 = vmul.f32 %v6034_v13, %v1239_v53  ;;  %1418 = vmatmul.f32.gmra.mxu2 %v1326_v32  ;;  %v7825_v32 = vsel %vm949_vm6, %v7781_v45, -1e+30 }
 0x555   : > { %v7809_v49 = vpop.eup %6037  ;;  %v1280_v31 = vmul.f32 %v6036_v21, %v1241_v25 }
 0x556   : > { %v1295_v40 = vsub.f32 2.0, %v1279_v4  ;;  %v6040_v29 = vpop.eup %6039 }
 0x557   : > { %1750 = vadd.xlane.f32.xlu0 %v7809_v49  ;;  %v1296_v3 = vsub.f32 2.0, %v1280_v31  ;;  %v7813_v34 = vpop.eup %6041  ;;  %v1281_v11 = vmul.f32 %v6040_v29, %v1243_v44 }
 0x558   : > { %v1311_v24 = vmul.f32 %v6034_v13, %v1295_v40 }
 0x559   : > { %v1312_v22 = vmul.f32 %v6036_v21, %v1296_v3  ;;  %v1297_v25 = vsub.f32 2.0, %v1281_v11  ;;  %v1633_v21 = vpop.f32.mrf.mxu3 }
 0x55a   : > { %v1327_v39 = vmul.f32 %v7714_v63, %v1311_v24  ;;  %v7832_v24 = vsel %vm949_vm6, %v1633_v21, -1e+30 }
 0x55b   : > { %v1328_v51 = vmul.f32 %v7706_v12, %v1312_v22  ;;  %v1313_v0 = vmul.f32 %v6040_v29, %v1297_v25  ;;  %v7838_v29 = vsel %vm949_vm6, %v7772_v30, -1e+30 }
 0x55c   : > { %v1245_v18 = vpop.xlane.xlu0 %1244  ;;  %1421 = vmatmul.f32.gmra.mxu2 %v1327_v39 }
 0x55d   : > { %6043 = vrcp.f32 %v1245_v18  ;;  %v1329_v44 = vmul.f32 %v7708_v35, %v1313_v0 }
 0x55e   : > { %6045 = vrcp.f32 %v7761_v1 }
 0x55f   : > { %1752 = vadd.xlane.f32.xlu0 %v7813_v34 }
 0x563   : > { %v6044_v53 = vpop.eup %6043 }
 0x564   : > { %v7818_v19 = vpop.permute.xlu1 %1989  ;;  %1424 = vmatmul.f32.gmra.mxu2 %v1328_v51  ;;  %v1741_v63 = vpop.xlane.xlu0 %1740  ;;  %v1282_v54 = vmul.f32 %v6044_v53, %v1245_v18 }
 0x565   : > { %v6046_v10 = vpop.eup %6045  ;;  %6047 = vrcp.f32 %v1741_v63  ;;  %v1636_v18 = vpop.f32.mrf.mxu3 }
 0x566   : > { %v1298_v23 = vsub.f32 2.0, %v1282_v54  ;;  %v1786_v13 = vmul.f32 %v6046_v10, %v7761_v1 }
 0x568   : > { %v1314_v58 = vmul.f32 %v6044_v53, %v1298_v23  ;;  %v1802_v4 = vsub.f32 2.0, %v1786_v13  ;;  %v7844_v53 = vsel %vm949_vm6, %v1636_v18, -1e+30 }
 0x56a   : > { %v1330_v35 = vmul.f32 %v7721_v47, %v1314_v58  ;;  %v1818_v39 = vmul.f32 %v6046_v10, %v1802_v4 }
 0x56b   : > { %1678 = vmax.xlane.f32.xlu2 %v7825_v32  ;;  %v6048_v31 = vpop.eup %6047 }
 0x56c   : > { %v2504_v12 = vpop.permute.xlu1 %2503  ;;  %1427 = vmatmul.f32.gmra.mxu2 %v1329_v44  ;;  %v1743_v40 = vpop.xlane.xlu0 %1742  ;;  %v1787_v1 = vmul.f32 %v6048_v31, %v1741_v63  ;;  %v1834_v22 = vmul.f32 %v7671_v52, %v1818_v39 }
 0x56d   : > { %5654 = vmatmul.msk.f32.gmra.mxu3 %vm998_vm5, %v2504_v12  ;;  %6049 = vrcp.f32 %v1743_v40  ;;  %v1639_v10 = vpop.f32.mrf.mxu3 }
 0x56e   : > { %v1803_v11 = vsub.f32 2.0, %v1787_v1  ;;  %v7851_v52 = vsel %vm949_vm6, %v1639_v10, -1e+30 }
 0x570   : > { %v1819_v63 = vmul.f32 %v6048_v31, %v1803_v11 }
 0x572   : > { %v1835_v0 = vmul.f32 %v7728_v37, %v1819_v63 }
 0x573   : > { %1684 = vmax.xlane.f32.xlu2 %v7832_v24  ;;  %v6050_v25 = vpop.eup %6049 }
 0x574   : > { %v5853_v45 = vpop.permute.xlu1 %5852  ;;  %1430 = vmatmul.f32.gmra.mxu2 %v1330_v35  ;;  %v1788_v51 = vmul.f32 %v6050_v25, %v1743_v40 }
 0x575   : > { %v5854_v3 = vunpack.i.l.bf16 %v5853_v45  ;;  %v5855_v47 = vunpack.i.h.bf16 %v5853_v45  ;;  %v7856_v4 = vpop.f32.mrf.mxu3 }
 0x576   : > { %v1804_v54 = vsub.f32 2.0, %v1788_v51 }
 0x577   : > { %1676 = vmax.xlane.f32.xlu1 %v7838_v29  ;;  %1912 = vmatpush.msrb.mxu0 %v5854_v3 }
 0x578   : > { %v1820_v23 = vmul.f32 %v6050_v25, %v1804_v54 }
 0x579   : > { %1913 = vmatpush.msrb.mxu0 %v5855_v47 }
 0x57a   : > { %1914 = vmatmul.f32.vlgmr.msrb.gmra.mxu0 %v1834_v22  ;;  %v1836_v12 = vmul.f32 %v7733_v36, %v1820_v23  ;;  %v1695_v22 = vsub.f32 %v7580_v5, %v7689_v55 }
 0x57b   : > { %1686 = vmax.xlane.f32.xlu2 %v7844_v53 }
 0x57f   : > { %v2506_v30 = vpop.permute.xlu0 %2505 }
 0x580   : > { %5655 = vmatmul.msk.f32.gmra.mxu3 %vm998_vm5, %v2506_v30 }
 0x582   : > { %1917 = vmatmul.f32.gmra.mxu0 %v1835_v0 }
 0x583   : > { %1688 = vmax.xlane.f32.xlu2 %v7851_v52 }
 0x585   : > { %v1675_v44 = vpop.xlane.xlu2 %1674 }
 0x586   : > { %v1698_v13 = vsub.f32 %v7747_v20, %v1675_v44  ;;  %v7863_v20 = vpop.f32.mrf.mxu3 }
 0x588   : > { %v1722_v21 = vmul.f32 1.442695, %v1698_v13 }
 0x58a   : > { %1920 = vmatmul.f32.gmra.mxu0 %v1836_v12  ;;  %6051 = vpow2.f32 %v1722_v21 }
 0x58d   : > { %v1247_v58 = vpop.xlane.xlu2 %1246 }
 0x58e   : > { %6053 = vrcp.f32 %v1247_v58 }
 0x590   : > { %2507 = vrot.lane.b32.xlu1 %v7019_v42, %s6364_s13  ;;  %v7860_v37 = vpop.eup %6051  ;;  %v2628_v42 = vpop.f32.mrf.mxu3 }
 0x591   : > { %1754 = vadd.xlane.f32.xlu0 %v7860_v37 }
 0x594   : > { %v6054_v40 = vpop.eup %6053 }
 0x595   : > { %v1283_v31 = vmul.f32 %v6054_v40, %v1247_v58  ;;  %v1251_v1 = vpop.xlane.xlu2 %1250 }
 0x596   : > { %6055 = vrcp.f32 %v1251_v1 }
 0x597   : > { %v1299_v35 = vsub.f32 2.0, %v1283_v31 }
 0x598   : > { %v2631_v54 = vpop.f32.mrf.mxu3 }
 0x599   : > { %v1315_v36 = vmul.f32 %v6054_v40, %v1299_v35 }
 0x59b   : > { %5857 = vrot.lane.b32.xlu2 %v10025_v28, %s6367_s16  ;;  %v1331_v45 = vmul.f32 %v7751_v46, %v1315_v36  ;;  %v1716_v46 = vmul.f32 1.442695, %v1695_v22 }
 0x59c   : > { %v6056_v3 = vpop.eup %6055 }
 0x59d   : > { %1433 = vmatmul.f32.gmra.mxu2 %v1331_v45  ;;  %v1285_v25 = vmul.f32 %v6056_v3, %v1251_v1  ;;  %v1255_v10 = vpop.xlane.xlu2 %1254 }
 0x59f   : > { %v1249_v39 = vpop.xlane.xlu1 %1248  ;;  %v1301_v0 = vsub.f32 2.0, %v1285_v25 }
 0x5a0   : > { %6057 = vrcp.f32 %v1249_v39  ;;  %v2634_v45 = vpop.f32.mrf.mxu3 }
 0x5a1   : > { %v1317_v5 = vmul.f32 %v6056_v3, %v1301_v0 }
 0x5a3   : > { %v1333_v31 = vmul.f32 %v7756_v14, %v1317_v5 }
 0x5a6   : > { %v6058_v18 = vpop.eup %6057 }
 0x5a7   : > { %v1253_v47 = vpop.xlane.xlu1 %1252  ;;  %v1284_v11 = vmul.f32 %v6058_v18, %v1249_v39 }
 0x5a8   : > { %6059 = vrcp.f32 %v1253_v47 }
 0x5a9   : > { %v1300_v51 = vsub.f32 2.0, %v1284_v11 }
 0x5aa   : > { %v1745_v63 = vpop.xlane.xlu0 %1744 }
 0x5ab   : > { %6061 = vrcp.f32 %v1745_v63  ;;  %v1316_v30 = vmul.f32 %v6058_v18, %v1300_v51 }
 0x5ac   : > { %6063 = vrcp.f32 %v1255_v10 }
 0x5ad   : > { %v1332_v23 = vmul.f32 %v7765_v7, %v1316_v30  ;;  %6065 = vpow2.f32 %v1716_v46  ;;  %v7884_v46 = vpop.f32.mrf.mxu2 }
 0x5ae   : > { %v6060_v44 = vpop.eup %6059 }
 0x5af   : > { %1436 = vmatmul.f32.gmra.mxu2 %v1332_v23  ;;  %v1286_v12 = vmul.f32 %v6060_v44, %v1253_v47  ;;  %v7904_v23 = vsel %vm949_vm6, %v2628_v42, -1e+30 }
 0x5b1   : > { %v6062_v13 = vpop.eup %6061  ;;  %v1302_v40 = vsub.f32 2.0, %v1286_v12  ;;  %v10043_v12 = vld [vmem:[#allocation25_spill] sm:$0xff] }
 0x5b2   : > { %v1789_v21 = vmul.f32 %v6062_v13, %v1745_v63  ;;  %v1747_v58 = vpop.xlane.xlu0 %1746  ;;  %v6064_v36 = vpop.eup %6063  ;;  %v7881_v63 = vsel %vm949_vm6, %v7856_v4, -1e+30 }
 0x5b3   : > { %6067 = vrcp.f32 %v1747_v58  ;;  %v7872_v1 = vpop.eup %6065  ;;  %v1287_v18 = vmul.f32 %v6064_v36, %v1255_v10  ;;  %v1318_v3 = vmul.f32 %v6060_v44, %v1302_v40  ;;  %v10042_v10 = vld [vmem:[#allocation20_spill] sm:$0xff]  ;;  %v7909_v44 = vpop.permute.xlu2 %1993 }
 0x5b4   : > { %v1805_v55 = vsub.f32 2.0, %v1789_v21  ;;  %v7926_v21 = vsel %vm949_vm6, %v2634_v45, -1e+30 }
 0x5b5   : > { %v1303_v22 = vsub.f32 2.0, %v1287_v18  ;;  %v1334_v25 = vmul.f32 %v7776_v17, %v1318_v3  ;;  %v7898_v4 = vpop.f32.mrf.mxu2 }
 0x5b6   : > { %v1821_v35 = vmul.f32 %v6062_v13, %v1805_v55  ;;  %v10046_v55 = vld [vmem:[#allocation22_spill] sm:$0xff] }
 0x5b7   : > { %1439 = vmatmul.f32.gmra.mxu2 %v1333_v31  ;;  %v1319_v30 = vmul.f32 %v6064_v36, %v1303_v22 }
 0x5b8   : > { %v1837_v7 = vmul.f32 %v7779_v59, %v1821_v35  ;;  %v2637_v59 = vpop.f32.mrf.mxu3 }
 0x5b9   : > { %v6068_v39 = vpop.eup %6067  ;;  %v7888_v0 = vsel %vm949_vm6, %v2637_v59, -1e+30  ;;  %v1335_v17 = vmul.f32 %v7767_v15, %v1319_v30  ;;  %v10049_v30 = vld [vmem:[#allocation10_spill] sm:$0xff] }
 0x5ba   : > { %v1790_v11 = vmul.f32 %v6068_v39, %v1747_v58  ;;  %1748 = vadd.xlane.f32.xlu1 %v7872_v1  ;;  %1923 = vmatmul.f32.gmra.mxu0 %v1837_v7 }
 0x5bc   : > { %v1806_v47 = vsub.f32 2.0, %v1790_v11 }
 0x5bd   : > { %v7907_v15 = vpop.f32.mrf.mxu2 }
 0x5be   : > { %v1822_v14 = vmul.f32 %v6068_v39, %v1806_v47  ;;  %v1681_v39 = vpop.xlane.xlu0 %1680 }
 0x5bf   : > { %1442 = vmatmul.f32.gmra.mxu2 %v1334_v25 }
 0x5c0   : > { %v1838_v51 = vmul.f32 %v7785_v2, %v1822_v14  ;;  %v7895_v2 = vsel %vm949_vm6, %v7863_v20, -1e+30  ;;  %v7915_v20 = vsel %vm949_vm6, %v2631_v54, -1e+30  ;;  %v10044_v54 = vld [vmem:[#allocation5_spill] sm:$0xff] }
 0x5c2   : > { %2686 = vmax.xlane.f32.xlu1 %v7881_v63  ;;  %1926 = vmatmul.f32.gmra.mxu0 %v1838_v51 }
 0x5c4   : > { %2696 = vmax.xlane.f32.xlu2 %v7888_v0 }
 0x5c5   : > { %v7918_v13 = vpop.f32.mrf.mxu2 }
 0x5c6   : > { %v1683_v47 = vpop.xlane.xlu0 %1682 }
 0x5c7   : > { %1445 = vmatmul.f32.gmra.mxu2 %v1335_v17 }
 0x5ca   : > { %2688 = vmax.xlane.f32.xlu1 %v7895_v2 }
 0x5cd   : > { %v7933_v58 = vpop.f32.mrf.mxu2 }
 0x5ce   : > { %10045 = vst [vmem:[#allocation16_spill] sm:$0xff] %v7933_v58 }
 0x5cf   : > { %5609 = vmatmul.msk.f32.vlgmr.msrb.gmra.mxu2 %vm998_vm5, %v10042_v10  ;;  %v10051_v10 = vld [vmem:[#allocation8_spill] sm:$0xff] }
 0x5d2   : > { %2690 = vmax.xlane.f32.xlu1 %v7904_v23 }
 0x5d5   : > { %v7943_v7 = vpop.f32.mrf.mxu2 }
 0x5d6   : > { %10047 = vst [vmem:[#allocation12_spill] sm:$0xff] %v7943_v7 }
 0x5d7   : > { %5610 = vmatmul.msk.f32.gmra.mxu2 %vm998_vm5, %v7448_v56  ;;  %v7928_v56 = vpop.permute.xlu1 %1991 }
 0x5da   : > { %2692 = vmax.xlane.f32.xlu1 %v7915_v20 }
 0x5dc   : > { %5887 = vrot.lane.b32.xlu2 %v10028_v43, %s6367_s16 }
 0x5dd   : > { %v7955_v3 = vpop.f32.mrf.mxu2 }
 0x5de   : > { %v1679_v42 = vpop.xlane.xlu2 %1678  ;;  %10048 = vst [vmem:[#allocation9_spill] sm:$0xff] %v7955_v3 }
 0x5df   : > { %5611 = vmatmul.msk.f32.gmra.mxu2 %vm998_vm5, %v10043_v12  ;;  %v1700_v36 = vsub.f32 %v7825_v32, %v1679_v42 }
 0x5e1   : > { %v1726_v18 = vmul.f32 1.442695, %v1700_v36 }
 0x5e2   : > { %2694 = vmax.xlane.f32.xlu1 %v7926_v21 }
 0x5e4   : > { %5907 = vrot.lane.b32.xlu2 %v10044_v54, %s6367_s16 }
 0x5e5   : > { %v7970_v17 = vpop.f32.mrf.mxu2 }
 0x5e6   : > { %v1685_v5 = vpop.xlane.xlu2 %1684  ;;  %10050 = vst [vmem:[#allocation7_spill] sm:$0xff] %v7970_v17 }
 0x5e7   : > { %5612 = vmatmul.msk.f32.gmra.mxu2 %vm998_vm5, %v10046_v55 }
 0x5ea   : > { %v1677_v40 = vpop.xlane.xlu1 %1676 }
 0x5eb   : > { %v1699_v31 = vsub.f32 %v7838_v29, %v1677_v40  ;;  %v1701_v29 = vsub.f32 %v7793_v50, %v1681_v39  ;;  %v1702_v50 = vsub.f32 %v7803_v33, %v1683_v47 }
 0x5ec   : > { %5912 = vrot.lane.b32.xlu2 %v10044_v54, %s6368_s17 }
 0x5ed   : > { %v1724_v35 = vmul.f32 1.442695, %v1699_v31  ;;  %v1730_v51 = vmul.f32 1.442695, %v1702_v50  ;;  %v7981_v12 = vpop.f32.mrf.mxu2 }
 0x5ee   : > { %v1687_v45 = vpop.xlane.xlu2 %1686  ;;  %10052 = vst [vmem:[#allocation11_spill] sm:$0xff] %v7981_v12 }
 0x5ef   : > { %6069 = vpow2.f32 %v1724_v35  ;;  %5613 = vmatmul.msk.f32.gmra.mxu2 %vm998_vm5, %v7461_v16  ;;  %v1728_v16 = vmul.f32 1.442695, %v1701_v29  ;;  %v1704_v54 = vsub.f32 %v7844_v53, %v1687_v45 }
 0x5f0   : > { %6071 = vpow2.f32 %v1726_v18 }
 0x5f1   : > { %6073 = vpow2.f32 %v1728_v16 }
 0x5f2   : > { %6075 = vpow2.f32 %v1730_v51 }
 0x5f4   : > { %5917 = vrot.lane.b32.xlu2 %v10040_v61, %s6367_s16 }
 0x5f5   : > { %v7945_v11 = vpop.eup %6069 }
 0x5f6   : > { %1756 = vadd.xlane.f32.xlu0 %v7945_v11  ;;  %v7951_v32 = vpop.xlane.xlu2 %1688  ;;  %v7959_v22 = vpop.eup %6071 }
 0x5f7   : > { %5614 = vmatmul.msk.f32.gmra.mxu2 %vm998_vm5, %v7291_v62 }
 0x5fb   : > { %5862 = vrot.lane.b32.xlu1 %v10025_v28, %s6368_s17  ;;  %v7968_v28 = vpop.eup %6073 }
 0x5fc   : > { %v7978_v42 = vpop.eup %6075 }
 0x5fe   : > { %1758 = vadd.xlane.f32.xlu0 %v7959_v22  ;;  %v5858_v25 = vpop.permute.xlu2 %5857 }
 0x5ff   : > { %5615 = vmatmul.msk.f32.gmra.mxu2 %vm998_vm5, %v7312_v26  ;;  %v5859_v14 = vunpack.i.l.bf16 %v5858_v25  ;;  %v5860_v59 = vunpack.i.h.bf16 %v5858_v25  ;;  %v1703_v26 = vsub.f32 %v7832_v24, %v1685_v5  ;;  %v1734_v24 = vmul.f32 1.442695, %v1704_v54  ;;  %v7993_v5 = vpop.f32.mrf.mxu2 }
 0x600   : > { %10053 = vst [vmem:[#allocation19_spill] sm:$0xff] %v7993_v5 }
 0x601   : > { %2412 = vmatpush.msrb.mxu1 %v5859_v14  ;;  %v1732_v33 = vmul.f32 1.442695, %v1703_v26 }
 0x602   : > { %v2508_v62 = vpop.permute.xlu1 %2507 }
 0x603   : > { %5872 = vrot.lane.b32.xlu1 %v10049_v30, %s6368_s17  ;;  %5656 = vmatmul.msk.f32.gmra.mxu3 %vm998_vm5, %v2508_v62  ;;  %6077 = vpow2.f32 %v1732_v33 }
 0x604   : > { %2413 = vmatpush.msrb.mxu1 %v5860_v59  ;;  %6079 = vpow2.f32 %v1734_v24 }
 0x606   : > { %1760 = vadd.xlane.f32.xlu0 %v7968_v28 }
 0x607   : > { %5616 = vmatmul.msk.f32.gmra.mxu2 %vm998_vm5, %v7484_v48 }
 0x609   : > { %v7988_v48 = vpop.eup %6077 }
 0x60a   : > { %v7997_v53 = vpop.eup %6079 }
 0x60b   : > { %5877 = vrot.lane.b32.xlu1 %v10051_v10, %s6367_s16 }
 0x60e   : > { %1762 = vadd.xlane.f32.xlu0 %v7978_v42 }
 0x60f   : > { %5617 = vmatmul.msk.f32.gmra.mxu2 %vm998_vm5, %v7492_v57  ;;  %v8002_v57 = vpop.f32.mrf.mxu2 }
 0x610   : > { %10054 = vst [vmem:[#allocation13_spill] sm:$0xff] %v8002_v57 }
 0x613   : > { %5882 = vrot.lane.b32.xlu1 %v10051_v10, %s6368_s17 }
 0x616   : > { %1764 = vadd.xlane.f32.xlu0 %v7988_v48 }
 0x617   : > { %5618 = vmatmul.msk.f32.gmra.mxu2 %vm998_vm5, %v7499_v6  ;;  %v1751_v6 = vpop.xlane.xlu0 %1750 }
 0x618   : > { %6081 = vrcp.f32 %v1751_v6 }
 0x61b   : > { %5897 = vrot.lane.b32.xlu1 %v10032_v38, %s6367_s16 }
 0x61e   : > { %1766 = vadd.xlane.f32.xlu0 %v7997_v53 }
 0x61f   : > { %5619 = vmatmul.msk.f32.gmra.mxu2 %vm998_vm5, %v7504_v8  ;;  %v6082_v8 = vpop.eup %6081 }
 0x620   : > { %v8008_v55 = vpop.f32.mrf.mxu2 }
 0x621   : > { %10055 = vst [vmem:[#allocation6_spill] sm:$0xff] %v8008_v55 }
 0x623   : > { %5902 = vrot.lane.b32.xlu1 %v10032_v38, %s6368_s17  ;;  %v1753_v38 = vpop.xlane.xlu0 %1752 }
 0x627   : > { %5620 = vmatmul.msk.f32.gmra.mxu2 %vm998_vm5, %v7512_v9 }
 0x62b   : > { %5922 = vrot.lane.b32.xlu1 %v10040_v61, %s6368_s17  ;;  %v1792_v61 = vmul.f32 %v6082_v8, %v1751_v6  ;;  %v1755_v39 = vpop.xlane.xlu0 %1754 }
 0x62d   : > { %v1749_v40 = vpop.xlane.xlu1 %1748 }
 0x62e   : > { %6083 = vrcp.f32 %v1749_v40 }
 0x62f   : > { %5621 = vmatmul.msk.f32.gmra.mxu2 %vm998_vm5, %v7546_v41  ;;  %6085 = vrcp.f32 %v1753_v38  ;;  %v1808_v41 = vsub.f32 2.0, %v1792_v61 }
 0x630   : > { %6087 = vrcp.f32 %v1755_v39 }
 0x631   : > { %v1824_v25 = vmul.f32 %v6082_v8, %v1808_v41 }
 0x632   : > { %5867 = vrot.lane.b32.xlu0 %v10049_v30, %s6367_s16  ;;  %v8016_v31 = vpop.f32.mrf.mxu2 }
 0x633   : > { %10056 = vst [vmem:[#allocation14_spill] sm:$0xff] %v8016_v31  ;;  %5932 = vrot.lane.b32.xlu1 %v10041_v27, %s6368_s17 }
 0x634   : > { %v6084_v9 = vpop.eup %6083 }
 0x635   : > { %v1791_v35 = vmul.f32 %v6084_v9, %v1749_v40  ;;  %v6086_v16 = vpop.eup %6085  ;;  %v8025_v47 = vpop.xlane.xlu1 %2686 }
 0x636   : > { %v1793_v50 = vmul.f32 %v6086_v16, %v1753_v38  ;;  %v6088_v51 = vpop.eup %6087 }
 0x637   : > { %v1807_v36 = vsub.f32 2.0, %v1791_v35  ;;  %5622 = vmatmul.msk.f32.gmra.mxu2 %vm998_vm5, %v7818_v19  ;;  %v1840_v19 = vmul.f32 %v7809_v49, %v1824_v25  ;;  %v1794_v59 = vmul.f32 %v6088_v51, %v1755_v39 }
 0x638   : > { %v1809_v14 = vsub.f32 2.0, %v1793_v50 }
 0x639   : > { %v1823_v45 = vmul.f32 %v6084_v9, %v1807_v36  ;;  %v1810_v26 = vsub.f32 2.0, %v1794_v59 }
 0x63a   : > { %v8022_v18 = vpop.f32.mrf.mxu2 }
 0x63b   : > { %10057 = vst [vmem:[#allocation17_spill] sm:$0xff] %v8022_v18  ;;  %v1839_v29 = vmul.f32 %v7872_v1, %v1823_v45  ;;  %v1825_v1 = vmul.f32 %v6086_v16, %v1809_v14  ;;  %v1826_v54 = vmul.f32 %v6088_v51, %v1810_v26 }
 0x63d   : > { %1929 = vmatmul.f32.gmra.mxu0 %v1839_v29  ;;  %v8032_v30 = vpop.xlane.xlu1 %2688  ;;  %v1841_v10 = vmul.f32 %v7813_v34, %v1825_v1  ;;  %v1842_v40 = vmul.f32 %v7860_v37, %v1826_v54  ;;  %v2640_v37 = vpop.f32.mrf.mxu3 }
 0x63e   : > { %v8059_v38 = vsel %vm949_vm6, %v2640_v37, -1e+30 }
 0x63f   : > { %5623 = vmatmul.msk.f32.gmra.mxu2 %vm998_vm5, %v7928_v56  ;;  %v1705_v56 = vsub.f32 %v7851_v52, %v7951_v32 }
 0x641   : > { %v1736_v49 = vmul.f32 1.442695, %v1705_v56 }
 0x642   : > { %v8029_v62 = vpop.f32.mrf.mxu2 }
 0x643   : > { %10058 = vst [vmem:[#allocation18_spill] sm:$0xff] %v8029_v62  ;;  %6089 = vpow2.f32 %v1736_v49 }
 0x645   : > { %1932 = vmatmul.f32.gmra.mxu0 %v1840_v19  ;;  %v2691_v24 = vpop.xlane.xlu1 %2690  ;;  %v8075_v59 = vpop.f32.mrf.mxu3 }
 0x646   : > { %v2720_v29 = vsub.f32 %v7904_v23, %v2691_v24 }
 0x647   : > { %5624 = vmatmul.msk.f32.gmra.mxu2 %vm998_vm5, %v7909_v44 }
 0x648   : > { %v2738_v51 = vmul.f32 1.442695, %v2720_v29 }
 0x649   : > { %v8047_v44 = vpop.eup %6089 }
 0x64a   : > { %v8036_v33 = vpop.f32.mrf.mxu2 }
 0x64b   : > { %10059 = vst [vmem:[#allocation15_spill] sm:$0xff] %v8036_v33 }
 0x64d   : > { %1935 = vmatmul.f32.gmra.mxu0 %v1841_v10  ;;  %v8049_v34 = vpop.xlane.xlu1 %2692 }
 0x652   : > { %v2108_v6 = vpop.f32.mrf.mxu2 }
 0x653   : > { %v8044_v8 = vsel %vm949_vm6, %v2108_v6, -1e+30 }
 0x654   : > { %2172 = vmax.xlane.f32.xlu2 %v8044_v8 }
 0x655   : > { %1938 = vmatmul.f32.gmra.mxu0 %v1842_v40  ;;  %v8066_v61 = vpop.xlane.xlu1 %2694 }
 0x65a   : > { %v2111_v52 = vpop.f32.mrf.mxu2 }
 0x65b   : > { %v8054_v32 = vsel %vm949_vm6, %v2111_v52, -1e+30 }
 0x65c   : > { %1768 = vadd.xlane.f32.xlu0 %v8047_v44  ;;  %2174 = vmax.xlane.f32.xlu2 %v8054_v32 }
 0x662   : > { %v2114_v9 = vpop.f32.mrf.mxu2 }
 0x663   : > { %v8064_v35 = vsel %vm949_vm6, %v2114_v9, -1e+30 }
 0x664   : > { %2698 = vmax.xlane.f32.xlu0 %v8059_v38  ;;  %2176 = vmax.xlane.f32.xlu2 %v8064_v35 }
 0x669   : > { %v1757_v36 = vpop.xlane.xlu0 %1756 }
 0x66a   : > { %6091 = vrcp.f32 %v1757_v36  ;;  %v2117_v45 = vpop.f32.mrf.mxu2 }
 0x66b   : > { %v8071_v41 = vsel %vm949_vm6, %v2117_v45, -1e+30  ;;  %v8089_v45 = vpop.f32.mrf.mxu3 }
 0x66c   : > { %2178 = vmax.xlane.f32.xlu2 %v8071_v41 }
 0x66d   : > { %v5863_v39 = vpop.permute.xlu1 %5862 }
 0x66e   : > { %v5864_v16 = vunpack.i.l.bf16 %v5863_v39  ;;  %v5865_v25 = vunpack.i.h.bf16 %v5863_v39 }
 0x670   : > { %v6092_v50 = vpop.eup %6091  ;;  %2926 = vmatpush.msra.mxu0 %v5864_v16 }
 0x671   : > { %v1795_v14 = vmul.f32 %v6092_v50, %v1757_v36  ;;  %v1759_v19 = vpop.xlane.xlu0 %1758 }
 0x672   : > { %6093 = vrcp.f32 %v1759_v19  ;;  %2927 = vmatpush.msra.mxu0 %v5865_v25  ;;  %v2120_v26 = vpop.f32.mrf.mxu2 }
 0x673   : > { %v1811_v1 = vsub.f32 2.0, %v1795_v14  ;;  %v8079_v10 = vsel %vm949_vm6, %v2120_v26, -1e+30  ;;  %6095 = vpow2.f32 %v2738_v51 }
 0x674   : > { %2180 = vmax.xlane.f32.xlu2 %v8079_v10 }
 0x675   : > { %v5873_v23 = vpop.permute.xlu1 %5872  ;;  %v1827_v56 = vmul.f32 %v6092_v50, %v1811_v1 }
 0x676   : > { %v5874_v54 = vunpack.i.l.bf16 %v5873_v23  ;;  %v5875_v6 = vunpack.i.h.bf16 %v5873_v23  ;;  %v8100_v23 = vpop.f32.mrf.mxu3 }
 0x677   : > { %v1843_v49 = vmul.f32 %v7945_v11, %v1827_v56 }
 0x678   : > { %v6094_v24 = vpop.eup %6093  ;;  %5892 = vrot.lane.b32.xlu0 %v10028_v43, %s6368_s17  ;;  %2928 = vmatpush.msra.mxu0 %v5874_v54 }
 0x679   : > { %v1796_v40 = vmul.f32 %v6094_v24, %v1759_v19  ;;  %v1761_v52 = vpop.xlane.xlu0 %1760  ;;  %1941 = vmatmul.f32.gmra.mxu0 %v1843_v49  ;;  %v8087_v36 = vpop.eup %6095 }
 0x67a   : > { %6097 = vrcp.f32 %v1761_v52  ;;  %2929 = vmatpush.msra.mxu0 %v5875_v6  ;;  %v8085_v9 = vpop.f32.mrf.mxu2 }
 0x67b   : > { %v1812_v37 = vsub.f32 2.0, %v1796_v40 }
 0x67c   : > { %2770 = vadd.xlane.f32.xlu2 %v8087_v36 }
 0x67d   : > { %v8092_v11 = vpop.permute.xlu1 %5877  ;;  %v1828_v39 = vmul.f32 %v6094_v24, %v1812_v37 }
 0x67f   : > { %v1844_v43 = vmul.f32 %v7959_v22, %v1828_v39  ;;  %v8108_v39 = vpop.xlane.xlu2 %2696 }
 0x680   : > { %v6098_v29 = vpop.eup %6097 }
 0x681   : > { %v1797_v16 = vmul.f32 %v6098_v29, %v1761_v52  ;;  %v1763_v50 = vpop.xlane.xlu0 %1762  ;;  %1944 = vmatmul.f32.gmra.mxu0 %v1844_v43 }
 0x682   : > { %6099 = vrcp.f32 %v1763_v50  ;;  %v2126_v14 = vpop.f32.mrf.mxu2 }
 0x683   : > { %v1813_v25 = vsub.f32 2.0, %v1797_v16  ;;  %v8097_v19 = vsel %vm949_vm6, %v2126_v14, -1e+30 }
 0x684   : > { %2184 = vmax.xlane.f32.xlu1 %v8097_v19 }
 0x685   : > { %v5883_v51 = vpop.permute.xlu1 %5882  ;;  %v1829_v1 = vmul.f32 %v6098_v29, %v1813_v25  ;;  %v2652_v29 = vpop.f32.mrf.mxu3  ;;  %v2718_v25 = vsub.f32 %v7881_v63, %v8025_v47 }
 0x686   : > { %v5884_v26 = vunpack.i.l.bf16 %v5883_v51  ;;  %v5885_v54 = vunpack.i.h.bf16 %v5883_v51 }
 0x687   : > { %v1845_v22 = vmul.f32 %v7968_v28, %v1829_v1  ;;  %v8115_v1 = vsel %vm949_vm6, %v2652_v29, -1e+30  ;;  %v5888_v63 = vpop.permute.xlu2 %5887 }
 0x688   : > { %v6100_v56 = vpop.eup %6099  ;;  %2930 = vmatpush.msra.mxu0 %v5884_v26 }
 0x689   : > { %v1798_v49 = vmul.f32 %v6100_v56, %v1763_v50  ;;  %v1765_v24 = vpop.xlane.xlu0 %1764  ;;  %1947 = vmatmul.f32.gmra.mxu0 %v1845_v22  ;;  %v2734_v22 = vmul.f32 1.442695, %v2718_v25 }
 0x68a   : > { %6101 = vrcp.f32 %v1765_v24  ;;  %2931 = vmatpush.msra.mxu0 %v5885_v54  ;;  %v2129_v40 = vpop.f32.mrf.mxu2 }
 0x68b   : > { %v1814_v6 = vsub.f32 2.0, %v1798_v49  ;;  %v8105_v52 = vsel %vm949_vm6, %v2129_v40, -1e+30 }
 0x68c   : > { %2186 = vmax.xlane.f32.xlu1 %v8105_v52 }
 0x68d   : > { %v1830_v37 = vmul.f32 %v6100_v56, %v1814_v6 }
 0x68f   : > { %v1846_v28 = vmul.f32 %v7978_v42, %v1830_v37 }
 0x690   : > { %v6102_v43 = vpop.eup %6101 }
 0x691   : > { %v1799_v16 = vmul.f32 %v6102_v43, %v1765_v24  ;;  %v1767_v50 = vpop.xlane.xlu0 %1766  ;;  %1950 = vmatmul.f32.gmra.mxu0 %v1846_v28 }
 0x692   : > { %6103 = vrcp.f32 %v1767_v50  ;;  %v2132_v51 = vpop.f32.mrf.mxu2 }
 0x693   : > { %v1815_v14 = vsub.f32 2.0, %v1799_v16  ;;  %v8119_v26 = vsel %vm949_vm6, %v2132_v51, -1e+30  ;;  %6105 = vpow2.f32 %v2734_v22  ;;  %v5880_v51 = vunpack.i.h.bf16 %v8092_v11 }
 0x694   : > { %2706 = vmax.xlane.f32.xlu1 %v8115_v1  ;;  %2188 = vmax.xlane.f32.xlu2 %v8119_v26  ;;  %v5890_v22 = vunpack.i.h.bf16 %v5888_v63 }
 0x695   : > { %v1831_v42 = vmul.f32 %v6102_v43, %v1815_v14  ;;  %v2719_v43 = vsub.f32 %v7895_v2, %v8032_v30  ;;  %v8138_v14 = vsel %vm949_vm6, %v8075_v59, -1e+30  ;;  %v5889_v30 = vunpack.i.l.bf16 %v5888_v63 }
 0x697   : > { %v1847_v56 = vmul.f32 %v7988_v48, %v1831_v42  ;;  %v5908_v48 = vpop.permute.xlu2 %5907  ;;  %v5898_v42 = vpop.permute.xlu1 %5897 }
 0x698   : > { %v6104_v54 = vpop.eup %6103  ;;  %v5899_v59 = vunpack.i.l.bf16 %v5898_v42 }
 0x699   : > { %v1800_v47 = vmul.f32 %v6104_v54, %v1767_v50  ;;  %1953 = vmatmul.f32.gmra.mxu0 %v1847_v56  ;;  %v8130_v28 = vpop.eup %6105  ;;  %v2736_v50 = vmul.f32 1.442695, %v2719_v43 }
 0x69a   : > { %v2135_v24 = vpop.f32.mrf.mxu2 }
 0x69b   : > { %v1816_v49 = vsub.f32 2.0, %v1800_v47  ;;  %v8126_v6 = vsel %vm949_vm6, %v2135_v24, -1e+30  ;;  %6107 = vpow2.f32 %v2736_v50  ;;  %v5909_v47 = vunpack.i.l.bf16 %v5908_v48 }
 0x69c   : > { %2190 = vmax.xlane.f32.xlu2 %v8126_v6 }
 0x69d   : > { %v1832_v40 = vmul.f32 %v6104_v54, %v1816_v49  ;;  %v5900_v54 = vunpack.i.h.bf16 %v5898_v42  ;;  %v8162_v42 = vsel %vm949_vm6, %v8100_v23, -1e+30  ;;  %v2723_v23 = vsub.f32 %v7888_v0, %v8108_v39 }
 0x69f   : > { %v1848_v37 = vmul.f32 %v7997_v53, %v1832_v40  ;;  %v5879_v53 = vunpack.i.l.bf16 %v8092_v11  ;;  %v8143_v2 = vpop.permute.xlu2 %5912  ;;  %v5910_v11 = vunpack.i.h.bf16 %v5908_v48  ;;  %v2721_v48 = vsub.f32 %v7915_v20, %v8049_v34 }
 0x6a1   : > { %1956 = vmatmul.f32.gmra.mxu0 %v1848_v37  ;;  %v8145_v56 = vpop.eup %6107 }
 0x6a2   : > { %2766 = vadd.xlane.f32.xlu0 %v8130_v28  ;;  %v8166_v34 = vpop.f32.mrf.mxu2 }
 0x6a4   : > { %v5868_v29 = vpop.permute.xlu0 %5867 }
 0x6a5   : > { %v5869_v16 = vunpack.i.l.bf16 %v5868_v29  ;;  %v5870_v25 = vunpack.i.h.bf16 %v5868_v29 }
 0x6a7   : > { %2414 = vmatpush.msrb.mxu1 %v5869_v16  ;;  %v5918_v49 = vpop.permute.xlu2 %5917 }
 0x6a8   : > { %v5919_v24 = vunpack.i.l.bf16 %v5918_v49  ;;  %v5920_v40 = vunpack.i.h.bf16 %v5918_v49 }
 0x6a9   : > { %2415 = vmatpush.msrb.mxu1 %v5870_v25 }
 0x6aa   : > { %2700 = vmax.xlane.f32.xlu0 %v8138_v14 }
 0x6ab   : > { %2416 = vmatpush.msrb.mxu1 %v5879_v53 }
 0x6ad   : > { %2417 = vmatpush.msrb.mxu1 %v5880_v51  ;;  %v2740_v51 = vmul.f32 1.442695, %v2721_v48 }
 0x6af   : > { %2418 = vmatpush.msrb.mxu1 %v5889_v30 }
 0x6b1   : > { %2419 = vmatpush.msrb.mxu1 %v5890_v22 }
 0x6b2   : > { %2768 = vadd.xlane.f32.xlu0 %v8145_v56 }
 0x6b3   : > { %2420 = vmatpush.msrb.mxu1 %v5899_v59 }
 0x6b5   : > { %2421 = vmatpush.msrb.mxu1 %v5900_v54  ;;  %v5903_v54 = vpop.permute.xlu1 %5902 }
 0x6b7   : > { %2422 = vmatpush.msrb.mxu1 %v5909_v47 }
 0x6b9   : > { %2423 = vmatpush.msrb.mxu1 %v5910_v11 }
 0x6bb   : > { %2424 = vmatpush.msrb.mxu1 %v5919_v24  ;;  %v2655_v24 = vpop.f32.mrf.mxu3 }
 0x6bc   : > { %v8181_v48 = vsel %vm949_vm6, %v2655_v24, -1e+30 }
 0x6bd   : > { %2425 = vmatpush.msrb.mxu1 %v5920_v40  ;;  %v5923_v40 = vpop.permute.xlu1 %5922 }
 0x6c6   : > { %5927 = vrot.lane.b32.xlu0 %v10041_v27, %s6367_s16 }
 0x6c7   : > { %v2173_v63 = vpop.xlane.xlu2 %2172 }
 0x6c8   : > { %v2204_v37 = vsub.f32 %v8044_v8, %v2173_v63  ;;  %v2141_v63 = vpop.f32.mrf.mxu2 }
 0x6ca   : > { %v2220_v43 = vmul.f32 1.442695, %v2204_v37 }
 0x6cc   : > { %6109 = vpow2.f32 %v2220_v43 }
 0x6cf   : > { %v1769_v29 = vpop.xlane.xlu0 %1768  ;;  %v8151_v16 = vpop.xlane.xlu2 %2174 }
 0x6d0   : > { %6111 = vrcp.f32 %v1769_v29 }
 0x6d1   : > { %6113 = vpow2.f32 %v2740_v51  ;;  %v8192_v51 = vsel %vm949_vm6, %v8085_v9, -1e+30  ;;  %v5915_v9 = vunpack.i.h.bf16 %v8143_v2 }
 0x6d2   : > { %v8153_v50 = vpop.eup %6109 }
 0x6d3   : > { %2252 = vadd.xlane.f32.xlu2 %v8153_v50 }
 0x6d6   : > { %v6112_v25 = vpop.eup %6111 }
 0x6d7   : > { %v1801_v53 = vmul.f32 %v6112_v25, %v1769_v29  ;;  %v2177_v27 = vpop.xlane.xlu2 %2176  ;;  %v2699_v49 = vpop.xlane.xlu0 %2698 }
 0x6d8   : > { %v2206_v8 = vsub.f32 %v8064_v35, %v2177_v27  ;;  %v8170_v35 = vpop.eup %6113  ;;  %v8194_v27 = vpop.f32.mrf.mxu3  ;;  %v2724_v24 = vsub.f32 %v8059_v38, %v2699_v49  ;;  %v5925_v38 = vunpack.i.h.bf16 %v5923_v40  ;;  %v2205_v49 = vsub.f32 %v8054_v32, %v8151_v16 }
 0x6d9   : > { %v1817_v30 = vsub.f32 2.0, %v1801_v53 }
 0x6da   : > { %v2224_v22 = vmul.f32 1.442695, %v2206_v8  ;;  %v5905_v8 = vunpack.i.h.bf16 %v5903_v54  ;;  %v2222_v16 = vmul.f32 1.442695, %v2205_v49 }
 0x6db   : > { %v1833_v59 = vmul.f32 %v6112_v25, %v1817_v30  ;;  %2704 = vmax.xlane.f32.xlu2 %v8162_v42  ;;  %v8185_v25 = vsel %vm949_vm6, %v2141_v63, -1e+30  ;;  %v5933_v30 = vpop.permute.xlu1 %5932 }
 0x6dc   : > { %6115 = vpow2.f32 %v2224_v22  ;;  %v5935_v32 = vunpack.i.h.bf16 %v5933_v30 }
 0x6dd   : > { %v1849_v20 = vmul.f32 %v8047_v44, %v1833_v59  ;;  %v2744_v44 = vmul.f32 1.442695, %v2723_v23  ;;  %v2144_v23 = vpop.f32.mrf.mxu2 }
 0x6df   : > { %1959 = vmatmul.f32.gmra.mxu0 %v1849_v20  ;;  %v8168_v47 = vpop.xlane.xlu2 %2178  ;;  %6117 = vpow2.f32 %v2744_v44  ;;  %v5914_v20 = vunpack.i.l.bf16 %v8143_v2  ;;  %v5924_v44 = vunpack.i.l.bf16 %v5923_v40  ;;  %v8230_v40 = vsel %vm949_vm6, %v8166_v34, -1e+30 }
 0x6e0   : > { %v2661_v63 = vpop.f32.mrf.mxu3 }
 0x6e1   : > { %v8217_v2 = vsel %vm949_vm6, %v2661_v63, -1e+30 }
 0x6e2   : > { %v8172_v11 = vpop.eup %6115 }
 0x6e3   : > { %2256 = vadd.xlane.f32.xlu1 %v8172_v11  ;;  %2772 = vadd.xlane.f32.xlu2 %v8170_v35 }
 0x6e5   : > { %v8197_v22 = vpop.eup %6117 }
 0x6e7   : > { %v2181_v37 = vpop.xlane.xlu2 %2180 }
 0x6e8   : > { %v2208_v43 = vsub.f32 %v8079_v10, %v2181_v37  ;;  %v5904_v10 = vunpack.i.l.bf16 %v5903_v54  ;;  %v8209_v54 = vsel %vm949_vm6, %v8089_v45, -1e+30  ;;  %v2746_v37 = vmul.f32 1.442695, %v2724_v24 }
 0x6e9   : > { %v5934_v45 = vunpack.i.l.bf16 %v5933_v30 }
 0x6ea   : > { %v5893_v29 = vpop.permute.xlu0 %5892  ;;  %v2228_v0 = vmul.f32 1.442695, %v2208_v43 }
 0x6eb   : > { %v5894_v39 = vunpack.i.l.bf16 %v5893_v29  ;;  %2708 = vmax.xlane.f32.xlu2 %v8181_v48  ;;  %2194 = vmax.xlane.f32.xlu1 %v8185_v25  ;;  %v5895_v53 = vunpack.i.h.bf16 %v5893_v29 }
 0x6ec   : > { %6119 = vpow2.f32 %v2228_v0  ;;  %v8221_v0 = vsel %vm949_vm6, %v2144_v23, -1e+30 }
 0x6ed   : > { %2932 = vmatpush.msra.mxu0 %v5894_v39  ;;  %6121 = vpow2.f32 %v2746_v37  ;;  %v2664_v37 = vpop.f32.mrf.mxu3 }
 0x6ef   : > { %2933 = vmatpush.msra.mxu0 %v5895_v53 }
 0x6f0   : > { %2182 = vmax.xlane.f32.xlu0 %v8192_v51 }
 0x6f1   : > { %2934 = vmatpush.msra.mxu0 %v5904_v10  ;;  %v2722_v10 = vsub.f32 %v7926_v21, %v8066_v61  ;;  %v2207_v21 = vsub.f32 %v8071_v41, %v8168_v47  ;;  %v8260_v41 = vsel %vm949_vm6, %v2664_v37, -1e+30 }
 0x6f2   : > { %v8199_v59 = vpop.eup %6119 }
 0x6f3   : > { %2935 = vmatpush.msra.mxu0 %v5905_v8  ;;  %2260 = vadd.xlane.f32.xlu2 %v8199_v59  ;;  %v8236_v8 = vpop.eup %6121  ;;  %v2742_v34 = vmul.f32 1.442695, %v2722_v10  ;;  %v2771_v10 = vpop.xlane.xlu2 %2770 }
 0x6f4   : > { %2776 = vadd.xlane.f32.xlu1 %v8197_v22 }
 0x6f5   : > { %2936 = vmatpush.msra.mxu0 %v5914_v20  ;;  %v2667_v12 = vpop.f32.mrf.mxu3 }
 0x6f7   : > { %2937 = vmatpush.msra.mxu0 %v5915_v9  ;;  %v2185_v43 = vpop.xlane.xlu1 %2184 }
 0x6f8   : > { %2702 = vmax.xlane.f32.xlu0 %v8209_v54  ;;  %v2210_v29 = vsub.f32 %v8097_v19, %v2185_v43  ;;  %v8225_v19 = vpop.f32.mrf.mxu2 }
 0x6f9   : > { %2938 = vmatpush.msra.mxu0 %v5924_v44  ;;  %v2226_v44 = vmul.f32 1.442695, %v2207_v21 }
 0x6fa   : > { %v2232_v39 = vmul.f32 1.442695, %v2210_v29 }
 0x6fb   : > { %2939 = vmatpush.msra.mxu0 %v5925_v38  ;;  %2196 = vmax.xlane.f32.xlu2 %v8221_v0 }
 0x6fc   : > { %2712 = vmax.xlane.f32.xlu1 %v8217_v2  ;;  %6123 = vpow2.f32 %v2232_v39 }
 0x6fd   : > { %2940 = vmatpush.msra.mxu0 %v5934_v45  ;;  %6125 = vpow2.f32 %v2222_v16 }
 0x6ff   : > { %2941 = vmatpush.msra.mxu0 %v5935_v32  ;;  %v2187_v53 = vpop.xlane.xlu1 %2186  ;;  %v8276_v32 = vsel %vm949_vm6, %v8194_v27, -1e+30 }
 0x700   : > { %2192 = vmax.xlane.f32.xlu0 %v8230_v40  ;;  %v2211_v30 = vsub.f32 %v8105_v52, %v2187_v53  ;;  %v2150_v9 = vpop.f32.mrf.mxu2 }
 0x701   : > { %v8251_v52 = vsel %vm949_vm6, %v2150_v9, -1e+30 }
 0x702   : > { %v8238_v20 = vpop.eup %6123  ;;  %v2234_v23 = vmul.f32 1.442695, %v2211_v30 }
 0x703   : > { %2778 = vadd.xlane.f32.xlu2 %v8236_v8  ;;  %v8242_v24 = vpop.eup %6125 }
 0x704   : > { %2264 = vadd.xlane.f32.xlu1 %v8238_v20  ;;  %6127 = vpow2.f32 %v2234_v23 }
 0x705   : > { %6129 = vpow2.f32 %v2742_v34 }
 0x706   : > { %6131 = vpow2.f32 %v2226_v44 }
 0x708   : > { %2254 = vadd.xlane.f32.xlu0 %v8242_v24  ;;  %v2153_v38 = vpop.f32.mrf.mxu2 }
 0x709   : > { %v8268_v49 = vsel %vm949_vm6, %v2153_v38, -1e+30 }
 0x70a   : > { %v8247_v61 = vpop.eup %6127 }
 0x70b   : > { %2266 = vadd.xlane.f32.xlu2 %v8247_v61  ;;  %v8255_v63 = vpop.eup %6129 }
 0x70c   : > { %2200 = vmax.xlane.f32.xlu1 %v8251_v52  ;;  %v8263_v43 = vpop.eup %6131 }
 0x710   : > { %2774 = vadd.xlane.f32.xlu0 %v8255_v63 }
 0x713   : > { %2714 = vmax.xlane.f32.xlu2 %v8260_v41 }
 0x715   : > { %v2767_v47 = vpop.xlane.xlu0 %2766 }
 0x716   : > { %6133 = vrcp.f32 %v2767_v47 }
 0x717   : > { %6135 = vrcp.f32 %v2771_v10 }
 0x718   : > { %2258 = vadd.xlane.f32.xlu0 %v8263_v43 }
 0x71b   : > { %2202 = vmax.xlane.f32.xlu2 %v8268_v49 }
 0x71c   : > { %v6134_v29 = vpop.eup %6133 }
 0x71d   : > { %v2814_v45 = vmul.f32 %v6134_v29, %v2767_v47  ;;  %v8271_v39 = vpop.xlane.xlu0 %2700  ;;  %v6136_v34 = vpop.eup %6135 }
 0x71e   : > { %v2816_v44 = vmul.f32 %v6136_v34, %v2771_v10 }
 0x71f   : > { %v2830_v16 = vsub.f32 2.0, %v2814_v45  ;;  %v8281_v45 = vpop.xlane.xlu2 %2188 }
 0x720   : > { %2710 = vmax.xlane.f32.xlu0 %v8276_v32  ;;  %v2832_v38 = vsub.f32 2.0, %v2816_v44 }
 0x721   : > { %v2846_v53 = vmul.f32 %v6134_v29, %v2830_v16 }
 0x722   : > { %v2848_v29 = vmul.f32 %v6136_v34, %v2832_v38 }
 0x723   : > { %v2862_v30 = vmul.f32 %v8130_v28, %v2846_v53 }
 0x724   : > { %v2864_v53 = vmul.f32 %v8087_v36, %v2848_v29 }
 0x725   : > { %v2769_v23 = vpop.xlane.xlu0 %2768  ;;  %2942 = vmatmul.f32.vlgmr.msra.gmra.mxu0 %v2862_v30  ;;  %v8284_v30 = vpop.f32.mrf.mxu0 }
 0x726   : > { %6137 = vrcp.f32 %v2769_v23 }
 0x727   : > { %v2191_v10 = vpop.xlane.xlu2 %2190 }
 0x72c   : > { %v6138_v9 = vpop.eup %6137 }
 0x72d   : > { %v2815_v21 = vmul.f32 %v6138_v9, %v2769_v23  ;;  %v8286_v23 = vpop.f32.mrf.mxu0 }
 0x72f   : > { %v2831_v37 = vsub.f32 2.0, %v2815_v21  ;;  %v2707_v21 = vpop.xlane.xlu1 %2706 }
 0x731   : > { %v2847_v47 = vmul.f32 %v6138_v9, %v2831_v37 }
 0x733   : > { %v2863_v27 = vmul.f32 %v8145_v56, %v2847_v47 }
 0x735   : > { %2945 = vmatmul.f32.gmra.mxu0 %v2863_v27  ;;  %v8288_v34 = vpop.f32.mrf.mxu0 }
 0x738   : > { %v5928_v16 = vpop.permute.xlu0 %5927 }
 0x739   : > { %v5929_v33 = vunpack.i.l.bf16 %v5928_v16  ;;  %v5930_v28 = vunpack.i.h.bf16 %v5928_v16 }
 0x73b   : > { %2426 = vmatpush.msrb.mxu1 %v5929_v33 }
 0x73d   : > { %2427 = vmatpush.msrb.mxu1 %v5930_v28  ;;  %2948 = vmatmul.f32.gmra.mxu0 %v2864_v53  ;;  %v8294_v28 = vpop.f32.mrf.mxu0 }
 0x746   : > { %v2253_v9 = vpop.xlane.xlu2 %2252 }
 0x747   : > { %6139 = vrcp.f32 %v2253_v9 }
 0x74d   : > { %v6140_v56 = vpop.eup %6139 }
 0x74e   : > { %v2300_v44 = vmul.f32 %v6140_v56, %v2253_v9  ;;  %v2705_v37 = vpop.xlane.xlu2 %2704 }
 0x74f   : > { %v2727_v33 = vsub.f32 %v8162_v42, %v2705_v37  ;;  %v8302_v37 = vpop.f32.mrf.mxu0 }
 0x750   : > { %v2316_v47 = vsub.f32 2.0, %v2300_v44 }
 0x751   : > { %v2752_v38 = vmul.f32 1.442695, %v2727_v33 }
 0x752   : > { %v2332_v36 = vmul.f32 %v6140_v56, %v2316_v47 }
 0x753   : > { %6141 = vpow2.f32 %v2752_v38 }
 0x754   : > { %v2348_v27 = vmul.f32 %v8153_v50, %v2332_v36 }
 0x756   : > { %v8292_v29 = vpop.xlane.xlu1 %2256  ;;  %2428 = vmatmul.f32.vlgmr.msrb.gmra.mxu1 %v2348_v27  ;;  %v2773_v16 = vpop.xlane.xlu2 %2772 }
 0x757   : > { %6143 = vrcp.f32 %v2773_v16  ;;  %v8308_v55 = vpop.f32.mrf.mxu0 }
 0x759   : > { %v8296_v53 = vpop.eup %6141 }
 0x75a   : > { %2784 = vadd.xlane.f32.xlu2 %v8296_v53 }
 0x75d   : > { %v6144_v9 = vpop.eup %6143 }
 0x75e   : > { %v8299_v62 = vpop.xlane.xlu2 %2708  ;;  %v2195_v42 = vpop.xlane.xlu1 %2194  ;;  %v2817_v44 = vmul.f32 %v6144_v9, %v2773_v16 }
 0x75f   : > { %v2215_v56 = vsub.f32 %v8185_v25, %v2195_v42 }
 0x760   : > { %v2833_v50 = vsub.f32 2.0, %v2817_v44  ;;  %v2213_v44 = vsub.f32 %v8126_v6, %v2191_v10  ;;  %v2728_v6 = vsub.f32 %v8115_v1, %v2707_v21 }
 0x761   : > { %v2242_v33 = vmul.f32 1.442695, %v2215_v56 }
 0x762   : > { %v2849_v38 = vmul.f32 %v6144_v9, %v2833_v50 }
 0x763   : > { %v2183_v47 = vpop.xlane.xlu0 %2182  ;;  %6145 = vpow2.f32 %v2242_v33  ;;  %v8320_v33 = vpop.f32.mrf.mxu0 }
 0x764   : > { %v2209_v36 = vsub.f32 %v8192_v51, %v2183_v47  ;;  %v2865_v18 = vmul.f32 %v8170_v35, %v2849_v38  ;;  %v2238_v35 = vmul.f32 1.442695, %v2213_v44 }
 0x766   : > { %v2230_v27 = vmul.f32 1.442695, %v2209_v36  ;;  %v8306_v31 = vpop.xlane.xlu2 %2260  ;;  %2951 = vmatmul.f32.gmra.mxu0 %v2865_v18  ;;  %v2725_v18 = vsub.f32 %v8138_v14, %v8271_v39  ;;  %v2212_v14 = vsub.f32 %v8119_v26, %v8281_v45  ;;  %v2754_v39 = vmul.f32 1.442695, %v2728_v6 }
 0x767   : > { %v2777_v10 = vpop.xlane.xlu1 %2776 }
 0x768   : > { %6147 = vpow2.f32 %v2230_v27  ;;  %v2748_v47 = vmul.f32 1.442695, %v2725_v18 }
 0x769   : > { %v8310_v16 = vpop.eup %6145 }
 0x76a   : > { %2274 = vadd.xlane.f32.xlu2 %v8310_v16 }
 0x76b   : > { %v2703_v25 = vpop.xlane.xlu0 %2702  ;;  %v8341_v21 = vpop.f32.mrf.mxu0 }
 0x76c   : > { %v2726_v42 = vsub.f32 %v8209_v54, %v2703_v25  ;;  %v8327_v54 = vsel %vm949_vm6, %v8225_v19, -1e+30  ;;  %v2236_v19 = vmul.f32 1.442695, %v2212_v14 }
 0x76e   : > { %v8314_v9 = vpop.eup %6147  ;;  %v2750_v51 = vmul.f32 1.442695, %v2726_v42  ;;  %v2197_v56 = vpop.xlane.xlu2 %2196 }
 0x76f   : > { %2262 = vadd.xlane.f32.xlu0 %v8314_v9  ;;  %v2216_v26 = vsub.f32 %v8221_v0, %v2197_v56 }
 0x770   : > { %6149 = vpow2.f32 %v2750_v51  ;;  %v2713_v51 = vpop.xlane.xlu1 %2712 }
 0x771   : > { %6151 = vpow2.f32 %v2238_v35  ;;  %v2731_v5 = vsub.f32 %v8217_v2, %v2713_v51 }
 0x772   : > { %6153 = vpow2.f32 %v2748_v47  ;;  %v2244_v47 = vmul.f32 1.442695, %v2216_v26 }
 0x773   : > { %v2193_v50 = vpop.xlane.xlu0 %2192  ;;  %6155 = vrcp.f32 %v8292_v29  ;;  %v8358_v56 = vpop.f32.mrf.mxu0  ;;  %v2760_v2 = vmul.f32 1.442695, %v2731_v5  ;;  %v2729_v5 = vsub.f32 %v8181_v48, %v8299_v62 }
 0x775   : > { %v2756_v48 = vmul.f32 1.442695, %v2729_v5 }
 0x776   : > { %v8322_v38 = vpop.eup %6149  ;;  %v8330_v36 = vpop.xlane.xlu2 %2778 }
 0x777   : > { %2198 = vmax.xlane.f32.xlu0 %v8327_v54  ;;  %2782 = vadd.xlane.f32.xlu1 %v8322_v38  ;;  %v8337_v25 = vpop.eup %6151 }
 0x778   : > { %v8339_v1 = vpop.eup %6153  ;;  %v8363_v51 = vpop.xlane.xlu1 %2264 }
 0x779   : > { %v6156_v45 = vpop.eup %6155 }
 0x77a   : > { %v2302_v14 = vmul.f32 %v6156_v45, %v8292_v29 }
 0x77b   : > { %v2255_v27 = vpop.xlane.xlu0 %2254 }
 0x77c   : > { %6157 = vrcp.f32 %v2255_v27  ;;  %v2318_v26 = vsub.f32 2.0, %v2302_v14 }
 0x77d   : > { %6159 = vpow2.f32 %v2754_v39 }
 0x77e   : > { %v8343_v42 = vpop.xlane.xlu2 %2266  ;;  %6161 = vpow2.f32 %v2236_v19 }
 0x77f   : > { %2780 = vadd.xlane.f32.xlu0 %v8339_v1  ;;  %2270 = vadd.xlane.f32.xlu1 %v8337_v25  ;;  %6163 = vrcp.f32 %v2777_v10 }
 0x782   : > { %v6158_v44 = vpop.eup %6157 }
 0x783   : > { %v2301_v18 = vmul.f32 %v6158_v44, %v2255_v27  ;;  %v2775_v35 = vpop.xlane.xlu0 %2774  ;;  %v8348_v6 = vpop.eup %6159  ;;  %v2214_v27 = vsub.f32 %v8230_v40, %v2193_v50 }
 0x784   : > { %6165 = vrcp.f32 %v2775_v35  ;;  %v8351_v57 = vpop.eup %6161 }
 0x785   : > { %v2317_v39 = vsub.f32 2.0, %v2301_v18  ;;  %6167 = vpow2.f32 %v2244_v47  ;;  %v6164_v18 = vpop.eup %6163  ;;  %v2240_v7 = vmul.f32 1.442695, %v2214_v27  ;;  %v2334_v47 = vmul.f32 %v6156_v45, %v2318_v26 }
 0x786   : > { %v8354_v19 = vpop.xlane.xlu2 %2714  ;;  %6169 = vrcp.f32 %v8306_v31  ;;  %v2819_v50 = vmul.f32 %v6164_v18, %v2777_v10 }
 0x787   : > { %2268 = vadd.xlane.f32.xlu0 %v8351_v57  ;;  %2786 = vadd.xlane.f32.xlu1 %v8348_v6  ;;  %v2333_v0 = vmul.f32 %v6158_v44, %v2317_v39  ;;  %6171 = vrcp.f32 %v8330_v36 }
 0x788   : > { %v2835_v27 = vsub.f32 2.0, %v2819_v50 }
 0x789   : > { %v2349_v29 = vmul.f32 %v8242_v24, %v2333_v0  ;;  %v8370_v24 = vsel %vm949_vm6, %v2667_v12, -1e+30  ;;  %v2350_v12 = vmul.f32 %v8172_v11, %v2334_v47 }
 0x78a   : > { %v6166_v17 = vpop.eup %6165  ;;  %v2851_v11 = vmul.f32 %v6164_v18, %v2835_v27 }
 0x78b   : > { %2431 = vmatmul.f32.gmra.mxu1 %v2349_v29  ;;  %v2259_v3 = vpop.xlane.xlu0 %2258  ;;  %v2818_v44 = vmul.f32 %v6166_v17, %v2775_v35  ;;  %v8366_v40 = vpop.eup %6167 }
 0x78c   : > { %6173 = vrcp.f32 %v2259_v3  ;;  %v8376_v35 = vpop.f32.mrf.mxu0  ;;  %v6170_v0 = vpop.eup %6169 }
 0x78d   : > { %v2834_v14 = vsub.f32 2.0, %v2818_v44  ;;  %6175 = vpow2.f32 %v2760_v2  ;;  %v6172_v10 = vpop.eup %6171 }
 0x78e   : > { %v2203_v39 = vpop.xlane.xlu2 %2202  ;;  %6177 = vpow2.f32 %v2240_v7  ;;  %v2304_v7 = vmul.f32 %v6170_v0, %v8306_v31  ;;  %v2820_v47 = vmul.f32 %v6172_v10, %v8330_v36  ;;  %v2867_v36 = vmul.f32 %v8197_v22, %v2851_v11 }
 0x78f   : > { %2716 = vmax.xlane.f32.xlu0 %v8370_v24  ;;  %2276 = vadd.xlane.f32.xlu1 %v8366_v40  ;;  %v2850_v45 = vmul.f32 %v6166_v17, %v2834_v14  ;;  %v2219_v60 = vsub.f32 %v8268_v49, %v2203_v39  ;;  %v2201_v17 = vpop.xlane.xlu1 %2200  ;;  %6179 = vpow2.f32 %v2756_v48 }
 0x790   : > { %v2320_v5 = vsub.f32 2.0, %v2304_v7  ;;  %v2836_v39 = vsub.f32 2.0, %v2820_v47 }
 0x791   : > { %v2866_v26 = vmul.f32 %v8255_v63, %v2850_v45  ;;  %v2250_v49 = vmul.f32 1.442695, %v2219_v60 }
 0x792   : > { %v6174_v62 = vpop.eup %6173  ;;  %v2852_v27 = vmul.f32 %v6172_v10, %v2836_v39 }
 0x793   : > { %2434 = vmatmul.f32.gmra.mxu1 %v2350_v12  ;;  %v2711_v29 = vpop.xlane.xlu0 %2710  ;;  %v2303_v2 = vmul.f32 %v6174_v62, %v2259_v3  ;;  %2954 = vmatmul.f32.gmra.mxu0 %v2866_v26  ;;  %v8382_v58 = vpop.eup %6175  ;;  %v2218_v3 = vsub.f32 %v8251_v52, %v2201_v17  ;;  %v2336_v52 = vmul.f32 %v6170_v0, %v2320_v5 }
 0x794   : > { %v2730_v44 = vsub.f32 %v8276_v32, %v2711_v29  ;;  %v8385_v14 = vpop.eup %6177  ;;  %v8391_v31 = vpop.f32.mrf.mxu0 }
 0x795   : > { %v2319_v63 = vsub.f32 2.0, %v2303_v2  ;;  %v2248_v45 = vmul.f32 1.442695, %v2218_v3  ;;  %v8395_v60 = vpop.eup %6179  ;;  %v2352_v22 = vmul.f32 %v8199_v59, %v2336_v52 }
 0x796   : > { %v2758_v50 = vmul.f32 1.442695, %v2730_v44 }
 0x797   : > { %2272 = vadd.xlane.f32.xlu0 %v8385_v14  ;;  %2792 = vadd.xlane.f32.xlu1 %v8382_v58  ;;  %v2335_v32 = vmul.f32 %v6174_v62, %v2319_v63 }
 0x798   : > { %6181 = vpow2.f32 %v2758_v50 }
 0x799   : > { %6183 = vpow2.f32 %v2250_v49  ;;  %v2351_v18 = vmul.f32 %v8263_v43, %v2335_v32  ;;  %v2868_v43 = vmul.f32 %v8236_v8, %v2852_v27 }
 0x79a   : > { %6185 = vpow2.f32 %v2248_v45  ;;  %v2732_v45 = vsub.f32 %v8260_v41, %v8354_v19 }
 0x79b   : > { %2437 = vmatmul.f32.gmra.mxu1 %v2351_v18  ;;  %2957 = vmatmul.f32.gmra.mxu0 %v2867_v36  ;;  %6187 = vrcp.f32 %v8363_v51 }
 0x79c   : > { %v8406_v62 = vpop.f32.mrf.mxu0 }
 0x79e   : > { %v8397_v12 = vpop.eup %6181 }
 0x79f   : > { %v8399_v26 = vpop.eup %6183  ;;  %2788 = vadd.xlane.f32.xlu0 %v8395_v60  ;;  %2790 = vadd.xlane.f32.xlu2 %v8397_v12 }
 0x7a0   : > { %2282 = vadd.xlane.f32.xlu1 %v8399_v26  ;;  %v8408_v48 = vpop.eup %6185 }
 0x7a1   : > { %v6188_v49 = vpop.eup %6187 }
 0x7a2   : > { %v2306_v3 = vmul.f32 %v6188_v49, %v8363_v51 }
 0x7a3   : > { %2440 = vmatmul.f32.gmra.mxu1 %v2352_v22  ;;  %2960 = vmatmul.f32.gmra.mxu0 %v2868_v43  ;;  %v2762_v43 = vmul.f32 1.442695, %v2732_v45 }
 0x7a4   : > { %v8411_v0 = vpop.f32.mrf.mxu0  ;;  %v2322_v27 = vsub.f32 2.0, %v2306_v3 }
 0x7a7   : > { %2280 = vadd.xlane.f32.xlu2 %v8408_v48 }
 0x7ac   : > { %v8413_v10 = vpop.f32.mrf.mxu0 }
 0x7b4   : > { %v8415_v29 = vpop.f32.mrf.mxu0 }
 0x7bc   : > { %v8417_v2 = vpop.f32.mrf.mxu0 }
 0x7c4   : > { %v8419_v44 = vpop.f32.mrf.mxu0 }
 0x7cc   : > { %v2946_v8 = vpop.f32.mrf.mxu0 }
 0x7d3   : > { %v2429_v59 = vpop.f32.mrf.mxu1 }
 0x7d4   : > { %3071 = vrot.lane.b32.xlu1 %v2429_v59, %s6369_s18  ;;  %v2949_v17 = vpop.f32.mrf.mxu0  ;;  %v2338_v59 = vmul.f32 %v6188_v49, %v2322_v27 }
 0x7dc   : > { %3137 = vrot.lane.b32.xlu1 %v2946_v8, %s6370_s19 }
 0x7e2   : > { %v2263_v7 = vpop.xlane.xlu0 %2262 }
 0x7e3   : > { %6189 = vrcp.f32 %v2263_v7  ;;  %v2952_v5 = vpop.f32.mrf.mxu0 }
 0x7e4   : > { %3139 = vrot.lane.b32.xlu1 %v2949_v17, %s6370_s19  ;;  %6191 = vrcp.f32 %v8343_v42 }
 0x7e9   : > { %v6190_v11 = vpop.eup %6189 }
 0x7ea   : > { %v2305_v47 = vmul.f32 %v6190_v11, %v2263_v7  ;;  %v2199_v63 = vpop.xlane.xlu0 %2198  ;;  %v2783_v18 = vpop.xlane.xlu1 %2782 }
 0x7eb   : > { %v2217_v50 = vsub.f32 %v8327_v54, %v2199_v63  ;;  %v6192_v22 = vpop.eup %6191  ;;  %v2785_v7 = vpop.xlane.xlu2 %2784 }
 0x7ec   : > { %v2321_v32 = vsub.f32 2.0, %v2305_v47  ;;  %3141 = vrot.lane.b32.xlu1 %v2952_v5, %s6370_s19  ;;  %v2307_v51 = vmul.f32 %v6192_v22, %v8343_v42 }
 0x7ed   : > { %v2246_v39 = vmul.f32 1.442695, %v2217_v50 }
 0x7ee   : > { %v2337_v36 = vmul.f32 %v6190_v11, %v2321_v32  ;;  %v2323_v17 = vsub.f32 2.0, %v2307_v51 }
 0x7ef   : > { %6193 = vpow2.f32 %v2246_v39 }
 0x7f0   : > { %v2353_v52 = vmul.f32 %v8314_v9, %v2337_v36  ;;  %6195 = vrcp.f32 %v2783_v18  ;;  %v2354_v9 = vmul.f32 %v8238_v20, %v2338_v59  ;;  %v2339_v49 = vmul.f32 %v6192_v22, %v2323_v17 }
 0x7f2   : > { %2443 = vmatmul.f32.gmra.mxu1 %v2353_v52  ;;  %v2781_v54 = vpop.xlane.xlu0 %2780  ;;  %v2271_v41 = vpop.xlane.xlu1 %2270  ;;  %v2355_v36 = vmul.f32 %v8247_v61, %v2339_v49 }
 0x7f3   : > { %6197 = vrcp.f32 %v2781_v54 }
 0x7f4   : > { %6199 = vpow2.f32 %v2762_v43 }
 0x7f5   : > { %v8433_v8 = vpop.eup %6193  ;;  %6201 = vrcp.f32 %v2785_v7 }
 0x7f6   : > { %2278 = vadd.xlane.f32.xlu0 %v8433_v8  ;;  %v6196_v19 = vpop.eup %6195 }
 0x7f7   : > { %v2822_v50 = vmul.f32 %v6196_v19, %v2783_v18 }
 0x7f9   : > { %v6198_v11 = vpop.eup %6197  ;;  %v2838_v39 = vsub.f32 2.0, %v2822_v50  ;;  %v2275_v50 = vpop.xlane.xlu2 %2274 }
 0x7fa   : > { %v2821_v47 = vmul.f32 %v6198_v11, %v2781_v54  ;;  %2446 = vmatmul.f32.gmra.mxu1 %v2354_v9  ;;  %v2269_v63 = vpop.xlane.xlu0 %2268  ;;  %v8437_v3 = vpop.eup %6199 }
 0x7fb   : > { %6203 = vrcp.f32 %v2269_v63  ;;  %v6202_v5 = vpop.eup %6201  ;;  %v2787_v27 = vpop.xlane.xlu1 %2786  ;;  %v2854_v43 = vmul.f32 %v6196_v19, %v2838_v39 }
 0x7fc   : > { %v2837_v42 = vsub.f32 2.0, %v2821_v47  ;;  %6205 = vrcp.f32 %v2271_v41  ;;  %v2823_v59 = vmul.f32 %v6202_v5, %v2785_v7 }
 0x7fd   : > { %6207 = vrcp.f32 %v2787_v27 }
 0x7fe   : > { %v2853_v32 = vmul.f32 %v6198_v11, %v2837_v42  ;;  %2794 = vadd.xlane.f32.xlu0 %v8437_v3  ;;  %v2839_v47 = vsub.f32 2.0, %v2823_v59 }
 0x800   : > { %v2869_v20 = vmul.f32 %v8339_v1, %v2853_v32  ;;  %v2870_v1 = vmul.f32 %v8322_v38, %v2854_v43  ;;  %v2855_v7 = vmul.f32 %v6202_v5, %v2839_v47 }
 0x801   : > { %v6204_v45 = vpop.eup %6203 }
 0x802   : > { %v6206_v52 = vpop.eup %6205  ;;  %v2308_v54 = vmul.f32 %v6204_v45, %v2269_v63  ;;  %2449 = vmatmul.f32.gmra.mxu1 %v2355_v36  ;;  %2963 = vmatmul.f32.gmra.mxu0 %v2869_v20  ;;  %v2717_v18 = vpop.xlane.xlu0 %2716  ;;  %v2871_v20 = vmul.f32 %v8296_v53, %v2855_v7 }
 0x803   : > { %v2733_v22 = vsub.f32 %v8370_v24, %v2717_v18  ;;  %v2309_v17 = vmul.f32 %v6206_v52, %v2271_v41  ;;  %v6208_v42 = vpop.eup %6207  ;;  %v2277_v32 = vpop.xlane.xlu1 %2276 }
 0x804   : > { %v2324_v51 = vsub.f32 2.0, %v2308_v54  ;;  %v2824_v19 = vmul.f32 %v6208_v42, %v2787_v27 }
 0x805   : > { %v2764_v9 = vmul.f32 1.442695, %v2733_v22  ;;  %v2325_v63 = vsub.f32 2.0, %v2309_v17 }
 0x806   : > { %v2340_v11 = vmul.f32 %v6204_v45, %v2324_v51  ;;  %v2840_v39 = vsub.f32 2.0, %v2824_v19 }
 0x807   : > { %6209 = vpow2.f32 %v2764_v9  ;;  %v2341_v41 = vmul.f32 %v6206_v52, %v2325_v63 }
 0x808   : > { %v2356_v61 = vmul.f32 %v8351_v57, %v2340_v11  ;;  %v2856_v22 = vmul.f32 %v6208_v42, %v2840_v39 }
 0x809   : > { %v2357_v36 = vmul.f32 %v8337_v25, %v2341_v41 }
 0x80a   : > { %2452 = vmatmul.f32.gmra.mxu1 %v2356_v61  ;;  %v2273_v49 = vpop.xlane.xlu0 %2272  ;;  %2966 = vmatmul.f32.gmra.mxu0 %v2870_v1  ;;  %v2872_v9 = vmul.f32 %v8348_v6, %v2856_v22  ;;  %v3236_v6 = vld [vmem:[%s9964_s4 + $0x18] sm:$0xff] }
 0x80b   : > { %6211 = vrcp.f32 %v2273_v49  ;;  %v2793_v59 = vpop.xlane.xlu1 %2792  ;;  %3301 = vmatpush.msra.mxu2 %v3236_v6 }
 0x80c   : > { %6213 = vrcp.f32 %v2275_v50 }
 0x80d   : > { %v8445_v24 = vpop.eup %6209 }
 0x80e   : > { %2796 = vadd.xlane.f32.xlu2 %v8445_v24 }
 0x810   : > { %v2955_v38 = vpop.f32.mrf.mxu0 }
 0x811   : > { %v6212_v57 = vpop.eup %6211  ;;  %3143 = vrot.lane.b32.xlu1 %v2955_v38, %s6370_s19 }
 0x812   : > { %v6214_v45 = vpop.eup %6213  ;;  %v2310_v54 = vmul.f32 %v6212_v57, %v2273_v49  ;;  %3007 = vrot.lane.b32.xlu0 %v8284_v30, %s6371_s20  ;;  %v2789_v5 = vpop.xlane.xlu0 %2788  ;;  %2455 = vmatmul.f32.gmra.mxu1 %v2357_v36 }
 0x813   : > { %v2791_v27 = vpop.xlane.xlu2 %2790  ;;  %6215 = vrcp.f32 %v2789_v5  ;;  %2969 = vmatmul.f32.gmra.mxu0 %v2871_v20  ;;  %v2311_v18 = vmul.f32 %v6214_v45, %v2275_v50 }
 0x814   : > { %6217 = vrcp.f32 %v2277_v32  ;;  %v2326_v52 = vsub.f32 2.0, %v2310_v54 }
 0x815   : > { %6219 = vrcp.f32 %v2791_v27  ;;  %v2327_v51 = vsub.f32 2.0, %v2311_v18 }
 0x816   : > { %v2342_v25 = vmul.f32 %v6212_v57, %v2326_v52  ;;  %6221 = vrcp.f32 %v2793_v59 }
 0x817   : > { %v2343_v47 = vmul.f32 %v6214_v45, %v2327_v51 }
 0x818   : > { %v2358_v53 = vmul.f32 %v8385_v14, %v2342_v25  ;;  %v2958_v17 = vpop.f32.mrf.mxu0 }
 0x819   : > { %v6216_v43 = vpop.eup %6215  ;;  %3145 = vrot.lane.b32.xlu1 %v2958_v17, %s6370_s19 }
 0x81a   : > { %v6218_v30 = vpop.eup %6217  ;;  %v2825_v11 = vmul.f32 %v6216_v43, %v2789_v5  ;;  %3009 = vrot.lane.b32.xlu0 %v8286_v23, %s6371_s20  ;;  %2458 = vmatmul.f32.gmra.mxu1 %v2358_v53  ;;  %v2359_v23 = vmul.f32 %v8310_v16, %v2343_v47 }
 0x81b   : > { %v6220_v61 = vpop.eup %6219  ;;  %2972 = vmatmul.f32.gmra.mxu0 %v2872_v9  ;;  %v2312_v14 = vmul.f32 %v6218_v30, %v2277_v32 }
 0x81c   : > { %v2841_v1 = vsub.f32 2.0, %v2825_v11  ;;  %v2826_v50 = vmul.f32 %v6220_v61, %v2791_v27  ;;  %v6222_v19 = vpop.eup %6221 }
 0x81d   : > { %v2328_v49 = vsub.f32 2.0, %v2312_v14  ;;  %v2827_v57 = vmul.f32 %v6222_v19, %v2793_v59 }
 0x81e   : > { %v2857_v63 = vmul.f32 %v6216_v43, %v2841_v1  ;;  %v2842_v7 = vsub.f32 2.0, %v2826_v50 }
 0x81f   : > { %v2344_v32 = vmul.f32 %v6218_v30, %v2328_v49  ;;  %v2843_v38 = vsub.f32 2.0, %v2827_v57 }
 0x820   : > { %v2873_v42 = vmul.f32 %v8395_v60, %v2857_v63  ;;  %v2961_v41 = vpop.f32.mrf.mxu0  ;;  %v2858_v39 = vmul.f32 %v6220_v61, %v2842_v7  ;;  %v2432_v60 = vpop.f32.mrf.mxu1 }
 0x821   : > { %3147 = vrot.lane.b32.xlu1 %v2961_v41, %s6370_s19  ;;  %v2360_v36 = vmul.f32 %v8366_v40, %v2344_v32 }
 0x822   : > { %3011 = vrot.lane.b32.xlu0 %v8288_v34, %s6371_s20  ;;  %2461 = vmatmul.f32.gmra.mxu1 %v2359_v23  ;;  %v2874_v16 = vmul.f32 %v8397_v12, %v2858_v39  ;;  %v2859_v34 = vmul.f32 %v6222_v19, %v2843_v38 }
 0x823   : > { %2975 = vmatmul.f32.gmra.mxu0 %v2873_v42 }
 0x824   : > { %v2875_v45 = vmul.f32 %v8382_v58, %v2859_v34 }
 0x826   : > { %3135 = vrot.lane.b32.xlu2 %v8419_v44, %s6370_s19 }
 0x828   : > { %v2435_v20 = vpop.f32.mrf.mxu1 }
 0x82a   : > { %3013 = vrot.lane.b32.xlu0 %v8294_v28, %s6371_s20  ;;  %2464 = vmatmul.f32.gmra.mxu1 %v2360_v36  ;;  %v3235_v28 = vld [vmem:[%s9964_s4 + $0x10] sm:$0xff] }
 0x82b   : > { %2978 = vmatmul.f32.gmra.mxu0 %v2874_v16  ;;  %3302 = vmatpush.msra.mxu2 %v3235_v28 }
 0x82e   : > { %3073 = vrot.lane.b32.xlu2 %v2432_v60, %s6369_s18 }
 0x830   : > { %v2438_v40 = vpop.f32.mrf.mxu1 }
 0x832   : > { %3015 = vrot.lane.b32.xlu0 %v8302_v37, %s6371_s20  ;;  %v2281_v37 = vpop.xlane.xlu2 %2280 }
 0x833   : > { %2981 = vmatmul.f32.gmra.mxu0 %v2875_v45  ;;  %6223 = vrcp.f32 %v2281_v37 }
 0x836   : > { %3075 = vrot.lane.b32.xlu2 %v2435_v20, %s6369_s18 }
 0x838   : > { %v2441_v58 = vpop.f32.mrf.mxu1 }
 0x83a   : > { %3017 = vrot.lane.b32.xlu0 %v8308_v55, %s6371_s20  ;;  %v3234_v55 = vld [vmem:[%s9964_s4 + $0x8] sm:$0xff] }
 0x83b   : > { %3303 = vmatpush.msra.mxu2 %v3234_v55 }
 0x83e   : > { %3077 = vrot.lane.b32.xlu2 %v2438_v40, %s6369_s18 }
 0x842   : > { %3019 = vrot.lane.b32.xlu0 %v8320_v33, %s6371_s20 }
 0x846   : > { %3079 = vrot.lane.b32.xlu2 %v2441_v58, %s6369_s18 }
 0x84a   : > { %3021 = vrot.lane.b32.xlu0 %v8341_v21, %s6371_s20  ;;  %v3233_v21 = vld [vmem:[%s9964_s4] sm:$0xff] }
 0x84b   : > { %3304 = vmatpush.msra.mxu2 %v3233_v21 }
 0x852   : > { %3023 = vrot.lane.b32.xlu0 %v8358_v56, %s6371_s20  ;;  %v2283_v56 = vpop.xlane.xlu1 %2282 }
 0x85a   : > { %3025 = vrot.lane.b32.xlu0 %v8376_v35, %s6371_s20  ;;  %v6224_v35 = vpop.eup %6223  ;;  %v3072_v47 = vpop.permute.xlu1 %3071 }
 0x85b   : > { %v2314_v5 = vmul.f32 %v6224_v35, %v2281_v37 }
 0x85d   : > { %v2330_v18 = vsub.f32 2.0, %v2314_v5 }
 0x85f   : > { %v2346_v59 = vmul.f32 %v6224_v35, %v2330_v18 }
 0x861   : > { %v2362_v61 = vmul.f32 %v8408_v48, %v2346_v59 }
 0x862   : > { %3027 = vrot.lane.b32.xlu0 %v8391_v31, %s6371_s20  ;;  %v3138_v41 = vpop.permute.xlu1 %3137 }
 0x869   : > { %v2279_v33 = vpop.xlane.xlu0 %2278 }
 0x86a   : > { %6225 = vrcp.f32 %v2279_v33  ;;  %3029 = vrot.lane.b32.xlu0 %v8406_v62, %s6371_s20  ;;  %v3140_v16 = vpop.permute.xlu1 %3139 }
 0x86b   : > { %6227 = vrcp.f32 %v2283_v56 }
 0x86f   : > { %v2444_v12 = vpop.f32.mrf.mxu1 }
 0x870   : > { %v6226_v44 = vpop.eup %6225  ;;  %3081 = vrot.lane.b32.xlu2 %v2444_v12, %s6369_s18 }
 0x871   : > { %v2313_v31 = vmul.f32 %v6226_v44, %v2279_v33  ;;  %v2795_v54 = vpop.xlane.xlu0 %2794  ;;  %v6228_v52 = vpop.eup %6227 }
 0x872   : > { %6229 = vrcp.f32 %v2795_v54  ;;  %3031 = vrot.lane.b32.xlu0 %v8411_v0, %s6371_s20  ;;  %v2315_v51 = vmul.f32 %v6228_v52, %v2283_v56  ;;  %v3142_v33 = vpop.permute.xlu1 %3141 }
 0x873   : > { %v2329_v62 = vsub.f32 2.0, %v2313_v31  ;;  %v10060_v31 = vld [vmem:[#allocation16_spill] sm:$0xff] }
 0x874   : > { %v2331_v9 = vsub.f32 2.0, %v2315_v51 }
 0x875   : > { %v2345_v27 = vmul.f32 %v6226_v44, %v2329_v62 }
 0x877   : > { %v2447_v22 = vpop.f32.mrf.mxu1  ;;  %v2361_v25 = vmul.f32 %v8433_v8, %v2345_v27 }
 0x878   : > { %v6230_v53 = vpop.eup %6229  ;;  %3083 = vrot.lane.b32.xlu2 %v2447_v22, %s6369_s18 }
 0x879   : > { %v2828_v43 = vmul.f32 %v6230_v53, %v2795_v54  ;;  %2467 = vmatmul.f32.gmra.mxu1 %v2361_v25  ;;  %v10061_v25 = vld [vmem:[#allocation12_spill] sm:$0xff] }
 0x87a   : > { %3033 = vrot.lane.b32.xlu0 %v8413_v10, %s6371_s20  ;;  %v2347_v10 = vmul.f32 %v6228_v52, %v2331_v9 }
 0x87b   : > { %v2844_v17 = vsub.f32 2.0, %v2828_v43 }
 0x87c   : > { %v2363_v63 = vmul.f32 %v8399_v26, %v2347_v10 }
 0x87d   : > { %v2860_v0 = vmul.f32 %v6230_v53, %v2844_v17 }
 0x87f   : > { %v2450_v30 = vpop.f32.mrf.mxu1  ;;  %v2964_v11 = vpop.f32.mrf.mxu0  ;;  %v2876_v1 = vmul.f32 %v8437_v3, %v2860_v0  ;;  %v10062_v0 = vld [vmem:[#allocation9_spill] sm:$0xff] }
 0x880   : > { %3085 = vrot.lane.b32.xlu2 %v2450_v30, %s6369_s18  ;;  %3149 = vrot.lane.b32.xlu1 %v2964_v11, %s6370_s19 }
 0x881   : > { %2470 = vmatmul.f32.gmra.mxu1 %v2362_v61  ;;  %2984 = vmatmul.f32.gmra.mxu0 %v2876_v1  ;;  %v2797_v8 = vpop.xlane.xlu2 %2796 }
 0x882   : > { %6231 = vrcp.f32 %v2797_v8  ;;  %3035 = vrot.lane.b32.xlu0 %v8415_v29, %s6371_s20 }
 0x883   : > { %v3144_v5 = vpop.permute.xlu1 %3143 }
 0x884   : > { %v3008_v14 = vpop.permute.xlu0 %3007 }
 0x885   : > { %v3183_v50 = vsel %vm998_vm5, %v7884_v46, %v3008_v14 }
 0x886   : > { %v3200_v29 = vsel %vm3199_vm7, %v3183_v50, %v3072_v47  ;;  %v10063_v50 = vld [vmem:[#allocation7_spill] sm:$0xff] }
 0x887   : > { %v2453_v48 = vpop.f32.mrf.mxu1  ;;  %v2967_v3 = vpop.f32.mrf.mxu0 }
 0x888   : > { %v6232_v6 = vpop.eup %6231  ;;  %3087 = vrot.lane.b32.xlu2 %v2453_v48, %s6369_s18  ;;  %3151 = vrot.lane.b32.xlu1 %v2967_v3, %s6370_s19 }
 0x889   : > { %v2829_v42 = vmul.f32 %v6232_v6, %v2797_v8  ;;  %2473 = vmatmul.f32.gmra.mxu1 %v2363_v63  ;;  %v3136_v49 = vpop.permute.xlu2 %3135 }
 0x88a   : > { %v3217_v7 = vsel %vm3216_vm8, %v3200_v29, %v3136_v49  ;;  %3037 = vrot.lane.b32.xlu0 %v8417_v2, %s6371_s20  ;;  %v10064_v29 = vld [vmem:[#allocation11_spill] sm:$0xff] }
 0x88b   : > { %v2845_v46 = vsub.f32 2.0, %v2829_v42  ;;  %5657 = vmatmul.msk.f32.vlgmr.msra.gmra.mxu2 %vm432_vm0, %v3217_v7  ;;  %v3146_v22 = vpop.permute.xlu1 %3145 }
 0x88c   : > { %v3010_v26 = vpop.permute.xlu0 %3009 }
 0x88d   : > { %v2861_v23 = vmul.f32 %v6232_v6, %v2845_v46  ;;  %v3184_v39 = vsel %vm998_vm5, %v7898_v4, %v3010_v26 }
 0x88f   : > { %v2877_v19 = vmul.f32 %v8445_v24, %v2861_v23  ;;  %v2456_v32 = vpop.f32.mrf.mxu1 }
 0x890   : > { %v2970_v57 = vpop.f32.mrf.mxu0  ;;  %3089 = vrot.lane.b32.xlu2 %v2456_v32, %s6369_s18 }
 0x891   : > { %3153 = vrot.lane.b32.xlu1 %v2970_v57, %s6370_s19  ;;  %v3074_v60 = vpop.permute.xlu2 %3073  ;;  %2987 = vmatmul.f32.gmra.mxu0 %v2877_v19  ;;  %v10065_v57 = vld [vmem:[#allocation19_spill] sm:$0xff] }
 0x892   : > { %v3201_v2 = vsel %vm3199_vm7, %v3184_v39, %v3074_v60 }
 0x893   : > { %v3218_v38 = vsel %vm3216_vm8, %v3201_v2, %v3138_v41  ;;  %v3148_v11 = vpop.permute.xlu1 %3147 }
 0x894   : > { %v3012_v36 = vpop.permute.xlu0 %3011  ;;  %5658 = vmatmul.msk.f32.gmra.mxu2 %vm432_vm0, %v3218_v38 }
 0x895   : > { %v3185_v20 = vsel %vm998_vm5, %v7907_v15, %v3012_v36 }
 0x897   : > { %v2459_v24 = vpop.f32.mrf.mxu1 }
 0x898   : > { %v2973_v34 = vpop.f32.mrf.mxu0  ;;  %3091 = vrot.lane.b32.xlu2 %v2459_v24, %s6369_s18 }
 0x899   : > { %3155 = vrot.lane.b32.xlu1 %v2973_v34, %s6370_s19  ;;  %v3076_v4 = vpop.permute.xlu2 %3075  ;;  %v10066_v34 = vld [vmem:[#allocation13_spill] sm:$0xff] }
 0x89a   : > { %v3202_v45 = vsel %vm3199_vm7, %v3185_v20, %v3076_v4 }
 0x89b   : > { %v3219_v40 = vsel %vm3216_vm8, %v3202_v45, %v3140_v16 }
 0x89c   : > { %v3014_v28 = vpop.permute.xlu0 %3013  ;;  %5659 = vmatmul.msk.f32.gmra.mxu2 %vm432_vm0, %v3219_v40 }
 0x89d   : > { %v3186_v37 = vsel %vm998_vm5, %v7918_v13, %v3014_v28 }
 0x89f   : > { %v2462_v58 = vpop.f32.mrf.mxu1 }
 0x8a0   : > { %v2976_v55 = vpop.f32.mrf.mxu0  ;;  %3093 = vrot.lane.b32.xlu2 %v2462_v58, %s6369_s18 }
 0x8a1   : > { %3157 = vrot.lane.b32.xlu1 %v2976_v55, %s6370_s19  ;;  %v3078_v15 = vpop.permute.xlu2 %3077 }
 0x8a2   : > { %v3203_v21 = vsel %vm3199_vm7, %v3186_v37, %v3078_v15  ;;  %v10067_v15 = vld [vmem:[#allocation6_spill] sm:$0xff] }
 0x8a3   : > { %v3220_v56 = vsel %vm3216_vm8, %v3203_v21, %v3142_v33 }
 0x8a4   : > { %5660 = vmatmul.msk.f32.gmra.mxu2 %vm432_vm0, %v3220_v56  ;;  %v3016_v35 = vpop.permute.xlu0 %3015 }
 0x8a5   : > { %v3187_v54 = vsel %vm998_vm5, %v10060_v31, %v3016_v35 }
 0x8a7   : > { %v2465_v12 = vpop.f32.mrf.mxu1 }
 0x8a8   : > { %v2979_v44 = vpop.f32.mrf.mxu0  ;;  %3095 = vrot.lane.b32.xlu2 %v2465_v12, %s6369_s18 }
 0x8a9   : > { %3159 = vrot.lane.b32.xlu1 %v2979_v44, %s6370_s19  ;;  %v3080_v13 = vpop.permute.xlu2 %3079 }
 0x8aa   : > { %v3204_v62 = vsel %vm3199_vm7, %v3187_v54, %v3080_v13  ;;  %v10068_v54 = vld [vmem:[#allocation14_spill] sm:$0xff] }
 0x8ab   : > { %v3221_v27 = vsel %vm3216_vm8, %v3204_v62, %v3144_v5 }
 0x8ac   : > { %5661 = vmatmul.msk.f32.gmra.mxu2 %vm432_vm0, %v3221_v27  ;;  %v3018_v18 = vpop.permute.xlu0 %3017 }
 0x8ad   : > { %v3188_v53 = vsel %vm998_vm5, %v10061_v25, %v3018_v18  ;;  %v6329_v25 = vld [vmem:[%s6453_s26 + $0x10] sm:$0xff] }
 0x8b0   : > { %v2982_v52 = vpop.f32.mrf.mxu0 }
 0x8b1   : > { %3161 = vrot.lane.b32.xlu1 %v2982_v52, %s6370_s19  ;;  %v8607_v52 = vld [vmem:[%s9965_s5] ss:$0 sm:$0xff] }
 0x8b4   : > { %v3020_v17 = vpop.permute.xlu0 %3019 }
 0x8b5   : > { %v3189_v9 = vsel %vm998_vm5, %v10062_v0, %v3020_v17  ;;  %v6330_v17 = vld [vmem:[%s6453_s26 + $0x18] sm:$0xff] }
 0x8bc   : > { %v3022_v8 = vpop.permute.xlu0 %3021 }
 0x8bd   : > { %v3190_v48 = vsel %vm998_vm5, %v10063_v50, %v3022_v8 }
 0x8c4   : > { %v3024_v47 = vpop.permute.xlu0 %3023 }
 0x8c5   : > { %v3191_v49 = vsel %vm998_vm5, %v10064_v29, %v3024_v47 }
 0x8ca   : > { %v3082_v43 = vpop.permute.xlu2 %3081 }
 0x8cb   : > { %v3205_v51 = vsel %vm3199_vm7, %v3188_v53, %v3082_v43 }
 0x8cc   : > { %v3222_v59 = vsel %vm3216_vm8, %v3205_v51, %v3146_v22  ;;  %v3026_v7 = vpop.permute.xlu0 %3025 }
 0x8cd   : > { %5662 = vmatmul.msk.f32.gmra.mxu2 %vm432_vm0, %v3222_v59  ;;  %v3192_v39 = vsel %vm998_vm5, %v10065_v57, %v3026_v7 }
 0x8d2   : > { %v3084_v30 = vpop.permute.xlu2 %3083 }
 0x8d3   : > { %v3206_v61 = vsel %vm3199_vm7, %v3189_v9, %v3084_v30 }
 0x8d4   : > { %v3223_v1 = vsel %vm3216_vm8, %v3206_v61, %v3148_v11  ;;  %v3028_v60 = vpop.permute.xlu0 %3027  ;;  %v6331_v61 = vld [vmem:[%s6453_s26 + $0x20] sm:$0xff] }
 0x8d5   : > { %5663 = vmatmul.msk.f32.gmra.mxu2 %vm432_vm0, %v3223_v1  ;;  %v3193_v20 = vsel %vm998_vm5, %v10066_v34, %v3028_v60  ;;  %v6334_v34 = vld [vmem:[%s6453_s26 + $0x38] sm:$0xff] }
 0x8da   : > { %v3086_v10 = vpop.permute.xlu2 %3085 }
 0x8db   : > { %v3207_v3 = vsel %vm3199_vm7, %v3190_v48, %v3086_v10 }
 0x8dc   : > { %v3030_v28 = vpop.permute.xlu0 %3029 }
 0x8dd   : > { %v3194_v33 = vsel %vm998_vm5, %v10067_v15, %v3030_v28 }
 0x8e2   : > { %v3088_v14 = vpop.permute.xlu2 %3087 }
 0x8e3   : > { %v3208_v46 = vsel %vm3199_vm7, %v3191_v49, %v3088_v14  ;;  %v10069_v14 = vld [vmem:[#allocation17_spill] sm:$0xff] }
 0x8e4   : > { %v3032_v12 = vpop.permute.xlu0 %3031 }
 0x8e5   : > { %v3195_v13 = vsel %vm998_vm5, %v10068_v54, %v3032_v12 }
 0x8ea   : > { %v3090_v26 = vpop.permute.xlu2 %3089 }
 0x8eb   : > { %v3209_v2 = vsel %vm3199_vm7, %v3192_v39, %v3090_v26  ;;  %v10070_v39 = vld [vmem:[#allocation18_spill] sm:$0xff] }
 0x8ec   : > { %v3034_v10 = vpop.permute.xlu0 %3033 }
 0x8ed   : > { %v3196_v50 = vsel %vm998_vm5, %v10069_v14, %v3034_v10  ;;  %v6337_v14 = vld [vmem:[%s6453_s26 + $0x50] sm:$0xff] }
 0x8f2   : > { %v3150_v63 = vpop.permute.xlu1 %3149  ;;  %v3092_v36 = vpop.permute.xlu2 %3091 }
 0x8f3   : > { %v3224_v6 = vsel %vm3216_vm8, %v3207_v3, %v3150_v63  ;;  %v3210_v4 = vsel %vm3199_vm7, %v3193_v20, %v3092_v36 }
 0x8f4   : > { %5664 = vmatmul.msk.f32.gmra.mxu2 %vm432_vm0, %v3224_v6 }
 0x8f6   : > { %v2468_v42 = vpop.f32.mrf.mxu1 }
 0x8f7   : > { %3097 = vrot.lane.b32.xlu2 %v2468_v42, %s6369_s18  ;;  %v6332_v42 = vld [vmem:[%s6453_s26 + $0x28] sm:$0xff] }
 0x8fa   : > { %v3152_v41 = vpop.permute.xlu1 %3151  ;;  %v3094_v58 = vpop.permute.xlu2 %3093 }
 0x8fb   : > { %v3225_v23 = vsel %vm3216_vm8, %v3208_v46, %v3152_v41  ;;  %v3211_v21 = vsel %vm3199_vm7, %v3194_v33, %v3094_v58  ;;  %v6333_v41 = vld [vmem:[%s6453_s26 + $0x30] sm:$0xff] }
 0x8fc   : > { %5665 = vmatmul.msk.f32.gmra.mxu2 %vm432_vm0, %v3225_v23 }
 0x8fe   : > { %v2471_v19 = vpop.f32.mrf.mxu1  ;;  %v2985_v32 = vpop.f32.mrf.mxu0 }
 0x8ff   : > { %3163 = vrot.lane.b32.xlu1 %v2985_v32, %s6370_s19  ;;  %3099 = vrot.lane.b32.xlu2 %v2471_v19, %s6369_s18  ;;  %v3036_v32 = vpop.permute.xlu0 %3035 }
 0x900   : > { %v3197_v60 = vsel %vm998_vm5, %v10070_v39, %v3036_v32 }
 0x902   : > { %v3096_v31 = vpop.permute.xlu2 %3095 }
 0x903   : > { %v3154_v38 = vpop.permute.xlu1 %3153  ;;  %v3212_v5 = vsel %vm3199_vm7, %v3195_v13, %v3096_v31  ;;  %v10072_v13 = vld [vmem:[#allocation2_spill] sm:$0xff] }
 0x904   : > { %v3226_v16 = vsel %vm3216_vm8, %v3209_v2, %v3154_v38 }
 0x905   : > { %5666 = vmatmul.msk.f32.gmra.mxu2 %vm432_vm0, %v3226_v16 }
 0x906   : > { %v2474_v24 = vpop.f32.mrf.mxu1 }
 0x907   : > { %3101 = vrot.lane.b32.xlu2 %v2474_v24, %s6369_s18 }
 0x90b   : > { %v3156_v45 = vpop.permute.xlu1 %3155 }
 0x90c   : > { %v3227_v40 = vsel %vm3216_vm8, %v3210_v4, %v3156_v45  ;;  %v3038_v45 = vpop.permute.xlu0 %3037 }
 0x90d   : > { %5667 = vmatmul.msk.f32.gmra.mxu2 %vm432_vm0, %v3227_v40 }
 0x90e   : > { %v8589_v55 = vpop.f32.mrf.mxu2  ;;  %v2988_v37 = vpop.f32.mrf.mxu0 }
 0x90f   : > { %3165 = vrot.lane.b32.xlu1 %v2988_v37, %s6370_s19  ;;  %v10071_v37 = vld [vmem:[#allocation15_spill] sm:$0xff] }
 0x910   : > { %v3198_v15 = vsel %vm998_vm5, %v10071_v37, %v3038_v45 }
 0x913   : > { %v3158_v56 = vpop.permute.xlu1 %3157 }
 0x914   : > { %v3228_v35 = vsel %vm3216_vm8, %v3211_v21, %v3158_v56  ;;  %v6335_v21 = vld [vmem:[%s6453_s26 + $0x40] sm:$0xff] }
 0x915   : > { %5668 = vmatmul.msk.f32.gmra.mxu2 %vm432_vm0, %v3228_v35 }
 0x917   : > { %v8597_v44 = vpop.f32.mrf.mxu2 }
 0x91b   : > { %v3160_v62 = vpop.permute.xlu1 %3159 }
 0x91c   : > { %v3229_v27 = vsel %vm3216_vm8, %v3212_v5, %v3160_v62 }
 0x91d   : > { %5669 = vmatmul.msk.f32.gmra.mxu2 %vm432_vm0, %v3229_v27 }
 0x91f   : > { %v3312_v18 = vpop.f32.mrf.mxu2 }
 0x920   : > { %v3313_v22 = vadd.f32 %v8607_v52, %v3312_v18 }
 0x922   : > { %v8611_v53 = vadd.f32 %v6329_v25, %v3313_v22 }
 0x923   : > { %v3162_v63 = vpop.permute.xlu1 %3161 }
 0x924   : > { %v3378_v43 = vsel %vm432_vm0, %v8611_v53, 0.0 }
 0x925   : > { %3379 = vadd.xlane.f32.xlu0 %v3378_v43  ;;  %v6336_v43 = vld [vmem:[%s6453_s26 + $0x48] sm:$0xff] }
 0x927   : > { %v3315_v51 = vpop.f32.mrf.mxu2 }
 0x928   : > { %v3316_v59 = vadd.f32 %v8607_v52, %v3315_v51 }
 0x92a   : > { %v8617_v0 = vadd.f32 %v6330_v17, %v3316_v59 }
 0x92c   : > { %v3381_v30 = vsel %vm432_vm0, %v8617_v0, 0.0 }
 0x92f   : > { %v3318_v9 = vpop.f32.mrf.mxu2 }
 0x930   : > { %3382 = vadd.xlane.f32.xlu2 %v3381_v30  ;;  %v3319_v11 = vadd.f32 %v8607_v52, %v3318_v9 }
 0x932   : > { %v8623_v1 = vadd.f32 %v6331_v61, %v3319_v11 }
 0x934   : > { %v3384_v8 = vsel %vm432_vm0, %v8623_v1, 0.0 }
 0x939   : > { %3385 = vadd.xlane.f32.xlu1 %v3384_v8 }
 0x950   : > { %v3321_v47 = vpop.f32.mrf.mxu2 }
 0x951   : > { %v3322_v48 = vadd.f32 %v8607_v52, %v3321_v47  ;;  %v3098_v3 = vpop.permute.xlu2 %3097 }
 0x952   : > { %v3213_v6 = vsel %vm3199_vm7, %v3196_v50, %v3098_v3 }
 0x953   : > { %v8632_v29 = vadd.f32 %v6332_v42, %v3322_v48  ;;  %v3230_v49 = vsel %vm3216_vm8, %v3213_v6, %v3162_v63 }
 0x954   : > { %5670 = vmatmul.msk.f32.gmra.mxu2 %vm432_vm0, %v3230_v49 }
 0x955   : > { %v3387_v7 = vsel %vm432_vm0, %v8632_v29, 0.0 }
 0x956   : > { %3388 = vadd.xlane.f32.xlu0 %v3387_v7 }
 0x958   : > { %v3324_v46 = vpop.f32.mrf.mxu2 }
 0x959   : > { %v3325_v26 = vadd.f32 %v8607_v52, %v3324_v46  ;;  %v3100_v57 = vpop.permute.xlu2 %3099  ;;  %v6338_v46 = vld [vmem:[%s6453_s26 + $0x58] sm:$0xff] }
 0x95a   : > { %v3214_v2 = vsel %vm3199_vm7, %v3197_v60, %v3100_v57 }
 0x95b   : > { %v8640_v23 = vadd.f32 %v6333_v41, %v3325_v26 }
 0x95d   : > { %v3390_v19 = vsel %vm432_vm0, %v8640_v23, 0.0 }
 0x95e   : > { %3391 = vadd.xlane.f32.xlu2 %v3390_v19 }
 0x961   : > { %v3102_v40 = vpop.permute.xlu2 %3101 }
 0x962   : > { %v3215_v33 = vsel %vm3199_vm7, %v3198_v15, %v3102_v40  ;;  %v6340_v15 = vld [vmem:[%s6453_s26 + $0x68] sm:$0xff] }
 0x971   : > { %v3164_v38 = vpop.permute.xlu1 %3163 }
 0x972   : > { %v3231_v36 = vsel %vm3216_vm8, %v3214_v2, %v3164_v38 }
 0x973   : > { %5671 = vmatmul.msk.f32.gmra.mxu2 %vm432_vm0, %v3231_v36 }
 0x977   : > { %v3327_v16 = vpop.f32.mrf.mxu2 }
 0x978   : > { %v3328_v24 = vadd.f32 %v8607_v52, %v3327_v16 }
 0x97a   : > { %v8651_v20 = vadd.f32 %v6334_v34, %v3328_v24  ;;  %v6339_v24 = vld [vmem:[%s6453_s26 + $0x60] sm:$0xff] }
 0x97c   : > { %v3393_v4 = vsel %vm432_vm0, %v8651_v20, 0.0 }
 0x97d   : > { %3394 = vadd.xlane.f32.xlu1 %v3393_v4 }
 0x97f   : > { %v3330_v28 = vpop.f32.mrf.mxu2 }
 0x980   : > { %v3331_v58 = vadd.f32 %v8607_v52, %v3330_v28 }
 0x981   : > { %v3166_v35 = vpop.permute.xlu1 %3165 }
 0x982   : > { %v8660_v56 = vadd.f32 %v6335_v21, %v3331_v58  ;;  %v3232_v12 = vsel %vm3216_vm8, %v3215_v33, %v3166_v35  ;;  %v3307_v21 = vadd.f32 %v8607_v52, %v8589_v55 }
 0x983   : > { %5672 = vmatmul.msk.f32.gmra.mxu2 %vm432_vm0, %v3232_v12  ;;  %v6341_v12 = vld [vmem:[%s6453_s26] sm:$0xff] }
 0x984   : > { %v3396_v31 = vsel %vm432_vm0, %v8660_v56, 0.0 }
 0x985   : > { %3397 = vadd.xlane.f32.xlu2 %v3396_v31  ;;  %v8734_v31 = vadd.f32 %v6341_v12, %v3307_v21 }
 0x988   : > { %v3333_v27 = vpop.f32.mrf.mxu2 }
 0x989   : > { %v3334_v22 = vadd.f32 %v8607_v52, %v3333_v27  ;;  %v6342_v27 = vld [vmem:[%s6453_s26 + $0x8] sm:$0xff] }
 0x98b   : > { %v8675_v51 = vadd.f32 %v6336_v43, %v3334_v22 }
 0x98d   : > { %v3399_v11 = vsel %vm432_vm0, %v8675_v51, 0.0 }
 0x990   : > { %v3336_v30 = vpop.f32.mrf.mxu2 }
 0x991   : > { %v3337_v8 = vadd.f32 %v8607_v52, %v3336_v30 }
 0x993   : > { %v8688_v50 = vadd.f32 %v6337_v14, %v3337_v8  ;;  %v6343_v8 = vld [vmem:[%s6453_s26 + $0x70] sm:$0xff] }
 0x995   : > { %v3402_v6 = vsel %vm432_vm0, %v8688_v50, 0.0 }
 0x998   : > { %v3380_v54 = vpop.xlane.xlu0 %3379  ;;  %v3339_v63 = vpop.f32.mrf.mxu2 }
 0x999   : > { %v3422_v5 = vmul.f32 %v3380_v54, %v10072_v13  ;;  %v3340_v49 = vadd.f32 %v8607_v52, %v3339_v63  ;;  %v3310_v54 = vadd.f32 %v8607_v52, %v8597_v44 }
 0x99b   : > { %v8668_v62 = vsub.f32 %v8611_v53, %v3422_v5  ;;  %v8701_v26 = vadd.f32 %v6338_v46, %v3340_v49  ;;  %v3372_v5 = vsel %vm432_vm0, %v8734_v31, 0.0  ;;  %v6344_v49 = vld [vmem:[%s6453_s26 + $0x78] sm:$0xff] }
 0x99c   : > { %v3765_v46 = vld [vmem:[%s9968_s8 + $0x18] sm:$0xff] }
 0x99d   : > { %v3454_v18 = vmul.f32 %v8668_v62, %v8668_v62  ;;  %v3405_v41 = vsel %vm432_vm0, %v8701_v26, 0.0  ;;  %5741 = vmatpush.msra.mxu1 %v3765_v46  ;;  %3830 = vmatpush.msrb.mxu0 %v3765_v46 }
 0x99f   : > { %v3474_v25 = vsel %vm432_vm0, %v3454_v18, 0.0  ;;  %v8741_v18 = vadd.f32 %v6342_v27, %v3310_v54 }
 0x9a0   : > { %3475 = vadd.xlane.f32.xlu0 %v3474_v25  ;;  %v3342_v39 = vpop.f32.mrf.mxu2 }
 0x9a1   : > { %v3343_v2 = vadd.f32 %v8607_v52, %v3342_v39  ;;  %v3375_v55 = vsel %vm432_vm0, %v8741_v18, 0.0 }
 0x9a3   : > { %v3383_v59 = vpop.xlane.xlu2 %3382  ;;  %v8715_v34 = vadd.f32 %v6339_v24, %v3343_v2 }
 0x9a4   : > { %v3423_v17 = vmul.f32 %v3383_v59, %v10072_v13 }
 0x9a5   : > { %v3408_v58 = vsel %vm432_vm0, %v8715_v34, 0.0 }
 0x9a6   : > { %v8679_v9 = vsub.f32 %v8617_v0, %v3423_v17 }
 0x9a8   : > { %3400 = vadd.xlane.f32.xlu0 %v3399_v11  ;;  %v3455_v61 = vmul.f32 %v8679_v9, %v8679_v9 }
 0x9aa   : > { %v3477_v10 = vsel %vm432_vm0, %v3455_v61, 0.0 }
 0x9ab   : > { %3478 = vadd.xlane.f32.xlu1 %v3477_v10 }
 0x9ac   : > { %v3386_v47 = vpop.xlane.xlu1 %3385 }
 0x9ad   : > { %v3424_v48 = vmul.f32 %v3386_v47, %v10072_v13 }
 0x9af   : > { %v8692_v3 = vsub.f32 %v8623_v1, %v3424_v48 }
 0x9b1   : > { %v3456_v42 = vmul.f32 %v8692_v3, %v8692_v3 }
 0x9b3   : > { %3403 = vadd.xlane.f32.xlu1 %v3402_v6  ;;  %v3480_v7 = vsel %vm432_vm0, %v3456_v42, 0.0 }
 0x9b4   : > { %3481 = vadd.xlane.f32.xlu2 %v3480_v7 }
 0x9bc   : > { %3406 = vadd.xlane.f32.xlu2 %v3405_v41 }
 0x9c9   : > { %v3389_v19 = vpop.xlane.xlu0 %3388 }
 0x9ca   : > { %v3425_v32 = vmul.f32 %v3389_v19, %v10072_v13  ;;  %v3764_v19 = vld [vmem:[%s9968_s8 + $0x10] sm:$0xff] }
 0x9cb   : > { %5742 = vmatpush.msra.mxu1 %v3764_v19  ;;  %3831 = vmatpush.msrb.mxu0 %v3764_v19 }
 0x9cc   : > { %v8707_v57 = vsub.f32 %v8632_v29, %v3425_v32  ;;  %v3762_v32 = vld [vmem:[%s9968_s8] sm:$0xff] }
 0x9ce   : > { %v3457_v60 = vmul.f32 %v8707_v57, %v8707_v57 }
 0x9d0   : > { %v3483_v38 = vsel %vm432_vm0, %v3457_v60, 0.0 }
 0x9d1   : > { %3484 = vadd.xlane.f32.xlu0 %v3483_v38  ;;  %v3392_v36 = vpop.xlane.xlu2 %3391 }
 0x9d2   : > { %v3426_v16 = vmul.f32 %v3392_v36, %v10072_v13 }
 0x9d4   : > { %v8718_v4 = vsub.f32 %v8640_v23, %v3426_v16 }
 0x9d6   : > { %v3458_v45 = vmul.f32 %v8718_v4, %v8718_v4 }
 0x9d7   : > { %v3345_v40 = vpop.f32.mrf.mxu2 }
 0x9d8   : > { %v3346_v28 = vadd.f32 %v8607_v52, %v3345_v40  ;;  %v3486_v37 = vsel %vm432_vm0, %v3458_v45, 0.0 }
 0x9d9   : > { %3409 = vadd.xlane.f32.xlu0 %v3408_v58  ;;  %3487 = vadd.xlane.f32.xlu1 %v3486_v37 }
 0x9da   : > { %v8727_v33 = vadd.f32 %v6340_v15, %v3346_v28 }
 0x9dc   : > { %v3411_v35 = vsel %vm432_vm0, %v8727_v33, 0.0 }
 0x9e1   : > { %3412 = vadd.xlane.f32.xlu1 %v3411_v35 }
 0x9e9   : > { %3373 = vadd.xlane.f32.xlu1 %v3372_v5 }
 0x9f0   : > { %v3395_v22 = vpop.xlane.xlu1 %3394 }
 0x9f1   : > { %v3427_v25 = vmul.f32 %v3395_v22, %v10072_v13  ;;  %3376 = vadd.xlane.f32.xlu1 %v3375_v55  ;;  %v8796_v22 = vld [vmem:[%s9966_s6] ss:$0 sm:$0xff] }
 0x9f3   : > { %v8747_v43 = vsub.f32 %v8651_v20, %v3427_v25 }
 0x9f5   : > { %v3459_v44 = vmul.f32 %v8747_v43, %v8747_v43 }
 0x9f6   : > { %v3348_v59 = vpop.f32.mrf.mxu2 }
 0x9f7   : > { %v3349_v17 = vadd.f32 %v8607_v52, %v3348_v59  ;;  %v3489_v30 = vsel %vm432_vm0, %v3459_v44, 0.0 }
 0x9f8   : > { %3490 = vadd.xlane.f32.xlu2 %v3489_v30  ;;  %v3398_v11 = vpop.xlane.xlu2 %3397  ;;  %v8805_v30 = vld [vmem:[%s9967_s7] ss:$0 sm:$0xff] }
 0x9f9   : > { %v3428_v61 = vmul.f32 %v3398_v11, %v10072_v13  ;;  %v8755_v10 = vadd.f32 %v6343_v8, %v3349_v17 }
 0x9fb   : > { %v8758_v47 = vsub.f32 %v8660_v56, %v3428_v61  ;;  %v3414_v48 = vsel %vm432_vm0, %v8755_v10, 0.0 }
 0x9fd   : > { %v3460_v14 = vmul.f32 %v8758_v47, %v8758_v47 }
 0x9ff   : > { %v3492_v63 = vsel %vm432_vm0, %v3460_v14, 0.0 }
 0xa00   : > { %3415 = vadd.xlane.f32.xlu2 %v3414_v48  ;;  %3493 = vadd.xlane.f32.xlu0 %v3492_v63 }
 0xa06   : > { %v3351_v6 = vpop.f32.mrf.mxu2 }
 0xa07   : > { %v3352_v42 = vadd.f32 %v8607_v52, %v3351_v6  ;;  %v3763_v52 = vld [vmem:[%s9968_s8 + $0x8] sm:$0xff] }
 0xa08   : > { %5743 = vmatpush.msra.mxu1 %v3763_v52  ;;  %3832 = vmatpush.msrb.mxu0 %v3763_v52 }
 0xa09   : > { %v8767_v7 = vadd.f32 %v6344_v49, %v3352_v42 }
 0xa0a   : > { %5744 = vmatpush.msra.mxu1 %v3762_v32  ;;  %3833 = vmatpush.msrb.mxu0 %v3762_v32 }
 0xa0b   : > { %v3417_v41 = vsel %vm432_vm0, %v8767_v7, 0.0 }
 0xa0c   : > { %3418 = vadd.xlane.f32.xlu2 %v3417_v41 }
 0xa13   : > { %v3476_v39 = vpop.xlane.xlu0 %3475 }
 0xa14   : > { %v3518_v60 = vmul.f32 %v3476_v39, %v10072_v13 }
 0xa16   : > { %v3534_v2 = vadd.f32 1e-05, %v3518_v60 }
 0xa18   : > { %6233 = vrsqrt.f32 %v3534_v2  ;;  %vm3574_vm10 = vweird.f32 %v3534_v2 }
 0xa1b   : > { %v3401_v38 = vpop.xlane.xlu0 %3400 }
 0xa1c   : > { %v3429_v36 = vmul.f32 %v3401_v38, %v10072_v13 }
 0xa1e   : > { %v6234_v16 = vpop.eup %6233  ;;  %v8786_v24 = vsub.f32 %v8675_v51, %v3429_v36  ;;  %v3479_v45 = vpop.xlane.xlu1 %3478 }
 0xa1f   : > { %v3569_v40 = vmul.f32 %v6234_v16, %v3534_v2  ;;  %v3519_v28 = vmul.f32 %v3479_v45, %v10072_v13  ;;  %vm3575_vm9 = vweird.f32 %v6234_v16 }
 0xa20   : > { %v3461_v58 = vmul.f32 %v8786_v24, %v8786_v24  ;;  %vm3576_vm11 = vmor %vm3574_vm10, %vm3575_vm9 }
 0xa21   : > { %v3570_v37 = vmul.f32 %v6234_v16, %v3569_v40  ;;  %v3535_v15 = vadd.f32 1e-05, %v3519_v28 }
 0xa22   : > { %v3495_v21 = vsel %vm432_vm0, %v3461_v58, 0.0 }
 0xa23   : > { %v3571_v35 = vmul.f32 0.5, %v3570_v37  ;;  %6235 = vrsqrt.f32 %v3535_v15  ;;  %3496 = vadd.xlane.f32.xlu0 %v3495_v21  ;;  %vm3584_vm13 = vweird.f32 %v3535_v15 }
 0xa25   : > { %v3572_v12 = vsub.f32 1.5, %v3571_v35 }
 0xa26   : > { %v3404_v54 = vpop.xlane.xlu1 %3403 }
 0xa27   : > { %v3573_v5 = vmul.f32 %v6234_v16, %v3572_v12  ;;  %v3430_v27 = vmul.f32 %v3404_v54, %v10072_v13  ;;  %v3482_v55 = vpop.xlane.xlu2 %3481 }
 0xa28   : > { %v3520_v17 = vmul.f32 %v3482_v55, %v10072_v13 }
 0xa29   : > { %v6236_v25 = vpop.eup %6235  ;;  %v3577_v44 = vsel %vm3576_vm11, %v6234_v16, %v3573_v5  ;;  %v8799_v59 = vsub.f32 %v8688_v50, %v3430_v27 }
 0xa2a   : > { %v3710_v11 = vmul.f32 %v3577_v44, %v8668_v62  ;;  %v3579_v61 = vmul.f32 %v6236_v25, %v3535_v15  ;;  %v3536_v8 = vadd.f32 1e-05, %v3520_v17  ;;  %vm3585_vm12 = vweird.f32 %v6236_v25 }
 0xa2b   : > { %v3462_v14 = vmul.f32 %v8799_v59, %v8799_v59  ;;  %vm3586_vm14 = vmor %vm3584_vm13, %vm3585_vm12 }
 0xa2c   : > { %v3729_v48 = vmul.f32 %v8796_v22, %v3710_v11  ;;  %v3580_v63 = vmul.f32 %v6236_v25, %v3579_v61  ;;  %6237 = vrsqrt.f32 %v3536_v8  ;;  %vm3594_vm1 = vweird.f32 %v3536_v8 }
 0xa2d   : > { %v3498_v6 = vsel %vm432_vm0, %v3462_v14, 0.0 }
 0xa2e   : > { %v3748_v42 = vadd.f32 %v8805_v30, %v3729_v48  ;;  %v3581_v49 = vmul.f32 0.5, %v3580_v63  ;;  %3499 = vadd.xlane.f32.xlu0 %v3498_v6 }
 0xa2f   : > { %v3407_v41 = vpop.xlane.xlu2 %3406 }
 0xa30   : > { %v3582_v46 = vsub.f32 1.5, %v3581_v49  ;;  %5675 = vmatmul.msk.f32.vlgmr.msra.gmra.mxu1 %vm432_vm0, %v3748_v42  ;;  %v3431_v62 = vmul.f32 %v3407_v41, %v10072_v13 }
 0xa32   : > { %v3583_v19 = vmul.f32 %v6236_v25, %v3582_v46  ;;  %v6238_v52 = vpop.eup %6237  ;;  %v8816_v32 = vsub.f32 %v8701_v26, %v3431_v62 }
 0xa33   : > { %v3589_v60 = vmul.f32 %v6238_v52, %v3536_v8  ;;  %vm3595_vm15 = vweird.f32 %v6238_v52 }
 0xa34   : > { %v3587_v39 = vsel %vm3586_vm14, %v6236_v25, %v3583_v19  ;;  %v3463_v38 = vmul.f32 %v8816_v32, %v8816_v32  ;;  %vm3596_vm2 = vmor %vm3594_vm1, %vm3595_vm15 }
 0xa35   : > { %v3711_v2 = vmul.f32 %v3587_v39, %v8679_v9  ;;  %v3590_v36 = vmul.f32 %v6238_v52, %v3589_v60 }
 0xa36   : > { %v3501_v16 = vsel %vm432_vm0, %v3463_v38, 0.0 }
 0xa37   : > { %v3730_v45 = vmul.f32 %v8796_v22, %v3711_v2  ;;  %v3591_v40 = vmul.f32 0.5, %v3590_v36  ;;  %3502 = vadd.xlane.f32.xlu2 %v3501_v16 }
 0xa39   : > { %v3749_v28 = vadd.f32 %v8805_v30, %v3730_v45  ;;  %v3592_v58 = vsub.f32 1.5, %v3591_v40 }
 0xa3b   : > { %5676 = vmatmul.msk.f32.gmra.mxu1 %vm432_vm0, %v3749_v28  ;;  %v3593_v37 = vmul.f32 %v6238_v52, %v3592_v58 }
 0xa3d   : > { %v3597_v9 = vsel %vm3596_vm2, %v6238_v52, %v3593_v37 }
 0xa3e   : > { %v3712_v15 = vmul.f32 %v3597_v9, %v8692_v3 }
 0xa40   : > { %v3731_v21 = vmul.f32 %v8796_v22, %v3712_v15 }
 0xa42   : > { %v3750_v35 = vadd.f32 %v8805_v30, %v3731_v21 }
 0xa44   : > { %v3485_v12 = vpop.xlane.xlu0 %3484  ;;  %5677 = vmatmul.msk.f32.gmra.mxu1 %vm432_vm0, %v3750_v35 }
 0xa45   : > { %v3521_v54 = vmul.f32 %v3485_v12, %v10072_v13 }
 0xa47   : > { %v3537_v5 = vadd.f32 1e-05, %v3521_v54 }
 0xa49   : > { %6239 = vrsqrt.f32 %v3537_v5  ;;  %vm3604_vm4 = vweird.f32 %v3537_v5 }
 0xa4c   : > { %v3410_v27 = vpop.xlane.xlu0 %3409  ;;  %v3488_v55 = vpop.xlane.xlu1 %3487 }
 0xa4d   : > { %v3432_v25 = vmul.f32 %v3410_v27, %v10072_v13  ;;  %v3522_v44 = vmul.f32 %v3488_v55, %v10072_v13 }
 0xa4f   : > { %v6240_v17 = vpop.eup %6239  ;;  %v8833_v3 = vsub.f32 %v8715_v34, %v3432_v25  ;;  %v3538_v11 = vadd.f32 1e-05, %v3522_v44 }
 0xa50   : > { %v3599_v61 = vmul.f32 %v6240_v17, %v3537_v5  ;;  %vm3605_vm3 = vweird.f32 %v6240_v17 }
 0xa51   : > { %6241 = vrsqrt.f32 %v3538_v11  ;;  %v3464_v8 = vmul.f32 %v8833_v3, %v8833_v3  ;;  %vm3606_vm5 = vmor %vm3604_vm4, %vm3605_vm3  ;;  %vm3614_vm7 = vweird.f32 %v3538_v11 }
 0xa52   : > { %v3600_v14 = vmul.f32 %v6240_v17, %v3599_v61 }
 0xa53   : > { %v3504_v48 = vsel %vm432_vm0, %v3464_v8, 0.0 }
 0xa54   : > { %v3601_v63 = vmul.f32 0.5, %v3600_v14  ;;  %3505 = vadd.xlane.f32.xlu1 %v3504_v48  ;;  %v3413_v6 = vpop.xlane.xlu1 %3412 }
 0xa55   : > { %v3433_v42 = vmul.f32 %v3413_v6, %v10072_v13 }
 0xa56   : > { %v3602_v49 = vsub.f32 1.5, %v3601_v63 }
 0xa57   : > { %v6242_v46 = vpop.eup %6241  ;;  %v8840_v41 = vsub.f32 %v8727_v33, %v3433_v42 }
 0xa58   : > { %v3603_v62 = vmul.f32 %v6240_v17, %v3602_v49  ;;  %v3609_v19 = vmul.f32 %v6242_v46, %v3538_v11  ;;  %vm3615_vm6 = vweird.f32 %v6242_v46 }
 0xa59   : > { %v3465_v52 = vmul.f32 %v8840_v41, %v8840_v41  ;;  %vm3616_vm8 = vmor %vm3614_vm7, %vm3615_vm6 }
 0xa5a   : > { %v3607_v39 = vsel %vm3606_vm5, %v6240_v17, %v3603_v62  ;;  %v3610_v60 = vmul.f32 %v6242_v46, %v3609_v19 }
 0xa5b   : > { %v3713_v2 = vmul.f32 %v3607_v39, %v8707_v57  ;;  %v3507_v38 = vsel %vm432_vm0, %v3465_v52, 0.0 }
 0xa5c   : > { %v3611_v36 = vmul.f32 0.5, %v3610_v60  ;;  %v3374_v16 = vpop.xlane.xlu1 %3373  ;;  %3508 = vadd.xlane.f32.xlu0 %v3507_v38 }
 0xa5d   : > { %v3420_v45 = vmul.f32 %v3374_v16, %v10072_v13  ;;  %v3732_v40 = vmul.f32 %v8796_v22, %v3713_v2 }
 0xa5e   : > { %v3612_v28 = vsub.f32 1.5, %v3611_v36 }
 0xa5f   : > { %v8849_v58 = vsub.f32 %v8734_v31, %v3420_v45  ;;  %v3751_v37 = vadd.f32 %v8805_v30, %v3732_v40 }
 0xa60   : > { %v3613_v9 = vmul.f32 %v6242_v46, %v3612_v28 }
 0xa61   : > { %5678 = vmatmul.msk.f32.gmra.mxu1 %vm432_vm0, %v3751_v37  ;;  %v3452_v57 = vmul.f32 %v8849_v58, %v8849_v58 }
 0xa62   : > { %v3617_v15 = vsel %vm3616_vm8, %v6242_v46, %v3613_v9 }
 0xa63   : > { %v3714_v21 = vmul.f32 %v3617_v15, %v8718_v4  ;;  %v3468_v35 = vsel %vm432_vm0, %v3452_v57, 0.0 }
 0xa64   : > { %3469 = vadd.xlane.f32.xlu1 %v3468_v35  ;;  %v3377_v25 = vpop.xlane.xlu1 %3376 }
 0xa65   : > { %v3733_v12 = vmul.f32 %v8796_v22, %v3714_v21  ;;  %v3421_v8 = vmul.f32 %v3377_v25, %v10072_v13 }
 0xa67   : > { %v3752_v54 = vadd.f32 %v8805_v30, %v3733_v12  ;;  %v8870_v49 = vsub.f32 %v8741_v18, %v3421_v8 }
 0xa69   : > { %5679 = vmatmul.msk.f32.gmra.mxu1 %vm432_vm0, %v3752_v54  ;;  %v3453_v39 = vmul.f32 %v8870_v49, %v8870_v49 }
 0xa6b   : > { %v3491_v5 = vpop.xlane.xlu2 %3490  ;;  %v3471_v28 = vsel %vm432_vm0, %v3453_v39, 0.0 }
 0xa6c   : > { %v3523_v27 = vmul.f32 %v3491_v5, %v10072_v13 }
 0xa6e   : > { %v3539_v55 = vadd.f32 1e-05, %v3523_v27 }
 0xa70   : > { %6243 = vrsqrt.f32 %v3539_v55  ;;  %vm3624_vm10 = vweird.f32 %v3539_v55 }
 0xa73   : > { %v3494_v44 = vpop.xlane.xlu0 %3493  ;;  %v3416_v17 = vpop.xlane.xlu2 %3415 }
 0xa74   : > { %v3524_v11 = vmul.f32 %v3494_v44, %v10072_v13  ;;  %v3434_v4 = vmul.f32 %v3416_v17, %v10072_v13 }
 0xa76   : > { %v6244_v61 = vpop.eup %6243  ;;  %v3540_v14 = vadd.f32 1e-05, %v3524_v11  ;;  %v8865_v48 = vsub.f32 %v8755_v10, %v3434_v4 }
 0xa77   : > { %v3619_v63 = vmul.f32 %v6244_v61, %v3539_v55  ;;  %vm3625_vm9 = vweird.f32 %v6244_v61 }
 0xa78   : > { %6245 = vrsqrt.f32 %v3540_v14  ;;  %v3466_v6 = vmul.f32 %v8865_v48, %v8865_v48  ;;  %vm3626_vm11 = vmor %vm3624_vm10, %vm3625_vm9  ;;  %vm3634_vm13 = vweird.f32 %v3540_v14 }
 0xa79   : > { %v3620_v42 = vmul.f32 %v6244_v61, %v3619_v63 }
 0xa7a   : > { %v3510_v46 = vsel %vm432_vm0, %v3466_v6, 0.0 }
 0xa7b   : > { %v3621_v62 = vmul.f32 0.5, %v3620_v42  ;;  %3511 = vadd.xlane.f32.xlu2 %v3510_v46  ;;  %v8896_v46 = vld [vmem:[%s9969_s9] ss:$0 sm:$0xff] }
 0xa7d   : > { %v3622_v19 = vsub.f32 1.5, %v3621_v62 }
 0xa7e   : > { %v6246_v52 = vpop.eup %6245 }
 0xa7f   : > { %v3623_v60 = vmul.f32 %v6244_v61, %v3622_v19  ;;  %v3629_v2 = vmul.f32 %v6246_v52, %v3540_v14  ;;  %v3419_v38 = vpop.xlane.xlu2 %3418  ;;  %vm3635_vm12 = vweird.f32 %v6246_v52 }
 0xa80   : > { %v3435_v45 = vmul.f32 %v3419_v38, %v10072_v13  ;;  %vm3636_vm14 = vmor %vm3634_vm13, %vm3635_vm12  ;;  %vm4599_vm13 = vcmask 523264  }
 0xa81   : > { %v3627_v36 = vsel %vm3626_vm11, %v6244_v61, %v3623_v60  ;;  %v3630_v16 = vmul.f32 %v6246_v52, %v3629_v2 }
 0xa82   : > { %v3715_v40 = vmul.f32 %v3627_v36, %v8747_v43  ;;  %v8879_v9 = vsub.f32 %v8767_v7, %v3435_v45 }
 0xa83   : > { %v3631_v37 = vmul.f32 0.5, %v3630_v16  ;;  %3472 = vadd.xlane.f32.xlu2 %v3471_v28 }
 0xa84   : > { %v3734_v57 = vmul.f32 %v8796_v22, %v3715_v40  ;;  %v3467_v21 = vmul.f32 %v8879_v9, %v8879_v9 }
 0xa85   : > { %v3632_v15 = vsub.f32 1.5, %v3631_v37 }
 0xa86   : > { %v3753_v35 = vadd.f32 %v8805_v30, %v3734_v57  ;;  %v3513_v43 = vsel %vm432_vm0, %v3467_v21, 0.0 }
 0xa87   : > { %v3633_v12 = vmul.f32 %v6246_v52, %v3632_v15  ;;  %3514 = vadd.xlane.f32.xlu0 %v3513_v43 }
 0xa88   : > { %5680 = vmatmul.msk.f32.gmra.mxu1 %vm432_vm0, %v3753_v35 }
 0xa89   : > { %v3637_v54 = vsel %vm3636_vm14, %v6246_v52, %v3633_v12 }
 0xa8a   : > { %v3716_v5 = vmul.f32 %v3637_v54, %v8758_v47 }
 0xa8c   : > { %v3735_v27 = vmul.f32 %v8796_v22, %v3716_v5 }
 0xa8e   : > { %v3754_v55 = vadd.f32 %v8805_v30, %v3735_v27 }
 0xa90   : > { %5681 = vmatmul.msk.f32.gmra.mxu1 %vm432_vm0, %v3754_v55  ;;  %v4594_v55 = vld [vmem:[%s9970_s10 + $0x38] sm:$0xff] }
 0xa91   : > { %5745 = vmatpush.msra.mxu3 %v4594_v55  ;;  %4656 = vmatpush.msra.mxu0 %v4594_v55 }
 0xa96   : > { %v3497_v25 = vpop.xlane.xlu0 %3496 }
 0xa97   : > { %v3525_v44 = vmul.f32 %v3497_v25, %v10072_v13 }
 0xa99   : > { %v3541_v17 = vadd.f32 1e-05, %v3525_v44 }
 0xa9b   : > { %6247 = vrsqrt.f32 %v3541_v17  ;;  %vm3644_vm1 = vweird.f32 %v3541_v17 }
 0xaa1   : > { %v6248_v11 = vpop.eup %6247  ;;  %v3500_v4 = vpop.xlane.xlu0 %3499 }
 0xaa2   : > { %v3639_v61 = vmul.f32 %v6248_v11, %v3541_v17  ;;  %v3526_v8 = vmul.f32 %v3500_v4, %v10072_v13  ;;  %vm3645_vm15 = vweird.f32 %v6248_v11 }
 0xaa3   : > { %vm3646_vm2 = vmor %vm3644_vm1, %vm3645_vm15 }
 0xaa4   : > { %v3640_v14 = vmul.f32 %v6248_v11, %v3639_v61  ;;  %v3542_v63 = vadd.f32 1e-05, %v3526_v8  ;;  %v4593_v8 = vld [vmem:[%s9970_s10 + $0x30] sm:$0xff] }
 0xaa5   : > { %5746 = vmatpush.msra.mxu3 %v4593_v8  ;;  %4657 = vmatpush.msra.mxu0 %v4593_v8 }
 0xaa6   : > { %v3641_v6 = vmul.f32 0.5, %v3640_v14  ;;  %6249 = vrsqrt.f32 %v3542_v63  ;;  %vm3654_vm4 = vweird.f32 %v3542_v63 }
 0xaa8   : > { %v3642_v47 = vsub.f32 1.5, %v3641_v6 }
 0xaaa   : > { %v3643_v42 = vmul.f32 %v6248_v11, %v3642_v47  ;;  %v3503_v62 = vpop.xlane.xlu2 %3502 }
 0xaab   : > { %v3527_v39 = vmul.f32 %v3503_v62, %v10072_v13 }
 0xaac   : > { %v6250_v19 = vpop.eup %6249  ;;  %v3647_v52 = vsel %vm3646_vm2, %v6248_v11, %v3643_v42  ;;  %v4592_v42 = vld [vmem:[%s9970_s10 + $0x28] sm:$0xff] }
 0xaad   : > { %v3717_v60 = vmul.f32 %v3647_v52, %v8786_v24  ;;  %v3649_v2 = vmul.f32 %v6250_v19, %v3542_v63  ;;  %v3841_v38 = vpop.f32.mrf.mxu1  ;;  %v3543_v36 = vadd.f32 1e-05, %v3527_v39  ;;  %vm3655_vm3 = vweird.f32 %v6250_v19  ;;  %5747 = vmatpush.msra.mxu3 %v4592_v42  ;;  %4658 = vmatpush.msra.mxu0 %v4592_v42 }
 0xaae   : > { %v8901_v16 = vadd.f32 %v8896_v46, %v3841_v38  ;;  %vm3656_vm5 = vmor %vm3654_vm4, %vm3655_vm3 }
 0xaaf   : > { %v3650_v45 = vmul.f32 %v6250_v19, %v3649_v2  ;;  %v3736_v40 = vmul.f32 %v8796_v22, %v3717_v60  ;;  %6251 = vrsqrt.f32 %v3543_v36  ;;  %v4591_v2 = vld [vmem:[%s9970_s10 + $0x20] sm:$0xff]  ;;  %vm3664_vm7 = vweird.f32 %v3543_v36 }
 0xab0   : > { %v8905_v28 = vmul.f32 0.70710677, %v8901_v16  ;;  %5748 = vmatpush.msra.mxu3 %v4591_v2  ;;  %4659 = vmatpush.msra.mxu0 %v4591_v2 }
 0xab1   : > { %v3651_v37 = vmul.f32 0.5, %v3650_v45  ;;  %v3755_v57 = vadd.f32 %v8805_v30, %v3736_v40 }
 0xab2   : > { %v3995_v15 = vmul.f32 %v8905_v28, %v8905_v28 }
 0xab3   : > { %v3652_v24 = vsub.f32 1.5, %v3651_v37  ;;  %5682 = vmatmul.msk.f32.gmra.mxu1 %vm432_vm0, %v3755_v57  ;;  %v4590_v57 = vld [vmem:[%s9970_s10 + $0x18] sm:$0xff] }
 0xab4   : > { %v8911_v21 = vmin.f32 %v3995_v15, 16.0  ;;  %5749 = vmatpush.msra.mxu3 %v4590_v57  ;;  %4660 = vmatpush.msra.mxu0 %v4590_v57 }
 0xab5   : > { %v3653_v35 = vmul.f32 %v6250_v19, %v3652_v24  ;;  %v6252_v12 = vpop.eup %6251 }
 0xab6   : > { %v3997_v43 = vmul.f32 2.1237322e-06, %v8911_v21  ;;  %v4008_v54 = vmul.f32 3.8918573e-05, %v8911_v21  ;;  %v3659_v27 = vmul.f32 %v6252_v12, %v3543_v36  ;;  %vm3665_vm6 = vweird.f32 %v6252_v12 }
 0xab7   : > { %v3657_v5 = vsel %vm3656_vm5, %v6250_v19, %v3653_v35  ;;  %vm3666_vm8 = vmor %vm3664_vm7, %vm3665_vm6 }
 0xab8   : > { %v3718_v25 = vmul.f32 %v3657_v5, %v8799_v59  ;;  %v3998_v44 = vadd.f32 0.00028619796, %v3997_v43  ;;  %v4009_v17 = vadd.f32 0.001143296, %v4008_v54  ;;  %v3844_v11 = vpop.f32.mrf.mxu1  ;;  %v3660_v4 = vmul.f32 %v6252_v12, %v3659_v27  ;;  %v4589_v27 = vld [vmem:[%s9970_s10 + $0x10] sm:$0xff] }
 0xab9   : > { %v8920_v61 = vadd.f32 %v8896_v46, %v3844_v11  ;;  %5750 = vmatpush.msra.mxu3 %v4589_v27  ;;  %4661 = vmatpush.msra.mxu0 %v4589_v27 }
 0xaba   : > { %v3999_v14 = vmul.f32 %v3998_v44, %v8911_v21  ;;  %v4010_v63 = vmul.f32 %v4009_v17, %v8911_v21  ;;  %v3737_v6 = vmul.f32 %v8796_v22, %v3718_v25  ;;  %v3661_v59 = vmul.f32 0.5, %v3660_v4 }
 0xabb   : > { %v8929_v47 = vmul.f32 0.70710677, %v8920_v61 }
 0xabc   : > { %v4000_v62 = vadd.f32 0.0036580483, %v3999_v14  ;;  %v4011_v19 = vadd.f32 0.014752088, %v4010_v63  ;;  %v3756_v52 = vadd.f32 %v8805_v30, %v3737_v6  ;;  %v3662_v39 = vsub.f32 1.5, %v3661_v59  ;;  %v4587_v59 = vld [vmem:[%s9970_s10] sm:$0xff] }
 0xabd   : > { %v4035_v60 = vmul.f32 %v8929_v47, %v8929_v47 }
 0xabe   : > { %v4012_v38 = vmul.f32 %v4011_v19, %v8911_v21  ;;  %5683 = vmatmul.msk.f32.gmra.mxu1 %vm432_vm0, %v3756_v52  ;;  %v3663_v45 = vmul.f32 %v6252_v12, %v3662_v39  ;;  %v4001_v40 = vmul.f32 %v4000_v62, %v8911_v21 }
 0xabf   : > { %v8943_v37 = vmin.f32 %v4035_v60, 16.0 }
 0xac0   : > { %v4013_v15 = vadd.f32 0.112945676, %v4012_v38  ;;  %v3667_v24 = vsel %vm3666_vm8, %v6252_v12, %v3663_v45  ;;  %v4002_v55 = vadd.f32 0.05243302, %v4001_v40 }
 0xac1   : > { %v4037_v35 = vmul.f32 2.1237322e-06, %v8943_v37  ;;  %v4048_v43 = vmul.f32 3.8918573e-05, %v8943_v37  ;;  %v3719_v36 = vmul.f32 %v3667_v24, %v8816_v32  ;;  %v3847_v5 = vpop.f32.mrf.mxu1  ;;  %v4588_v32 = vld [vmem:[%s9970_s10 + $0x8] sm:$0xff] }
 0xac2   : > { %v4014_v54 = vmul.f32 %v4013_v15, %v8911_v21  ;;  %v8956_v17 = vadd.f32 %v8896_v46, %v3847_v5  ;;  %5751 = vmatpush.msra.mxu3 %v4588_v32  ;;  %4662 = vmatpush.msra.mxu0 %v4588_v32  ;;  %v4003_v42 = vmul.f32 %v4002_v55, %v8911_v21 }
 0xac3   : > { %v4038_v25 = vadd.f32 0.00028619796, %v4037_v35  ;;  %v4049_v44 = vadd.f32 0.001143296, %v4048_v43  ;;  %v3738_v11 = vmul.f32 %v8796_v22, %v3719_v36 }
 0xac4   : > { %v4015_v12 = vadd.f32 0.4994258, %v4014_v54  ;;  %v8965_v14 = vmul.f32 0.70710677, %v8956_v17  ;;  %5752 = vmatpush.msra.mxu3 %v4587_v59  ;;  %4663 = vmatpush.msra.mxu0 %v4587_v59  ;;  %v4004_v57 = vadd.f32 0.18741608, %v4003_v42 }
 0xac5   : > { %v4039_v4 = vmul.f32 %v4038_v25, %v8943_v37  ;;  %v4050_v8 = vmul.f32 %v4049_v44, %v8943_v37  ;;  %v3757_v6 = vadd.f32 %v8805_v30, %v3738_v11 }
 0xac6   : > { %v4016_v63 = vmul.f32 %v4015_v12, %v8911_v21  ;;  %v4075_v52 = vmul.f32 %v8965_v14, %v8965_v14  ;;  %v4005_v55 = vmul.f32 %v4004_v57, %v8911_v21 }
 0xac7   : > { %v4040_v62 = vadd.f32 0.0036580483, %v4039_v4  ;;  %v4051_v19 = vadd.f32 0.014752088, %v4050_v8  ;;  %v3506_v39 = vpop.xlane.xlu1 %3505  ;;  %5684 = vmatmul.msk.f32.gmra.mxu1 %vm432_vm0, %v3757_v6 }
 0xac8   : > { %v4017_v60 = vadd.f32 1.0, %v4016_v63  ;;  %v8978_v45 = vmin.f32 %v4075_v52, 16.0  ;;  %v3528_v40 = vmul.f32 %v3506_v39, %v10072_v13  ;;  %v4006_v21 = vadd.f32 1.1283791, %v4005_v55 }
 0xac9   : > { %v4041_v2 = vmul.f32 %v4040_v62, %v8943_v37  ;;  %v4052_v38 = vmul.f32 %v4051_v19, %v8943_v37 }
 0xaca   : > { %6253 = vrcp.f32 %v4017_v60  ;;  %v4077_v35 = vmul.f32 2.1237322e-06, %v8978_v45  ;;  %v4088_v43 = vmul.f32 3.8918573e-05, %v8978_v45  ;;  %v8984_v54 = vadd.f32 1e-05, %v3528_v40 }
 0xacb   : > { %v4053_v15 = vadd.f32 0.112945676, %v4052_v38  ;;  %v4042_v24 = vadd.f32 0.05243302, %v4041_v2  ;;  %v4029_v52 = vand.u32 2147483648, %v4017_v60  ;;  %vm4023_vm10 = vweird.f32 %v4017_v60 }
 0xacc   : > { %v4078_v5 = vadd.f32 0.00028619796, %v4077_v35  ;;  %v4089_v27 = vadd.f32 0.001143296, %v4088_v43  ;;  %6255 = vrsqrt.f32 %v8984_v54  ;;  %v3885_v35 = vmul.f32 0.5, %v8901_v16 }
 0xacd   : > { %v4054_v36 = vmul.f32 %v4053_v15, %v8943_v37  ;;  %v4043_v11 = vmul.f32 %v4042_v24, %v8943_v37  ;;  %v4027_v24 = vand.u32 2147483647, %v4017_v60  ;;  %vm3674_vm14 = vweird.f32 %v8984_v54 }
 0xace   : > { %v4079_v32 = vmul.f32 %v4078_v5, %v8978_v45  ;;  %v4090_v4 = vmul.f32 %v4089_v27, %v8978_v45  ;;  %v4007_v5 = vmul.f32 %v4006_v21, %v8905_v28 }
 0xacf   : > { %v4055_v25 = vadd.f32 0.4994258, %v4054_v36  ;;  %v3509_v44 = vpop.xlane.xlu0 %3508  ;;  %v4044_v2 = vadd.f32 0.18741608, %v4043_v11  ;;  %vm4028_vm12 = vcmp.eq.f32.partialorder %v4027_v24, 8.507059e+37 }
 0xad0   : > { %v6254_v12 = vpop.eup %6253  ;;  %v3529_v8 = vmul.f32 %v3509_v44, %v10072_v13  ;;  %v4080_v59 = vadd.f32 0.0036580483, %v4079_v32  ;;  %v4091_v42 = vadd.f32 0.014752088, %v4090_v4  ;;  %v4030_v44 = vor.u32 1.1754944e-38, %v4029_v52 }
 0xad1   : > { %v4019_v63 = vmul.f32 %v6254_v12, %v4017_v60  ;;  %v4056_v6 = vmul.f32 %v4055_v25, %v8943_v37  ;;  %vm4024_vm9 = vweird.f32 %v6254_v12  ;;  %v4045_v11 = vmul.f32 %v4044_v2, %v8943_v37 }
 0xad2   : > { %v8993_v62 = vadd.f32 1e-05, %v3529_v8  ;;  %v4081_v38 = vmul.f32 %v4080_v59, %v8978_v45  ;;  %v4092_v40 = vmul.f32 %v4091_v42, %v8978_v45  ;;  %v6256_v57 = vpop.eup %6255  ;;  %vm4025_vm11 = vmor %vm4023_vm10, %vm4024_vm9 }
 0xad3   : > { %v4020_v19 = vsub.f32 1.0, %v4019_v63  ;;  %v8995_v39 = vadd.f32 1.0, %v4056_v6  ;;  %v3669_v36 = vmul.f32 %v6256_v57, %v8984_v54  ;;  %v4046_v52 = vadd.f32 1.1283791, %v4045_v11 }
 0xad4   : > { %6257 = vrsqrt.f32 %v8993_v62  ;;  %v4082_v43 = vadd.f32 0.05243302, %v4081_v38  ;;  %v4093_v55 = vadd.f32 0.112945676, %v4092_v40  ;;  %vm3675_vm15 = vweird.f32 %v6256_v57 }
 0xad5   : > { %v4021_v15 = vmul.f32 %v6254_v12, %v4020_v19  ;;  %6259 = vrcp.f32 %v8995_v39  ;;  %v3670_v4 = vmul.f32 %v6256_v57, %v3669_v36  ;;  %v4069_v36 = vand.u32 2147483648, %v8995_v39  ;;  %vm3676_vm1 = vmor %vm3674_vm14, %vm3675_vm15 }
 0xad6   : > { %v4083_v32 = vmul.f32 %v4082_v43, %v8978_v45  ;;  %v4094_v16 = vmul.f32 %v4093_v55, %v8978_v45  ;;  %vm4063_vm3 = vweird.f32 %v8995_v39  ;;  %vm3684_vm6 = vweird.f32 %v8993_v62 }
 0xad7   : > { %v4022_v27 = vadd.f32 %v6254_v12, %v4021_v15  ;;  %v3470_v25 = vpop.xlane.xlu1 %3469  ;;  %v3671_v42 = vmul.f32 0.5, %v3670_v4  ;;  %v4067_v4 = vand.u32 2147483647, %v8995_v39 }
 0xad8   : > { %v3516_v63 = vmul.f32 %v3470_v25, %v10072_v13  ;;  %v4084_v28 = vadd.f32 0.18741608, %v4083_v32  ;;  %v4095_v19 = vadd.f32 0.4994258, %v4094_v16 }
 0xad9   : > { %v4026_v8 = vsel %vm4025_vm11, %v6254_v12, %v4022_v27  ;;  %v3672_v2 = vsub.f32 1.5, %v3671_v42  ;;  %v4070_v42 = vor.u32 1.1754944e-38, %v4069_v36  ;;  %vm4068_vm7 = vcmp.eq.f32.partialorder %v4067_v4, 8.507059e+37 }
 0xada   : > { %v6258_v6 = vpop.eup %6257  ;;  %v4031_v59 = vsel %vm4028_vm12, %v4030_v44, %v4026_v8  ;;  %v4096_v40 = vmul.f32 %v4095_v19, %v8978_v45  ;;  %v9012_v24 = vadd.f32 1e-05, %v3516_v63 }
 0xadb   : > { %v6260_v60 = vpop.eup %6259  ;;  %v4032_v21 = vmul.f32 %v4031_v59, %v4007_v5  ;;  %v3679_v37 = vmul.f32 %v6258_v6, %v8993_v62  ;;  %v4085_v5 = vmul.f32 %v4084_v28, %v8978_v45  ;;  %v3673_v27 = vmul.f32 %v6256_v57, %v3672_v2 }
 0xadc   : > { %v4059_v12 = vmul.f32 %v6260_v60, %v8995_v39  ;;  %v9016_v44 = vadd.f32 1.0, %v4096_v40  ;;  %6261 = vrsqrt.f32 %v9012_v24  ;;  %vm4064_vm2 = vweird.f32 %v6260_v60 }
 0xadd   : > { %v5691_v38 = vclamps-f32 %v4032_v21, 1.0  ;;  %v3680_v15 = vmul.f32 %v6258_v6, %v3679_v37  ;;  %v3677_v8 = vsel %vm3676_vm1, %v6256_v57, %v3673_v27  ;;  %vm3685_vm4 = vweird.f32 %v6258_v6  ;;  %vm4065_vm5 = vmor %vm4063_vm3, %vm4064_vm2 }
 0xade   : > { %v4060_v43 = vsub.f32 1.0, %v4059_v12  ;;  %v3850_v55 = vpop.f32.mrf.mxu1  ;;  %6263 = vrcp.f32 %v9016_v44  ;;  %v4086_v63 = vadd.f32 1.1283791, %v4085_v5  ;;  %v3720_v59 = vmul.f32 %v3677_v8, %v8833_v3  ;;  %vm3686_vm8 = vmor %vm3684_vm6, %vm3685_vm4 }
 0xadf   : > { %v4557_v25 = vadd.f32 1.0, %v5691_v38  ;;  %v3681_v11 = vmul.f32 0.5, %v3680_v15  ;;  %v4047_v28 = vmul.f32 %v4046_v52, %v8929_v47  ;;  %v9028_v21 = vadd.f32 %v8896_v46, %v3850_v55 }
 0xae0   : > { %v4061_v32 = vmul.f32 %v6260_v60, %v4060_v43  ;;  %v3886_v3 = vmul.f32 0.5, %v8920_v61  ;;  %v4087_v52 = vmul.f32 %v4086_v63, %v8965_v14  ;;  %vm3554_vm9 = vweird.f32 %v9012_v24 }
 0xae1   : > { %v4573_v16 = vmul.f32 %v4557_v25, %v3885_v35  ;;  %v3682_v54 = vsub.f32 1.5, %v3681_v11  ;;  %v3739_v35 = vmul.f32 %v8796_v22, %v3720_v59  ;;  %v9035_v47 = vmul.f32 0.70710677, %v9028_v21 }
 0xae2   : > { %v4062_v45 = vadd.f32 %v6260_v60, %v4061_v32  ;;  %v6262_v19 = vpop.eup %6261  ;;  %v4107_v14 = vand.u32 2147483647, %v9016_v44  ;;  %v4109_v32 = vand.u32 2147483648, %v9016_v44  ;;  %vm4103_vm12 = vweird.f32 %v9016_v44 }
 0xae3   : > { %5707 = vmatmul.msk.f32.vlgmr.msra.gmra.mxu3 %vm4599_vm13, %v4573_v16  ;;  %v3683_v57 = vmul.f32 %v6258_v6, %v3682_v54  ;;  %v3549_v2 = vmul.f32 %v6262_v19, %v9012_v24  ;;  %v4115_v15 = vmul.f32 %v9035_v47, %v9035_v47  ;;  %v3758_v61 = vadd.f32 %v8805_v30, %v3739_v35 }
 0xae4   : > { %v4066_v39 = vsel %vm4065_vm5, %v6260_v60, %v4062_v45  ;;  %v6264_v38 = vpop.eup %6263  ;;  %vm3555_vm10 = vweird.f32 %v6262_v19  ;;  %vm4108_vm1 = vcmp.eq.f32.partialorder %v4107_v14, 8.507059e+37 }
 0xae5   : > { %v4071_v37 = vsel %vm4068_vm7, %v4070_v42, %v4066_v39  ;;  %v3687_v12 = vsel %vm3686_vm8, %v6258_v6, %v3683_v57  ;;  %v4099_v5 = vmul.f32 %v6264_v38, %v9016_v44  ;;  %v3550_v27 = vmul.f32 %v6262_v19, %v3549_v2  ;;  %5685 = vmatmul.msk.f32.gmra.mxu1 %vm432_vm0, %v3758_v61  ;;  %vm3556_vm14 = vmor %vm3554_vm9, %vm3555_vm10 }
 0xae6   : > { %v4072_v62 = vmul.f32 %v4071_v37, %v4047_v28  ;;  %v3853_v60 = vpop.f32.mrf.mxu1  ;;  %v3721_v40 = vmul.f32 %v3687_v12, %v8840_v41  ;;  %v9049_v6 = vmin.f32 %v4115_v15, 16.0  ;;  %vm4104_vm11 = vweird.f32 %v6264_v38 }
 0xae7   : > { %v9044_v43 = vadd.f32 %v8896_v46, %v3853_v60  ;;  %v4100_v11 = vsub.f32 1.0, %v4099_v5  ;;  %v3551_v4 = vmul.f32 0.5, %v3550_v27  ;;  %v4110_v37 = vor.u32 1.1754944e-38, %v4109_v32  ;;  %vm4105_vm15 = vmor %vm4103_vm12, %vm4104_vm11 }
 0xae8   : > { %v5692_v36 = vclamps-f32 %v4072_v62, 1.0  ;;  %v3740_v55 = vmul.f32 %v8796_v22, %v3721_v40  ;;  %v4117_v8 = vmul.f32 2.1237322e-06, %v9049_v6  ;;  %v4128_v16 = vmul.f32 3.8918573e-05, %v9049_v6 }
 0xae9   : > { %v9053_v41 = vmul.f32 0.70710677, %v9044_v43  ;;  %v4101_v59 = vmul.f32 %v6264_v38, %v4100_v11  ;;  %v3552_v54 = vsub.f32 1.5, %v3551_v4 }
 0xaea   : > { %v4558_v25 = vadd.f32 1.0, %v5692_v36  ;;  %v4118_v28 = vadd.f32 0.00028619796, %v4117_v8  ;;  %v4129_v42 = vadd.f32 0.001143296, %v4128_v16  ;;  %v3759_v57 = vadd.f32 %v8805_v30, %v3740_v55 }
 0xaeb   : > { %v4155_v45 = vmul.f32 %v9053_v41, %v9053_v41  ;;  %v4102_v35 = vadd.f32 %v6264_v38, %v4101_v59  ;;  %v3553_v62 = vmul.f32 %v6262_v19, %v3552_v54 }
 0xaec   : > { %v4574_v63 = vmul.f32 %v4558_v25, %v3886_v3  ;;  %v4119_v12 = vmul.f32 %v4118_v28, %v9049_v6  ;;  %v4130_v2 = vmul.f32 %v4129_v42, %v9049_v6 }
 0xaed   : > { %v9061_v39 = vmin.f32 %v4155_v45, 16.0  ;;  %v4106_v15 = vsel %vm4105_vm15, %v6264_v38, %v4102_v35  ;;  %v3557_v44 = vsel %vm3556_vm14, %v6262_v19, %v3553_v62  ;;  %5686 = vmatmul.msk.f32.gmra.mxu1 %vm432_vm0, %v3759_v57 }
 0xaee   : > { %5708 = vmatmul.msk.f32.gmra.mxu3 %vm4599_vm13, %v4574_v63  ;;  %v3512_v3 = vpop.xlane.xlu2 %3511  ;;  %v4111_v36 = vsel %vm4108_vm1, %v4110_v37, %v4106_v15  ;;  %v3708_v24 = vmul.f32 %v3557_v44, %v8849_v58  ;;  %v4120_v5 = vadd.f32 0.0036580483, %v4119_v12  ;;  %v4131_v27 = vadd.f32 0.014752088, %v4130_v2 }
 0xaef   : > { %v4157_v60 = vmul.f32 2.1237322e-06, %v9061_v39  ;;  %v4168_v40 = vmul.f32 3.8918573e-05, %v9061_v39  ;;  %v3530_v61 = vmul.f32 %v3512_v3, %v10072_v13  ;;  %v4112_v55 = vmul.f32 %v4111_v36, %v4087_v52 }
 0xaf0   : > { %v3727_v4 = vmul.f32 %v8796_v22, %v3708_v24  ;;  %v4121_v38 = vmul.f32 %v4120_v5, %v9049_v6  ;;  %v4132_v19 = vmul.f32 %v4131_v27, %v9049_v6  ;;  %v3887_v63 = vmul.f32 0.5, %v8956_v17 }
 0xaf1   : > { %v4158_v25 = vadd.f32 0.00028619796, %v4157_v60  ;;  %v4169_v11 = vadd.f32 0.001143296, %v4168_v40  ;;  %v9076_v32 = vadd.f32 1e-05, %v3530_v61 }
 0xaf2   : > { %v5693_v14 = vclamps-f32 %v4112_v55, 1.0  ;;  %v3746_v16 = vadd.f32 %v8805_v30, %v3727_v4  ;;  %v4122_v52 = vadd.f32 0.05243302, %v4121_v38  ;;  %v4133_v45 = vadd.f32 0.112945676, %v4132_v19 }
 0xaf3   : > { %v4159_v8 = vmul.f32 %v4158_v25, %v9061_v39  ;;  %v4170_v58 = vmul.f32 %v4169_v11, %v9061_v39  ;;  %6265 = vrsqrt.f32 %v9076_v32  ;;  %vm3694_vm3 = vweird.f32 %v9076_v32 }
 0xaf4   : > { %v4559_v59 = vadd.f32 1.0, %v5693_v14  ;;  %v4123_v42 = vmul.f32 %v4122_v52, %v9049_v6  ;;  %v4134_v57 = vmul.f32 %v4133_v45, %v9049_v6  ;;  %5673 = vmatmul.msk.f32.vlgmr.msrb.gmra.mxu0 %vm432_vm0, %v3746_v16 }
 0xaf5   : > { %v4160_v54 = vadd.f32 0.0036580483, %v4159_v8  ;;  %v4171_v22 = vadd.f32 0.014752088, %v4170_v58 }
 0xaf6   : > { %v3473_v28 = vpop.xlane.xlu2 %3472  ;;  %v4575_v37 = vmul.f32 %v4559_v59, %v3887_v63  ;;  %v4135_v3 = vadd.f32 0.4994258, %v4134_v57  ;;  %v4124_v2 = vadd.f32 0.18741608, %v4123_v42 }
 0xaf7   : > { %v3517_v35 = vmul.f32 %v3473_v28, %v10072_v13  ;;  %v4161_v62 = vmul.f32 %v4160_v54, %v9061_v39  ;;  %v4172_v30 = vmul.f32 %v4171_v22, %v9061_v39 }
 0xaf8   : > { %5709 = vmatmul.msk.f32.gmra.mxu3 %vm4599_vm13, %v4575_v37  ;;  %v4136_v15 = vmul.f32 %v4135_v3, %v9049_v6  ;;  %v4125_v25 = vmul.f32 %v4124_v2, %v9049_v6 }
 0xaf9   : > { %v9092_v12 = vadd.f32 1e-05, %v3517_v35  ;;  %v6266_v17 = vpop.eup %6265  ;;  %v4162_v60 = vadd.f32 0.05243302, %v4161_v62  ;;  %v4173_v40 = vadd.f32 0.112945676, %v4172_v30 }
 0xafa   : > { %v3689_v44 = vmul.f32 %v6266_v17, %v9076_v32  ;;  %v3515_v61 = vpop.xlane.xlu0 %3514  ;;  %v4137_v5 = vadd.f32 1.0, %v4136_v15  ;;  %v4126_v16 = vadd.f32 1.1283791, %v4125_v25  ;;  %vm3695_vm2 = vweird.f32 %v6266_v17 }
 0xafb   : > { %v4163_v36 = vmul.f32 %v4162_v60, %v9061_v39  ;;  %v4174_v24 = vmul.f32 %v4173_v40, %v9061_v39  ;;  %6267 = vrsqrt.f32 %v9092_v12  ;;  %v3531_v55 = vmul.f32 %v3515_v61, %v10072_v13  ;;  %vm3696_vm6 = vmor %vm3694_vm3, %vm3695_vm2 }
 0xafc   : > { %v3690_v27 = vmul.f32 %v6266_v17, %v3689_v44  ;;  %6269 = vrcp.f32 %v4137_v5  ;;  %v4147_v63 = vand.u32 2147483647, %v4137_v5  ;;  %v4149_v13 = vand.u32 2147483648, %v4137_v5 }
 0xafd   : > { %v4164_v11 = vadd.f32 0.18741608, %v4163_v36  ;;  %v4175_v4 = vadd.f32 0.4994258, %v4174_v24  ;;  %v9104_v8 = vadd.f32 1e-05, %v3531_v55  ;;  %vm3564_vm4 = vweird.f32 %v9092_v12 }
 0xafe   : > { %v3691_v19 = vmul.f32 0.5, %v3690_v27  ;;  %v4127_v42 = vmul.f32 %v4126_v16, %v9035_v47  ;;  %vm4143_vm5 = vweird.f32 %v4137_v5  ;;  %vm9118_vm7 = vcmp.eq.f32.partialorder %v4147_v63, 8.507059e+37  ;;  %v6345_v55 = vld [vmem:[%s9966_s6] ss:$0 sm:$0xff] }
 0xaff   : > { %v4176_v38 = vmul.f32 %v4175_v4, %v9061_v39  ;;  %v4165_v14 = vmul.f32 %v4164_v11, %v9061_v39  ;;  %6271 = vrsqrt.f32 %v9104_v8  ;;  %v4150_v32 = vor.u32 1.1754944e-38, %v4149_v13  ;;  %v6346_v16 = vld [vmem:[%s9967_s7] ss:$0 sm:$0xff] }
 0xb00   : > { %v3692_v45 = vsub.f32 1.5, %v3691_v19  ;;  %vm3704_vm11 = vweird.f32 %v9104_v8 }
 0xb01   : > { %v6268_v58 = vpop.eup %6267  ;;  %v9106_v52 = vadd.f32 1.0, %v4176_v38  ;;  %v4166_v39 = vadd.f32 1.1283791, %v4165_v14 }
 0xb02   : > { %v3559_v6 = vmul.f32 %v6268_v58, %v9092_v12  ;;  %v6270_v59 = vpop.eup %6269  ;;  %v3693_v54 = vmul.f32 %v6266_v17, %v3692_v45  ;;  %vm3565_vm8 = vweird.f32 %v6268_v58 }
 0xb03   : > { %6273 = vrcp.f32 %v9106_v52  ;;  %v4139_v57 = vmul.f32 %v6270_v59, %v4137_v5  ;;  %v4167_v40 = vmul.f32 %v4166_v39, %v9053_v41  ;;  %vm4183_vm9 = vweird.f32 %v9106_v52  ;;  %vm3566_vm12 = vmor %vm3564_vm4, %vm3565_vm8 }
 0xb04   : > { %v3560_v22 = vmul.f32 %v6268_v58, %v3559_v6  ;;  %v3697_v62 = vsel %vm3696_vm6, %v6266_v17, %v3693_v54  ;;  %v4187_v15 = vand.u32 2147483647, %v9106_v52  ;;  %vm4144_vm10 = vweird.f32 %v6270_v59 }
 0xb05   : > { %v3856_v28 = vpop.f32.mrf.mxu1  ;;  %v4140_v3 = vsub.f32 1.0, %v4139_v57  ;;  %v3722_v2 = vmul.f32 %v3697_v62, %v8865_v48  ;;  %v6272_v60 = vpop.eup %6271  ;;  %v4189_v27 = vand.u32 2147483648, %v9106_v52  ;;  %vm4145_vm15 = vmor %vm4143_vm5, %vm4144_vm10 }
 0xb06   : > { %v9116_v35 = vadd.f32 %v8896_v46, %v3856_v28  ;;  %v3561_v30 = vmul.f32 0.5, %v3560_v22  ;;  %v3699_v17 = vmul.f32 %v6272_v60, %v9104_v8  ;;  %vm3705_vm14 = vweird.f32 %v6272_v60 }
 0xb07   : > { %v4141_v36 = vmul.f32 %v6270_v59, %v4140_v3  ;;  %v3741_v25 = vmul.f32 %v6345_v55, %v3722_v2  ;;  %vm4188_vm3 = vcmp.eq.f32.partialorder %v4187_v15, 8.507059e+37  ;;  %vm3706_vm4 = vmor %vm3704_vm11, %vm3705_vm14 }
 0xb08   : > { %v9124_v47 = vmul.f32 0.70710677, %v9116_v35  ;;  %v3562_v44 = vsub.f32 1.5, %v3561_v30  ;;  %v3700_v4 = vmul.f32 %v6272_v60, %v3699_v17 }
 0xb09   : > { %v6274_v61 = vpop.eup %6273  ;;  %v4142_v11 = vadd.f32 %v6270_v59, %v4141_v36  ;;  %v3760_v45 = vadd.f32 %v6346_v16, %v3741_v25 }
 0xb0a   : > { %v4195_v48 = vmul.f32 %v9124_v47, %v9124_v47  ;;  %v4179_v24 = vmul.f32 %v6274_v61, %v9106_v52  ;;  %v3563_v41 = vmul.f32 %v6268_v58, %v3562_v44  ;;  %vm4184_vm1 = vweird.f32 %v6274_v61 }
 0xb0b   : > { %v4146_v13 = vsel %vm4145_vm15, %v6270_v59, %v4142_v11  ;;  %v3701_v12 = vmul.f32 0.5, %v3700_v4  ;;  %5687 = vmatmul.msk.f32.gmra.mxu1 %vm432_vm0, %v3760_v45  ;;  %vm4185_vm2 = vmor %vm4183_vm9, %vm4184_vm1 }
 0xb0c   : > { %v9141_v38 = vmin.f32 %v4195_v48, 16.0  ;;  %v4180_v19 = vsub.f32 1.0, %v4179_v24  ;;  %v3567_v14 = vsel %vm3566_vm12, %v6268_v58, %v3563_v41  ;;  %v4151_v54 = vsel %vm9118_vm7, %v4150_v32, %v4146_v13 }
 0xb0d   : > { %v3859_v63 = vpop.f32.mrf.mxu1  ;;  %v3709_v6 = vmul.f32 %v3567_v14, %v8870_v49  ;;  %v4152_v28 = vmul.f32 %v4151_v54, %v4127_v42  ;;  %v3702_v57 = vsub.f32 1.5, %v3701_v12  ;;  %v4190_v49 = vor.u32 1.1754944e-38, %v4189_v27 }
 0xb0e   : > { %v4197_v39 = vmul.f32 2.1237322e-06, %v9141_v38  ;;  %v4181_v5 = vmul.f32 %v6274_v61, %v4180_v19  ;;  %v4208_v22 = vmul.f32 3.8918573e-05, %v9141_v38  ;;  %v9154_v58 = vadd.f32 %v8896_v46, %v3859_v63 }
 0xb0f   : > { %v3728_v59 = vmul.f32 %v6345_v55, %v3709_v6  ;;  %v5694_v37 = vclamps-f32 %v4152_v28, 1.0  ;;  %v3703_v32 = vmul.f32 %v6272_v60, %v3702_v57  ;;  %v3888_v24 = vmul.f32 0.5, %v9028_v21 }
 0xb10   : > { %v4198_v62 = vadd.f32 0.00028619796, %v4197_v39  ;;  %v4182_v30 = vadd.f32 %v6274_v61, %v4181_v5  ;;  %v4209_v3 = vadd.f32 0.001143296, %v4208_v22  ;;  %v9157_v2 = vmul.f32 0.70710677, %v9154_v58 }
 0xb11   : > { %v3747_v36 = vadd.f32 %v6346_v16, %v3728_v59  ;;  %v4560_v27 = vadd.f32 1.0, %v5694_v37  ;;  %v3707_v41 = vsel %vm3706_vm4, %v6272_v60, %v3703_v32 }
 0xb12   : > { %v4199_v44 = vmul.f32 %v4198_v62, %v9141_v38  ;;  %v4186_v17 = vsel %vm4185_vm2, %v6274_v61, %v4182_v30  ;;  %v4210_v42 = vmul.f32 %v4209_v3, %v9141_v38  ;;  %v4235_v48 = vmul.f32 %v9157_v2, %v9157_v2 }
 0xb13   : > { %v4191_v52 = vsel %vm4188_vm3, %v4190_v49, %v4186_v17  ;;  %5674 = vmatmul.msk.f32.gmra.mxu0 %vm432_vm0, %v3747_v36  ;;  %v3723_v61 = vmul.f32 %v3707_v41, %v8879_v9  ;;  %v4576_v8 = vmul.f32 %v4560_v27, %v3888_v24  ;;  %v3889_v9 = vmul.f32 0.5, %v9044_v43 }
 0xb14   : > { %v4192_v25 = vmul.f32 %v4191_v52, %v4167_v40  ;;  %v4211_v15 = vadd.f32 0.014752088, %v4210_v42  ;;  %v9172_v11 = vmin.f32 %v4235_v48, 16.0  ;;  %v4200_v4 = vadd.f32 0.0036580483, %v4199_v44 }
 0xb15   : > { %5710 = vmatmul.msk.f32.gmra.mxu3 %vm4599_vm13, %v4576_v8  ;;  %v3742_v60 = vmul.f32 %v6345_v55, %v3723_v61 }
 0xb16   : > { %v5695_v19 = vclamps-f32 %v4192_v25, 1.0  ;;  %v4212_v14 = vmul.f32 %v4211_v15, %v9141_v38  ;;  %v4237_v45 = vmul.f32 2.1237322e-06, %v9172_v11  ;;  %v4248_v21 = vmul.f32 3.8918573e-05, %v9172_v11 }
 0xb17   : > { %v4201_v6 = vmul.f32 %v4200_v4, %v9141_v38  ;;  %v3761_v39 = vadd.f32 %v6346_v16, %v3742_v60 }
 0xb18   : > { %v4561_v63 = vadd.f32 1.0, %v5695_v19  ;;  %v4213_v13 = vadd.f32 0.112945676, %v4212_v14  ;;  %v4238_v40 = vadd.f32 0.00028619796, %v4237_v45 }
 0xb19   : > { %v4249_v12 = vadd.f32 0.001143296, %v4248_v21  ;;  %5688 = vmatmul.msk.f32.gmra.mxu1 %vm432_vm0, %v3761_v39  ;;  %v4202_v55 = vadd.f32 0.05243302, %v4201_v6 }
 0xb1a   : > { %v4214_v54 = vmul.f32 %v4213_v13, %v9141_v38  ;;  %v4239_v5 = vmul.f32 %v4238_v40, %v9172_v11  ;;  %v4577_v22 = vmul.f32 %v4561_v63, %v3889_v9 }
 0xb1b   : > { %v4250_v28 = vmul.f32 %v4249_v12, %v9172_v11  ;;  %v4203_v49 = vmul.f32 %v4202_v55, %v9141_v38 }
 0xb1c   : > { %v4215_v57 = vadd.f32 0.4994258, %v4214_v54  ;;  %v4240_v30 = vadd.f32 0.0036580483, %v4239_v5 }
 0xb1d   : > { %v4251_v62 = vadd.f32 0.014752088, %v4250_v28  ;;  %5711 = vmatmul.msk.f32.gmra.mxu3 %vm4599_vm13, %v4577_v22  ;;  %v4204_v44 = vadd.f32 0.18741608, %v4203_v49 }
 0xb1e   : > { %v4216_v59 = vmul.f32 %v4215_v57, %v9141_v38  ;;  %v4241_v37 = vmul.f32 %v4240_v30, %v9172_v11 }
 0xb1f   : > { %v4252_v43 = vmul.f32 %v4251_v62, %v9172_v11  ;;  %v4205_v24 = vmul.f32 %v4204_v44, %v9141_v38  ;;  %v3890_v62 = vmul.f32 0.5, %v9116_v35 }
 0xb20   : > { %v4217_v16 = vadd.f32 1.0, %v4216_v59  ;;  %v4242_v17 = vadd.f32 0.05243302, %v4241_v37 }
 0xb21   : > { %v4253_v3 = vadd.f32 0.112945676, %v4252_v43  ;;  %v4206_v15 = vadd.f32 1.1283791, %v4205_v24 }
 0xb22   : > { %6275 = vrcp.f32 %v4217_v16  ;;  %v4243_v41 = vmul.f32 %v4242_v17, %v9172_v11  ;;  %v4229_v61 = vand.u32 2147483648, %v4217_v16  ;;  %v4227_v4 = vand.u32 2147483647, %v4217_v16 }
 0xb23   : > { %v4254_v32 = vmul.f32 %v4253_v3, %v9172_v11  ;;  %vm4223_vm6 = vweird.f32 %v4217_v16  ;;  %v4207_v63 = vmul.f32 %v4206_v15, %v9124_v47  ;;  %v3891_v15 = vmul.f32 0.5, %v9154_v58  ;;  %v9232_v58 = vld [vmem:[%s9969_s9] ss:$0 sm:$0xff] }
 0xb24   : > { %v4244_v19 = vadd.f32 0.18741608, %v4243_v41  ;;  %v4230_v21 = vor.u32 1.1754944e-38, %v4229_v61  ;;  %vm4228_vm8 = vcmp.eq.f32.partialorder %v4227_v4, 8.507059e+37 }
 0xb25   : > { %v4255_v36 = vadd.f32 0.4994258, %v4254_v32 }
 0xb26   : > { %v4245_v9 = vmul.f32 %v4244_v19, %v9172_v11 }
 0xb27   : > { %v4256_v42 = vmul.f32 %v4255_v36, %v9172_v11 }
 0xb28   : > { %v6276_v48 = vpop.eup %6275  ;;  %v4246_v57 = vadd.f32 1.1283791, %v4245_v9 }
 0xb29   : > { %v4219_v27 = vmul.f32 %v6276_v48, %v4217_v16  ;;  %v4257_v52 = vadd.f32 1.0, %v4256_v42  ;;  %vm4224_vm5 = vweird.f32 %v6276_v48 }
 0xb2a   : > { %vm4225_vm7 = vmor %vm4223_vm6, %vm4224_vm5  ;;  %v4247_v37 = vmul.f32 %v4246_v57, %v9157_v2 }
 0xb2b   : > { %v4220_v25 = vsub.f32 1.0, %v4219_v27  ;;  %6277 = vrcp.f32 %v4257_v52  ;;  %v4269_v22 = vand.u32 2147483648, %v4257_v52  ;;  %v4267_v47 = vand.u32 2147483647, %v4257_v52 }
 0xb2c   : > { %vm4263_vm10 = vweird.f32 %v4257_v52 }
 0xb2d   : > { %v4221_v8 = vmul.f32 %v6276_v48, %v4220_v25  ;;  %v4270_v16 = vor.u32 1.1754944e-38, %v4269_v22  ;;  %vm4268_vm12 = vcmp.eq.f32.partialorder %v4267_v47, 8.507059e+37 }
 0xb2f   : > { %v4222_v14 = vadd.f32 %v6276_v48, %v4221_v8 }
 0xb30   : > { %v3862_v45 = vpop.f32.mrf.mxu1 }
 0xb31   : > { %v9194_v60 = vadd.f32 %v8896_v46, %v3862_v45  ;;  %v6278_v38 = vpop.eup %6277  ;;  %v4226_v13 = vsel %vm4225_vm7, %v6276_v48, %v4222_v14 }
 0xb32   : > { %v4231_v40 = vsel %vm4228_vm8, %v4230_v21, %v4226_v13  ;;  %v4259_v6 = vmul.f32 %v6278_v38, %v4257_v52  ;;  %vm4264_vm9 = vweird.f32 %v6278_v38 }
 0xb33   : > { %v4232_v12 = vmul.f32 %v4231_v40, %v4207_v63  ;;  %v9199_v39 = vmul.f32 0.70710677, %v9194_v60  ;;  %vm4265_vm11 = vmor %vm4263_vm10, %vm4264_vm9 }
 0xb34   : > { %v4260_v54 = vsub.f32 1.0, %v4259_v6 }
 0xb35   : > { %v5696_v5 = vclamps-f32 %v4232_v12, 1.0  ;;  %v4275_v28 = vmul.f32 %v9199_v39, %v9199_v39 }
 0xb36   : > { %v4261_v55 = vmul.f32 %v6278_v38, %v4260_v54 }
 0xb37   : > { %v4562_v59 = vadd.f32 1.0, %v5696_v5  ;;  %v9204_v30 = vmin.f32 %v4275_v28, 16.0 }
 0xb38   : > { %v4262_v11 = vadd.f32 %v6278_v38, %v4261_v55 }
 0xb39   : > { %v4578_v43 = vmul.f32 %v4562_v59, %v3890_v62  ;;  %v4277_v49 = vmul.f32 2.1237322e-06, %v9204_v30  ;;  %v4288_v3 = vmul.f32 3.8918573e-05, %v9204_v30 }
 0xb3a   : > { %v4266_v32 = vsel %vm4265_vm11, %v6278_v38, %v4262_v11 }
 0xb3b   : > { %v3865_v44 = vpop.f32.mrf.mxu1  ;;  %v4271_v36 = vsel %vm4268_vm12, %v4270_v16, %v4266_v32  ;;  %v4278_v17 = vadd.f32 0.00028619796, %v4277_v49  ;;  %v4289_v35 = vadd.f32 0.001143296, %v4288_v3  ;;  %5712 = vmatmul.msk.f32.gmra.mxu3 %vm4599_vm13, %v4578_v43 }
 0xb3c   : > { %v9210_v42 = vadd.f32 %v8896_v46, %v3865_v44  ;;  %v4272_v48 = vmul.f32 %v4271_v36, %v4247_v37 }
 0xb3d   : > { %v4279_v24 = vmul.f32 %v4278_v17, %v9204_v30  ;;  %v4290_v27 = vmul.f32 %v4289_v35, %v9204_v30 }
 0xb3e   : > { %v9216_v52 = vmul.f32 0.70710677, %v9210_v42  ;;  %v5697_v2 = vclamps-f32 %v4272_v48, 1.0 }
 0xb3f   : > { %v4280_v41 = vadd.f32 0.0036580483, %v4279_v24  ;;  %v4291_v25 = vadd.f32 0.014752088, %v4290_v27 }
 0xb40   : > { %v4315_v61 = vmul.f32 %v9216_v52, %v9216_v52  ;;  %v4563_v46 = vadd.f32 1.0, %v5697_v2 }
 0xb41   : > { %v4292_v8 = vmul.f32 %v4291_v25, %v9204_v30  ;;  %v4281_v14 = vmul.f32 %v4280_v41, %v9204_v30 }
 0xb42   : > { %v9222_v4 = vmin.f32 %v4315_v61, 16.0  ;;  %v4579_v19 = vmul.f32 %v4563_v46, %v3891_v15 }
 0xb43   : > { %v4293_v45 = vadd.f32 0.112945676, %v4292_v8  ;;  %v4282_v6 = vadd.f32 0.05243302, %v4281_v14 }
 0xb44   : > { %v4317_v21 = vmul.f32 2.1237322e-06, %v9222_v4  ;;  %v4328_v38 = vmul.f32 3.8918573e-05, %v9222_v4  ;;  %5713 = vmatmul.msk.f32.gmra.mxu3 %vm4599_vm13, %v4579_v19  ;;  %v3868_v63 = vpop.f32.mrf.mxu1 }
 0xb45   : > { %v4294_v13 = vmul.f32 %v4293_v45, %v9204_v30  ;;  %v9235_v9 = vadd.f32 %v9232_v58, %v3868_v63  ;;  %v4283_v55 = vmul.f32 %v4282_v6, %v9204_v30 }
 0xb46   : > { %v4318_v40 = vadd.f32 0.00028619796, %v4317_v21  ;;  %v4329_v12 = vadd.f32 0.001143296, %v4328_v38 }
 0xb47   : > { %v4295_v54 = vadd.f32 0.4994258, %v4294_v13  ;;  %v9240_v28 = vmul.f32 0.70710677, %v9235_v9  ;;  %v4284_v49 = vadd.f32 0.18741608, %v4283_v55 }
 0xb48   : > { %v4319_v5 = vmul.f32 %v4318_v40, %v9222_v4  ;;  %v4330_v22 = vmul.f32 %v4329_v12, %v9222_v4 }
 0xb49   : > { %v4296_v57 = vmul.f32 %v4295_v54, %v9204_v30  ;;  %v4355_v62 = vmul.f32 %v9240_v28, %v9240_v28  ;;  %v4285_v48 = vmul.f32 %v4284_v49, %v9204_v30 }
 0xb4a   : > { %v4331_v47 = vadd.f32 0.014752088, %v4330_v22  ;;  %v4320_v11 = vadd.f32 0.0036580483, %v4319_v5 }
 0xb4b   : > { %v4297_v59 = vadd.f32 1.0, %v4296_v57  ;;  %v9247_v16 = vmin.f32 %v4355_v62, 16.0  ;;  %v4286_v19 = vadd.f32 1.1283791, %v4285_v48 }
 0xb4c   : > { %v4332_v43 = vmul.f32 %v4331_v47, %v9222_v4  ;;  %v4321_v37 = vmul.f32 %v4320_v11, %v9222_v4 }
 0xb4d   : > { %6279 = vrcp.f32 %v4297_v59  ;;  %v4357_v32 = vmul.f32 2.1237322e-06, %v9247_v16  ;;  %v4368_v44 = vmul.f32 3.8918573e-05, %v9247_v16  ;;  %v4307_v21 = vand.u32 2147483647, %v4297_v59 }
 0xb4e   : > { %v4333_v3 = vadd.f32 0.112945676, %v4332_v43  ;;  %v4322_v2 = vadd.f32 0.05243302, %v4321_v37  ;;  %v4309_v38 = vand.u32 2147483648, %v4297_v59  ;;  %vm4303_vm15 = vweird.f32 %v4297_v59 }
 0xb4f   : > { %v4358_v17 = vadd.f32 0.00028619796, %v4357_v32  ;;  %v4369_v35 = vadd.f32 0.001143296, %v4368_v44  ;;  %v4287_v54 = vmul.f32 %v4286_v19, %v9199_v39  ;;  %vm4308_vm2 = vcmp.eq.f32.partialorder %v4307_v21, 8.507059e+37 }
 0xb50   : > { %v4334_v36 = vmul.f32 %v4333_v3, %v9222_v4  ;;  %v4323_v63 = vmul.f32 %v4322_v2, %v9222_v4  ;;  %v4310_v5 = vor.u32 1.1754944e-38, %v4309_v38 }
 0xb51   : > { %v4359_v41 = vmul.f32 %v4358_v17, %v9247_v16  ;;  %v4370_v25 = vmul.f32 %v4369_v35, %v9247_v16 }
 0xb52   : > { %v4335_v24 = vadd.f32 0.4994258, %v4334_v36  ;;  %v4324_v22 = vadd.f32 0.18741608, %v4323_v63  ;;  %v3892_v36 = vmul.f32 0.5, %v9194_v60 }
 0xb53   : > { %v6280_v27 = vpop.eup %6279  ;;  %v4360_v46 = vadd.f32 0.0036580483, %v4359_v41  ;;  %v4371_v8 = vadd.f32 0.014752088, %v4370_v25 }
 0xb54   : > { %v4299_v61 = vmul.f32 %v6280_v27, %v4297_v59  ;;  %v4336_v15 = vmul.f32 %v4335_v24, %v9222_v4  ;;  %vm4304_vm14 = vweird.f32 %v6280_v27  ;;  %v4325_v3 = vmul.f32 %v4324_v22, %v9222_v4  ;;  %v9269_v24 = vld [vmem:[%s9971_s11] ss:$0 sm:$0xff] }
 0xb55   : > { %v4372_v30 = vmul.f32 %v4371_v8, %v9247_v16  ;;  %v4361_v40 = vmul.f32 %v4360_v46, %v9247_v16  ;;  %vm4305_vm1 = vmor %vm4303_vm15, %vm4304_vm14 }
 0xb56   : > { %v4300_v14 = vsub.f32 1.0, %v4299_v61  ;;  %v4337_v45 = vadd.f32 1.0, %v4336_v15 }
 0xb57   : > { %v4373_v12 = vadd.f32 0.112945676, %v4372_v30  ;;  %v4362_v55 = vadd.f32 0.05243302, %v4361_v40 }
 0xb58   : > { %v4301_v13 = vmul.f32 %v6280_v27, %v4300_v14  ;;  %6281 = vrcp.f32 %v4337_v45  ;;  %v4349_v35 = vand.u32 2147483648, %v4337_v45  ;;  %v4347_v4 = vand.u32 2147483647, %v4337_v45 }
 0xb59   : > { %v4374_v47 = vmul.f32 %v4373_v12, %v9247_v16  ;;  %v4363_v59 = vmul.f32 %v4362_v55, %v9247_v16  ;;  %vm4343_vm4 = vweird.f32 %v4337_v45 }
 0xb5a   : > { %v4302_v6 = vadd.f32 %v6280_v27, %v4301_v13  ;;  %v4350_v60 = vor.u32 1.1754944e-38, %v4349_v35  ;;  %vm4348_vm6 = vcmp.eq.f32.partialorder %v4347_v4, 8.507059e+37 }
 0xb5b   : > { %v4375_v49 = vadd.f32 0.4994258, %v4374_v47  ;;  %v4364_v25 = vadd.f32 0.18741608, %v4363_v59 }
 0xb5c   : > { %v4306_v57 = vsel %vm4305_vm1, %v6280_v27, %v4302_v6  ;;  %v4326_v27 = vadd.f32 1.1283791, %v4325_v3 }
 0xb5d   : > { %v4311_v62 = vsel %vm4308_vm2, %v4310_v5, %v4306_v57  ;;  %v4376_v39 = vmul.f32 %v4375_v49, %v9247_v16  ;;  %v4365_v63 = vmul.f32 %v4364_v25, %v9247_v16  ;;  %v3893_v5 = vmul.f32 0.5, %v9210_v42 }
 0xb5e   : > { %v6282_v11 = vpop.eup %6281  ;;  %v4312_v43 = vmul.f32 %v4311_v62, %v4287_v54  ;;  %v4327_v14 = vmul.f32 %v4326_v27, %v9216_v52 }
 0xb5f   : > { %v4339_v37 = vmul.f32 %v6282_v11, %v4337_v45  ;;  %v4377_v48 = vadd.f32 1.0, %v4376_v39  ;;  %vm4344_vm3 = vweird.f32 %v6282_v11  ;;  %v4366_v22 = vadd.f32 1.1283791, %v4365_v63 }
 0xb60   : > { %v5698_v32 = vclamps-f32 %v4312_v43, 1.0  ;;  %vm4345_vm5 = vmor %vm4343_vm4, %vm4344_vm3 }
 0xb61   : > { %v4340_v44 = vsub.f32 1.0, %v4339_v37  ;;  %6283 = vrcp.f32 %v4377_v48  ;;  %v4387_v16 = vand.u32 2147483647, %v4377_v48  ;;  %v4389_v62 = vand.u32 2147483648, %v4377_v48 }
 0xb62   : > { %v4564_v17 = vadd.f32 1.0, %v5698_v32  ;;  %v3871_v15 = vpop.f32.mrf.mxu1  ;;  %vm4383_vm8 = vweird.f32 %v4377_v48 }
 0xb63   : > { %v4341_v2 = vmul.f32 %v6282_v11, %v4340_v44  ;;  %v9272_v8 = vadd.f32 %v9232_v58, %v3871_v15  ;;  %v4367_v44 = vmul.f32 %v4366_v22, %v9240_v28  ;;  %vm4388_vm10 = vcmp.eq.f32.partialorder %v4387_v16, 8.507059e+37 }
 0xb64   : > { %v4580_v41 = vmul.f32 %v4564_v17, %v3892_v36 }
 0xb65   : > { %v4342_v61 = vadd.f32 %v6282_v11, %v4341_v2  ;;  %v9281_v45 = vmul.f32 0.70710677, %v9272_v8 }
 0xb66   : > { %v4671_v46 = vpop.f32.mrf.mxu3  ;;  %5714 = vmatmul.msk.f32.gmra.mxu3 %vm4599_vm13, %v4580_v41  ;;  %v4390_v41 = vor.u32 1.1754944e-38, %v4389_v62 }
 0xb67   : > { %v9275_v19 = vadd.f32 %v9269_v24, %v4671_v46  ;;  %v4346_v21 = vsel %vm4345_vm5, %v6282_v11, %v4342_v61  ;;  %v6284_v40 = vpop.eup %6283  ;;  %v4395_v6 = vmul.f32 %v9281_v45, %v9281_v45 }
 0xb68   : > { %v4351_v38 = vsel %vm4348_vm6, %v4350_v60, %v4346_v21  ;;  %v4379_v54 = vmul.f32 %v6284_v40, %v4377_v48  ;;  %vm4384_vm7 = vweird.f32 %v6284_v40 }
 0xb69   : > { %v4352_v30 = vmul.f32 %v4351_v38, %v4327_v14  ;;  %v9284_v13 = vmul.f32 0.70710677, %v9275_v19  ;;  %v9291_v57 = vmin.f32 %v4395_v6, 16.0  ;;  %vm4385_vm9 = vmor %vm4383_vm8, %vm4384_vm7 }
 0xb6a   : > { %v4380_v47 = vsub.f32 1.0, %v4379_v54  ;;  %v3874_v43 = vpop.f32.mrf.mxu1 }
 0xb6b   : > { %v5699_v12 = vclamps-f32 %v4352_v30, 1.0  ;;  %v4825_v52 = vmul.f32 %v9284_v13, %v9284_v13  ;;  %v4397_v49 = vmul.f32 2.1237322e-06, %v9291_v57  ;;  %v4408_v3 = vmul.f32 3.8918573e-05, %v9291_v57 }
 0xb6c   : > { %v9298_v37 = vadd.f32 %v9232_v58, %v3874_v43  ;;  %v4381_v42 = vmul.f32 %v6284_v40, %v4380_v47 }
 0xb6d   : > { %v4565_v55 = vadd.f32 1.0, %v5699_v12  ;;  %v9293_v11 = vmin.f32 %v4825_v52, 16.0  ;;  %v4398_v36 = vadd.f32 0.00028619796, %v4397_v49  ;;  %v4409_v17 = vadd.f32 0.001143296, %v4408_v3 }
 0xb6e   : > { %v4382_v35 = vadd.f32 %v6284_v40, %v4381_v42  ;;  %v9304_v4 = vmul.f32 0.70710677, %v9298_v37  ;;  %v3894_v42 = vmul.f32 0.5, %v9235_v9 }
 0xb6f   : > { %v4581_v32 = vmul.f32 %v4565_v55, %v3893_v5  ;;  %v4827_v59 = vmul.f32 2.1237322e-06, %v9293_v11  ;;  %v4838_v39 = vmul.f32 3.8918573e-05, %v9293_v11  ;;  %v4399_v25 = vmul.f32 %v4398_v36, %v9291_v57 }
 0xb70   : > { %v4410_v61 = vmul.f32 %v4409_v17, %v9291_v57  ;;  %v4386_v28 = vsel %vm4385_vm9, %v6284_v40, %v4382_v35  ;;  %v4435_v46 = vmul.f32 %v9304_v4, %v9304_v4 }
 0xb71   : > { %v4828_v27 = vadd.f32 0.00028619796, %v4827_v59  ;;  %v4839_v2 = vadd.f32 0.001143296, %v4838_v39  ;;  %5715 = vmatmul.msk.f32.gmra.mxu3 %vm4599_vm13, %v4581_v32  ;;  %v3835_v60 = vpop.f32.mrf.mxu0  ;;  %v4391_v14 = vsel %vm4388_vm10, %v4390_v41, %v4386_v28  ;;  %v4400_v21 = vadd.f32 0.0036580483, %v4399_v25  ;;  %v4674_v62 = vpop.f32.mrf.mxu3 }
 0xb72   : > { %v4411_v38 = vadd.f32 0.014752088, %v4410_v61  ;;  %v9315_v63 = vadd.f32 %v9232_v58, %v3835_v60  ;;  %v4392_v30 = vmul.f32 %v4391_v14, %v4367_v44  ;;  %v9317_v54 = vmin.f32 %v4435_v46, 16.0 }
 0xb73   : > { %v4829_v48 = vmul.f32 %v4828_v27, %v9293_v11  ;;  %v4840_v15 = vmul.f32 %v4839_v2, %v9293_v11  ;;  %v4401_v40 = vmul.f32 %v4400_v21, %v9291_v57 }
 0xb74   : > { %v4412_v52 = vmul.f32 %v4411_v38, %v9291_v57  ;;  %v9322_v5 = vmul.f32 0.70710677, %v9315_v63  ;;  %v5700_v22 = vclamps-f32 %v4392_v30, 1.0  ;;  %v4437_v47 = vmul.f32 2.1237322e-06, %v9317_v54 }
 0xb75   : > { %v4830_v6 = vadd.f32 0.0036580483, %v4829_v48  ;;  %v4841_v12 = vadd.f32 0.014752088, %v4840_v15  ;;  %v4402_v43 = vadd.f32 0.05243302, %v4401_v40 }
 0xb76   : > { %v4413_v49 = vadd.f32 0.112945676, %v4412_v52  ;;  %v4448_v3 = vmul.f32 3.8918573e-05, %v9317_v54  ;;  %v3915_v32 = vmul.f32 %v9322_v5, %v9322_v5  ;;  %v4566_v59 = vadd.f32 1.0, %v5700_v22 }
 0xb77   : > { %v4831_v16 = vmul.f32 %v4830_v6, %v9293_v11  ;;  %v4842_v55 = vmul.f32 %v4841_v12, %v9293_v11  ;;  %v4403_v36 = vmul.f32 %v4402_v43, %v9291_v57  ;;  %v4438_v35 = vadd.f32 0.00028619796, %v4437_v47 }
 0xb78   : > { %v4414_v17 = vmul.f32 %v4413_v49, %v9291_v57  ;;  %v4449_v27 = vadd.f32 0.001143296, %v4448_v3  ;;  %v4582_v2 = vmul.f32 %v4566_v59, %v3894_v42  ;;  %v9335_v61 = vmin.f32 %v3915_v32, 16.0 }
 0xb79   : > { %v4832_v39 = vadd.f32 0.05243302, %v4831_v16  ;;  %v4843_v44 = vadd.f32 0.112945676, %v4842_v55  ;;  %v4404_v28 = vadd.f32 0.18741608, %v4403_v36  ;;  %v4439_v9 = vmul.f32 %v4438_v35, %v9317_v54 }
 0xb7a   : > { %v4415_v48 = vadd.f32 0.4994258, %v4414_v17  ;;  %v4450_v15 = vmul.f32 %v4449_v27, %v9317_v54  ;;  %v3917_v14 = vmul.f32 2.1237322e-06, %v9335_v61  ;;  %5716 = vmatmul.msk.f32.gmra.mxu3 %vm4599_vm13, %v4582_v2  ;;  %v3928_v52 = vmul.f32 3.8918573e-05, %v9335_v61 }
 0xb7b   : > { %v4833_v41 = vmul.f32 %v4832_v39, %v9293_v11  ;;  %v4844_v25 = vmul.f32 %v4843_v44, %v9293_v11  ;;  %v4405_v21 = vmul.f32 %v4404_v28, %v9291_v57  ;;  %v4440_v30 = vadd.f32 0.0036580483, %v4439_v9  ;;  %v4677_v3 = vpop.f32.mrf.mxu3 }
 0xb7c   : > { %v4416_v38 = vmul.f32 %v4415_v48, %v9291_v57  ;;  %v4451_v6 = vadd.f32 0.014752088, %v4450_v15  ;;  %v3918_v40 = vadd.f32 0.00028619796, %v3917_v14  ;;  %v3929_v57 = vadd.f32 0.001143296, %v3928_v52 }
 0xb7d   : > { %v4834_v46 = vadd.f32 0.18741608, %v4833_v41  ;;  %v4845_v60 = vadd.f32 0.4994258, %v4844_v25  ;;  %v4441_v55 = vmul.f32 %v4440_v30, %v9317_v54  ;;  %v4406_v32 = vadd.f32 1.1283791, %v4405_v21 }
 0xb7e   : > { %v9345_v22 = vadd.f32 1.0, %v4416_v38  ;;  %v4452_v43 = vmul.f32 %v4451_v6, %v9317_v54  ;;  %v3919_v49 = vmul.f32 %v3918_v40, %v9335_v61  ;;  %v9355_v42 = vadd.f32 %v9269_v24, %v4674_v62 }
 0xb7f   : > { %v4846_v12 = vmul.f32 %v4845_v60, %v9293_v11  ;;  %v4835_v16 = vmul.f32 %v4834_v46, %v9293_v11  ;;  %v9358_v59 = vmul.f32 0.5, %v9272_v8  ;;  %v9362_v11 = vmul.f32 0.5, %v9275_v19 }
 0xb80   : > { %6285 = vrcp.f32 %v9345_v22  ;;  %v4442_v44 = vadd.f32 0.05243302, %v4441_v55  ;;  %v9365_v36 = vadd.f32 %v9269_v24, %v4677_v3  ;;  %v4427_v17 = vand.u32 2147483647, %v9345_v22 }
 0xb81   : > { %v9349_v47 = vadd.f32 1.0, %v4846_v12  ;;  %v4836_v39 = vadd.f32 1.1283791, %v4835_v16  ;;  %v4453_v35 = vadd.f32 0.112945676, %v4452_v43  ;;  %v3930_v62 = vmul.f32 %v3929_v57, %v9335_v61 }
 0xb82   : > { %v3920_v27 = vadd.f32 0.0036580483, %v3919_v49  ;;  %v4407_v2 = vmul.f32 %v4406_v32, %v9281_v45  ;;  %v4429_v8 = vand.u32 2147483648, %v9345_v22  ;;  %v4443_v41 = vmul.f32 %v4442_v44, %v9317_v54 }
 0xb83   : > { %6287 = vrcp.f32 %v9349_v47  ;;  %v9373_v19 = vmul.f32 0.70710677, %v9355_v42  ;;  %vm4423_vm11 = vweird.f32 %v9345_v22  ;;  %v4454_v25 = vmul.f32 %v4453_v35, %v9317_v54 }
 0xb84   : > { %v3921_v28 = vmul.f32 %v3920_v27, %v9335_v61  ;;  %v3931_v48 = vadd.f32 0.014752088, %v3930_v62  ;;  %v4837_v15 = vmul.f32 %v4836_v39, %v9284_v13  ;;  %vm4853_vm12 = vweird.f32 %v9349_v47 }
 0xb85   : > { %v4444_v45 = vadd.f32 0.18741608, %v4443_v41  ;;  %v4865_v46 = vmul.f32 %v9373_v19, %v9373_v19  ;;  %vm9383_vm14 = vcmp.eq.f32.partialorder %v4427_v17, 8.507059e+37  ;;  %v4857_v38 = vand.u32 2147483647, %v9349_v47 }
 0xb86   : > { %v6286_v9 = vpop.eup %6285  ;;  %v4455_v30 = vadd.f32 0.4994258, %v4454_v25  ;;  %v3922_v6 = vadd.f32 0.05243302, %v3921_v28  ;;  %v4430_v12 = vor.u32 1.1754944e-38, %v4429_v8  ;;  %v4859_v40 = vand.u32 2147483648, %v9349_v47 }
 0xb87   : > { %v4419_v14 = vmul.f32 %v6286_v9, %v9345_v22  ;;  %v3932_v52 = vmul.f32 %v3931_v48, %v9335_v61  ;;  %v9392_v43 = vmin.f32 %v4865_v46, 16.0  ;;  %v9395_v49 = vmul.f32 0.70710677, %v9365_v36 }
 0xb88   : > { %v4456_v55 = vmul.f32 %v4455_v30, %v9317_v54  ;;  %v4445_v3 = vmul.f32 %v4444_v45, %v9317_v54  ;;  %v3923_v32 = vmul.f32 %v3922_v6, %v9335_v61  ;;  %vm4424_vm15 = vweird.f32 %v6286_v9 }
 0xb89   : > { %v6288_v60 = vpop.eup %6287  ;;  %v4420_v16 = vsub.f32 1.0, %v4419_v14  ;;  %v3933_v39 = vadd.f32 0.112945676, %v3932_v52  ;;  %v4867_v35 = vmul.f32 2.1237322e-06, %v9392_v43  ;;  %vm9404_vm2 = vcmp.eq.f32.partialorder %v4857_v38, 8.507059e+37  ;;  %vm4425_vm3 = vmor %vm4423_vm11, %vm4424_vm15 }
 0xb8a   : > { %v4849_v13 = vmul.f32 %v6288_v60, %v9349_v47  ;;  %v9399_v17 = vadd.f32 1.0, %v4456_v55  ;;  %vm4854_vm1 = vweird.f32 %v6288_v60  ;;  %v4878_v8 = vmul.f32 3.8918573e-05, %v9392_v43 }
 0xb8b   : > { %v4421_v44 = vmul.f32 %v6286_v9, %v4420_v16  ;;  %v3934_v62 = vmul.f32 %v3933_v39, %v9335_v61  ;;  %v4860_v54 = vor.u32 1.1754944e-38, %v4859_v40  ;;  %v4446_v48 = vadd.f32 1.1283791, %v4445_v3  ;;  %vm4855_vm4 = vmor %vm4853_vm12, %vm4854_vm1 }
 0xb8c   : > { %v4850_v57 = vsub.f32 1.0, %v4849_v13  ;;  %6289 = vrcp.f32 %v9399_v17  ;;  %v3924_v45 = vadd.f32 0.18741608, %v3923_v32  ;;  %v4868_v30 = vadd.f32 0.00028619796, %v4867_v35 }
 0xb8d   : > { %v4422_v41 = vadd.f32 %v6286_v9, %v4421_v44  ;;  %v3935_v46 = vadd.f32 0.4994258, %v3934_v62  ;;  %v4879_v6 = vadd.f32 0.001143296, %v4878_v8  ;;  %v4905_v38 = vmul.f32 %v9395_v49, %v9395_v49  ;;  %v3877_v8 = vpop.f32.mrf.mxu1 }
 0xb8e   : > { %v4851_v27 = vmul.f32 %v6288_v60, %v4850_v57  ;;  %v4467_v22 = vand.u32 2147483647, %v9399_v17  ;;  %v4469_v52 = vand.u32 2147483648, %v9399_v17  ;;  %v4869_v55 = vmul.f32 %v4868_v30, %v9392_v43 }
 0xb8f   : > { %v4426_v14 = vsel %vm4425_vm3, %v6286_v9, %v4422_v41  ;;  %v3936_v47 = vmul.f32 %v3935_v46, %v9335_v61  ;;  %v9424_v3 = vmul.f32 0.5, %v9298_v37  ;;  %v3925_v21 = vmul.f32 %v3924_v45, %v9335_v61 }
 0xb90   : > { %v4852_v28 = vadd.f32 %v6288_v60, %v4851_v27  ;;  %v4431_v13 = vsel %vm9383_vm14, %v4430_v12, %v4426_v14  ;;  %v9430_v44 = vmin.f32 %v4905_v38, 16.0  ;;  %v4447_v27 = vmul.f32 %v4446_v48, %v9304_v4 }
 0xb91   : > { %v4432_v16 = vmul.f32 %v4431_v13, %v4407_v2  ;;  %v9428_v39 = vadd.f32 1.0, %v3936_v47  ;;  %v4870_v2 = vadd.f32 0.0036580483, %v4869_v55  ;;  %vm9434_vm5 = vcmp.eq.f32.partialorder %v4467_v22, 8.507059e+37 }
 0xb92   : > { %v4856_v40 = vsel %vm4855_vm4, %v6288_v60, %v4852_v28  ;;  %v4880_v60 = vmul.f32 %v4879_v6, %v9392_v43  ;;  %v6290_v12 = vpop.eup %6289  ;;  %v4470_v41 = vor.u32 1.1754944e-38, %v4469_v52  ;;  %v3926_v28 = vadd.f32 1.1283791, %v3925_v21  ;;  %v3838_v21 = vpop.f32.mrf.mxu0 }
 0xb93   : > { %v4861_v9 = vsel %vm9404_vm2, %v4860_v54, %v4856_v40  ;;  %v5701_v32 = vclamps-f32 %v4432_v16, 1.0  ;;  %v4459_v62 = vmul.f32 %v6290_v12, %v9399_v17  ;;  %6291 = vrcp.f32 %v9428_v39 }
 0xb94   : > { %v4862_v57 = vmul.f32 %v4861_v9, %v4837_v15  ;;  %v4881_v15 = vadd.f32 0.014752088, %v4880_v60  ;;  %v4871_v45 = vmul.f32 %v4870_v2, %v9392_v43  ;;  %v4907_v46 = vmul.f32 2.1237322e-06, %v9430_v44 }
 0xb95   : > { %v4567_v37 = vadd.f32 1.0, %v5701_v32  ;;  %v4460_v54 = vsub.f32 1.0, %v4459_v62  ;;  %v9444_v14 = vadd.f32 %v9232_v58, %v3877_v8  ;;  %vm4464_vm6 = vweird.f32 %v6290_v12 }
 0xb96   : > { %v5723_v35 = vclamps-f32 %v4862_v57, 1.0  ;;  %v4882_v48 = vmul.f32 %v4881_v15, %v9392_v43  ;;  %v4872_v38 = vadd.f32 0.05243302, %v4871_v45  ;;  %vm4463_vm7 = vweird.f32 %v9399_v17 }
 0xb97   : > { %v4583_v4 = vmul.f32 %v4567_v37, %v9358_v59  ;;  %v4461_v6 = vmul.f32 %v6290_v12, %v4460_v54  ;;  %v4908_v13 = vadd.f32 0.00028619796, %v4907_v46  ;;  %v4918_v40 = vmul.f32 3.8918573e-05, %v9430_v44  ;;  %vm4465_vm8 = vmor %vm4463_vm7, %vm4464_vm6 }
 0xb98   : > { %v5387_v25 = vadd.f32 1.0, %v5723_v35  ;;  %v4883_v59 = vadd.f32 0.112945676, %v4882_v48  ;;  %v3927_v52 = vmul.f32 %v3926_v28, %v9322_v5  ;;  %v4873_v16 = vmul.f32 %v4872_v38, %v9392_v43 }
 0xb99   : > { %5717 = vmatmul.msk.f32.gmra.mxu3 %vm4599_vm13, %v4583_v4  ;;  %v4462_v22 = vadd.f32 %v6290_v12, %v4461_v6  ;;  %v6292_v9 = vpop.eup %6291  ;;  %v4909_v17 = vmul.f32 %v4908_v13, %v9430_v44  ;;  %v4919_v55 = vadd.f32 0.001143296, %v4918_v40  ;;  %v9463_v57 = vmul.f32 0.70710677, %v9444_v14 }
 0xb9a   : > { %v5403_v30 = vmul.f32 %v5387_v25, %v9362_v11  ;;  %v4884_v47 = vmul.f32 %v4883_v59, %v9392_v43  ;;  %v3947_v5 = vand.u32 2147483647, %v9428_v39  ;;  %v3949_v32 = vand.u32 2147483648, %v9428_v39 }
 0xb9b   : > { %v4466_v60 = vsel %vm4465_vm8, %v6290_v12, %v4462_v22  ;;  %v4910_v62 = vadd.f32 0.0036580483, %v4909_v17  ;;  %v4920_v15 = vmul.f32 %v4919_v55, %v9430_v44  ;;  %v4475_v25 = vmul.f32 %v9463_v57, %v9463_v57  ;;  %v3880_v17 = vpop.f32.mrf.mxu1 }
 0xb9c   : > { %v5419_v11 = vadd.f32 %v5403_v30, %v8611_v53  ;;  %v3939_v53 = vmul.f32 %v6292_v9, %v9428_v39  ;;  %v4471_v2 = vsel %vm9434_vm5, %v4470_v41, %v4466_v60  ;;  %v4885_v35 = vadd.f32 0.4994258, %v4884_v47 }
 0xb9d   : > { %v4472_v8 = vmul.f32 %v4471_v2, %v4447_v27  ;;  %v9476_v12 = vadd.f32 %v9232_v58, %v3838_v21  ;;  %v4874_v54 = vadd.f32 0.18741608, %v4873_v16  ;;  %v4911_v45 = vmul.f32 %v4910_v62, %v9430_v44 }
 0xb9e   : > { %5435 = vst.msk [vmem:[%s9452_s30 + $0x10] sm:$0xff] %vm432_vm0, %v5419_v11  ;;  %v3940_v37 = vsub.f32 1.0, %v3939_v53  ;;  %v4886_v28 = vmul.f32 %v4885_v35, %v9392_v43  ;;  %v4921_v4 = vadd.f32 0.014752088, %v4920_v15  ;;  %vm3944_vm9 = vweird.f32 %v6292_v9 }
 0xb9f   : > { %v5702_v61 = vclamps-f32 %v4472_v8, 1.0  ;;  %v9480_v48 = vmin.f32 %v4475_v25, 16.0  ;;  %vm3943_vm10 = vweird.f32 %v9428_v39  ;;  %v4912_v46 = vadd.f32 0.05243302, %v4911_v45 }
 0xba0   : > { %v3941_v41 = vmul.f32 %v6292_v9, %v3940_v37  ;;  %v9483_v27 = vadd.f32 1.0, %v4886_v28  ;;  %v4922_v30 = vmul.f32 %v4921_v4, %v9430_v44  ;;  %vm3948_vm11 = vcmp.eq.f32.partialorder %v3947_v5, 8.507059e+37  ;;  %vm3945_vm12 = vmor %vm3943_vm10, %vm3944_vm9 }
 0xba1   : > { %v4568_v6 = vadd.f32 1.0, %v5702_v61  ;;  %v4477_v59 = vmul.f32 2.1237322e-06, %v9480_v48  ;;  %v3950_v13 = vor.u32 1.1754944e-38, %v3949_v32  ;;  %v4875_v40 = vmul.f32 %v4874_v54, %v9392_v43 }
 0xba2   : > { %v3942_v38 = vadd.f32 %v6292_v9, %v3941_v41  ;;  %6293 = vrcp.f32 %v9483_v27  ;;  %v9490_v11 = vmul.f32 0.70710677, %v9476_v12  ;;  %v4913_v16 = vmul.f32 %v4912_v46, %v9430_v44 }
 0xba3   : > { %v4584_v39 = vmul.f32 %v4568_v6, %v9424_v3  ;;  %v4923_v47 = vadd.f32 0.112945676, %v4922_v30  ;;  %v4478_v21 = vadd.f32 0.00028619796, %v4477_v59  ;;  %v4488_v43 = vmul.f32 3.8918573e-05, %v9480_v48 }
 0xba4   : > { %v3946_v22 = vsel %vm3945_vm12, %v6292_v9, %v3942_v38  ;;  %v4914_v53 = vadd.f32 0.18741608, %v4913_v16  ;;  %v4876_v32 = vadd.f32 1.1283791, %v4875_v40  ;;  %v3955_v3 = vmul.f32 %v9490_v11, %v9490_v11 }
 0xba5   : > { %v3951_v55 = vsel %vm3948_vm11, %v3950_v13, %v3946_v22  ;;  %v4924_v5 = vmul.f32 %v4923_v47, %v9430_v44  ;;  %5718 = vmatmul.msk.f32.gmra.mxu3 %vm4599_vm13, %v4584_v39  ;;  %v4479_v2 = vmul.f32 %v4478_v21, %v9480_v48  ;;  %v9501_v9 = vadd.f32 %v9232_v58, %v3880_v17  ;;  %v4680_v17 = vpop.f32.mrf.mxu3 }
 0xba6   : > { %v3952_v60 = vmul.f32 %v3951_v55, %v3927_v52  ;;  %v3883_v35 = vmul.f32 0.5, %v9315_v63  ;;  %v4489_v15 = vadd.f32 0.001143296, %v4488_v43  ;;  %v9505_v37 = vmul.f32 0.5, %v9355_v42 }
 0xba7   : > { %v4925_v52 = vadd.f32 0.4994258, %v4924_v5  ;;  %v4480_v25 = vadd.f32 0.0036580483, %v4479_v2  ;;  %v9507_v54 = vmin.f32 %v3955_v3, 16.0  ;;  %v4915_v63 = vmul.f32 %v4914_v53, %v9430_v44 }
 0xba8   : > { %v5689_v62 = vclamps-f32 %v3952_v60, 1.0  ;;  %v6294_v8 = vpop.eup %6293  ;;  %v9510_v28 = vmul.f32 0.70710677, %v9501_v9  ;;  %v4897_v58 = vand.u32 2147483647, %v9483_v27  ;;  %v4899_v61 = vand.u32 2147483648, %v9483_v27 }
 0xba9   : > { %v4889_v4 = vmul.f32 %v6294_v8, %v9483_v27  ;;  %v4926_v41 = vmul.f32 %v4925_v52, %v9430_v44  ;;  %v4490_v42 = vmul.f32 %v4489_v15, %v9480_v48  ;;  %v3957_v46 = vmul.f32 2.1237322e-06, %v9507_v54 }
 0xbaa   : > { %v4555_v45 = vadd.f32 1.0, %v5689_v62  ;;  %v4481_v38 = vmul.f32 %v4480_v25, %v9480_v48  ;;  %v3968_v59 = vmul.f32 3.8918573e-05, %v9507_v54  ;;  %vm4894_vm14 = vweird.f32 %v6294_v8 }
 0xbab   : > { %v4890_v6 = vsub.f32 1.0, %v4889_v4  ;;  %v9521_v13 = vadd.f32 1.0, %v4926_v41  ;;  %v4491_v40 = vadd.f32 0.014752088, %v4490_v42  ;;  %v4515_v39 = vmul.f32 %v9510_v28, %v9510_v28 }
 0xbac   : > { %v4571_v30 = vmul.f32 %v4555_v45, %v3883_v35  ;;  %v4916_v16 = vadd.f32 1.1283791, %v4915_v63  ;;  %v3958_v44 = vadd.f32 0.00028619796, %v3957_v46  ;;  %v3969_v47 = vadd.f32 0.001143296, %v3968_v59 }
 0xbad   : > { %v4891_v22 = vmul.f32 %v6294_v8, %v4890_v6  ;;  %v4877_v55 = vmul.f32 %v4876_v32, %v9373_v19  ;;  %vm4893_vm15 = vweird.f32 %v9483_v27  ;;  %vm4898_vm1 = vcmp.eq.f32.partialorder %v4897_v58, 8.507059e+37 }
 0xbae   : > { %5705 = vmatmul.msk.f32.vlgmr.msra.gmra.mxu0 %vm4599_vm13, %v4571_v30  ;;  %6295 = vrcp.f32 %v9521_v13  ;;  %v4482_v60 = vadd.f32 0.05243302, %v4481_v38  ;;  %v4492_v53 = vmul.f32 %v4491_v40, %v9480_v48  ;;  %v3959_v5 = vmul.f32 %v3958_v44, %v9507_v54  ;;  %vm4895_vm2 = vmor %vm4893_vm15, %vm4894_vm14 }
 0xbaf   : > { %v4892_v21 = vadd.f32 %v6294_v8, %v4891_v22  ;;  %v4900_v43 = vor.u32 1.1754944e-38, %v4899_v61  ;;  %v3970_v2 = vmul.f32 %v3969_v47, %v9507_v54  ;;  %v9533_v3 = vmin.f32 %v4515_v39, 16.0 }
 0xbb0   : > { %v9536_v19 = vadd.f32 %v9269_v24, %v4680_v17  ;;  %v4917_v32 = vmul.f32 %v4916_v16, %v9395_v49  ;;  %v4493_v35 = vadd.f32 0.112945676, %v4492_v53  ;;  %v3960_v62 = vadd.f32 0.0036580483, %v3959_v5 }
 0xbb1   : > { %v4896_v27 = vsel %vm4895_vm2, %v6294_v8, %v4892_v21  ;;  %v3971_v15 = vadd.f32 0.014752088, %v3970_v2  ;;  %v4517_v25 = vmul.f32 2.1237322e-06, %v9533_v3  ;;  %v4528_v45 = vmul.f32 3.8918573e-05, %v9533_v3 }
 0xbb2   : > { %v4901_v52 = vsel %vm4898_vm1, %v4900_v43, %v4896_v27  ;;  %v4483_v58 = vmul.f32 %v4482_v60, %v9480_v48  ;;  %v4494_v63 = vmul.f32 %v4493_v35, %v9480_v48  ;;  %v3961_v61 = vmul.f32 %v3960_v62, %v9507_v54 }
 0xbb3   : > { %v4902_v4 = vmul.f32 %v4901_v52, %v4877_v55  ;;  %v4937_v8 = vand.u32 2147483647, %v9521_v13  ;;  %v3972_v49 = vmul.f32 %v3971_v15, %v9507_v54  ;;  %v4518_v42 = vadd.f32 0.00028619796, %v4517_v25 }
 0xbb4   : > { %v6296_v41 = vpop.eup %6295  ;;  %v4529_v46 = vadd.f32 0.001143296, %v4528_v45  ;;  %v4939_v38 = vand.u32 2147483648, %v9521_v13  ;;  %v9549_v59 = vmul.f32 0.70710677, %v9536_v19  ;;  %vm4933_vm4 = vweird.f32 %v9521_v13 }
 0xbb5   : > { %v5724_v30 = vclamps-f32 %v4902_v4, 1.0  ;;  %v4929_v6 = vmul.f32 %v6296_v41, %v9521_v13  ;;  %v4495_v40 = vadd.f32 0.4994258, %v4494_v63  ;;  %v3962_v39 = vadd.f32 0.05243302, %v3961_v61 }
 0xbb6   : > { %v3973_v22 = vadd.f32 0.112945676, %v3972_v49  ;;  %v4519_v16 = vmul.f32 %v4518_v42, %v9533_v3  ;;  %v4484_v17 = vadd.f32 0.18741608, %v4483_v58  ;;  %v4530_v55 = vmul.f32 %v4529_v46, %v9533_v3 }
 0xbb7   : > { %v5388_v44 = vadd.f32 1.0, %v5724_v30  ;;  %v4930_v47 = vsub.f32 1.0, %v4929_v6  ;;  %vm4934_vm3 = vweird.f32 %v6296_v41  ;;  %v4496_v21 = vmul.f32 %v4495_v40, %v9480_v48 }
 0xbb8   : > { %v3974_v60 = vmul.f32 %v3973_v22, %v9507_v54  ;;  %v4520_v53 = vadd.f32 0.0036580483, %v4519_v16  ;;  %v4531_v2 = vadd.f32 0.014752088, %v4530_v55  ;;  %v4945_v27 = vmul.f32 %v9549_v59, %v9549_v59  ;;  %vm4935_vm5 = vmor %vm4933_vm4, %vm4934_vm3 }
 0xbb9   : > { %v5404_v5 = vmul.f32 %v5388_v44, %v9505_v37  ;;  %v4931_v43 = vmul.f32 %v6296_v41, %v4930_v47  ;;  %v9558_v35 = vadd.f32 1.0, %v4496_v21  ;;  %v3963_v62 = vmul.f32 %v3962_v39, %v9507_v54 }
 0xbba   : > { %v3975_v52 = vadd.f32 0.4994258, %v3974_v60  ;;  %v4521_v15 = vmul.f32 %v4520_v53, %v9533_v3  ;;  %v4532_v37 = vmul.f32 %v4531_v2, %v9533_v3  ;;  %v4940_v4 = vor.u32 1.1754944e-38, %v4939_v38  ;;  %v4683_v38 = vpop.f32.mrf.mxu3 }
 0xbbb   : > { %v5420_v25 = vadd.f32 %v5404_v5, %v8617_v0  ;;  %v4932_v45 = vadd.f32 %v6296_v41, %v4931_v43  ;;  %v4485_v58 = vmul.f32 %v4484_v17, %v9480_v48  ;;  %6297 = vrcp.f32 %v9558_v35 }
 0xbbc   : > { %v9568_v63 = vmin.f32 %v4945_v27, 16.0  ;;  %vm4938_vm6 = vcmp.eq.f32.partialorder %v4937_v8, 8.507059e+37  ;;  %v3976_v0 = vmul.f32 %v3975_v52, %v9507_v54  ;;  %v4522_v49 = vadd.f32 0.05243302, %v4521_v15 }
 0xbbd   : > { %5436 = vst.msk [vmem:[%s9452_s30 + $0x18] sm:$0xff] %vm432_vm0, %v5420_v25  ;;  %v4936_v61 = vsel %vm4935_vm5, %v6296_v41, %v4932_v45  ;;  %v3964_v13 = vadd.f32 0.18741608, %v3963_v62  ;;  %v4533_v46 = vadd.f32 0.112945676, %v4532_v37  ;;  %v4717_v41 = vmul.f32 0.5, %v9365_v36 }
 0xbbe   : > { %v4941_v42 = vsel %vm4938_vm6, %v4940_v4, %v4936_v61  ;;  %v9573_v6 = vadd.f32 1.0, %v3976_v0  ;;  %v4486_v40 = vadd.f32 1.1283791, %v4485_v58  ;;  %v4523_v48 = vmul.f32 %v4522_v49, %v9533_v3 }
 0xbbf   : > { %v4942_v30 = vmul.f32 %v4941_v42, %v4917_v32  ;;  %v4534_v39 = vmul.f32 %v4533_v46, %v9533_v3  ;;  %v4947_v22 = vmul.f32 2.1237322e-06, %v9568_v63  ;;  %v4958_v16 = vmul.f32 3.8918573e-05, %v9568_v63 }
 0xbc0   : > { %6299 = vrcp.f32 %v9573_v6  ;;  %v9582_v32 = vmul.f32 0.5, %v9444_v14  ;;  %v9585_v47 = vmul.f32 0.5, %v9476_v12  ;;  %v3965_v17 = vmul.f32 %v3964_v13, %v9507_v54 }
 0xbc1   : > { %v5725_v8 = vclamps-f32 %v4942_v30, 1.0  ;;  %v6298_v44 = vpop.eup %6297  ;;  %v9589_v55 = vadd.f32 %v9269_v24, %v4683_v38  ;;  %v4507_v60 = vand.u32 2147483647, %v9558_v35  ;;  %v4535_v53 = vadd.f32 0.4994258, %v4534_v39 }
 0xbc2   : > { %v4499_v36 = vmul.f32 %v6298_v44, %v9558_v35  ;;  %v4487_v5 = vmul.f32 %v4486_v40, %v9463_v57  ;;  %v4509_v43 = vand.u32 2147483648, %v9558_v35  ;;  %v4524_v14 = vadd.f32 0.18741608, %v4523_v48  ;;  %v4686_v46 = vpop.f32.mrf.mxu3 }
 0xbc3   : > { %v5389_v21 = vadd.f32 1.0, %v5725_v8  ;;  %v4948_v2 = vadd.f32 0.00028619796, %v4947_v22  ;;  %v4536_v54 = vmul.f32 %v4535_v53, %v9533_v3  ;;  %v4959_v62 = vadd.f32 0.001143296, %v4958_v16 }
 0xbc4   : > { %v4500_v12 = vsub.f32 1.0, %v4499_v36  ;;  %vm4504_vm7 = vweird.f32 %v6298_v44  ;;  %v3966_v52 = vadd.f32 1.1283791, %v3965_v17  ;;  %v9598_v25 = vmul.f32 0.70710677, %v9589_v55 }
 0xbc5   : > { %v5405_v27 = vmul.f32 %v5389_v21, %v4717_v41  ;;  %v4949_v15 = vmul.f32 %v4948_v2, %v9568_v63  ;;  %v9601_v4 = vadd.f32 1.0, %v4536_v54  ;;  %v4960_v58 = vmul.f32 %v4959_v62, %v9568_v63 }
 0xbc6   : > { %v6300_v45 = vpop.eup %6299  ;;  %v4501_v37 = vmul.f32 %v6298_v44, %v4500_v12  ;;  %vm4503_vm8 = vweird.f32 %v9558_v35  ;;  %vm9605_vm9 = vcmp.eq.f32.partialorder %v4507_v60, 8.507059e+37  ;;  %v4525_v49 = vmul.f32 %v4524_v14, %v9533_v3 }
 0xbc7   : > { %v5421_v57 = vadd.f32 %v5405_v27, %v8623_v1  ;;  %v3979_v0 = vmul.f32 %v6300_v45, %v9573_v6  ;;  %v4510_v13 = vor.u32 1.1754944e-38, %v4509_v43  ;;  %v3987_v1 = vand.u32 2147483647, %v9573_v6  ;;  %vm4505_vm10 = vmor %vm4503_vm8, %vm4504_vm7 }
 0xbc8   : > { %v4502_v42 = vadd.f32 %v6298_v44, %v4501_v37  ;;  %6301 = vrcp.f32 %v9601_v4  ;;  %v3967_v35 = vmul.f32 %v3966_v52, %v9490_v11  ;;  %v4950_v38 = vadd.f32 0.0036580483, %v4949_v15 }
 0xbc9   : > { %5437 = vst.msk [vmem:[%s9452_s30 + $0x20] sm:$0xff] %vm432_vm0, %v5421_v57  ;;  %v3980_v30 = vsub.f32 1.0, %v3979_v0  ;;  %v4961_v40 = vadd.f32 0.014752088, %v4960_v58  ;;  %v3989_v39 = vand.u32 2147483648, %v9573_v6  ;;  %v4985_v3 = vmul.f32 %v9598_v25, %v9598_v25 }
 0xbca   : > { %v4506_v48 = vsel %vm4505_vm10, %v6298_v44, %v4502_v42  ;;  %v9621_v22 = vadd.f32 %v9269_v24, %v4686_v46  ;;  %vm3984_vm11 = vweird.f32 %v6300_v45  ;;  %v4526_v16 = vadd.f32 1.1283791, %v4525_v49 }
 0xbcb   : > { %v4511_v41 = vsel %vm9605_vm9, %v4510_v13, %v4506_v48  ;;  %v3981_v8 = vmul.f32 %v6300_v45, %v3980_v30  ;;  %vm3983_vm12 = vweird.f32 %v9573_v6  ;;  %v4962_v11 = vmul.f32 %v4961_v40, %v9568_v63 }
 0xbcc   : > { %v4512_v17 = vmul.f32 %v4511_v41, %v4487_v5  ;;  %v9627_v44 = vmin.f32 %v4985_v3, 16.0  ;;  %vm3988_vm14 = vcmp.eq.f32.partialorder %v3987_v1, 8.507059e+37  ;;  %v4951_v36 = vmul.f32 %v4950_v38, %v9568_v63  ;;  %vm3985_vm15 = vmor %vm3983_vm12, %vm3984_vm11  ;;  %v4689_v3 = vpop.f32.mrf.mxu3 }
 0xbcd   : > { %v3982_v21 = vadd.f32 %v6300_v45, %v3981_v8  ;;  %v9631_v60 = vmul.f32 0.70710677, %v9621_v22  ;;  %v3990_v14 = vor.u32 1.1754944e-38, %v3989_v39  ;;  %v4963_v2 = vadd.f32 0.112945676, %v4962_v11 }
 0xbce   : > { %v6302_v53 = vpop.eup %6301  ;;  %v5703_v43 = vclamps-f32 %v4512_v17, 1.0  ;;  %v4987_v5 = vmul.f32 2.1237322e-06, %v9627_v44  ;;  %v4527_v6 = vmul.f32 %v4526_v16, %v9510_v28  ;;  %v4547_v54 = vand.u32 2147483647, %v9601_v4 }
 0xbcf   : > { %v3986_v27 = vsel %vm3985_vm15, %v6300_v45, %v3982_v21  ;;  %v4539_v12 = vmul.f32 %v6302_v53, %v9601_v4  ;;  %v4964_v15 = vmul.f32 %v4963_v2, %v9568_v63  ;;  %v4952_v61 = vadd.f32 0.05243302, %v4951_v36 }
 0xbd0   : > { %v4569_v62 = vadd.f32 1.0, %v5703_v43  ;;  %v3991_v52 = vsel %vm3988_vm14, %v3990_v14, %v3986_v27  ;;  %v4988_v57 = vadd.f32 0.00028619796, %v4987_v5  ;;  %v4998_v0 = vmul.f32 3.8918573e-05, %v9627_v44 }
 0xbd1   : > { %v3992_v37 = vmul.f32 %v3991_v52, %v3967_v35  ;;  %v4540_v58 = vsub.f32 1.0, %v4539_v12  ;;  %v4549_v45 = vand.u32 2147483648, %v9601_v4  ;;  %v4965_v42 = vadd.f32 0.4994258, %v4964_v15 }
 0xbd2   : > { %v4585_v49 = vmul.f32 %v4569_v62, %v9582_v32  ;;  %v5025_v28 = vmul.f32 %v9631_v60, %v9631_v60  ;;  %vm4544_vm1 = vweird.f32 %v6302_v53  ;;  %v4999_v46 = vadd.f32 0.001143296, %v4998_v0 }
 0xbd3   : > { %v5690_v13 = vclamps-f32 %v3992_v37, 1.0  ;;  %v4541_v1 = vmul.f32 %v6302_v53, %v4540_v58  ;;  %vm4543_vm2 = vweird.f32 %v9601_v4  ;;  %v4966_v35 = vmul.f32 %v4965_v42, %v9568_v63 }
 0xbd4   : > { %v4989_v30 = vmul.f32 %v4988_v57, %v9627_v44  ;;  %v9646_v38 = vmin.f32 %v5025_v28, 16.0  ;;  %5719 = vmatmul.msk.f32.gmra.mxu3 %vm4599_vm13, %v4585_v49  ;;  %v4953_v48 = vmul.f32 %v4952_v61, %v9568_v63  ;;  %v5000_v39 = vmul.f32 %v4999_v46, %v9627_v44  ;;  %vm4545_vm3 = vmor %vm4543_vm2, %vm4544_vm1 }
 0xbd5   : > { %v4556_v32 = vadd.f32 1.0, %v5690_v13  ;;  %v4542_v40 = vadd.f32 %v6302_v53, %v4541_v1  ;;  %v4550_v41 = vor.u32 1.1754944e-38, %v4549_v45  ;;  %v4967_v8 = vadd.f32 1.0, %v4966_v35 }
 0xbd6   : > { %v5027_v4 = vmul.f32 2.1237322e-06, %v9646_v38  ;;  %v5038_v16 = vmul.f32 3.8918573e-05, %v9646_v38  ;;  %vm4548_vm4 = vcmp.eq.f32.partialorder %v4547_v54, 8.507059e+37  ;;  %v9655_v14 = vadd.f32 %v9269_v24, %v4689_v3 }
 0xbd7   : > { %v4572_v17 = vmul.f32 %v4556_v32, %v9585_v47  ;;  %v4546_v11 = vsel %vm4545_vm3, %v6302_v53, %v4542_v40  ;;  %v5001_v21 = vadd.f32 0.014752088, %v5000_v39  ;;  %6303 = vrcp.f32 %v4967_v8 }
 0xbd8   : > { %v4551_v36 = vsel %vm4548_vm4, %v4550_v41, %v4546_v11  ;;  %v4990_v43 = vadd.f32 0.0036580483, %v4989_v30  ;;  %v4954_v5 = vadd.f32 0.18741608, %v4953_v48  ;;  %v5028_v12 = vadd.f32 0.00028619796, %v5027_v4 }
 0xbd9   : > { %v4552_v2 = vmul.f32 %v4551_v36, %v4527_v6  ;;  %v5002_v27 = vmul.f32 %v5001_v21, %v9627_v44  ;;  %5706 = vmatmul.msk.f32.gmra.mxu0 %vm4599_vm13, %v4572_v17  ;;  %v5039_v62 = vadd.f32 0.001143296, %v5038_v16  ;;  %v9663_v57 = vmul.f32 0.70710677, %v9655_v14 }
 0xbda   : > { %v4991_v47 = vmul.f32 %v4990_v43, %v9627_v44  ;;  %v5029_v53 = vmul.f32 %v5028_v12, %v9646_v38  ;;  %v3898_v24 = vmul.f32 0.5, %v9501_v9  ;;  %v4955_v37 = vmul.f32 %v4954_v5, %v9568_v63 }
 0xbdb   : > { %v5704_v52 = vclamps-f32 %v4552_v2, 1.0  ;;  %v5003_v15 = vadd.f32 0.112945676, %v5002_v27  ;;  %v5040_v54 = vmul.f32 %v5039_v62, %v9646_v38  ;;  %v5065_v49 = vmul.f32 %v9663_v57, %v9663_v57 }
 0xbdc   : > { %v5030_v28 = vadd.f32 0.0036580483, %v5029_v53  ;;  %v4992_v13 = vadd.f32 0.05243302, %v4991_v47  ;;  %v4956_v9 = vadd.f32 1.1283791, %v4955_v37 }
 0xbdd   : > { %v4570_v6 = vadd.f32 1.0, %v5704_v52  ;;  %v5004_v58 = vmul.f32 %v5003_v15, %v9627_v44  ;;  %v6304_v61 = vpop.eup %6303  ;;  %v5041_v0 = vadd.f32 0.014752088, %v5040_v54  ;;  %v9671_v35 = vmin.f32 %v5065_v49, 16.0 }
 0xbde   : > { %v4969_v42 = vmul.f32 %v6304_v61, %v4967_v8  ;;  %v4977_v32 = vand.u32 2147483647, %v4967_v8  ;;  %v4979_v63 = vand.u32 2147483648, %v4967_v8  ;;  %vm4974_vm5 = vweird.f32 %v6304_v61 }
 0xbdf   : > { %v4586_v45 = vmul.f32 %v4570_v6, %v3898_v24  ;;  %v5005_v1 = vadd.f32 0.4994258, %v5004_v58  ;;  %v5042_v46 = vmul.f32 %v5041_v0, %v9646_v38  ;;  %v5067_v39 = vmul.f32 2.1237322e-06, %v9671_v35 }
 0xbe0   : > { %v4970_v30 = vsub.f32 1.0, %v4969_v42  ;;  %v5031_v41 = vmul.f32 %v5030_v28, %v9646_v38  ;;  %v5078_v4 = vmul.f32 3.8918573e-05, %v9671_v35  ;;  %v4993_v16 = vmul.f32 %v4992_v13, %v9627_v44 }
 0xbe1   : > { %5720 = vmatmul.msk.f32.gmra.mxu3 %vm4599_vm13, %v4586_v45  ;;  %v5006_v40 = vmul.f32 %v5005_v1, %v9627_v44  ;;  %v5043_v48 = vadd.f32 0.112945676, %v5042_v46  ;;  %v5068_v21 = vadd.f32 0.00028619796, %v5067_v39  ;;  %vm4973_vm13 = vweird.f32 %v4967_v8 }
 0xbe2   : > { %v4971_v3 = vmul.f32 %v6304_v61, %v4970_v30  ;;  %v5079_v43 = vadd.f32 0.001143296, %v5078_v4  ;;  %v4957_v2 = vmul.f32 %v4956_v9, %v9549_v59  ;;  %vm4975_vm6 = vmor %vm4973_vm13, %vm4974_vm5  ;;  %v4980_v5 = vor.u32 1.1754944e-38, %v4979_v63 }
 0xbe3   : > { %v5007_v17 = vadd.f32 1.0, %v5006_v40  ;;  %v5044_v11 = vmul.f32 %v5043_v48, %v9646_v38  ;;  %vm4978_vm7 = vcmp.eq.f32.partialorder %v4977_v32, 8.507059e+37  ;;  %v5032_v12 = vadd.f32 0.05243302, %v5031_v41 }
 0xbe4   : > { %v4972_v36 = vadd.f32 %v6304_v61, %v4971_v3  ;;  %v4994_v15 = vadd.f32 0.18741608, %v4993_v16  ;;  %v5069_v47 = vmul.f32 %v5068_v21, %v9671_v35  ;;  %v5080_v53 = vmul.f32 %v5079_v43, %v9671_v35 }
 0xbe5   : > { %6305 = vrcp.f32 %v5007_v17  ;;  %v5045_v62 = vadd.f32 0.4994258, %v5044_v11  ;;  %v5033_v59 = vmul.f32 %v5032_v12, %v9646_v38  ;;  %v4718_v45 = vmul.f32 0.5, %v9536_v19 }
 0xbe6   : > { %v4976_v27 = vsel %vm4975_vm6, %v6304_v61, %v4972_v36  ;;  %v5081_v8 = vadd.f32 0.014752088, %v5080_v53  ;;  %v4995_v61 = vmul.f32 %v4994_v15, %v9627_v44  ;;  %v5070_v0 = vadd.f32 0.0036580483, %v5069_v47 }
 0xbe7   : > { %v4981_v52 = vsel %vm4978_vm7, %v4980_v5, %v4976_v27  ;;  %v5046_v24 = vmul.f32 %v5045_v62, %v9646_v38  ;;  %v5034_v46 = vadd.f32 0.18741608, %v5033_v59  ;;  %v5017_v32 = vand.u32 2147483647, %v5007_v17 }
 0xbe8   : > { %v4982_v54 = vmul.f32 %v4981_v52, %v4957_v2  ;;  %v5082_v49 = vmul.f32 %v5081_v8, %v9671_v35  ;;  %v4996_v30 = vadd.f32 1.1283791, %v4995_v61  ;;  %v5019_v63 = vand.u32 2147483648, %v5007_v17 }
 0xbe9   : > { %v5047_v37 = vadd.f32 1.0, %v5046_v24  ;;  %v5071_v40 = vmul.f32 %v5070_v0, %v9671_v35  ;;  %vm5013_vm9 = vweird.f32 %v5007_v17  ;;  %v5035_v3 = vmul.f32 %v5034_v46, %v9646_v38  ;;  %v4692_v4 = vpop.f32.mrf.mxu3 }
 0xbea   : > { %v5726_v6 = vclamps-f32 %v4982_v54, 1.0  ;;  %v5083_v9 = vadd.f32 0.112945676, %v5082_v49  ;;  %v5020_v11 = vor.u32 1.1754944e-38, %v5019_v63  ;;  %v4997_v43 = vmul.f32 %v4996_v30, %v9598_v25 }
 0xbeb   : > { %v6306_v58 = vpop.eup %6305  ;;  %6307 = vrcp.f32 %v5047_v37  ;;  %v5072_v21 = vadd.f32 0.05243302, %v5071_v40  ;;  %vm5018_vm11 = vcmp.eq.f32.partialorder %v5017_v32, 8.507059e+37  ;;  %v5036_v62 = vadd.f32 1.1283791, %v5035_v3 }
 0xbec   : > { %v5390_v42 = vadd.f32 1.0, %v5726_v6  ;;  %v5009_v28 = vmul.f32 %v6306_v58, %v5007_v17  ;;  %vm5014_vm8 = vweird.f32 %v6306_v58  ;;  %v5084_v39 = vmul.f32 %v5083_v9, %v9671_v35 }
 0xbed   : > { %vm5015_vm10 = vmor %vm5013_vm9, %vm5014_vm8  ;;  %v5057_v15 = vand.u32 2147483647, %v5047_v37  ;;  %v5059_v47 = vand.u32 2147483648, %v5047_v37  ;;  %v5073_v53 = vmul.f32 %v5072_v21, %v9671_v35  ;;  %v4719_v6 = vmul.f32 0.5, %v9589_v55 }
 0xbee   : > { %v5406_v13 = vmul.f32 %v5390_v42, %v4718_v45  ;;  %v5010_v1 = vsub.f32 1.0, %v5009_v28  ;;  %v5085_v41 = vadd.f32 0.4994258, %v5084_v39  ;;  %vm5053_vm14 = vweird.f32 %v5047_v37 }
 0xbef   : > { %v5037_v0 = vmul.f32 %v5036_v62, %v9631_v60  ;;  %vm5058_vm1 = vcmp.eq.f32.partialorder %v5057_v15, 8.507059e+37  ;;  %v5060_v49 = vor.u32 1.1754944e-38, %v5059_v47  ;;  %v5074_v45 = vadd.f32 0.18741608, %v5073_v53 }
 0xbf0   : > { %v5422_v44 = vadd.f32 %v5406_v13, %v8632_v29  ;;  %v5011_v48 = vmul.f32 %v6306_v58, %v5010_v1  ;;  %v9697_v29 = vld [vmem:[%s9971_s11] ss:$0 sm:$0xff]  ;;  %v5086_v5 = vmul.f32 %v5085_v41, %v9671_v35 }
 0xbf1   : > { %v6308_v16 = vpop.eup %6307  ;;  %v9700_v36 = vadd.f32 %v9697_v29, %v4692_v4  ;;  %v5075_v60 = vmul.f32 %v5074_v45, %v9671_v35 }
 0xbf2   : > { %5438 = vst.msk [vmem:[%s9452_s30 + $0x28] sm:$0xff] %vm432_vm0, %v5422_v44  ;;  %v5012_v19 = vadd.f32 %v6306_v58, %v5011_v48  ;;  %v5049_v17 = vmul.f32 %v6308_v16, %v5047_v37  ;;  %v9708_v54 = vadd.f32 1.0, %v5086_v5  ;;  %vm5054_vm12 = vweird.f32 %v6308_v16 }
 0xbf3   : > { %v9705_v27 = vmul.f32 0.70710677, %v9700_v36  ;;  %vm5055_vm15 = vmor %vm5053_vm14, %vm5054_vm12 }
 0xbf4   : > { %v5016_v2 = vsel %vm5015_vm10, %v6306_v58, %v5012_v19  ;;  %v5050_v52 = vsub.f32 1.0, %v5049_v17  ;;  %6309 = vrcp.f32 %v9708_v54  ;;  %v4695_v46 = vpop.f32.mrf.mxu3  ;;  %v4720_v19 = vmul.f32 0.5, %v9621_v22 }
 0xbf5   : > { %v5021_v38 = vsel %vm5018_vm11, %v5020_v11, %v5016_v2  ;;  %v5105_v25 = vmul.f32 %v9705_v27, %v9705_v27  ;;  %v9722_v40 = vadd.f32 %v9697_v29, %v4695_v46  ;;  %v5099_v35 = vand.u32 2147483648, %v9708_v54 }
 0xbf6   : > { %v5022_v12 = vmul.f32 %v5021_v38, %v4997_v43  ;;  %v5051_v8 = vmul.f32 %v6308_v16, %v5050_v52  ;;  %v5076_v11 = vadd.f32 1.1283791, %v5075_v60  ;;  %v5097_v22 = vand.u32 2147483647, %v9708_v54 }
 0xbf7   : > { %v9714_v61 = vmin.f32 %v5105_v25, 16.0  ;;  %v9731_v3 = vmul.f32 0.70710677, %v9722_v40  ;;  %vm5093_vm3 = vweird.f32 %v9708_v54  ;;  %v5100_v52 = vor.u32 1.1754944e-38, %v5099_v35 }
 0xbf8   : > { %v5727_v24 = vclamps-f32 %v5022_v12, 1.0  ;;  %v5052_v58 = vadd.f32 %v6308_v16, %v5051_v8  ;;  %vm5098_vm5 = vcmp.eq.f32.partialorder %v5097_v22, 8.507059e+37 }
 0xbf9   : > { %v5107_v13 = vmul.f32 2.1237322e-06, %v9714_v61  ;;  %v5118_v55 = vmul.f32 3.8918573e-05, %v9714_v61  ;;  %v5145_v43 = vmul.f32 %v9731_v3, %v9731_v3 }
 0xbfa   : > { %v5391_v59 = vadd.f32 1.0, %v5727_v24  ;;  %v5056_v28 = vsel %vm5055_vm15, %v6308_v16, %v5052_v58  ;;  %v6310_v63 = vpop.eup %6309 }
 0xbfb   : > { %v5061_v1 = vsel %vm5058_vm1, %v5060_v49, %v5056_v28  ;;  %v5108_v30 = vadd.f32 0.00028619796, %v5107_v13  ;;  %v5119_v32 = vadd.f32 0.001143296, %v5118_v55  ;;  %v5089_v48 = vmul.f32 %v6310_v63, %v9708_v54 }
 0xbfc   : > { %v5407_v42 = vmul.f32 %v5391_v59, %v4719_v6  ;;  %v5062_v37 = vmul.f32 %v5061_v1, %v5037_v0  ;;  %vm5094_vm2 = vweird.f32 %v6310_v63  ;;  %v9739_v5 = vmin.f32 %v5145_v43, 16.0 }
 0xbfd   : > { %v5109_v39 = vmul.f32 %v5108_v30, %v9714_v61  ;;  %v5090_v4 = vsub.f32 1.0, %v5089_v48  ;;  %v4698_v47 = vpop.f32.mrf.mxu3  ;;  %vm5095_vm4 = vmor %vm5093_vm3, %vm5094_vm2  ;;  %v5077_v54 = vmul.f32 %v5076_v11, %v9663_v57 }
 0xbfe   : > { %v5423_v9 = vadd.f32 %v5407_v42, %v8640_v23  ;;  %v5728_v44 = vclamps-f32 %v5062_v37, 1.0  ;;  %v5120_v23 = vmul.f32 %v5119_v32, %v9714_v61  ;;  %v5147_v25 = vmul.f32 2.1237322e-06, %v9739_v5 }
 0xbff   : > { %v5110_v16 = vadd.f32 0.0036580483, %v5109_v39  ;;  %v5091_v17 = vmul.f32 %v6310_v63, %v5090_v4  ;;  %v5158_v24 = vmul.f32 3.8918573e-05, %v9739_v5  ;;  %v9746_v8 = vadd.f32 %v9697_v29, %v4698_v47 }
 0xc00   : > { %5439 = vst.msk [vmem:[%s9452_s30 + $0x30] sm:$0xff] %vm432_vm0, %v5423_v9  ;;  %v5392_v41 = vadd.f32 1.0, %v5728_v44  ;;  %v5121_v21 = vadd.f32 0.014752088, %v5120_v23  ;;  %v5148_v58 = vadd.f32 0.00028619796, %v5147_v25 }
 0xc01   : > { %v5092_v62 = vadd.f32 %v6310_v63, %v5091_v17  ;;  %v5111_v15 = vmul.f32 %v5110_v16, %v9714_v61  ;;  %v5159_v0 = vadd.f32 0.001143296, %v5158_v24  ;;  %v9753_v45 = vmul.f32 0.70710677, %v9746_v8 }
 0xc02   : > { %v5408_v2 = vmul.f32 %v5392_v41, %v4720_v19  ;;  %v5122_v38 = vmul.f32 %v5121_v21, %v9714_v61  ;;  %v5149_v13 = vmul.f32 %v5148_v58, %v9739_v5  ;;  %v4721_v37 = vmul.f32 0.5, %v9655_v14 }
 0xc03   : > { %v5096_v6 = vsel %vm5095_vm4, %v6310_v63, %v5092_v62  ;;  %v5112_v42 = vadd.f32 0.05243302, %v5111_v15  ;;  %v5160_v55 = vmul.f32 %v5159_v0, %v9739_v5  ;;  %v5185_v57 = vmul.f32 %v9753_v45, %v9753_v45 }
 0xc04   : > { %v5424_v12 = vadd.f32 %v5408_v2, %v8651_v20  ;;  %v5123_v53 = vadd.f32 0.112945676, %v5122_v38  ;;  %v5101_v20 = vsel %vm5098_vm5, %v5100_v52, %v5096_v6  ;;  %v5150_v44 = vadd.f32 0.0036580483, %v5149_v13 }
 0xc05   : > { %v5102_v49 = vmul.f32 %v5101_v20, %v5077_v54  ;;  %v5161_v9 = vadd.f32 0.014752088, %v5160_v55  ;;  %v9761_v32 = vmin.f32 %v5185_v57, 16.0  ;;  %v5113_v63 = vmul.f32 %v5112_v42, %v9714_v61 }
 0xc06   : > { %5440 = vst.msk [vmem:[%s9452_s30 + $0x38] sm:$0xff] %vm432_vm0, %v5424_v12  ;;  %v5124_v59 = vmul.f32 %v5123_v53, %v9714_v61  ;;  %v5151_v16 = vmul.f32 %v5150_v44, %v9739_v5 }
 0xc07   : > { %v5729_v1 = vclamps-f32 %v5102_v49, 1.0  ;;  %v5162_v48 = vmul.f32 %v5161_v9, %v9739_v5  ;;  %v5187_v19 = vmul.f32 2.1237322e-06, %v9761_v32  ;;  %v5198_v23 = vmul.f32 3.8918573e-05, %v9761_v32 }
 0xc08   : > { %v5125_v28 = vadd.f32 0.4994258, %v5124_v59  ;;  %v5114_v35 = vadd.f32 0.18741608, %v5113_v63 }
 0xc09   : > { %v5393_v30 = vadd.f32 1.0, %v5729_v1  ;;  %v5163_v4 = vadd.f32 0.112945676, %v5162_v48  ;;  %v5188_v14 = vadd.f32 0.00028619796, %v5187_v19 }
 0xc0a   : > { %v5126_v46 = vmul.f32 %v5125_v28, %v9714_v61  ;;  %v5199_v11 = vadd.f32 0.001143296, %v5198_v23  ;;  %v5115_v12 = vmul.f32 %v5114_v35, %v9714_v61 }
 0xc0b   : > { %v5409_v39 = vmul.f32 %v5393_v30, %v4721_v37  ;;  %v5164_v21 = vmul.f32 %v5163_v4, %v9739_v5  ;;  %v5189_v43 = vmul.f32 %v5188_v14, %v9761_v32  ;;  %v4722_v14 = vmul.f32 0.5, %v9700_v36 }
 0xc0c   : > { %v5127_v60 = vadd.f32 1.0, %v5126_v46  ;;  %v5200_v2 = vmul.f32 %v5199_v11, %v9761_v32  ;;  %v5116_v54 = vadd.f32 1.1283791, %v5115_v12 }
 0xc0d   : > { %v5425_v41 = vadd.f32 %v5409_v39, %v8660_v56  ;;  %v5165_v17 = vadd.f32 0.4994258, %v5164_v21  ;;  %v5190_v22 = vadd.f32 0.0036580483, %v5189_v43  ;;  %v5152_v56 = vadd.f32 0.05243302, %v5151_v16 }
 0xc0e   : > { %6311 = vrcp.f32 %v5127_v60  ;;  %v5201_v62 = vadd.f32 0.014752088, %v5200_v2  ;;  %v5139_v6 = vand.u32 2147483648, %v5127_v60  ;;  %v5137_v0 = vand.u32 2147483647, %v5127_v60 }
 0xc0f   : > { %5441 = vst.msk [vmem:[%s9452_s30 + $0x40] sm:$0xff] %vm432_vm0, %v5425_v41  ;;  %v5166_v15 = vmul.f32 %v5165_v17, %v9739_v5  ;;  %v5191_v47 = vmul.f32 %v5190_v22, %v9761_v32  ;;  %v5153_v20 = vmul.f32 %v5152_v56, %v9739_v5  ;;  %vm5133_vm6 = vweird.f32 %v5127_v60 }
 0xc10   : > { %v5202_v53 = vmul.f32 %v5201_v62, %v9761_v32  ;;  %v5140_v28 = vor.u32 1.1754944e-38, %v5139_v6  ;;  %v5117_v1 = vmul.f32 %v5116_v54, %v9705_v27  ;;  %vm5138_vm8 = vcmp.eq.f32.partialorder %v5137_v0, 8.507059e+37 }
 0xc11   : > { %v5167_v24 = vadd.f32 1.0, %v5166_v15  ;;  %v5192_v61 = vadd.f32 0.05243302, %v5191_v47  ;;  %v5154_v13 = vadd.f32 0.18741608, %v5153_v20 }
 0xc12   : > { %v5203_v59 = vadd.f32 0.112945676, %v5202_v53 }
 0xc13   : > { %6313 = vrcp.f32 %v5167_v24  ;;  %v5193_v37 = vmul.f32 %v5192_v61, %v9761_v32  ;;  %v5179_v16 = vand.u32 2147483648, %v5167_v24  ;;  %v5177_v43 = vand.u32 2147483647, %v5167_v24 }
 0xc14   : > { %v6312_v38 = vpop.eup %6311  ;;  %v5204_v49 = vmul.f32 %v5203_v59, %v9761_v32  ;;  %vm5173_vm10 = vweird.f32 %v5167_v24 }
 0xc15   : > { %v5129_v52 = vmul.f32 %v6312_v38, %v5127_v60  ;;  %vm5134_vm13 = vweird.f32 %v6312_v38  ;;  %v5155_v60 = vmul.f32 %v5154_v13, %v9739_v5  ;;  %v5194_v4 = vadd.f32 0.18741608, %v5193_v37 }
 0xc16   : > { %vm5135_vm7 = vmor %vm5133_vm6, %vm5134_vm13  ;;  %v5205_v55 = vadd.f32 0.4994258, %v5204_v49  ;;  %v5180_v36 = vor.u32 1.1754944e-38, %v5179_v16  ;;  %vm5178_vm12 = vcmp.eq.f32.partialorder %v5177_v43, 8.507059e+37 }
 0xc17   : > { %v5130_v25 = vsub.f32 1.0, %v5129_v52  ;;  %v5156_v21 = vadd.f32 1.1283791, %v5155_v60 }
 0xc18   : > { %v5206_v30 = vmul.f32 %v5205_v55, %v9761_v32 }
 0xc19   : > { %v5131_v58 = vmul.f32 %v6312_v38, %v5130_v25  ;;  %v6314_v44 = vpop.eup %6313  ;;  %v5157_v15 = vmul.f32 %v5156_v21, %v9731_v3 }
 0xc1a   : > { %v5169_v39 = vmul.f32 %v6314_v44, %v5167_v24  ;;  %v9787_v19 = vadd.f32 1.0, %v5206_v30  ;;  %vm5174_vm9 = vweird.f32 %v6314_v44 }
 0xc1b   : > { %v5132_v42 = vadd.f32 %v6312_v38, %v5131_v58  ;;  %vm5175_vm11 = vmor %vm5173_vm10, %vm5174_vm9 }
 0xc1c   : > { %v4701_v46 = vpop.f32.mrf.mxu3  ;;  %v5170_v41 = vsub.f32 1.0, %v5169_v39  ;;  %6315 = vrcp.f32 %v9787_v19  ;;  %v5217_v0 = vand.u32 2147483647, %v9787_v19  ;;  %vm5213_vm15 = vweird.f32 %v9787_v19 }
 0xc1d   : > { %v5136_v57 = vsel %vm5135_vm7, %v6312_v38, %v5132_v42  ;;  %v9784_v63 = vadd.f32 %v9697_v29, %v4701_v46  ;;  %v5195_v38 = vmul.f32 %v5194_v4, %v9761_v32  ;;  %v5219_v42 = vand.u32 2147483648, %v9787_v19 }
 0xc1e   : > { %v5141_v9 = vsel %vm5138_vm8, %v5140_v28, %v5136_v57  ;;  %v5171_v5 = vmul.f32 %v6314_v44, %v5170_v41  ;;  %v4723_v46 = vmul.f32 0.5, %v9722_v40  ;;  %vm5218_vm2 = vcmp.eq.f32.partialorder %v5217_v0, 8.507059e+37 }
 0xc1f   : > { %v5142_v48 = vmul.f32 %v5141_v9, %v5117_v1  ;;  %v9790_v27 = vmul.f32 0.70710677, %v9784_v63 }
 0xc20   : > { %v5172_v22 = vadd.f32 %v6314_v44, %v5171_v5 }
 0xc21   : > { %v5730_v23 = vclamps-f32 %v5142_v48, 1.0  ;;  %v5225_v11 = vmul.f32 %v9790_v27, %v9790_v27 }
 0xc22   : > { %v6316_v52 = vpop.eup %6315  ;;  %v5176_v47 = vsel %vm5175_vm11, %v6314_v44, %v5172_v22 }
 0xc23   : > { %v5394_v35 = vadd.f32 1.0, %v5730_v23  ;;  %v9796_v17 = vmin.f32 %v5225_v11, 16.0  ;;  %v5181_v25 = vsel %vm5178_vm12, %v5180_v36, %v5176_v47  ;;  %v5209_v24 = vmul.f32 %v6316_v52, %v9787_v19 }
 0xc24   : > { %v5182_v54 = vmul.f32 %v5181_v25, %v5157_v15  ;;  %vm5214_vm14 = vweird.f32 %v6316_v52  ;;  %v5220_v23 = vor.u32 1.1754944e-38, %v5219_v42  ;;  %v4724_v47 = vmul.f32 0.5, %v9746_v8 }
 0xc25   : > { %v5410_v2 = vmul.f32 %v5394_v35, %v4722_v14  ;;  %v5227_v56 = vmul.f32 2.1237322e-06, %v9796_v17  ;;  %v5238_v62 = vmul.f32 3.8918573e-05, %v9796_v17  ;;  %v5210_v58 = vsub.f32 1.0, %v5209_v24  ;;  %vm5215_vm1 = vmor %vm5213_vm15, %vm5214_vm14 }
 0xc26   : > { %v5731_v49 = vclamps-f32 %v5182_v54, 1.0 }
 0xc27   : > { %v5426_v12 = vadd.f32 %v5410_v2, %v8675_v51  ;;  %v5228_v32 = vadd.f32 0.00028619796, %v5227_v56  ;;  %v5196_v51 = vadd.f32 1.1283791, %v5195_v38  ;;  %v5239_v6 = vadd.f32 0.001143296, %v5238_v62 }
 0xc28   : > { %v4704_v53 = vpop.f32.mrf.mxu3  ;;  %v5211_v55 = vmul.f32 %v6316_v52, %v5210_v58  ;;  %v5395_v9 = vadd.f32 1.0, %v5731_v49 }
 0xc29   : > { %5442 = vst.msk [vmem:[%s9452_s30 + $0x48] sm:$0xff] %vm432_vm0, %v5426_v12  ;;  %v9807_v20 = vadd.f32 %v9697_v29, %v4704_v53  ;;  %v5229_v3 = vmul.f32 %v5228_v32, %v9796_v17  ;;  %v5240_v28 = vmul.f32 %v5239_v6, %v9796_v17  ;;  %v5197_v44 = vmul.f32 %v5196_v51, %v9753_v45 }
 0xc2a   : > { %v5212_v48 = vadd.f32 %v6316_v52, %v5211_v55  ;;  %v5411_v39 = vmul.f32 %v5395_v9, %v4723_v46 }
 0xc2b   : > { %v4665_v59 = vpop.f32.mrf.mxu0  ;;  %v9817_v13 = vmul.f32 0.70710677, %v9807_v20  ;;  %v5230_v1 = vadd.f32 0.0036580483, %v5229_v3  ;;  %v5241_v37 = vadd.f32 0.014752088, %v5240_v28 }
 0xc2c   : > { %v9812_v61 = vadd.f32 %v9697_v29, %v4665_v59  ;;  %v5216_v4 = vsel %vm5215_vm1, %v6316_v52, %v5212_v48  ;;  %v5427_v45 = vadd.f32 %v5411_v39, %v8688_v50 }
 0xc2d   : > { %v5265_v30 = vmul.f32 %v9817_v13, %v9817_v13  ;;  %v5242_v41 = vmul.f32 %v5241_v37, %v9796_v17  ;;  %v5231_v14 = vmul.f32 %v5230_v1, %v9796_v17  ;;  %v5221_v19 = vsel %vm5218_vm2, %v5220_v23, %v5216_v4 }
 0xc2e   : > { %v9820_v57 = vmul.f32 0.70710677, %v9812_v61  ;;  %v5222_v21 = vmul.f32 %v5221_v19, %v5197_v44  ;;  %5443 = vst.msk [vmem:[%s9452_s30 + $0x50] sm:$0xff] %vm432_vm0, %v5427_v45 }
 0xc2f   : > { %v9830_v40 = vmin.f32 %v5265_v30, 16.0  ;;  %v5243_v16 = vadd.f32 0.112945676, %v5242_v41  ;;  %v5232_v36 = vadd.f32 0.05243302, %v5231_v14 }
 0xc30   : > { %v4745_v60 = vmul.f32 %v9820_v57, %v9820_v57  ;;  %v5732_v12 = vclamps-f32 %v5222_v21, 1.0 }
 0xc31   : > { %v5267_v11 = vmul.f32 2.1237322e-06, %v9830_v40  ;;  %v5278_v5 = vmul.f32 3.8918573e-05, %v9830_v40  ;;  %v5244_v2 = vmul.f32 %v5243_v16, %v9796_v17  ;;  %v5233_v58 = vmul.f32 %v5232_v36, %v9796_v17 }
 0xc32   : > { %v9833_v35 = vmin.f32 %v4745_v60, 16.0  ;;  %v5396_v53 = vadd.f32 1.0, %v5732_v12 }
 0xc33   : > { %v5268_v22 = vadd.f32 0.00028619796, %v5267_v11  ;;  %v5279_v56 = vadd.f32 0.001143296, %v5278_v5  ;;  %v5245_v50 = vadd.f32 0.4994258, %v5244_v2 }
 0xc34   : > { %v4747_v43 = vmul.f32 2.1237322e-06, %v9833_v35  ;;  %v4758_v38 = vmul.f32 3.8918573e-05, %v9833_v35  ;;  %v5412_v51 = vmul.f32 %v5396_v53, %v4724_v47  ;;  %v5234_v46 = vadd.f32 0.18741608, %v5233_v58 }
 0xc35   : > { %v5269_v62 = vmul.f32 %v5268_v22, %v9830_v40  ;;  %v5280_v25 = vmul.f32 %v5279_v56, %v9830_v40  ;;  %v5246_v24 = vmul.f32 %v5245_v50, %v9796_v17 }
 0xc36   : > { %v4748_v52 = vadd.f32 0.00028619796, %v4747_v43  ;;  %v4759_v15 = vadd.f32 0.001143296, %v4758_v38  ;;  %v5428_v8 = vadd.f32 %v5412_v51, %v8701_v26  ;;  %v5235_v39 = vmul.f32 %v5234_v46, %v9796_v17 }
 0xc37   : > { %v5270_v6 = vadd.f32 0.0036580483, %v5269_v62  ;;  %v5281_v59 = vadd.f32 0.014752088, %v5280_v25  ;;  %v5247_v0 = vadd.f32 1.0, %v5246_v24 }
 0xc38   : > { %v4749_v32 = vmul.f32 %v4748_v52, %v9833_v35  ;;  %v4760_v54 = vmul.f32 %v4759_v15, %v9833_v35  ;;  %5444 = vst.msk [vmem:[%s9452_s30 + $0x58] sm:$0xff] %vm432_vm0, %v5428_v8  ;;  %v5236_v11 = vadd.f32 1.1283791, %v5235_v39 }
 0xc39   : > { %v5282_v42 = vmul.f32 %v5281_v59, %v9830_v40  ;;  %6317 = vrcp.f32 %v5247_v0  ;;  %v5271_v28 = vmul.f32 %v5270_v6, %v9830_v40  ;;  %v5259_v21 = vand.u32 2147483648, %v5247_v0 }
 0xc3a   : > { %v4750_v3 = vadd.f32 0.0036580483, %v4749_v32  ;;  %v4761_v49 = vadd.f32 0.014752088, %v4760_v54  ;;  %v5257_v22 = vand.u32 2147483647, %v5247_v0  ;;  %vm5253_vm4 = vweird.f32 %v5247_v0 }
 0xc3b   : > { %v5283_v55 = vadd.f32 0.112945676, %v5282_v42  ;;  %v5272_v44 = vadd.f32 0.05243302, %v5271_v28  ;;  %v5260_v36 = vor.u32 1.1754944e-38, %v5259_v21  ;;  %v5237_v50 = vmul.f32 %v5236_v11, %v9790_v27 }
 0xc3c   : > { %v4762_v1 = vmul.f32 %v4761_v49, %v9833_v35  ;;  %v4751_v9 = vmul.f32 %v4750_v3, %v9833_v35  ;;  %vm5258_vm13 = vcmp.eq.f32.partialorder %v5257_v22, 8.507059e+37  ;;  %v4725_v6 = vmul.f32 0.5, %v9784_v63 }
 0xc3d   : > { %v5284_v37 = vmul.f32 %v5283_v55, %v9830_v40  ;;  %v5273_v19 = vmul.f32 %v5272_v44, %v9830_v40 }
 0xc3e   : > { %v4763_v30 = vadd.f32 0.112945676, %v4762_v1  ;;  %v4752_v23 = vadd.f32 0.05243302, %v4751_v9 }
 0xc3f   : > { %v5285_v48 = vadd.f32 0.4994258, %v5284_v37  ;;  %v6318_v60 = vpop.eup %6317  ;;  %v5274_v12 = vadd.f32 0.18741608, %v5273_v19 }
 0xc40   : > { %v4764_v26 = vmul.f32 %v4763_v30, %v9833_v35  ;;  %v5249_v41 = vmul.f32 %v6318_v60, %v5247_v0  ;;  %v4753_v5 = vmul.f32 %v4752_v23, %v9833_v35  ;;  %vm5254_vm3 = vweird.f32 %v6318_v60 }
 0xc41   : > { %v5286_v4 = vmul.f32 %v5285_v48, %v9830_v40  ;;  %vm5255_vm5 = vmor %vm5253_vm4, %vm5254_vm3  ;;  %v5275_v53 = vmul.f32 %v5274_v12, %v9830_v40 }
 0xc42   : > { %v4765_v14 = vadd.f32 0.4994258, %v4764_v26  ;;  %v5250_v45 = vsub.f32 1.0, %v5249_v41  ;;  %v4754_v56 = vadd.f32 0.18741608, %v4753_v5 }
 0xc43   : > { %v5287_v16 = vadd.f32 1.0, %v5286_v4  ;;  %v5276_v0 = vadd.f32 1.1283791, %v5275_v53 }
 0xc44   : > { %v4766_v43 = vmul.f32 %v4765_v14, %v9833_v35  ;;  %v5251_v2 = vmul.f32 %v6318_v60, %v5250_v45  ;;  %v4755_v24 = vmul.f32 %v4754_v56, %v9833_v35 }
 0xc45   : > { %6319 = vrcp.f32 %v5287_v16  ;;  %v5299_v54 = vand.u32 2147483648, %v5287_v16  ;;  %vm5293_vm6 = vweird.f32 %v5287_v16  ;;  %v5297_v49 = vand.u32 2147483647, %v5287_v16 }
 0xc46   : > { %v4767_v17 = vadd.f32 1.0, %v4766_v43  ;;  %v5252_v38 = vadd.f32 %v6318_v60, %v5251_v2  ;;  %v4756_v8 = vadd.f32 1.1283791, %v4755_v24  ;;  %v5277_v26 = vmul.f32 %v5276_v0, %v9817_v13 }
 0xc47   : > { %v5300_v40 = vor.u32 1.1754944e-38, %v5299_v54  ;;  %vm5298_vm10 = vcmp.eq.f32.partialorder %v5297_v49, 8.507059e+37 }
 0xc48   : > { %6321 = vrcp.f32 %v4767_v17  ;;  %v5256_v62 = vsel %vm5255_vm5, %v6318_v60, %v5252_v38  ;;  %v4777_v63 = vand.u32 2147483647, %v4767_v17  ;;  %v4779_v9 = vand.u32 2147483648, %v4767_v17 }
 0xc49   : > { %v5261_v52 = vsel %vm5258_vm13, %v5260_v36, %v5256_v62  ;;  %vm4773_vm11 = vweird.f32 %v4767_v17  ;;  %v4757_v13 = vmul.f32 %v4756_v8, %v9820_v57 }
 0xc4a   : > { %v5262_v47 = vmul.f32 %v5261_v52, %v5237_v50  ;;  %v4780_v14 = vor.u32 1.1754944e-38, %v4779_v9  ;;  %vm4778_vm14 = vcmp.eq.f32.partialorder %v4777_v63, 8.507059e+37 }
 0xc4b   : > { %v6320_v15 = vpop.eup %6319 }
 0xc4c   : > { %v5289_v25 = vmul.f32 %v6320_v15, %v5287_v16  ;;  %v5733_v32 = vclamps-f32 %v5262_v47, 1.0  ;;  %vm5294_vm7 = vweird.f32 %v6320_v15  ;;  %v4713_v47 = vmul.f32 0.5, %v9812_v61 }
 0xc4d   : > { %vm5295_vm8 = vmor %vm5293_vm6, %vm5294_vm7 }
 0xc4e   : > { %v6322_v51 = vpop.eup %6321  ;;  %v5290_v59 = vsub.f32 1.0, %v5289_v25  ;;  %v5397_v58 = vadd.f32 1.0, %v5733_v32 }
 0xc4f   : > { %v4769_v27 = vmul.f32 %v6322_v51, %v4767_v17  ;;  %vm4774_vm9 = vweird.f32 %v6322_v51  ;;  %v4726_v17 = vmul.f32 0.5, %v9807_v20 }
 0xc50   : > { %v5291_v3 = vmul.f32 %v6320_v15, %v5290_v59  ;;  %v5413_v28 = vmul.f32 %v5397_v58, %v4725_v6  ;;  %vm4775_vm12 = vmor %vm4773_vm11, %vm4774_vm9 }
 0xc51   : > { %v4770_v55 = vsub.f32 1.0, %v4769_v27 }
 0xc52   : > { %v5292_v46 = vadd.f32 %v6320_v15, %v5291_v3  ;;  %v5429_v30 = vadd.f32 %v5413_v28, %v8715_v34 }
 0xc53   : > { %v4771_v44 = vmul.f32 %v6322_v51, %v4770_v55 }
 0xc54   : > { %v5296_v60 = vsel %vm5295_vm8, %v6320_v15, %v5292_v46  ;;  %5445 = vst.msk [vmem:[%s9452_s30 + $0x60] sm:$0xff] %vm432_vm0, %v5429_v30 }
 0xc55   : > { %v5301_v23 = vsel %vm5298_vm10, %v5300_v40, %v5296_v60  ;;  %v4772_v41 = vadd.f32 %v6322_v51, %v4771_v44 }
 0xc56   : > { %v4668_v42 = vpop.f32.mrf.mxu0  ;;  %v5302_v4 = vmul.f32 %v5301_v23, %v5277_v26 }
 0xc57   : > { %v4707_v35 = vpop.f32.mrf.mxu3  ;;  %v9869_v1 = vadd.f32 %v9697_v29, %v4668_v42  ;;  %v4776_v19 = vsel %vm4775_vm12, %v6322_v51, %v4772_v41 }
 0xc58   : > { %v9872_v37 = vadd.f32 %v9697_v29, %v4707_v35  ;;  %v5734_v11 = vclamps-f32 %v5302_v4, 1.0  ;;  %v4781_v21 = vsel %vm4778_vm14, %v4780_v14, %v4776_v19 }
 0xc59   : > { %v9877_v48 = vmul.f32 0.70710677, %v9869_v1  ;;  %v4782_v43 = vmul.f32 %v4781_v21, %v4757_v13 }
 0xc5a   : > { %v9881_v39 = vmul.f32 0.70710677, %v9872_v37  ;;  %v5398_v38 = vadd.f32 1.0, %v5734_v11 }
 0xc5b   : > { %v4785_v34 = vmul.f32 %v9877_v48, %v9877_v48  ;;  %v5721_v36 = vclamps-f32 %v4782_v43, 1.0 }
 0xc5c   : > { %v5305_v45 = vmul.f32 %v9881_v39, %v9881_v39  ;;  %v5414_v62 = vmul.f32 %v5398_v38, %v4726_v17 }
 0xc5d   : > { %v9890_v16 = vmin.f32 %v4785_v34, 16.0  ;;  %v5385_v53 = vadd.f32 1.0, %v5721_v36 }
 0xc5e   : > { %v9892_v5 = vmin.f32 %v5305_v45, 16.0  ;;  %v5430_v20 = vadd.f32 %v5414_v62, %v8727_v33 }
 0xc5f   : > { %v4787_v2 = vmul.f32 2.1237322e-06, %v9890_v16  ;;  %v4798_v22 = vmul.f32 3.8918573e-05, %v9890_v16  ;;  %v5401_v6 = vmul.f32 %v5385_v53, %v4713_v47 }
 0xc60   : > { %v5307_v12 = vmul.f32 2.1237322e-06, %v9892_v5  ;;  %v5318_v57 = vmul.f32 3.8918573e-05, %v9892_v5  ;;  %5446 = vst.msk [vmem:[%s9452_s30 + $0x68] sm:$0xff] %vm432_vm0, %v5430_v20 }
 0xc61   : > { %v4788_v56 = vadd.f32 0.00028619796, %v4787_v2  ;;  %v4799_v50 = vadd.f32 0.001143296, %v4798_v22  ;;  %v5417_v27 = vadd.f32 %v5401_v6, %v8734_v31 }
 0xc62   : > { %v5308_v52 = vadd.f32 0.00028619796, %v5307_v12  ;;  %v5319_v15 = vadd.f32 0.001143296, %v5318_v57 }
 0xc63   : > { %v4789_v25 = vmul.f32 %v4788_v56, %v9890_v16  ;;  %v4800_v24 = vmul.f32 %v4799_v50, %v9890_v16  ;;  %5433 = vst.msk [vmem:[%s9452_s30] sm:$0xff] %vm432_vm0, %v5417_v27 }
 0xc64   : > { %v5309_v32 = vmul.f32 %v5308_v52, %v9892_v5  ;;  %v5320_v54 = vmul.f32 %v5319_v15, %v9892_v5  ;;  %v4710_v51 = vpop.f32.mrf.mxu3 }
 0xc65   : > { %v4790_v59 = vadd.f32 0.0036580483, %v4789_v25  ;;  %v4801_v58 = vadd.f32 0.014752088, %v4800_v24  ;;  %v9906_v0 = vadd.f32 %v9697_v29, %v4710_v51 }
 0xc66   : > { %v5321_v61 = vadd.f32 0.014752088, %v5320_v54  ;;  %v5310_v3 = vadd.f32 0.0036580483, %v5309_v32 }
 0xc67   : > { %v4802_v33 = vmul.f32 %v4801_v58, %v9890_v16  ;;  %v4791_v8 = vmul.f32 %v4790_v59, %v9890_v16  ;;  %v9915_v42 = vmul.f32 0.70710677, %v9906_v0 }
 0xc68   : > { %v5322_v49 = vmul.f32 %v5321_v61, %v9892_v5  ;;  %v5311_v55 = vmul.f32 %v5310_v3, %v9892_v5 }
 0xc69   : > { %v4803_v28 = vadd.f32 0.112945676, %v4802_v33  ;;  %v5345_v40 = vmul.f32 %v9915_v42, %v9915_v42  ;;  %v4792_v46 = vadd.f32 0.05243302, %v4791_v8 }
 0xc6a   : > { %v5323_v29 = vadd.f32 0.112945676, %v5322_v49  ;;  %v5312_v26 = vadd.f32 0.05243302, %v5311_v55 }
 0xc6b   : > { %v4804_v31 = vmul.f32 %v4803_v28, %v9890_v16  ;;  %v9924_v63 = vmin.f32 %v5345_v40, 16.0  ;;  %v4793_v34 = vmul.f32 %v4792_v46, %v9890_v16 }
 0xc6c   : > { %v5324_v35 = vmul.f32 %v5323_v29, %v9892_v5  ;;  %v5313_v19 = vmul.f32 %v5312_v26, %v9892_v5  ;;  %v4714_v26 = vmul.f32 0.5, %v9869_v1 }
 0xc6d   : > { %v4805_v9 = vadd.f32 0.4994258, %v4804_v31  ;;  %v5347_v44 = vmul.f32 2.1237322e-06, %v9924_v63  ;;  %v5358_v23 = vmul.f32 3.8918573e-05, %v9924_v63 }
 0xc6e   : > { %v5325_v30 = vadd.f32 0.4994258, %v5324_v35  ;;  %v4794_v11 = vadd.f32 0.18741608, %v4793_v34  ;;  %v5314_v2 = vadd.f32 0.18741608, %v5313_v19 }
 0xc6f   : > { %v4806_v60 = vmul.f32 %v4805_v9, %v9890_v16  ;;  %v5348_v14 = vadd.f32 0.00028619796, %v5347_v44  ;;  %v5359_v13 = vadd.f32 0.001143296, %v5358_v23  ;;  %v4727_v23 = vmul.f32 0.5, %v9872_v37 }
 0xc70   : > { %v5326_v41 = vmul.f32 %v5325_v30, %v9892_v5  ;;  %v4795_v22 = vmul.f32 %v4794_v11, %v9890_v16  ;;  %v5315_v50 = vmul.f32 %v5314_v2, %v9892_v5 }
 0xc71   : > { %v4807_v4 = vadd.f32 1.0, %v4806_v60  ;;  %v5349_v21 = vmul.f32 %v5348_v14, %v9924_v63  ;;  %v5360_v43 = vmul.f32 %v5359_v13, %v9924_v63 }
 0xc72   : > { %v5327_v45 = vadd.f32 1.0, %v5326_v41  ;;  %v4796_v52 = vadd.f32 1.1283791, %v4795_v22  ;;  %v5316_v51 = vadd.f32 1.1283791, %v5315_v50 }
 0xc73   : > { %6323 = vrcp.f32 %v4807_v4  ;;  %v5361_v17 = vadd.f32 0.014752088, %v5360_v43  ;;  %v5350_v12 = vadd.f32 0.0036580483, %v5349_v21  ;;  %v4817_v25 = vand.u32 2147483647, %v4807_v4 }
 0xc74   : > { %6325 = vrcp.f32 %v5327_v45  ;;  %v4819_v24 = vand.u32 2147483648, %v4807_v4  ;;  %v5339_v32 = vand.u32 2147483648, %v5327_v45  ;;  %v5337_v59 = vand.u32 2147483647, %v5327_v45 }
 0xc75   : > { %v5362_v56 = vmul.f32 %v5361_v17, %v9924_v63  ;;  %v5351_v20 = vmul.f32 %v5350_v12, %v9924_v63  ;;  %v4797_v5 = vmul.f32 %v4796_v52, %v9877_v48  ;;  %vm4813_vm2 = vweird.f32 %v4807_v4 }
 0xc76   : > { %vm5333_vm3 = vweird.f32 %v5327_v45  ;;  %v4820_v3 = vor.u32 1.1754944e-38, %v4819_v24  ;;  %v5340_v49 = vor.u32 1.1754944e-38, %v5339_v32  ;;  %vm4818_vm13 = vcmp.eq.f32.partialorder %v4817_v25, 8.507059e+37 }
 0xc77   : > { %v5363_v47 = vadd.f32 0.112945676, %v5362_v56  ;;  %v5352_v33 = vadd.f32 0.05243302, %v5351_v20  ;;  %v5317_v29 = vmul.f32 %v5316_v51, %v9881_v39  ;;  %vm5338_vm6 = vcmp.eq.f32.partialorder %v5337_v59, 8.507059e+37 }
 0xc79   : > { %v6324_v38 = vpop.eup %6323  ;;  %v5364_v54 = vmul.f32 %v5363_v47, %v9924_v63  ;;  %v5353_v9 = vmul.f32 %v5352_v33, %v9924_v63 }
 0xc7a   : > { %v6326_v57 = vpop.eup %6325  ;;  %v4809_v36 = vmul.f32 %v6324_v38, %v4807_v4  ;;  %vm4814_vm15 = vweird.f32 %v6324_v38 }
 0xc7b   : > { %v5329_v62 = vmul.f32 %v6326_v57, %v5327_v45  ;;  %vm5334_vm1 = vweird.f32 %v6326_v57  ;;  %v5365_v61 = vadd.f32 0.4994258, %v5364_v54  ;;  %vm4815_vm4 = vmor %vm4813_vm2, %vm4814_vm15  ;;  %v5354_v41 = vadd.f32 0.18741608, %v5353_v9 }
 0xc7c   : > { %v4810_v15 = vsub.f32 1.0, %v4809_v36  ;;  %vm5335_vm5 = vmor %vm5333_vm3, %vm5334_vm1 }
 0xc7d   : > { %v5330_v53 = vsub.f32 1.0, %v5329_v62  ;;  %v5366_v28 = vmul.f32 %v5365_v61, %v9924_v63  ;;  %v5355_v19 = vmul.f32 %v5354_v41, %v9924_v63 }
 0xc7e   : > { %v4811_v16 = vmul.f32 %v6324_v38, %v4810_v15 }
 0xc7f   : > { %v5331_v6 = vmul.f32 %v6326_v57, %v5330_v53  ;;  %v5367_v35 = vadd.f32 1.0, %v5366_v28  ;;  %v5356_v43 = vadd.f32 1.1283791, %v5355_v19 }
 0xc80   : > { %v4812_v58 = vadd.f32 %v6324_v38, %v4811_v16 }
 0xc81   : > { %v5332_v27 = vadd.f32 %v6326_v57, %v5331_v6  ;;  %6327 = vrcp.f32 %v5367_v35  ;;  %v5379_v21 = vand.u32 2147483648, %v5367_v35  ;;  %v5377_v2 = vand.u32 2147483647, %v5367_v35 }
 0xc82   : > { %v4816_v8 = vsel %vm4815_vm4, %v6324_v38, %v4812_v58  ;;  %vm5373_vm8 = vweird.f32 %v5367_v35 }
 0xc83   : > { %v5336_v40 = vsel %vm5335_vm5, %v6326_v57, %v5332_v27  ;;  %v4821_v55 = vsel %vm4818_vm13, %v4820_v3, %v4816_v8  ;;  %vm5378_vm10 = vcmp.eq.f32.partialorder %v5377_v2, 8.507059e+37  ;;  %v4728_v57 = vmul.f32 0.5, %v9906_v0 }
 0xc84   : > { %v5341_v48 = vsel %vm5338_vm6, %v5340_v49, %v5336_v40  ;;  %v4822_v31 = vmul.f32 %v4821_v55, %v4797_v5 }
 0xc85   : > { %v5342_v46 = vmul.f32 %v5341_v48, %v5317_v29 }
 0xc86   : > { %v5722_v30 = vclamps-f32 %v4822_v31, 1.0 }
 0xc87   : > { %v5735_v44 = vclamps-f32 %v5342_v46, 1.0  ;;  %v6328_v14 = vpop.eup %6327 }
 0xc88   : > { %v5386_v60 = vadd.f32 1.0, %v5722_v30  ;;  %v5369_v11 = vmul.f32 %v6328_v14, %v5367_v35  ;;  %vm5374_vm7 = vweird.f32 %v6328_v14 }
 0xc89   : > { %v5399_v39 = vadd.f32 1.0, %v5735_v44  ;;  %vm5375_vm9 = vmor %vm5373_vm8, %vm5374_vm7 }
 0xc8a   : > { %v5402_v34 = vmul.f32 %v5386_v60, %v4714_v26  ;;  %v5370_v1 = vsub.f32 1.0, %v5369_v11 }
 0xc8b   : > { %v5415_v4 = vmul.f32 %v5399_v39, %v4727_v23 }
 0xc8c   : > { %v5418_v45 = vadd.f32 %v5402_v34, %v8741_v18  ;;  %v5371_v37 = vmul.f32 %v6328_v14, %v5370_v1  ;;  %v5380_v18 = vor.u32 1.1754944e-38, %v5379_v21 }
 0xc8d   : > { %v5431_v13 = vadd.f32 %v5415_v4, %v8755_v10  ;;  %v5357_v10 = vmul.f32 %v5356_v43, %v9915_v42 }
 0xc8e   : > { %5434 = vst.msk [vmem:[%s9452_s30 + $0x8] sm:$0xff] %vm432_vm0, %v5418_v45  ;;  %v5372_v22 = vadd.f32 %v6328_v14, %v5371_v37 }
 0xc8f   : > { %5447 = vst.msk [vmem:[%s9452_s30 + $0x70] sm:$0xff] %vm432_vm0, %v5431_v13 }
 0xc90   : > { %v5376_v17 = vsel %vm5375_vm9, %v6328_v14, %v5372_v22 }
 0xc91   : > { %v5381_v63 = vsel %vm5378_vm10, %v5380_v18, %v5376_v17 }
 0xc92   : > { %v5382_v38 = vmul.f32 %v5381_v63, %v5357_v10 }
 0xc94   : > { %v5736_v12 = vclamps-f32 %v5382_v38, 1.0 }
 0xc96   : > { %v5400_v36 = vadd.f32 1.0, %v5736_v12 }
 0xc98   : > { %v5416_v56 = vmul.f32 %v5400_v36, %v4728_v57 }
 0xc9a   : > { %v5432_v50 = vadd.f32 %v5416_v56, %v8767_v7 }
 0xc9c   : > { %5448 = vst.msk [vmem:[%s9452_s30 + $0x78] sm:$0xff] %vm432_vm0, %v5432_v50 }
 0xc9d PF: > { %s22_s21 = sadd.s32 1, %s6355_s21  }
 0xc9e   : > { %p19_p4 = scmp.ge.s32.totalorder %s22_s21, 4  }
 0xca0   :  { %21 = sbr.rel (!%p19_p4) target bundleno = 1 (0x1), region = 98 }

</bundles_post_ra>
